<compile_context>
chip_gen: v6e
topology: v6e:2x2x1
jax: 0.10.0
libtpu: 0.0.40
codegen_flags: <defaults>
</compile_context>

<pallas_src>
import functools

import jax
import jax.numpy as jnp
from jax.experimental import pallas as pl
from jax.experimental.pallas import tpu as pltpu


# ---------------------------------------------------------------------------
# helpers
# ---------------------------------------------------------------------------
def _pick_tile(dim, cap, align):
    """Largest tile <= cap that divides `dim` and is a multiple of `align`.
    Falls back to the full extent (always a legal block).  Every dim in this model
    (64 / 128 / 256 / 768 / 1024) hits the divisor path, so the fallback never
    produces an oversized block here."""
    if dim <= cap:
        return dim
    t = (cap // align) * align
    while t >= align:
        if dim % t == 0:
            return t
        t -= align
    return dim


# ---------------------------------------------------------------------------
# fused (LayerNorm) + matmul + bias (+ activation) (+ residual) kernel
# ---------------------------------------------------------------------------
def _gemm_kernel(*refs, has_ln, has_res, activation, eps):
    it = iter(refs)
    x_ref = next(it)
    w_ref = next(it)
    b_ref = next(it)
    g_ref = next(it) if has_ln else None
    beta_ref = next(it) if has_ln else None
    r_ref = next(it) if has_res else None
    o_ref = next(it)
    acc_ref = next(it)

    k = pl.program_id(2)

    x = x_ref[...]
    if has_ln:
        xf = x.astype(jnp.float32)
        mean = jnp.mean(xf, axis=-1, keepdims=True)
        xc = xf - mean
        var = jnp.mean(xc * xc, axis=-1, keepdims=True)
        xf = xc * jax.lax.rsqrt(var + eps)
        xf = xf * g_ref[...] + beta_ref[...]
        x = xf.astype(jnp.bfloat16)

    @pl.when(k == 0)
    def _():
        # Fold the bias into the accumulator init (saves the epilogue add).
        acc_ref[...] = jnp.broadcast_to(b_ref[...], acc_ref.shape)

    acc_ref[...] += jnp.dot(x, w_ref[...], preferred_element_type=jnp.float32)

    @pl.when(k == pl.num_programs(2) - 1)
    def _():
        r = acc_ref[...]
        if activation == "gelu":
            # TODO(synk): PyTorch nn.GELU defaults to the erf form; tanh approx differs ~1e-3.
            r = jax.nn.gelu(r, approximate=True)
        elif activation == "relu":
            r = jnp.maximum(r, 0.0)
        if has_res:
            r = r + r_ref[...].astype(jnp.float32)
        o_ref[...] = r.astype(o_ref.dtype)


def _linear(x, w, b, *, ln=None, residual=None, activation=None,
            out_dtype=jnp.bfloat16, eps=1e-6, tm_cap=256, tn_cap=256, tk_cap=1024):
    """y = act(LN(x) @ w + b) + residual.
    x:(M,K) bf16, w:(K,N) bf16, b:(1,N) f32, ln=(gamma,beta) each (1,K) f32, residual:(M,N).
    N must be a multiple of 128 (true for this E=256 architecture)."""
    M, K = x.shape
    Kw, N = w.shape
    assert K == Kw and b.shape == (1, N) and N % 128 == 0

    tm = _pick_tile(M, tm_cap, 8)
    tn = _pick_tile(N, tn_cap, 128)
    tk = K if (ln is not None or K <= tk_cap) else _pick_tile(K, tk_cap, 128)
    assert ln is None or tk == K, "fused LayerNorm needs the full K in one block"

    # v7x megacore: make sure the parallel (i, j) grid has at least 2 tiles.
    if (M // tm) * (N // tn) < 2:
        if N // 128 >= 2:
            tn = 128
        elif tm % 16 == 0 and tm >= 16:
            tm //= 2

    nk = K // tk

    x_spec = (pl.BlockSpec((tm, K), lambda i, j, k: (i, 0)) if ln is not None
              else pl.BlockSpec((tm, tk), lambda i, j, k: (i, k)))
    in_specs = [x_spec,
                pl.BlockSpec((tk, tn), lambda i, j, k: (k, j)),
                pl.BlockSpec((1, tn), lambda i, j, k: (0, j))]
    args = [x, w, b]
    if ln is not None:
        gamma, beta = ln
        in_specs += [pl.BlockSpec((1, K), lambda i, j, k: (0, 0)),
                     pl.BlockSpec((1, K), lambda i, j, k: (0, 0))]
        args += [gamma, beta]
    if residual is not None:
        in_specs.append(pl.BlockSpec((tm, tn), lambda i, j, k: (i, j)))
        args.append(residual)

    kernel = functools.partial(_gemm_kernel, has_ln=ln is not None,
                               has_res=residual is not None,
                               activation=activation, eps=eps)
    return pl.pallas_call(
        kernel,
        out_shape=jax.ShapeDtypeStruct((M, N), out_dtype),
        grid_spec=pltpu.PrefetchScalarGridSpec(
            num_scalar_prefetch=0,
            grid=(M // tm, N // tn, nk),             # K innermost (reduction)
            in_specs=in_specs,
            out_specs=pl.BlockSpec((tm, tn), lambda i, j, k: (i, j)),
            scratch_shapes=[pltpu.VMEM((tm, tn), jnp.float32)],
        ),
        compiler_params=pltpu.CompilerParams(
            dimension_semantics=("parallel", "parallel", "arbitrary")),
    )(*args)


# ---------------------------------------------------------------------------
# Scaled-dot-product attention: one (batch, head) tile per grid step, q/k/v read
# directly from the (M, 3E) qkv tensor, output written in head-merged layout.
# ---------------------------------------------------------------------------
def _attention_kernel(q_ref, k_ref, v_ref, o_ref, *, scale):
    q = q_ref[...]                                            # (n_tok, hd) bf16
    s = jax.lax.dot_general(q, k_ref[...], (((1,), (1,)), ((), ())),
                            preferred_element_type=jnp.float32) * scale
    m = jnp.max(s, axis=-1, keepdims=True)
    e = jnp.exp(s - m)
    den = jnp.sum(e, axis=-1, keepdims=True)
    p = (e * pl.reciprocal(den, approx=True)).astype(v_ref.dtype)
    o = jnp.dot(p, v_ref[...], preferred_element_type=jnp.float32)
    o_ref[...] = o.astype(o_ref.dtype)


def _attention(qkv, *, batch, n_tok, num_heads, head_dim, scale):
    """qkv: (B*n_tok, 3*H*hd) bf16 with column order (qkv, head, hd) -- exactly the
    layout the PyTorch qkv Linear produces.  Returns (B*n_tok, H*hd) bf16 already in the
    head-merged layout the proj GEMM consumes (zero XLA transposes)."""
    M = batch * n_tok
    E = num_heads * head_dim
    blk = (n_tok, head_dim)
    q_spec = pl.BlockSpec(blk, lambda b, h: (b, h))
    k_spec = pl.BlockSpec(blk, lambda b, h: (b, num_heads + h))
    v_spec = pl.BlockSpec(blk, lambda b, h: (b, 2 * num_heads + h))
    return pl.pallas_call(
        functools.partial(_attention_kernel, scale=scale),
        out_shape=jax.ShapeDtypeStruct((M, E), jnp.bfloat16),
        grid_spec=pltpu.PrefetchScalarGridSpec(
            num_scalar_prefetch=0,
            grid=(batch, num_heads),
            in_specs=[q_spec, k_spec, v_spec],
            out_specs=pl.BlockSpec(blk, lambda b, h: (b, h)),
        ),
        compiler_params=pltpu.CompilerParams(
            dimension_semantics=("parallel", "parallel")),
    )(qkv, qkv, qkv)


# ---------------------------------------------------------------------------
# Final LayerNorm + pre_logits (Conv3d 1x1x1: 256->64->32->4 with ReLUs) fused.
# ---------------------------------------------------------------------------
def _head_kernel(x_ref, g_ref, b_ref, w1_ref, b1_ref, w2_ref, b2_ref, w3_ref, b3_ref,
                 o_ref, *, eps):
    x = x_ref[...].astype(jnp.float32)
    mean = jnp.mean(x, axis=-1, keepdims=True)
    xc = x - mean
    var = jnp.mean(xc * xc, axis=-1, keepdims=True)
    x = xc * jax.lax.rsqrt(var + eps) * g_ref[...] + b_ref[...]
    h = jnp.dot(x.astype(jnp.bfloat16), w1_ref[...], preferred_element_type=jnp.float32)
    h = jnp.maximum(h + b1_ref[...], 0.0)
    h = jnp.dot(h.astype(jnp.bfloat16), w2_ref[...], preferred_element_type=jnp.float32)
    h = jnp.maximum(h + b2_ref[...], 0.0)
    h = jnp.dot(h.astype(jnp.bfloat16), w3_ref[...], preferred_element_type=jnp.float32)
    o_ref[...] = (h + b3_ref[...]).astype(o_ref.dtype)


def _norm_pre_logits(x, norm_g, norm_b, w1, b1, w2, b2, w3, b3, *, eps=1e-6):
    M, E = x.shape
    n_out = w3.shape[1]
    tm = M // 2 if (M % 16 == 0 and M >= 16) else M   # >=2 parallel tiles for v7x
    full = lambda a: pl.BlockSpec(a.shape, lambda i: (0, 0))
    return pl.pallas_call(
        functools.partial(_head_kernel, eps=eps),
        out_shape=jax.ShapeDtypeStruct((M, n_out), jnp.float32),
        grid_spec=pltpu.PrefetchScalarGridSpec(
            num_scalar_prefetch=0,
            grid=(M // tm,),
            in_specs=[pl.BlockSpec((tm, E), lambda i: (i, 0)),
                      full(norm_g), full(norm_b),
                      full(w1), full(b1), full(w2), full(b2), full(w3), full(b3)],
            out_specs=pl.BlockSpec((tm, n_out), lambda i: (i, 0)),
        ),
        compiler_params=pltpu.CompilerParams(dimension_semantics=("parallel",)),
    )(x, norm_g, norm_b, w1, b1, w2, b2, w3, b3)


# ---------------------------------------------------------------------------
# One-time parameter preparation (review: pre-cast / pre-layout weights)
# ---------------------------------------------------------------------------
def prepare_params(raw, *, batch):
    E = raw["patch_w"].shape[0]
    n_tok = raw["pos_embed"].shape[1]
    M = batch * n_tok
    bf = lambda a: a.astype(jnp.bfloat16)
    row = lambda a: a.astype(jnp.float32).reshape(1, -1)

    blocks = []
    for b in raw["blocks"]:
        blocks.append(dict(
            ln1_g=row(b["ln1_g"]), ln1_b=row(b["ln1_b"]),
            w_qkv=bf(b["w_qkv"]), b_qkv=row(b["b_qkv"]),
            w_proj=bf(b["w_proj"]), b_proj=row(b["b_proj"]),
            ln2_g=row(b["ln2_g"]), ln2_b=row(b["ln2_b"]),
            w_fc1=bf(b["w_fc1"]), b_fc1=row(b["b_fc1"]),
            w_fc2=bf(b["w_fc2"]), b_fc2=row(b["b_fc2"]),
        ))
    pos = jnp.broadcast_to(raw["pos_embed"], (batch, n_tok, E)).reshape(M, E)
    return dict(
        patch_w=bf(raw["patch_w"].reshape(E, -1).T),
        patch_b=row(raw["patch_b"]),
        pos_embed=bf(pos),
        blocks=blocks,
        norm_g=row(raw["norm_g"]), norm_b=row(raw["norm_b"]),
        pl_w1=bf(raw["pl_w1"]), pl_b1=row(raw["pl_b1"]),
        pl_w2=bf(raw["pl_w2"]), pl_b2=row(raw["pl_b2"]),
        pl_w3=bf(raw["pl_w3"]), pl_b3=row(raw["pl_b3"]),
    )


# ---------------------------------------------------------------------------
# Full VisionTransformer forward
# ---------------------------------------------------------------------------
def vision_transformer_3d(x, params, *, patch_size, num_heads, eps=1e-6):
    B, C, D, H, W = x.shape
    p = patch_size
    gd, gh, gw = D // p, H // p, W // p
    n_tok = gd * gh * gw
    E = params["pos_embed"].shape[-1]
    hd = E // num_heads
    scale = float(hd) ** -0.5

    # ---- PatchEmbed_3d: stride==kernel Conv3d == patch extraction + matmul ----
    # TODO(synk): the 8-D transpose materializes the patch matrix in HBM; for large volumes
    # gather patches in-kernel via scalar-prefetched offsets instead.
    xp = x.reshape(B, C, gd, p, gh, p, gw, p).transpose(0, 2, 4, 6, 1, 3, 5, 7)
    patches = xp.reshape(B * n_tok, C * p * p * p).astype(jnp.bfloat16)

    # patch-embed GEMM with the (pre-broadcast) pos_embed folded into the epilogue.
    x2 = _linear(patches, params["patch_w"], params["patch_b"],
                 residual=params["pos_embed"])                          # (M, E) bf16

    # ---- transformer blocks ----
    for blk in params["blocks"]:
        qkv = _linear(x2, blk["w_qkv"], blk["b_qkv"],
                      ln=(blk["ln1_g"], blk["ln1_b"]), eps=eps)         # (M, 3E) bf16
        att = _attention(qkv, batch=B, n_tok=n_tok, num_heads=num_heads,
                         head_dim=hd, scale=scale)                      # (M, E) bf16
        x2 = _linear(att, blk["w_proj"], blk["b_proj"], residual=x2)    # residual fused
        y = _linear(x2, blk["w_fc1"], blk["b_fc1"],
                    ln=(blk["ln2_g"], blk["ln2_b"]), activation="gelu", eps=eps)
        x2 = _linear(y, blk["w_fc2"], blk["b_fc2"], residual=x2)

    # ---- final LayerNorm + pre_logits (three 1x1x1 convs) in one fused kernel ----
    assert n_tok == p ** 3, "model requires img_size == patch_size**2"
    y = _norm_pre_logits(x2, params["norm_g"], params["norm_b"],
                         params["pl_w1"], params["pl_b1"],
                         params["pl_w2"], params["pl_b2"],
                         params["pl_w3"], params["pl_b3"], eps=eps)     # (M, 4) f32
    n_out = y.shape[-1]
    return y.reshape(B, n_tok, n_out).transpose(0, 2, 1).reshape(B, n_out, p, p, p)


# ---------------------------------------------------------------------------
if __name__ == "__main__":
    # Shapes consistent with the module: embed_dim = 256 is forced by the hard-coded
    # pre_logits Conv3d(256, ...); the final reshape forces img_size == patch_size**2;
    # num_heads must divide 256 -> use 2 heads so head_dim = 128 (lane-dense blocks).
    B, C, IMG, P, E, DEPTH, HEADS = 2, 1, 16, 4, 256, 2, 2
    MLP_HIDDEN = int(E * 4.0)
    NP = (IMG // P) ** 3

    key = jax.random.PRNGKey(0)
    keys = iter(jax.random.split(key, 64))
    nrm = lambda k, s, std=0.02: jax.random.normal(k, s, dtype=jnp.float32) * std

    x = jax.random.normal(next(keys), (B, C, IMG, IMG, IMG), dtype=jnp.float32)

    blocks = []
    for _ in range(DEPTH):
        blocks.append(dict(
            ln1_g=jnp.ones((E,), jnp.float32), ln1_b=jnp.zeros((E,), jnp.float32),
            w_qkv=nrm(next(keys), (E, 3 * E), 0.01), b_qkv=nrm(next(keys), (3 * E,), 0.01),
            w_proj=nrm(next(keys), (E, E), 0.01), b_proj=nrm(next(keys), (E,), 0.01),
            ln2_g=jnp.ones((E,), jnp.float32), ln2_b=jnp.zeros((E,), jnp.float32),
            w_fc1=nrm(next(keys), (E, MLP_HIDDEN), 0.01), b_fc1=nrm(next(keys), (MLP_HIDDEN,), 0.01),
            w_fc2=nrm(next(keys), (MLP_HIDDEN, E), 0.01), b_fc2=nrm(next(keys), (E,), 0.01),
        ))

    raw_params = dict(
        patch_w=nrm(next(keys), (E, C, P, P, P)),
        patch_b=nrm(next(keys), (E,)),
        pos_embed=nrm(next(keys), (1, NP, E)),
        blocks=blocks,
        norm_g=jnp.ones((E,), jnp.float32), norm_b=jnp.zeros((E,), jnp.float32),
        pl_w1=nrm(next(keys), (E, 64)), pl_b1=nrm(next(keys), (64,)),
        pl_w2=nrm(next(keys), (64, 32)), pl_b2=nrm(next(keys), (32,)),
        pl_w3=nrm(next(keys), (32, 4)), pl_b3=nrm(next(keys), (4,)),
    )

    # One-time bf16 cast / layout prep (kept out of the per-step forward).
    params = prepare_params(raw_params, batch=B)

    fwd = jax.jit(functools.partial(vision_transformer_3d,
                                    patch_size=P, num_heads=HEADS))
    out = jax.block_until_ready(fwd(x, params))

    assert out.shape == (B, 4, P, P, P), out.shape
    assert out.dtype == jnp.float32
    assert bool(jnp.all(jnp.isfinite(out)))

    print("KERNEL_OK")
</pallas_src>

<mosaic_0001>
module attributes {stable_mosaic.version = 11 : i64} {
  func.func @_gemm_kernel(%arg0: i32, %arg1: i32, %arg2: i32, %arg3: memref<128x64xbf16, #tpu.memory_space<vmem>>, %arg4: memref<64x128xbf16, #tpu.memory_space<vmem>>, %arg5: memref<1x128xf32, #tpu.memory_space<vmem>>, %arg6: memref<128x128xbf16, #tpu.memory_space<vmem>>, %arg7: memref<128x128xbf16, #tpu.memory_space<vmem>>, %arg8: memref<128x128xf32, #tpu.memory_space<vmem>>) attributes {dimension_semantics = [#tpu.dimension_semantics<parallel>, #tpu.dimension_semantics<parallel>, #tpu.dimension_semantics<arbitrary>], iteration_bounds = array<i64: 1, 2, 1>, scalar_prefetch = 0 : i64, scratch_operands = 1 : i64, tpu.core_type = #tpu.core_type<tc>, window_params = [{transform_indices = @transform_0, window_bounds = array<i64: 128, 64>}, {transform_indices = @transform_1, window_bounds = array<i64: 64, 128>}, {transform_indices = @transform_2, window_bounds = array<i64: 1, 128>}, {transform_indices = @transform_3, window_bounds = array<i64: 128, 128>}, {transform_indices = @transform_4, window_bounds = array<i64: 128, 128>}]} {
    %c0 = arith.constant 0 : index
    %c0_0 = arith.constant 0 : index
    %0 = vector.load %arg3[%c0, %c0_0] : memref<128x64xbf16, #tpu.memory_space<vmem>>, vector<128x64xbf16>
    %c0_i32 = arith.constant 0 : i32
    %1 = arith.cmpi eq, %arg2, %c0_i32 : i32
    %2 = arith.extui %1 : i1 to i32
    %c0_i32_1 = arith.constant 0 : i32
    %3 = arith.cmpi ne, %2, %c0_i32_1 : i32
    scf.if %3 {
      %c0_10 = arith.constant 0 : index
      %c0_11 = arith.constant 0 : index
      %12 = vector.load %arg5[%c0_10, %c0_11] : memref<1x128xf32, #tpu.memory_space<vmem>>, vector<1x128xf32>
      %13 = vector.shape_cast %12 : vector<1x128xf32> to vector<1x128xf32>
      %14 = vector.broadcast %13 : vector<1x128xf32> to vector<128x128xf32>
      %c0_12 = arith.constant 0 : index
      %c0_13 = arith.constant 0 : index
      %15 = vector.load %arg8[%c0_12, %c0_13] : memref<128x128xf32, #tpu.memory_space<vmem>>, vector<128x128xf32>
      tpu.vector_store %arg8[%c0_12, %c0_13], %14 {strides = array<i32>} : memref<128x128xf32, #tpu.memory_space<vmem>>, vector<128x128xf32>,
    } else {
    }
    %c0_2 = arith.constant 0 : index
    %c0_3 = arith.constant 0 : index
    %4 = vector.load %arg8[%c0_2, %c0_3] : memref<128x128xf32, #tpu.memory_space<vmem>>, vector<128x128xf32>
    %c0_4 = arith.constant 0 : index
    %c0_5 = arith.constant 0 : index
    %5 = vector.load %arg4[%c0_4, %c0_5] : memref<64x128xbf16, #tpu.memory_space<vmem>>, vector<64x128xbf16>
    %cst = arith.constant dense<0.000000e+00> : vector<128x128xf32>
    %6 = tpu.matmul %0, %5, %cst {dimension_numbers = #tpu.dot_dimension_numbers<[1], [0], [0], [1], [0, 0, 1, 1], [], []>} : vector<128x64xbf16>, vector<64x128xbf16>, vector<128x128xf32> -> vector<128x128xf32>
    %7 = arith.addf %4, %6 : vector<128x128xf32>
    %c0_6 = arith.constant 0 : index
    %c0_7 = arith.constant 0 : index
    %8 = vector.load %arg8[%c0_6, %c0_7] : memref<128x128xf32, #tpu.memory_space<vmem>>, vector<128x128xf32>
    tpu.vector_store %arg8[%c0_6, %c0_7], %7 {strides = array<i32>} : memref<128x128xf32, #tpu.memory_space<vmem>>, vector<128x128xf32>,
    %c0_i32_8 = arith.constant 0 : i32
    %9 = arith.cmpi eq, %arg2, %c0_i32_8 : i32
    %10 = arith.extui %9 : i1 to i32
    %c0_i32_9 = arith.constant 0 : i32
    %11 = arith.cmpi ne, %10, %c0_i32_9 : i32
    scf.if %11 {
      %c0_10 = arith.constant 0 : index
      %c0_11 = arith.constant 0 : index
      %12 = vector.load %arg8[%c0_10, %c0_11] : memref<128x128xf32, #tpu.memory_space<vmem>>, vector<128x128xf32>
      %c0_12 = arith.constant 0 : index
      %c0_13 = arith.constant 0 : index
      %13 = vector.load %arg6[%c0_12, %c0_13] : memref<128x128xbf16, #tpu.memory_space<vmem>>, vector<128x128xbf16>
      %14 = arith.extf %13 : vector<128x128xbf16> to vector<128x128xf32>
      %15 = arith.addf %12, %14 : vector<128x128xf32>
      %16 = arith.truncf %15 : vector<128x128xf32> to vector<128x128xbf16>
      %c0_14 = arith.constant 0 : index
      %c0_15 = arith.constant 0 : index
      %17 = vector.load %arg7[%c0_14, %c0_15] : memref<128x128xbf16, #tpu.memory_space<vmem>>, vector<128x128xbf16>
      tpu.vector_store %arg7[%c0_14, %c0_15], %16 {strides = array<i32>} : memref<128x128xbf16, #tpu.memory_space<vmem>>, vector<128x128xbf16>,
    } else {
    }
    return
  }
  func.func @transform_0(%arg0: i32, %arg1: i32, %arg2: i32) -> (i32, i32) {
    %c0_i32 = arith.constant 0 : i32
    return %arg0, %arg2 : i32, i32
  }
  func.func @transform_1(%arg0: i32, %arg1: i32, %arg2: i32) -> (i32, i32) {
    %c0_i32 = arith.constant 0 : i32
    return %arg2, %arg1 : i32, i32
  }
  func.func @transform_2(%arg0: i32, %arg1: i32, %arg2: i32) -> (i32, i32) {
    %c0_i32 = arith.constant 0 : i32
    %c0_i32_0 = arith.constant 0 : i32
    return %c0_i32, %arg1 : i32, i32
  }
  func.func @transform_3(%arg0: i32, %arg1: i32, %arg2: i32) -> (i32, i32) {
    %c0_i32 = arith.constant 0 : i32
    return %arg0, %arg1 : i32, i32
  }
  func.func @transform_4(%arg0: i32, %arg1: i32, %arg2: i32) -> (i32, i32) {
    %c0_i32 = arith.constant 0 : i32
    return %arg0, %arg1 : i32, i32
  }
}

module attributes {stable_mosaic.version = 11 : i64} {
  func.func @_gemm_kernel(%arg0: i32, %arg1: i32, %arg2: i32, %arg3: memref<128x256xbf16, #tpu.memory_space<vmem>>, %arg4: memref<256x256xbf16, #tpu.memory_space<vmem>>, %arg5: memref<1x256xf32, #tpu.memory_space<vmem>>, %arg6: memref<1x256xf32, #tpu.memory_space<vmem>>, %arg7: memref<1x256xf32, #tpu.memory_space<vmem>>, %arg8: memref<128x256xbf16, #tpu.memory_space<vmem>>, %arg9: memref<128x256xf32, #tpu.memory_space<vmem>>) attributes {dimension_semantics = [#tpu.dimension_semantics<parallel>, #tpu.dimension_semantics<parallel>, #tpu.dimension_semantics<arbitrary>], iteration_bounds = array<i64: 1, 3, 1>, scalar_prefetch = 0 : i64, scratch_operands = 1 : i64, tpu.core_type = #tpu.core_type<tc>, window_params = [{transform_indices = @transform_0, window_bounds = array<i64: 128, 256>}, {transform_indices = @transform_1, window_bounds = array<i64: 256, 256>}, {transform_indices = @transform_2, window_bounds = array<i64: 1, 256>}, {pipeline_mode = #tpu.pipeline_mode<synchronous>, transform_indices = @transform_3, window_bounds = array<i64: 1, 256>}, {pipeline_mode = #tpu.pipeline_mode<synchronous>, transform_indices = @transform_4, window_bounds = array<i64: 1, 256>}, {transform_indices = @transform_5, window_bounds = array<i64: 128, 256>}]} {
    %c0 = arith.constant 0 : index
    %c0_0 = arith.constant 0 : index
    %0 = vector.load %arg3[%c0, %c0_0] : memref<128x256xbf16, #tpu.memory_space<vmem>>, vector<128x256xbf16>
    %1 = arith.extf %0 : vector<128x256xbf16> to vector<128x256xf32>
    %cst = arith.constant dense<0.000000e+00> : vector<128xf32>
    %2 = vector.multi_reduction <add>, %1, %cst [1] : vector<128x256xf32> to vector<128xf32>
    %3 = vector.shape_cast %2 : vector<128xf32> to vector<128x1xf32>
    %cst_1 = arith.constant 2.560000e+02 : f32
    %4 = vector.broadcast %cst_1 : f32 to vector<128x1xf32>
    %5 = arith.divf %3, %4 : vector<128x1xf32>
    %6 = vector.broadcast %5 : vector<128x1xf32> to vector<128x256xf32>
    %7 = arith.subf %1, %6 : vector<128x256xf32>
    %8 = arith.mulf %7, %7 : vector<128x256xf32>
    %cst_2 = arith.constant dense<0.000000e+00> : vector<128xf32>
    %9 = vector.multi_reduction <add>, %8, %cst_2 [1] : vector<128x256xf32> to vector<128xf32>
    %10 = vector.shape_cast %9 : vector<128xf32> to vector<128x1xf32>
    %cst_3 = arith.constant 2.560000e+02 : f32
    %11 = vector.broadcast %cst_3 : f32 to vector<128x1xf32>
    %12 = arith.divf %10, %11 : vector<128x1xf32>
    %cst_4 = arith.constant 9.99999997E-7 : f32
    %13 = vector.broadcast %cst_4 : f32 to vector<128x1xf32>
    %14 = arith.addf %12, %13 : vector<128x1xf32>
    %15 = math.rsqrt %14 : vector<128x1xf32>
    %16 = vector.broadcast %15 : vector<128x1xf32> to vector<128x256xf32>
    %17 = arith.mulf %7, %16 : vector<128x256xf32>
    %c0_5 = arith.constant 0 : index
    %c0_6 = arith.constant 0 : index
    %18 = vector.load %arg6[%c0_5, %c0_6] : memref<1x256xf32, #tpu.memory_space<vmem>>, vector<1x256xf32>
    %19 = vector.broadcast %18 : vector<1x256xf32> to vector<128x256xf32>
    %20 = arith.mulf %17, %19 : vector<128x256xf32>
    %c0_7 = arith.constant 0 : index
    %c0_8 = arith.constant 0 : index
    %21 = vector.load %arg7[%c0_7, %c0_8] : memref<1x256xf32, #tpu.memory_space<vmem>>, vector<1x256xf32>
    %22 = vector.broadcast %21 : vector<1x256xf32> to vector<128x256xf32>
    %23 = arith.addf %20, %22 : vector<128x256xf32>
    %24 = arith.truncf %23 : vector<128x256xf32> to vector<128x256xbf16>
    %c0_i32 = arith.constant 0 : i32
    %25 = arith.cmpi eq, %arg2, %c0_i32 : i32
    %26 = arith.extui %25 : i1 to i32
    %c0_i32_9 = arith.constant 0 : i32
    %27 = arith.cmpi ne, %26, %c0_i32_9 : i32
    scf.if %27 {
      %c0_19 = arith.constant 0 : index
      %c0_20 = arith.constant 0 : index
      %36 = vector.load %arg5[%c0_19, %c0_20] : memref<1x256xf32, #tpu.memory_space<vmem>>, vector<1x256xf32>
      %37 = vector.shape_cast %36 : vector<1x256xf32> to vector<1x256xf32>
      %38 = vector.broadcast %37 : vector<1x256xf32> to vector<128x256xf32>
      %c0_21 = arith.constant 0 : index
      %c0_22 = arith.constant 0 : index
      %39 = vector.load %arg9[%c0_21, %c0_22] : memref<128x256xf32, #tpu.memory_space<vmem>>, vector<128x256xf32>
      tpu.vector_store %arg9[%c0_21, %c0_22], %38 {strides = array<i32>} : memref<128x256xf32, #tpu.memory_space<vmem>>, vector<128x256xf32>,
    } else {
    }
    %c0_10 = arith.constant 0 : index
    %c0_11 = arith.constant 0 : index
    %28 = vector.load %arg9[%c0_10, %c0_11] : memref<128x256xf32, #tpu.memory_space<vmem>>, vector<128x256xf32>
    %c0_12 = arith.constant 0 : index
    %c0_13 = arith.constant 0 : index
    %29 = vector.load %arg4[%c0_12, %c0_13] : memref<256x256xbf16, #tpu.memory_space<vmem>>, vector<256x256xbf16>
    %cst_14 = arith.constant dense<0.000000e+00> : vector<128x256xf32>
    %30 = tpu.matmul %24, %29, %cst_14 {dimension_numbers = #tpu.dot_dimension_numbers<[1], [0], [0], [1], [0, 0, 1, 1], [], []>} : vector<128x256xbf16>, vector<256x256xbf16>, vector<128x256xf32> -> vector<128x256xf32>
    %31 = arith.addf %28, %30 : vector<128x256xf32>
    %c0_15 = arith.constant 0 : index
    %c0_16 = arith.constant 0 : index
    %32 = vector.load %arg9[%c0_15, %c0_16] : memref<128x256xf32, #tpu.memory_space<vmem>>, vector<128x256xf32>
    tpu.vector_store %arg9[%c0_15, %c0_16], %31 {strides = array<i32>} : memref<128x256xf32, #tpu.memory_space<vmem>>, vector<128x256xf32>,
    %c0_i32_17 = arith.constant 0 : i32
    %33 = arith.cmpi eq, %arg2, %c0_i32_17 : i32
    %34 = arith.extui %33 : i1 to i32
    %c0_i32_18 = arith.constant 0 : i32
    %35 = arith.cmpi ne, %34, %c0_i32_18 : i32
    scf.if %35 {
      %c0_19 = arith.constant 0 : index
      %c0_20 = arith.constant 0 : index
      %36 = vector.load %arg9[%c0_19, %c0_20] : memref<128x256xf32, #tpu.memory_space<vmem>>, vector<128x256xf32>
      %37 = arith.truncf %36 : vector<128x256xf32> to vector<128x256xbf16>
      %c0_21 = arith.constant 0 : index
      %c0_22 = arith.constant 0 : index
      %38 = vector.load %arg8[%c0_21, %c0_22] : memref<128x256xbf16, #tpu.memory_space<vmem>>, vector<128x256xbf16>
      tpu.vector_store %arg8[%c0_21, %c0_22], %37 {strides = array<i32>} : memref<128x256xbf16, #tpu.memory_space<vmem>>, vector<128x256xbf16>,
    } else {
    }
    return
  }
  func.func @transform_0(%arg0: i32, %arg1: i32, %arg2: i32) -> (i32, i32) {
    %c0_i32 = arith.constant 0 : i32
    %c0_i32_0 = arith.constant 0 : i32
    return %arg0, %c0_i32 : i32, i32
  }
  func.func @transform_1(%arg0: i32, %arg1: i32, %arg2: i32) -> (i32, i32) {
    %c0_i32 = arith.constant 0 : i32
    return %arg2, %arg1 : i32, i32
  }
  func.func @transform_2(%arg0: i32, %arg1: i32, %arg2: i32) -> (i32, i32) {
    %c0_i32 = arith.constant 0 : i32
    %c0_i32_0 = arith.constant 0 : i32
    return %c0_i32, %arg1 : i32, i32
  }
  func.func @transform_3(%arg0: i32, %arg1: i32, %arg2: i32) -> (i32, i32) {
    %c0_i32 = arith.constant 0 : i32
    %c0_i32_0 = arith.constant 0 : i32
    %c0_i32_1 = arith.constant 0 : i32
    return %c0_i32, %c0_i32_0 : i32, i32
  }
  func.func @transform_4(%arg0: i32, %arg1: i32, %arg2: i32) -> (i32, i32) {
    %c0_i32 = arith.constant 0 : i32
    %c0_i32_0 = arith.constant 0 : i32
    %c0_i32_1 = arith.constant 0 : i32
    return %c0_i32, %c0_i32_0 : i32, i32
  }
  func.func @transform_5(%arg0: i32, %arg1: i32, %arg2: i32) -> (i32, i32) {
    %c0_i32 = arith.constant 0 : i32
    return %arg0, %arg1 : i32, i32
  }
}

module attributes {stable_mosaic.version = 11 : i64} {
  func.func @_attention_kernel(%arg0: i32, %arg1: i32, %arg2: memref<64x128xbf16, #tpu.memory_space<vmem>>, %arg3: memref<64x128xbf16, #tpu.memory_space<vmem>>, %arg4: memref<64x128xbf16, #tpu.memory_space<vmem>>, %arg5: memref<64x128xbf16, #tpu.memory_space<vmem>>) attributes {dimension_semantics = [#tpu.dimension_semantics<parallel>, #tpu.dimension_semantics<parallel>], iteration_bounds = array<i64: 2, 2>, scalar_prefetch = 0 : i64, scratch_operands = 0 : i64, tpu.core_type = #tpu.core_type<tc>, window_params = [{transform_indices = @transform_0, window_bounds = array<i64: 64, 128>}, {transform_indices = @transform_1, window_bounds = array<i64: 64, 128>}, {transform_indices = @transform_2, window_bounds = array<i64: 64, 128>}, {transform_indices = @transform_3, window_bounds = array<i64: 64, 128>}]} {
    %c0 = arith.constant 0 : index
    %c0_0 = arith.constant 0 : index
    %0 = vector.load %arg2[%c0, %c0_0] : memref<64x128xbf16, #tpu.memory_space<vmem>>, vector<64x128xbf16>
    %c0_1 = arith.constant 0 : index
    %c0_2 = arith.constant 0 : index
    %1 = vector.load %arg3[%c0_1, %c0_2] : memref<64x128xbf16, #tpu.memory_space<vmem>>, vector<64x128xbf16>
    %cst = arith.constant dense<0.000000e+00> : vector<64x64xf32>
    %2 = tpu.matmul %0, %1, %cst {dimension_numbers = #tpu.dot_dimension_numbers<[1], [1], [0], [0], [0, 0, 1, 0], [], []>} : vector<64x128xbf16>, vector<64x128xbf16>, vector<64x64xf32> -> vector<64x64xf32>
    %cst_3 = arith.constant 0.0883883461 : f32
    %3 = vector.broadcast %cst_3 : f32 to vector<64x64xf32>
    %4 = arith.mulf %2, %3 : vector<64x64xf32>
    %cst_4 = arith.constant dense<0xFF800000> : vector<64xf32>
    %5 = vector.multi_reduction <maximumf>, %4, %cst_4 [1] : vector<64x64xf32> to vector<64xf32>
    %6 = vector.shape_cast %5 : vector<64xf32> to vector<64x1xf32>
    %7 = vector.broadcast %6 : vector<64x1xf32> to vector<64x64xf32>
    %8 = arith.subf %4, %7 : vector<64x64xf32>
    %9 = math.exp %8 : vector<64x64xf32>
    %cst_5 = arith.constant dense<0.000000e+00> : vector<64xf32>
    %10 = vector.multi_reduction <add>, %9, %cst_5 [1] : vector<64x64xf32> to vector<64xf32>
    %11 = vector.shape_cast %10 : vector<64xf32> to vector<64x1xf32>
    %12 = tpu.reciprocal %11 {approx = true} : vector<64x1xf32> -> vector<64x1xf32>
    %13 = vector.broadcast %12 : vector<64x1xf32> to vector<64x64xf32>
    %14 = arith.mulf %9, %13 : vector<64x64xf32>
    %15 = arith.truncf %14 : vector<64x64xf32> to vector<64x64xbf16>
    %c0_6 = arith.constant 0 : index
    %c0_7 = arith.constant 0 : index
    %16 = vector.load %arg4[%c0_6, %c0_7] : memref<64x128xbf16, #tpu.memory_space<vmem>>, vector<64x128xbf16>
    %cst_8 = arith.constant dense<0.000000e+00> : vector<64x128xf32>
    %17 = tpu.matmul %15, %16, %cst_8 {dimension_numbers = #tpu.dot_dimension_numbers<[1], [0], [0], [1], [0, 0, 1, 1], [], []>} : vector<64x64xbf16>, vector<64x128xbf16>, vector<64x128xf32> -> vector<64x128xf32>
    %18 = arith.truncf %17 : vector<64x128xf32> to vector<64x128xbf16>
    %c0_9 = arith.constant 0 : index
    %c0_10 = arith.constant 0 : index
    %19 = vector.load %arg5[%c0_9, %c0_10] : memref<64x128xbf16, #tpu.memory_space<vmem>>, vector<64x128xbf16>
    tpu.vector_store %arg5[%c0_9, %c0_10], %18 {strides = array<i32>} : memref<64x128xbf16, #tpu.memory_space<vmem>>, vector<64x128xbf16>,
    return
  }
  func.func @transform_0(%arg0: i32, %arg1: i32) -> (i32, i32) {
    %c0_i32 = arith.constant 0 : i32
    return %arg0, %arg1 : i32, i32
  }
  func.func @transform_1(%arg0: i32, %arg1: i32) -> (i32, i32) {
    %c2_i32 = arith.constant 2 : i32
    %0 = arith.addi %c2_i32, %arg1 : i32
    %c0_i32 = arith.constant 0 : i32
    return %arg0, %0 : i32, i32
  }
  func.func @transform_2(%arg0: i32, %arg1: i32) -> (i32, i32) {
    %c4_i32 = arith.constant 4 : i32
    %0 = arith.addi %c4_i32, %arg1 : i32
    %c0_i32 = arith.constant 0 : i32
    return %arg0, %0 : i32, i32
  }
  func.func @transform_3(%arg0: i32, %arg1: i32) -> (i32, i32) {
    %c0_i32 = arith.constant 0 : i32
    return %arg0, %arg1 : i32, i32
  }
}

module attributes {stable_mosaic.version = 11 : i64} {
  func.func @_gemm_kernel(%arg0: i32, %arg1: i32, %arg2: i32, %arg3: memref<128x256xbf16, #tpu.memory_space<vmem>>, %arg4: memref<256x128xbf16, #tpu.memory_space<vmem>>, %arg5: memref<1x128xf32, #tpu.memory_space<vmem>>, %arg6: memref<128x128xbf16, #tpu.memory_space<vmem>>, %arg7: memref<128x128xbf16, #tpu.memory_space<vmem>>, %arg8: memref<128x128xf32, #tpu.memory_space<vmem>>) attributes {dimension_semantics = [#tpu.dimension_semantics<parallel>, #tpu.dimension_semantics<parallel>, #tpu.dimension_semantics<arbitrary>], iteration_bounds = array<i64: 1, 2, 1>, scalar_prefetch = 0 : i64, scratch_operands = 1 : i64, tpu.core_type = #tpu.core_type<tc>, window_params = [{transform_indices = @transform_0, window_bounds = array<i64: 128, 256>}, {transform_indices = @transform_1, window_bounds = array<i64: 256, 128>}, {transform_indices = @transform_2, window_bounds = array<i64: 1, 128>}, {transform_indices = @transform_3, window_bounds = array<i64: 128, 128>}, {transform_indices = @transform_4, window_bounds = array<i64: 128, 128>}]} {
    %c0 = arith.constant 0 : index
    %c0_0 = arith.constant 0 : index
    %0 = vector.load %arg3[%c0, %c0_0] : memref<128x256xbf16, #tpu.memory_space<vmem>>, vector<128x256xbf16>
    %c0_i32 = arith.constant 0 : i32
    %1 = arith.cmpi eq, %arg2, %c0_i32 : i32
    %2 = arith.extui %1 : i1 to i32
    %c0_i32_1 = arith.constant 0 : i32
    %3 = arith.cmpi ne, %2, %c0_i32_1 : i32
    scf.if %3 {
      %c0_10 = arith.constant 0 : index
      %c0_11 = arith.constant 0 : index
      %12 = vector.load %arg5[%c0_10, %c0_11] : memref<1x128xf32, #tpu.memory_space<vmem>>, vector<1x128xf32>
      %13 = vector.shape_cast %12 : vector<1x128xf32> to vector<1x128xf32>
      %14 = vector.broadcast %13 : vector<1x128xf32> to vector<128x128xf32>
      %c0_12 = arith.constant 0 : index
      %c0_13 = arith.constant 0 : index
      %15 = vector.load %arg8[%c0_12, %c0_13] : memref<128x128xf32, #tpu.memory_space<vmem>>, vector<128x128xf32>
      tpu.vector_store %arg8[%c0_12, %c0_13], %14 {strides = array<i32>} : memref<128x128xf32, #tpu.memory_space<vmem>>, vector<128x128xf32>,
    } else {
    }
    %c0_2 = arith.constant 0 : index
    %c0_3 = arith.constant 0 : index
    %4 = vector.load %arg8[%c0_2, %c0_3] : memref<128x128xf32, #tpu.memory_space<vmem>>, vector<128x128xf32>
    %c0_4 = arith.constant 0 : index
    %c0_5 = arith.constant 0 : index
    %5 = vector.load %arg4[%c0_4, %c0_5] : memref<256x128xbf16, #tpu.memory_space<vmem>>, vector<256x128xbf16>
    %cst = arith.constant dense<0.000000e+00> : vector<128x128xf32>
    %6 = tpu.matmul %0, %5, %cst {dimension_numbers = #tpu.dot_dimension_numbers<[1], [0], [0], [1], [0, 0, 1, 1], [], []>} : vector<128x256xbf16>, vector<256x128xbf16>, vector<128x128xf32> -> vector<128x128xf32>
    %7 = arith.addf %4, %6 : vector<128x128xf32>
    %c0_6 = arith.constant 0 : index
    %c0_7 = arith.constant 0 : index
    %8 = vector.load %arg8[%c0_6, %c0_7] : memref<128x128xf32, #tpu.memory_space<vmem>>, vector<128x128xf32>
    tpu.vector_store %arg8[%c0_6, %c0_7], %7 {strides = array<i32>} : memref<128x128xf32, #tpu.memory_space<vmem>>, vector<128x128xf32>,
    %c0_i32_8 = arith.constant 0 : i32
    %9 = arith.cmpi eq, %arg2, %c0_i32_8 : i32
    %10 = arith.extui %9 : i1 to i32
    %c0_i32_9 = arith.constant 0 : i32
    %11 = arith.cmpi ne, %10, %c0_i32_9 : i32
    scf.if %11 {
      %c0_10 = arith.constant 0 : index
      %c0_11 = arith.constant 0 : index
      %12 = vector.load %arg8[%c0_10, %c0_11] : memref<128x128xf32, #tpu.memory_space<vmem>>, vector<128x128xf32>
      %c0_12 = arith.constant 0 : index
      %c0_13 = arith.constant 0 : index
      %13 = vector.load %arg6[%c0_12, %c0_13] : memref<128x128xbf16, #tpu.memory_space<vmem>>, vector<128x128xbf16>
      %14 = arith.extf %13 : vector<128x128xbf16> to vector<128x128xf32>
      %15 = arith.addf %12, %14 : vector<128x128xf32>
      %16 = arith.truncf %15 : vector<128x128xf32> to vector<128x128xbf16>
      %c0_14 = arith.constant 0 : index
      %c0_15 = arith.constant 0 : index
      %17 = vector.load %arg7[%c0_14, %c0_15] : memref<128x128xbf16, #tpu.memory_space<vmem>>, vector<128x128xbf16>
      tpu.vector_store %arg7[%c0_14, %c0_15], %16 {strides = array<i32>} : memref<128x128xbf16, #tpu.memory_space<vmem>>, vector<128x128xbf16>,
    } else {
    }
    return
  }
  func.func @transform_0(%arg0: i32, %arg1: i32, %arg2: i32) -> (i32, i32) {
    %c0_i32 = arith.constant 0 : i32
    return %arg0, %arg2 : i32, i32
  }
  func.func @transform_1(%arg0: i32, %arg1: i32, %arg2: i32) -> (i32, i32) {
    %c0_i32 = arith.constant 0 : i32
    return %arg2, %arg1 : i32, i32
  }
  func.func @transform_2(%arg0: i32, %arg1: i32, %arg2: i32) -> (i32, i32) {
    %c0_i32 = arith.constant 0 : i32
    %c0_i32_0 = arith.constant 0 : i32
    return %c0_i32, %arg1 : i32, i32
  }
  func.func @transform_3(%arg0: i32, %arg1: i32, %arg2: i32) -> (i32, i32) {
    %c0_i32 = arith.constant 0 : i32
    return %arg0, %arg1 : i32, i32
  }
  func.func @transform_4(%arg0: i32, %arg1: i32, %arg2: i32) -> (i32, i32) {
    %c0_i32 = arith.constant 0 : i32
    return %arg0, %arg1 : i32, i32
  }
}

module attributes {stable_mosaic.version = 11 : i64} {
  func.func @_gemm_kernel(%arg0: i32, %arg1: i32, %arg2: i32, %arg3: memref<128x256xbf16, #tpu.memory_space<vmem>>, %arg4: memref<256x256xbf16, #tpu.memory_space<vmem>>, %arg5: memref<1x256xf32, #tpu.memory_space<vmem>>, %arg6: memref<1x256xf32, #tpu.memory_space<vmem>>, %arg7: memref<1x256xf32, #tpu.memory_space<vmem>>, %arg8: memref<128x256xbf16, #tpu.memory_space<vmem>>, %arg9: memref<128x256xf32, #tpu.memory_space<vmem>>) attributes {dimension_semantics = [#tpu.dimension_semantics<parallel>, #tpu.dimension_semantics<parallel>, #tpu.dimension_semantics<arbitrary>], iteration_bounds = array<i64: 1, 4, 1>, scalar_prefetch = 0 : i64, scratch_operands = 1 : i64, tpu.core_type = #tpu.core_type<tc>, window_params = [{transform_indices = @transform_0, window_bounds = array<i64: 128, 256>}, {transform_indices = @transform_1, window_bounds = array<i64: 256, 256>}, {transform_indices = @transform_2, window_bounds = array<i64: 1, 256>}, {pipeline_mode = #tpu.pipeline_mode<synchronous>, transform_indices = @transform_3, window_bounds = array<i64: 1, 256>}, {pipeline_mode = #tpu.pipeline_mode<synchronous>, transform_indices = @transform_4, window_bounds = array<i64: 1, 256>}, {transform_indices = @transform_5, window_bounds = array<i64: 128, 256>}]} {
    %c0 = arith.constant 0 : index
    %c0_0 = arith.constant 0 : index
    %0 = vector.load %arg3[%c0, %c0_0] : memref<128x256xbf16, #tpu.memory_space<vmem>>, vector<128x256xbf16>
    %1 = arith.extf %0 : vector<128x256xbf16> to vector<128x256xf32>
    %cst = arith.constant dense<0.000000e+00> : vector<128xf32>
    %2 = vector.multi_reduction <add>, %1, %cst [1] : vector<128x256xf32> to vector<128xf32>
    %3 = vector.shape_cast %2 : vector<128xf32> to vector<128x1xf32>
    %cst_1 = arith.constant 2.560000e+02 : f32
    %4 = vector.broadcast %cst_1 : f32 to vector<128x1xf32>
    %5 = arith.divf %3, %4 : vector<128x1xf32>
    %6 = vector.broadcast %5 : vector<128x1xf32> to vector<128x256xf32>
    %7 = arith.subf %1, %6 : vector<128x256xf32>
    %8 = arith.mulf %7, %7 : vector<128x256xf32>
    %cst_2 = arith.constant dense<0.000000e+00> : vector<128xf32>
    %9 = vector.multi_reduction <add>, %8, %cst_2 [1] : vector<128x256xf32> to vector<128xf32>
    %10 = vector.shape_cast %9 : vector<128xf32> to vector<128x1xf32>
    %cst_3 = arith.constant 2.560000e+02 : f32
    %11 = vector.broadcast %cst_3 : f32 to vector<128x1xf32>
    %12 = arith.divf %10, %11 : vector<128x1xf32>
    %cst_4 = arith.constant 9.99999997E-7 : f32
    %13 = vector.broadcast %cst_4 : f32 to vector<128x1xf32>
    %14 = arith.addf %12, %13 : vector<128x1xf32>
    %15 = math.rsqrt %14 : vector<128x1xf32>
    %16 = vector.broadcast %15 : vector<128x1xf32> to vector<128x256xf32>
    %17 = arith.mulf %7, %16 : vector<128x256xf32>
    %c0_5 = arith.constant 0 : index
    %c0_6 = arith.constant 0 : index
    %18 = vector.load %arg6[%c0_5, %c0_6] : memref<1x256xf32, #tpu.memory_space<vmem>>, vector<1x256xf32>
    %19 = vector.broadcast %18 : vector<1x256xf32> to vector<128x256xf32>
    %20 = arith.mulf %17, %19 : vector<128x256xf32>
    %c0_7 = arith.constant 0 : index
    %c0_8 = arith.constant 0 : index
    %21 = vector.load %arg7[%c0_7, %c0_8] : memref<1x256xf32, #tpu.memory_space<vmem>>, vector<1x256xf32>
    %22 = vector.broadcast %21 : vector<1x256xf32> to vector<128x256xf32>
    %23 = arith.addf %20, %22 : vector<128x256xf32>
    %24 = arith.truncf %23 : vector<128x256xf32> to vector<128x256xbf16>
    %c0_i32 = arith.constant 0 : i32
    %25 = arith.cmpi eq, %arg2, %c0_i32 : i32
    %26 = arith.extui %25 : i1 to i32
    %c0_i32_9 = arith.constant 0 : i32
    %27 = arith.cmpi ne, %26, %c0_i32_9 : i32
    scf.if %27 {
      %c0_19 = arith.constant 0 : index
      %c0_20 = arith.constant 0 : index
      %36 = vector.load %arg5[%c0_19, %c0_20] : memref<1x256xf32, #tpu.memory_space<vmem>>, vector<1x256xf32>
      %37 = vector.shape_cast %36 : vector<1x256xf32> to vector<1x256xf32>
      %38 = vector.broadcast %37 : vector<1x256xf32> to vector<128x256xf32>
      %c0_21 = arith.constant 0 : index
      %c0_22 = arith.constant 0 : index
      %39 = vector.load %arg9[%c0_21, %c0_22] : memref<128x256xf32, #tpu.memory_space<vmem>>, vector<128x256xf32>
      tpu.vector_store %arg9[%c0_21, %c0_22], %38 {strides = array<i32>} : memref<128x256xf32, #tpu.memory_space<vmem>>, vector<128x256xf32>,
    } else {
    }
    %c0_10 = arith.constant 0 : index
    %c0_11 = arith.constant 0 : index
    %28 = vector.load %arg9[%c0_10, %c0_11] : memref<128x256xf32, #tpu.memory_space<vmem>>, vector<128x256xf32>
    %c0_12 = arith.constant 0 : index
    %c0_13 = arith.constant 0 : index
    %29 = vector.load %arg4[%c0_12, %c0_13] : memref<256x256xbf16, #tpu.memory_space<vmem>>, vector<256x256xbf16>
    %cst_14 = arith.constant dense<0.000000e+00> : vector<128x256xf32>
    %30 = tpu.matmul %24, %29, %cst_14 {dimension_numbers = #tpu.dot_dimension_numbers<[1], [0], [0], [1], [0, 0, 1, 1], [], []>} : vector<128x256xbf16>, vector<256x256xbf16>, vector<128x256xf32> -> vector<128x256xf32>
    %31 = arith.addf %28, %30 : vector<128x256xf32>
    %c0_15 = arith.constant 0 : index
    %c0_16 = arith.constant 0 : index
    %32 = vector.load %arg9[%c0_15, %c0_16] : memref<128x256xf32, #tpu.memory_space<vmem>>, vector<128x256xf32>
    tpu.vector_store %arg9[%c0_15, %c0_16], %31 {strides = array<i32>} : memref<128x256xf32, #tpu.memory_space<vmem>>, vector<128x256xf32>,
    %c0_i32_17 = arith.constant 0 : i32
    %33 = arith.cmpi eq, %arg2, %c0_i32_17 : i32
    %34 = arith.extui %33 : i1 to i32
    %c0_i32_18 = arith.constant 0 : i32
    %35 = arith.cmpi ne, %34, %c0_i32_18 : i32
    scf.if %35 {
      %c0_19 = arith.constant 0 : index
      %c0_20 = arith.constant 0 : index
      %36 = vector.load %arg9[%c0_19, %c0_20] : memref<128x256xf32, #tpu.memory_space<vmem>>, vector<128x256xf32>
      %37 = arith.mulf %36, %36 : vector<128x256xf32>
      %38 = arith.mulf %36, %37 : vector<128x256xf32>
      %cst_21 = arith.constant 4.471500e-02 : f32
      %39 = vector.broadcast %cst_21 : f32 to vector<128x256xf32>
      %40 = arith.mulf %39, %38 : vector<128x256xf32>
      %41 = arith.addf %36, %40 : vector<128x256xf32>
      %cst_22 = arith.constant 0.797884583 : f32
      %42 = vector.broadcast %cst_22 : f32 to vector<128x256xf32>
      %43 = arith.mulf %42, %41 : vector<128x256xf32>
      %44 = math.tanh %43 : vector<128x256xf32>
      %cst_23 = arith.constant 1.000000e+00 : f32
      %45 = vector.broadcast %cst_23 : f32 to vector<128x256xf32>
      %46 = arith.addf %45, %44 : vector<128x256xf32>
      %cst_24 = arith.constant 5.000000e-01 : f32
      %47 = vector.broadcast %cst_24 : f32 to vector<128x256xf32>
      %48 = arith.mulf %47, %46 : vector<128x256xf32>
      %49 = arith.mulf %36, %48 : vector<128x256xf32>
      %50 = arith.truncf %49 : vector<128x256xf32> to vector<128x256xbf16>
      %c0_25 = arith.constant 0 : index
      %c0_26 = arith.constant 0 : index
      %51 = vector.load %arg8[%c0_25, %c0_26] : memref<128x256xbf16, #tpu.memory_space<vmem>>, vector<128x256xbf16>
      tpu.vector_store %arg8[%c0_25, %c0_26], %50 {strides = array<i32>} : memref<128x256xbf16, #tpu.memory_space<vmem>>, vector<128x256xbf16>,
    } else {
    }
    return
  }
  func.func @transform_0(%arg0: i32, %arg1: i32, %arg2: i32) -> (i32, i32) {
    %c0_i32 = arith.constant 0 : i32
    %c0_i32_0 = arith.constant 0 : i32
    return %arg0, %c0_i32 : i32, i32
  }
  func.func @transform_1(%arg0: i32, %arg1: i32, %arg2: i32) -> (i32, i32) {
    %c0_i32 = arith.constant 0 : i32
    return %arg2, %arg1 : i32, i32
  }
  func.func @transform_2(%arg0: i32, %arg1: i32, %arg2: i32) -> (i32, i32) {
    %c0_i32 = arith.constant 0 : i32
    %c0_i32_0 = arith.constant 0 : i32
    return %c0_i32, %arg1 : i32, i32
  }
  func.func @transform_3(%arg0: i32, %arg1: i32, %arg2: i32) -> (i32, i32) {
    %c0_i32 = arith.constant 0 : i32
    %c0_i32_0 = arith.constant 0 : i32
    %c0_i32_1 = arith.constant 0 : i32
    return %c0_i32, %c0_i32_0 : i32, i32
  }
  func.func @transform_4(%arg0: i32, %arg1: i32, %arg2: i32) -> (i32, i32) {
    %c0_i32 = arith.constant 0 : i32
    %c0_i32_0 = arith.constant 0 : i32
    %c0_i32_1 = arith.constant 0 : i32
    return %c0_i32, %c0_i32_0 : i32, i32
  }
  func.func @transform_5(%arg0: i32, %arg1: i32, %arg2: i32) -> (i32, i32) {
    %c0_i32 = arith.constant 0 : i32
    return %arg0, %arg1 : i32, i32
  }
}

module attributes {stable_mosaic.version = 11 : i64} {
  func.func @_gemm_kernel(%arg0: i32, %arg1: i32, %arg2: i32, %arg3: memref<128x1024xbf16, #tpu.memory_space<vmem>>, %arg4: memref<1024x128xbf16, #tpu.memory_space<vmem>>, %arg5: memref<1x128xf32, #tpu.memory_space<vmem>>, %arg6: memref<128x128xbf16, #tpu.memory_space<vmem>>, %arg7: memref<128x128xbf16, #tpu.memory_space<vmem>>, %arg8: memref<128x128xf32, #tpu.memory_space<vmem>>) attributes {dimension_semantics = [#tpu.dimension_semantics<parallel>, #tpu.dimension_semantics<parallel>, #tpu.dimension_semantics<arbitrary>], iteration_bounds = array<i64: 1, 2, 1>, scalar_prefetch = 0 : i64, scratch_operands = 1 : i64, tpu.core_type = #tpu.core_type<tc>, window_params = [{transform_indices = @transform_0, window_bounds = array<i64: 128, 1024>}, {transform_indices = @transform_1, window_bounds = array<i64: 1024, 128>}, {transform_indices = @transform_2, window_bounds = array<i64: 1, 128>}, {transform_indices = @transform_3, window_bounds = array<i64: 128, 128>}, {transform_indices = @transform_4, window_bounds = array<i64: 128, 128>}]} {
    %c0 = arith.constant 0 : index
    %c0_0 = arith.constant 0 : index
    %0 = vector.load %arg3[%c0, %c0_0] : memref<128x1024xbf16, #tpu.memory_space<vmem>>, vector<128x1024xbf16>
    %c0_i32 = arith.constant 0 : i32
    %1 = arith.cmpi eq, %arg2, %c0_i32 : i32
    %2 = arith.extui %1 : i1 to i32
    %c0_i32_1 = arith.constant 0 : i32
    %3 = arith.cmpi ne, %2, %c0_i32_1 : i32
    scf.if %3 {
      %c0_10 = arith.constant 0 : index
      %c0_11 = arith.constant 0 : index
      %12 = vector.load %arg5[%c0_10, %c0_11] : memref<1x128xf32, #tpu.memory_space<vmem>>, vector<1x128xf32>
      %13 = vector.shape_cast %12 : vector<1x128xf32> to vector<1x128xf32>
      %14 = vector.broadcast %13 : vector<1x128xf32> to vector<128x128xf32>
      %c0_12 = arith.constant 0 : index
      %c0_13 = arith.constant 0 : index
      %15 = vector.load %arg8[%c0_12, %c0_13] : memref<128x128xf32, #tpu.memory_space<vmem>>, vector<128x128xf32>
      tpu.vector_store %arg8[%c0_12, %c0_13], %14 {strides = array<i32>} : memref<128x128xf32, #tpu.memory_space<vmem>>, vector<128x128xf32>,
    } else {
    }
    %c0_2 = arith.constant 0 : index
    %c0_3 = arith.constant 0 : index
    %4 = vector.load %arg8[%c0_2, %c0_3] : memref<128x128xf32, #tpu.memory_space<vmem>>, vector<128x128xf32>
    %c0_4 = arith.constant 0 : index
    %c0_5 = arith.constant 0 : index
    %5 = vector.load %arg4[%c0_4, %c0_5] : memref<1024x128xbf16, #tpu.memory_space<vmem>>, vector<1024x128xbf16>
    %cst = arith.constant dense<0.000000e+00> : vector<128x128xf32>
    %6 = tpu.matmul %0, %5, %cst {dimension_numbers = #tpu.dot_dimension_numbers<[1], [0], [0], [1], [0, 0, 1, 1], [], []>} : vector<128x1024xbf16>, vector<1024x128xbf16>, vector<128x128xf32> -> vector<128x128xf32>
    %7 = arith.addf %4, %6 : vector<128x128xf32>
    %c0_6 = arith.constant 0 : index
    %c0_7 = arith.constant 0 : index
    %8 = vector.load %arg8[%c0_6, %c0_7] : memref<128x128xf32, #tpu.memory_space<vmem>>, vector<128x128xf32>
    tpu.vector_store %arg8[%c0_6, %c0_7], %7 {strides = array<i32>} : memref<128x128xf32, #tpu.memory_space<vmem>>, vector<128x128xf32>,
    %c0_i32_8 = arith.constant 0 : i32
    %9 = arith.cmpi eq, %arg2, %c0_i32_8 : i32
    %10 = arith.extui %9 : i1 to i32
    %c0_i32_9 = arith.constant 0 : i32
    %11 = arith.cmpi ne, %10, %c0_i32_9 : i32
    scf.if %11 {
      %c0_10 = arith.constant 0 : index
      %c0_11 = arith.constant 0 : index
      %12 = vector.load %arg8[%c0_10, %c0_11] : memref<128x128xf32, #tpu.memory_space<vmem>>, vector<128x128xf32>
      %c0_12 = arith.constant 0 : index
      %c0_13 = arith.constant 0 : index
      %13 = vector.load %arg6[%c0_12, %c0_13] : memref<128x128xbf16, #tpu.memory_space<vmem>>, vector<128x128xbf16>
      %14 = arith.extf %13 : vector<128x128xbf16> to vector<128x128xf32>
      %15 = arith.addf %12, %14 : vector<128x128xf32>
      %16 = arith.truncf %15 : vector<128x128xf32> to vector<128x128xbf16>
      %c0_14 = arith.constant 0 : index
      %c0_15 = arith.constant 0 : index
      %17 = vector.load %arg7[%c0_14, %c0_15] : memref<128x128xbf16, #tpu.memory_space<vmem>>, vector<128x128xbf16>
      tpu.vector_store %arg7[%c0_14, %c0_15], %16 {strides = array<i32>} : memref<128x128xbf16, #tpu.memory_space<vmem>>, vector<128x128xbf16>,
    } else {
    }
    return
  }
  func.func @transform_0(%arg0: i32, %arg1: i32, %arg2: i32) -> (i32, i32) {
    %c0_i32 = arith.constant 0 : i32
    return %arg0, %arg2 : i32, i32
  }
  func.func @transform_1(%arg0: i32, %arg1: i32, %arg2: i32) -> (i32, i32) {
    %c0_i32 = arith.constant 0 : i32
    return %arg2, %arg1 : i32, i32
  }
  func.func @transform_2(%arg0: i32, %arg1: i32, %arg2: i32) -> (i32, i32) {
    %c0_i32 = arith.constant 0 : i32
    %c0_i32_0 = arith.constant 0 : i32
    return %c0_i32, %arg1 : i32, i32
  }
  func.func @transform_3(%arg0: i32, %arg1: i32, %arg2: i32) -> (i32, i32) {
    %c0_i32 = arith.constant 0 : i32
    return %arg0, %arg1 : i32, i32
  }
  func.func @transform_4(%arg0: i32, %arg1: i32, %arg2: i32) -> (i32, i32) {
    %c0_i32 = arith.constant 0 : i32
    return %arg0, %arg1 : i32, i32
  }
}

module attributes {stable_mosaic.version = 11 : i64} {
  func.func @_head_kernel(%arg0: i32, %arg1: memref<64x256xbf16, #tpu.memory_space<vmem>>, %arg2: memref<1x256xf32, #tpu.memory_space<vmem>>, %arg3: memref<1x256xf32, #tpu.memory_space<vmem>>, %arg4: memref<256x64xbf16, #tpu.memory_space<vmem>>, %arg5: memref<1x64xf32, #tpu.memory_space<vmem>>, %arg6: memref<64x32xbf16, #tpu.memory_space<vmem>>, %arg7: memref<1x32xf32, #tpu.memory_space<vmem>>, %arg8: memref<32x4xbf16, #tpu.memory_space<vmem>>, %arg9: memref<1x4xf32, #tpu.memory_space<vmem>>, %arg10: memref<64x4xf32, #tpu.memory_space<vmem>>) attributes {dimension_semantics = [#tpu.dimension_semantics<parallel>], iteration_bounds = array<i64: 2>, scalar_prefetch = 0 : i64, scratch_operands = 0 : i64, tpu.core_type = #tpu.core_type<tc>, window_params = [{transform_indices = @transform_0, window_bounds = array<i64: 64, 256>}, {pipeline_mode = #tpu.pipeline_mode<synchronous>, transform_indices = @transform_1, window_bounds = array<i64: 1, 256>}, {pipeline_mode = #tpu.pipeline_mode<synchronous>, transform_indices = @transform_2, window_bounds = array<i64: 1, 256>}, {pipeline_mode = #tpu.pipeline_mode<synchronous>, transform_indices = @transform_3, window_bounds = array<i64: 256, 64>}, {pipeline_mode = #tpu.pipeline_mode<synchronous>, transform_indices = @transform_4, window_bounds = array<i64: 1, 64>}, {pipeline_mode = #tpu.pipeline_mode<synchronous>, transform_indices = @transform_5, window_bounds = array<i64: 64, 32>}, {pipeline_mode = #tpu.pipeline_mode<synchronous>, transform_indices = @transform_6, window_bounds = array<i64: 1, 32>}, {pipeline_mode = #tpu.pipeline_mode<synchronous>, transform_indices = @transform_7, window_bounds = array<i64: 32, 4>}, {pipeline_mode = #tpu.pipeline_mode<synchronous>, transform_indices = @transform_8, window_bounds = array<i64: 1, 4>}, {transform_indices = @transform_9, window_bounds = array<i64: 64, 4>}]} {
    %c0 = arith.constant 0 : index
    %c0_0 = arith.constant 0 : index
    %0 = vector.load %arg1[%c0, %c0_0] : memref<64x256xbf16, #tpu.memory_space<vmem>>, vector<64x256xbf16>
    %1 = arith.extf %0 : vector<64x256xbf16> to vector<64x256xf32>
    %cst = arith.constant dense<0.000000e+00> : vector<64xf32>
    %2 = vector.multi_reduction <add>, %1, %cst [1] : vector<64x256xf32> to vector<64xf32>
    %3 = vector.shape_cast %2 : vector<64xf32> to vector<64x1xf32>
    %cst_1 = arith.constant 2.560000e+02 : f32
    %4 = vector.broadcast %cst_1 : f32 to vector<64x1xf32>
    %5 = arith.divf %3, %4 : vector<64x1xf32>
    %6 = vector.broadcast %5 : vector<64x1xf32> to vector<64x256xf32>
    %7 = arith.subf %1, %6 : vector<64x256xf32>
    %8 = arith.mulf %7, %7 : vector<64x256xf32>
    %cst_2 = arith.constant dense<0.000000e+00> : vector<64xf32>
    %9 = vector.multi_reduction <add>, %8, %cst_2 [1] : vector<64x256xf32> to vector<64xf32>
    %10 = vector.shape_cast %9 : vector<64xf32> to vector<64x1xf32>
    %cst_3 = arith.constant 2.560000e+02 : f32
    %11 = vector.broadcast %cst_3 : f32 to vector<64x1xf32>
    %12 = arith.divf %10, %11 : vector<64x1xf32>
    %cst_4 = arith.constant 9.99999997E-7 : f32
    %13 = vector.broadcast %cst_4 : f32 to vector<64x1xf32>
    %14 = arith.addf %12, %13 : vector<64x1xf32>
    %15 = math.rsqrt %14 : vector<64x1xf32>
    %16 = vector.broadcast %15 : vector<64x1xf32> to vector<64x256xf32>
    %17 = arith.mulf %7, %16 : vector<64x256xf32>
    %c0_5 = arith.constant 0 : index
    %c0_6 = arith.constant 0 : index
    %18 = vector.load %arg2[%c0_5, %c0_6] : memref<1x256xf32, #tpu.memory_space<vmem>>, vector<1x256xf32>
    %19 = vector.broadcast %18 : vector<1x256xf32> to vector<64x256xf32>
    %20 = arith.mulf %17, %19 : vector<64x256xf32>
    %c0_7 = arith.constant 0 : index
    %c0_8 = arith.constant 0 : index
    %21 = vector.load %arg3[%c0_7, %c0_8] : memref<1x256xf32, #tpu.memory_space<vmem>>, vector<1x256xf32>
    %22 = vector.broadcast %21 : vector<1x256xf32> to vector<64x256xf32>
    %23 = arith.addf %20, %22 : vector<64x256xf32>
    %24 = arith.truncf %23 : vector<64x256xf32> to vector<64x256xbf16>
    %c0_9 = arith.constant 0 : index
    %c0_10 = arith.constant 0 : index
    %25 = vector.load %arg4[%c0_9, %c0_10] : memref<256x64xbf16, #tpu.memory_space<vmem>>, vector<256x64xbf16>
    %cst_11 = arith.constant dense<0.000000e+00> : vector<64x64xf32>
    %26 = tpu.matmul %24, %25, %cst_11 {dimension_numbers = #tpu.dot_dimension_numbers<[1], [0], [0], [1], [0, 0, 1, 1], [], []>} : vector<64x256xbf16>, vector<256x64xbf16>, vector<64x64xf32> -> vector<64x64xf32>
    %c0_12 = arith.constant 0 : index
    %c0_13 = arith.constant 0 : index
    %27 = vector.load %arg5[%c0_12, %c0_13] : memref<1x64xf32, #tpu.memory_space<vmem>>, vector<1x64xf32>
    %28 = vector.broadcast %27 : vector<1x64xf32> to vector<64x64xf32>
    %29 = arith.addf %26, %28 : vector<64x64xf32>
    %cst_14 = arith.constant 0.000000e+00 : f32
    %30 = vector.broadcast %cst_14 : f32 to vector<64x64xf32>
    %31 = arith.maximumf %29, %30 : vector<64x64xf32>
    %32 = arith.truncf %31 : vector<64x64xf32> to vector<64x64xbf16>
    %c0_15 = arith.constant 0 : index
    %c0_16 = arith.constant 0 : index
    %33 = vector.load %arg6[%c0_15, %c0_16] : memref<64x32xbf16, #tpu.memory_space<vmem>>, vector<64x32xbf16>
    %cst_17 = arith.constant dense<0.000000e+00> : vector<64x32xf32>
    %34 = tpu.matmul %32, %33, %cst_17 {dimension_numbers = #tpu.dot_dimension_numbers<[1], [0], [0], [1], [0, 0, 1, 1], [], []>} : vector<64x64xbf16>, vector<64x32xbf16>, vector<64x32xf32> -> vector<64x32xf32>
    %c0_18 = arith.constant 0 : index
    %c0_19 = arith.constant 0 : index
    %35 = vector.load %arg7[%c0_18, %c0_19] : memref<1x32xf32, #tpu.memory_space<vmem>>, vector<1x32xf32>
    %36 = vector.broadcast %35 : vector<1x32xf32> to vector<64x32xf32>
    %37 = arith.addf %34, %36 : vector<64x32xf32>
    %cst_20 = arith.constant 0.000000e+00 : f32
    %38 = vector.broadcast %cst_20 : f32 to vector<64x32xf32>
    %39 = arith.maximumf %37, %38 : vector<64x32xf32>
    %40 = arith.truncf %39 : vector<64x32xf32> to vector<64x32xbf16>
    %c0_21 = arith.constant 0 : index
    %c0_22 = arith.constant 0 : index
    %41 = vector.load %arg8[%c0_21, %c0_22] : memref<32x4xbf16, #tpu.memory_space<vmem>>, vector<32x4xbf16>
    %cst_23 = arith.constant dense<0.000000e+00> : vector<64x4xf32>
    %42 = tpu.matmul %40, %41, %cst_23 {dimension_numbers = #tpu.dot_dimension_numbers<[1], [0], [0], [1], [0, 0, 1, 1], [], []>} : vector<64x32xbf16>, vector<32x4xbf16>, vector<64x4xf32> -> vector<64x4xf32>
    %c0_24 = arith.constant 0 : index
    %c0_25 = arith.constant 0 : index
    %43 = vector.load %arg9[%c0_24, %c0_25] : memref<1x4xf32, #tpu.memory_space<vmem>>, vector<1x4xf32>
    %44 = vector.broadcast %43 : vector<1x4xf32> to vector<64x4xf32>
    %45 = arith.addf %42, %44 : vector<64x4xf32>
    %c0_26 = arith.constant 0 : index
    %c0_27 = arith.constant 0 : index
    %46 = vector.load %arg10[%c0_26, %c0_27] : memref<64x4xf32, #tpu.memory_space<vmem>>, vector<64x4xf32>
    tpu.vector_store %arg10[%c0_26, %c0_27], %45 {strides = array<i32>} : memref<64x4xf32, #tpu.memory_space<vmem>>, vector<64x4xf32>,
    return
  }
  func.func @transform_0(%arg0: i32) -> (i32, i32) {
    %c0_i32 = arith.constant 0 : i32
    %c0_i32_0 = arith.constant 0 : i32
    return %arg0, %c0_i32 : i32, i32
  }
  func.func @transform_1(%arg0: i32) -> (i32, i32) {
    %c0_i32 = arith.constant 0 : i32
    %c0_i32_0 = arith.constant 0 : i32
    %c0_i32_1 = arith.constant 0 : i32
    return %c0_i32, %c0_i32_0 : i32, i32
  }
  func.func @transform_2(%arg0: i32) -> (i32, i32) {
    %c0_i32 = arith.constant 0 : i32
    %c0_i32_0 = arith.constant 0 : i32
    %c0_i32_1 = arith.constant 0 : i32
    return %c0_i32, %c0_i32_0 : i32, i32
  }
  func.func @transform_3(%arg0: i32) -> (i32, i32) {
    %c0_i32 = arith.constant 0 : i32
    %c0_i32_0 = arith.constant 0 : i32
    %c0_i32_1 = arith.constant 0 : i32
    return %c0_i32, %c0_i32_0 : i32, i32
  }
  func.func @transform_4(%arg0: i32) -> (i32, i32) {
    %c0_i32 = arith.constant 0 : i32
    %c0_i32_0 = arith.constant 0 : i32
    %c0_i32_1 = arith.constant 0 : i32
    return %c0_i32, %c0_i32_0 : i32, i32
  }
  func.func @transform_5(%arg0: i32) -> (i32, i32) {
    %c0_i32 = arith.constant 0 : i32
    %c0_i32_0 = arith.constant 0 : i32
    %c0_i32_1 = arith.constant 0 : i32
    return %c0_i32, %c0_i32_0 : i32, i32
  }
  func.func @transform_6(%arg0: i32) -> (i32, i32) {
    %c0_i32 = arith.constant 0 : i32
    %c0_i32_0 = arith.constant 0 : i32
    %c0_i32_1 = arith.constant 0 : i32
    return %c0_i32, %c0_i32_0 : i32, i32
  }
  func.func @transform_7(%arg0: i32) -> (i32, i32) {
    %c0_i32 = arith.constant 0 : i32
    %c0_i32_0 = arith.constant 0 : i32
    %c0_i32_1 = arith.constant 0 : i32
    return %c0_i32, %c0_i32_0 : i32, i32
  }
  func.func @transform_8(%arg0: i32) -> (i32, i32) {
    %c0_i32 = arith.constant 0 : i32
    %c0_i32_0 = arith.constant 0 : i32
    %c0_i32_1 = arith.constant 0 : i32
    return %c0_i32, %c0_i32_0 : i32, i32
  }
  func.func @transform_9(%arg0: i32) -> (i32, i32) {
    %c0_i32 = arith.constant 0 : i32
    %c0_i32_0 = arith.constant 0 : i32
    return %arg0, %c0_i32 : i32, i32
  }
}

</mosaic_0001>

<bundles_post_ra>
// kernel: vision_transformer_3d.12
= control target key start
LH: loop header
LB: loop body
LE: loop exit
PB: predicated region body
PF: predicated region fallthrough
CT: control target
= control target key end

     0   :  { %s1449_s15 = smov 0   ;;  %s1451_s16 = smov 0   ;;  %s1651_s0 = inlined_call_operand.vmem [shape: bf16[128,64], index: 0, kind: input, shape index: {}]   ;;  %s1652_s1 = inlined_call_operand.vmem [shape: bf16[64,256], index: 1, kind: input, shape index: {}]   ;;  %s1653_s2 = inlined_call_operand.vmem [shape: f32[1,256], index: 2, kind: input, shape index: {}]   ;;  %s1654_s3 = inlined_call_operand.vmem [shape: bf16[128,256], index: 3, kind: input, shape index: {}]   ;;  %s1655_s4 = inlined_call_operand.vmem [shape: bf16[128,256], index: 4, kind: output, shape index: {}]  }
   0x1   :  { %s1453_s17 = smov 0   ;;  %s1455_s18 = smov 0  }
   0x2   :  { %s1457_s19 = smov 0  }
   0x3 LB: > { %s29_s20 = sadd.s32 1, %s1418_s18  ;;  %s1132_s21 = sadd.s32 4294967295, %s1422_s19   ;;  %s1422_s19 = sphi %s1457_s19, %s14_s19   ;;  %s1418_s18 = sphi %s1455_s18, %s1661_s18   ;;  %s1414_s17 = sphi %s1453_s17, %s1660_s17   ;;  %s1410_s16 = sphi %s1451_s16, %s1659_s16   ;;  %s1406_s15 = sphi %s1449_s15, %s1658_s15  }
   0x4   : > { %p31_p0 = scmp.ge.s32.totalorder %s29_s20, 2  ;;  %p77_p1 = scmp.ne.s32.totalorder %s1410_s16, %s1406_s15 }
   0x5   : > { %p78_p2 = scmp.eq.s32.totalorder %s1422_s19, 0  ;;  %p163_p4 = scmp.eq.s32.totalorder %s1132_s21, 1 }
   0x6   : > { %s1663_s20 = smov (%p31_p0, %s29_s20), 0  ;;  %s70_s24 = sadd.s32 1, %s1410_s16 }
   0x7   : > { %p1481_p3 = por %p78_p2, %p77_p1  ;;  %s66_s23 = ssub.s32 %s1418_s18, %s1663_s20 }
   0x8   : > { %p68_p5 = scmp.eq.s32.totalorder %s66_s23, 0  ;;  %p1488_p6 = por %p163_p4, %p77_p1 }
   0x9   : > { %p1136_p7 = scmp.ge.s32.totalorder %s1422_s19, 2 }
   0xa   : > { %s1493_s26 = scalar_select %p68_p5, %s1410_s16, %s70_s24  }
   0xb   : > { %197 = sbr.rel (%p1136_p7) target bundleno = 39 (0x27), region = 20 }
  0x10   : > { %200 = sbr.rel (!%p1481_p3) target bundleno = 25 (0x19), region = 24  ;;  %s202_s27 = sand.u32 (%p1481_p3), 1, %s1410_s16  }
  0x11   : > { %s1138_s28 = sshll.u32 (%p1481_p3), %s1418_s18, 2  ;;  %s1137_s29 = sshll.u32 (%p1481_p3), %s202_s27, 5 }
  0x12   : > { %s209_s6 = scalar_lea.vmem (%p1481_p3), %s1652_s1, %s1138_s28  ;;  %s204_s7 = scalar_lea.vmem (%p1481_p3), [#allocation3], %s1137_s29 }
  0x13   : > { %v226_v0 = vld [vmem:[%s209_s6] sm:$0xf] (%p1481_p3)  ;;  %v228_v1 = vld [vmem:[%s209_s6 + $0x8] sm:$0xf] (%p1481_p3)  ;;  %v230_v2 = vld [vmem:[%s209_s6 + $0x10] sm:$0xf] (%p1481_p3) }
  0x14   : > { %227 = vst [vmem:[%s204_s7] sm:$0xf] (%p1481_p3), %v226_v0  ;;  %229 = vst [vmem:[%s204_s7 + $0x4] sm:$0xf] (%p1481_p3), %v228_v1  ;;  %v232_v3 = vld [vmem:[%s209_s6 + $0x18] sm:$0xf] (%p1481_p3) }
  0x15   : > { %v234_v4 = vld [vmem:[%s209_s6 + $0x20] sm:$0xf]  ;;  %231 = vst [vmem:[%s204_s7 + $0x8] sm:$0xf] %v230_v2  ;;  %233 = vst [vmem:[%s204_s7 + $0xc] sm:$0xf] %v232_v3 }
  0x16   : > { %235 = vst [vmem:[%s204_s7 + $0x10] sm:$0xf] %v234_v4  ;;  %v236_v5 = vld [vmem:[%s209_s6 + $0x28] sm:$0xf]  ;;  %v238_v6 = vld [vmem:[%s209_s6 + $0x30] sm:$0xf] }
  0x17   : > { %v240_v7 = vld [vmem:[%s209_s6 + $0x38] sm:$0xf]  ;;  %237 = vst [vmem:[%s204_s7 + $0x14] sm:$0xf] %v236_v5  ;;  %239 = vst [vmem:[%s204_s7 + $0x18] sm:$0xf] %v238_v6 }
  0x18   : > { %241 = vst [vmem:[%s204_s7 + $0x1c] sm:$0xf] %v240_v7 }
  0x19 PF: > { %287 = sbr.rel (!%p1481_p3) target bundleno = 39 (0x27), region = 69  ;;  %s289_s8 = sand.u32 (%p1481_p3), 1, %s1410_s16  }
  0x1a   : > { %s1140_s9 = sshll.u32 (%p1481_p3), %s1418_s18, 2  ;;  %s1139_s10 = sshll.u32 (%p1481_p3), %s289_s8, 6 }
  0x1b   : > { %s1510_s13 = scalar_lea.vmem (%p1481_p3), %s1654_s3, %s1140_s9  ;;  %s291_s14 = scalar_lea.vmem (%p1481_p3), [#allocation4], %s1139_s10 }
  0x1c   : > { %v313_v8 = vld [vmem:[%s1510_s13] sm:$0xf] (%p1481_p3)  ;;  %v315_v9 = vld [vmem:[%s1510_s13 + $0x8] sm:$0xf] (%p1481_p3)  ;;  %v317_v10 = vld [vmem:[%s1510_s13 + $0x10] sm:$0xf] (%p1481_p3) }
  0x1d   : > { %314 = vst [vmem:[%s291_s14] sm:$0xf] (%p1481_p3), %v313_v8  ;;  %316 = vst [vmem:[%s291_s14 + $0x4] sm:$0xf] (%p1481_p3), %v315_v9  ;;  %v319_v11 = vld [vmem:[%s1510_s13 + $0x18] sm:$0xf] (%p1481_p3) }
  0x1e   : > { %v321_v12 = vld [vmem:[%s1510_s13 + $0x20] sm:$0xf]  ;;  %318 = vst [vmem:[%s291_s14 + $0x8] sm:$0xf] %v317_v10  ;;  %320 = vst [vmem:[%s291_s14 + $0xc] sm:$0xf] %v319_v11 }
  0x1f   : > { %322 = vst [vmem:[%s291_s14 + $0x10] sm:$0xf] %v321_v12  ;;  %v323_v13 = vld [vmem:[%s1510_s13 + $0x28] sm:$0xf]  ;;  %v325_v14 = vld [vmem:[%s1510_s13 + $0x30] sm:$0xf] }
  0x20   : > { %v327_v15 = vld [vmem:[%s1510_s13 + $0x38] sm:$0xf]  ;;  %324 = vst [vmem:[%s291_s14 + $0x14] sm:$0xf] %v323_v13  ;;  %326 = vst [vmem:[%s291_s14 + $0x18] sm:$0xf] %v325_v14 }
  0x21   : > { %328 = vst [vmem:[%s291_s14 + $0x1c] sm:$0xf] %v327_v15  ;;  %v329_v16 = vld [vmem:[%s1510_s13 + $0x40] sm:$0xf]  ;;  %v331_v17 = vld [vmem:[%s1510_s13 + $0x48] sm:$0xf] }
  0x22   : > { %v333_v18 = vld [vmem:[%s1510_s13 + $0x50] sm:$0xf]  ;;  %330 = vst [vmem:[%s291_s14 + $0x20] sm:$0xf] %v329_v16  ;;  %332 = vst [vmem:[%s291_s14 + $0x24] sm:$0xf] %v331_v17 }
  0x23   : > { %334 = vst [vmem:[%s291_s14 + $0x28] sm:$0xf] %v333_v18  ;;  %v335_v19 = vld [vmem:[%s1510_s13 + $0x58] sm:$0xf]  ;;  %v337_v20 = vld [vmem:[%s1510_s13 + $0x60] sm:$0xf] }
  0x24   : > { %v339_v21 = vld [vmem:[%s1510_s13 + $0x68] sm:$0xf]  ;;  %336 = vst [vmem:[%s291_s14 + $0x2c] sm:$0xf] %v335_v19  ;;  %338 = vst [vmem:[%s291_s14 + $0x30] sm:$0xf] %v337_v20 }
  0x25   : > { %340 = vst [vmem:[%s291_s14 + $0x34] sm:$0xf] %v339_v21  ;;  %v341_v22 = vld [vmem:[%s1510_s13 + $0x70] sm:$0xf]  ;;  %v343_v23 = vld [vmem:[%s1510_s13 + $0x78] sm:$0xf] }
  0x26   : > { %342 = vst [vmem:[%s291_s14 + $0x38] sm:$0xf] %v341_v22  ;;  %344 = vst [vmem:[%s291_s14 + $0x3c] sm:$0xf] %v343_v23 }
  0x27 PF: > { %p1141_p8 = scmp.ge.s32.totalorder %s1422_s19, 1  ;;  %p399_p9 = scmp.lt.s32.totalorder %s1422_s19, 3 }
  0x29   : > { %p400_p10 = pnand %p1141_p8, %p399_p9 }
  0x2a   : > { %s406_s21 = sand.u32 (!%p400_p10), 1, %s1406_s15   ;;  %p462_p11 = scmp.lt.s32.totalorder (!%p400_p10), %s1414_s17, 1 }
  0x2b   : > { %403 = sbr.rel (%p400_p10) target bundleno = 290 (0x122), region = 110  ;;  %s1142_s24 = sshll.u32 (!%p400_p10), %s406_s21, 5 }
  0x2c   : > { %s408_s29 = scalar_lea.vmem (!%p400_p10), [#allocation3], %s1142_s24  ;;  %s1569_s24 = sshll.u32 (!%p400_p10), %s406_s21, 6 }
  0x2d   : > { %s1577_s30 = scalar_lea.vmem (!%p400_p10), [#allocation4], %s1569_s24  ;;  %s1598_s15 = scalar_lea.vmem (!%p400_p10), [#allocation5], %s1569_s24 }
  0x30   : > { %v1376_v24 = vld [vmem:[%s1651_s0] sm:$0xff]   ;;  %vm599_vm0 = vcmask 523264   ;;  %v1372_v26 = vld [vmem:[%s408_s29 + $0x18] sm:$0xff]   ;;  %v1373_v27 = vld [vmem:[%s408_s29 + $0x10] sm:$0xff]   ;;  %s463_s23 = scalar_select %p462_p11, %s1414_s17, 1 }
  0x31   : > { %1308 = vmatprep.mubr.msk.bf16.mxu0 %vm599_vm0, %v1376_v24  ;;  %v1377_v25 = vld [vmem:[%s1651_s0 + $0x20] sm:$0xff]   ;;  %1300 = vmatprep.subr.bf16.mxu0 %v1372_v26  ;;  %v1374_v28 = vld [vmem:[%s408_s29 + $0x8] sm:$0xff]   ;;  %v1380_v32 = vld [vmem:[%s1651_s0 + $0x10] sm:$0xff]   ;;  %s1183_s21 = sshll.u32 (%p1488_p6), %s1414_s17, 2 }
  0x32   : > { %1316 = vmatprep.mubr.msk.bf16.mxu1 %vm599_vm0, %v1377_v25  ;;  %1324 = vmatprep.subr.bf16.mxu1 %v1372_v26  ;;  %v1375_v29 = vld [vmem:[%s408_s29] sm:$0xff]   ;;  %v1378_v30 = vld [vmem:[%s1651_s0 + $0x8] sm:$0xff]   ;;  %v1381_v33 = vld [vmem:[%s1651_s0 + $0x30] sm:$0xff]   ;;  %s464_s29 = scalar_lea.vmem %s1653_s2, %s463_s23  ;;  %s911_s7 = scalar_lea.vmem (%p1488_p6), %s1655_s4, %s1183_s21 }
  0x33   : > { %1301 = vmatpush3.bf16.msra.mxu0 %v1372_v26  ;;  %1328 = vmatpush3.bf16.msra.mxu1 %v1372_v26  ;;  %v1379_v31 = vld [vmem:[%s1651_s0 + $0x28] sm:$0xff]   ;;  %v1382_v34 = vld [vmem:[%s1651_s0 + $0x18] sm:$0xff]   ;;  %v1574_v36 = vld [vmem:[%s464_s29] ss:$0 sm:$0xff] }
  0x34   : > { %1302 = vmatprep.subr.bf16.mxu0 %v1373_v27  ;;  %1325 = vmatprep.subr.bf16.mxu1 %v1373_v27  ;;  %v1383_v35 = vld [vmem:[%s1651_s0 + $0x38] sm:$0xff]   ;;  %v1274_v37 = vld [vmem:[%s1577_s30 + $0x8] sm:$0xff]   ;;  %v1203_v41 = vld [vmem:[%s1577_s30] sm:$0xff]  }
  0x35   : > { %v1278_v38 = vld [vmem:[%s1577_s30 + $0x28] sm:$0xff]   ;;  %v1277_v42 = vld [vmem:[%s1577_s30 + $0x20] sm:$0xff]   ;;  %v1208_v44 = vunpack.c.l.bf16 %v1274_v37  ;;  %v1209_v49 = vunpack.c.h.bf16 %v1274_v37  ;;  %v1204_v52 = vunpack.c.l.bf16 %v1203_v41  ;;  %v1205_v59 = vunpack.c.h.bf16 %v1203_v41  ;;  %v1276_v5 = vld [vmem:[%s1577_s30 + $0x18] sm:$0xff]  }
  0x36   : > { %v1224_v46 = vunpack.c.l.bf16 %v1278_v38  ;;  %v1225_v50 = vunpack.c.h.bf16 %v1278_v38  ;;  %v1220_v54 = vunpack.c.l.bf16 %v1277_v42  ;;  %v1221_v60 = vunpack.c.h.bf16 %v1277_v42  ;;  %v1280_v6 = vld [vmem:[%s1577_s30 + $0x38] sm:$0xff]   ;;  %v1275_v15 = vld [vmem:[%s1577_s30 + $0x10] sm:$0xff]  }
  0x37   : > { %1303 = vmatpush3.bf16.msra.mxu0 %v1373_v27  ;;  %1329 = vmatpush3.bf16.msra.mxu1 %v1373_v27  ;;  %v1279_v16 = vld [vmem:[%s1577_s30 + $0x30] sm:$0xff]   ;;  %v1216_v18 = vunpack.c.l.bf16 %v1276_v5  ;;  %v1232_v20 = vunpack.c.l.bf16 %v1280_v6  ;;  %v1217_v25 = vunpack.c.h.bf16 %v1276_v5  ;;  %v1233_v26 = vunpack.c.h.bf16 %v1280_v6 }
  0x38   : > { %1304 = vmatprep.subr.bf16.mxu0 %v1374_v28  ;;  %1326 = vmatprep.subr.bf16.mxu1 %v1374_v28  ;;  %v1229_v37 = vunpack.c.h.bf16 %v1279_v16 }
  0x3b   : > { %1305 = vmatpush3.bf16.msra.mxu0 %v1374_v28  ;;  %1330 = vmatpush3.bf16.msra.mxu1 %v1374_v28  ;;  %v1212_v28 = vunpack.c.l.bf16 %v1275_v15 }
  0x3c   : > { %1306 = vmatprep.subr.bf16.mxu0 %v1375_v29  ;;  %1327 = vmatprep.subr.bf16.mxu1 %v1375_v29 }
  0x3f   : > { %1307 = vmatpush3.bf16.msra.mxu0 %v1375_v29  ;;  %1331 = vmatpush3.bf16.msra.mxu1 %v1375_v29 }
  0x42   : > { %1309 = vmatmul.mubr.msk.bf16.vlgmr.msra.gmra.mxu0 %vm599_vm0, %v1378_v30  ;;  %1317 = vmatmul.mubr.msk.bf16.vlgmr.msra.gmra.mxu1 %vm599_vm0, %v1379_v31  ;;  %v1228_v30 = vunpack.c.l.bf16 %v1279_v16 }
  0x43   : > { %1312 = vmatprep.mubr.msk.bf16.mxu0 %vm599_vm0, %v1380_v32  ;;  %1320 = vmatprep.mubr.msk.bf16.mxu1 %vm599_vm0, %v1381_v33 }
  0x4a   : > { %1313 = vmatmul.mubr.msk.bf16.gmra.mxu0 %vm599_vm0, %v1382_v34  ;;  %1321 = vmatmul.mubr.msk.bf16.gmra.mxu1 %vm599_vm0, %v1383_v35  ;;  %v1213_v35 = vunpack.c.h.bf16 %v1275_v15 }
 0x102   : > { %v1310_v39 = vpop.f32.mrf.mxu0  ;;  %v1318_v40 = vpop.f32.mrf.mxu1 }
 0x103   : > { %v723_v43 = vadd.f32 %v1310_v39, %v1574_v36  ;;  %v731_v45 = vadd.f32 %v1318_v40, %v1574_v36 }
 0x104   : > { %v658_v47 = vpop.f32.mrf.mxu0  ;;  %v690_v48 = vpop.f32.mrf.mxu1 }
 0x105   : > { %v721_v51 = vadd.f32 %v1574_v36, %v658_v47  ;;  %v729_v53 = vadd.f32 %v1574_v36, %v690_v48  ;;  %v806_v61 = vadd.f32 %v1208_v44, %v723_v43  ;;  %v814_v62 = vadd.f32 %v1224_v46, %v731_v45 }
 0x106   : > { %v1311_v55 = vpop.f32.mrf.mxu0  ;;  %v1319_v56 = vpop.f32.mrf.mxu1 }
 0x107   : > { %v724_v57 = vadd.f32 %v1311_v55, %v1574_v36  ;;  %v732_v58 = vadd.f32 %v1319_v56, %v1574_v36  ;;  %v804_v7 = vadd.f32 %v1204_v52, %v721_v51  ;;  %v812_v8 = vadd.f32 %v1220_v54, %v729_v53 }
 0x108   : > { %v661_v63 = vpop.f32.mrf.mxu0  ;;  %v693_v0 = vpop.f32.mrf.mxu1 }
 0x109   : > { %v807_v1 = vadd.f32 %v1209_v49, %v724_v57  ;;  %v815_v2 = vadd.f32 %v1225_v50, %v732_v58  ;;  %v722_v3 = vadd.f32 %v1574_v36, %v661_v63  ;;  %v730_v4 = vadd.f32 %v1574_v36, %v693_v0 }
 0x10a   : > { %v1314_v9 = vpop.f32.mrf.mxu0  ;;  %v1322_v10 = vpop.f32.mrf.mxu1 }
 0x10b   : > { %v1242_v11 = vpack.c.bf16 %v807_v1, %v806_v61  ;;  %v1262_v12 = vpack.c.bf16 %v815_v2, %v814_v62  ;;  %v805_v13 = vadd.f32 %v1205_v59, %v722_v3  ;;  %v813_v14 = vadd.f32 %v1221_v60, %v730_v4 }
 0x10c   : > { %v727_v17 = vadd.f32 %v1314_v9, %v1574_v36  ;;  %v735_v19 = vadd.f32 %v1322_v10, %v1574_v36  ;;  %v674_v21 = vpop.f32.mrf.mxu0  ;;  %v706_v22 = vpop.f32.mrf.mxu1 }
 0x10d   : > { %1281 = vst [vmem:[%s1598_s15 + $0x8] sm:$0xff] %v1242_v11   ;;  %1285 = vst [vmem:[%s1598_s15 + $0x28] sm:$0xff] %v1262_v12   ;;  %v1237_v23 = vpack.c.bf16 %v805_v13, %v804_v7  ;;  %v1257_v24 = vpack.c.bf16 %v813_v14, %v812_v8  ;;  %v725_v27 = vadd.f32 %v1574_v36, %v674_v21 }
 0x10e   : > { %v733_v29 = vadd.f32 %v1574_v36, %v706_v22  ;;  %v1315_v31 = vpop.f32.mrf.mxu0  ;;  %v1323_v32 = vpop.f32.mrf.mxu1  ;;  %v810_v38 = vadd.f32 %v1216_v18, %v727_v17  ;;  %v818_v39 = vadd.f32 %v1232_v20, %v735_v19 }
 0x10f   : > { %1238 = vst [vmem:[%s1598_s15] sm:$0xff] %v1237_v23   ;;  %1284 = vst [vmem:[%s1598_s15 + $0x20] sm:$0xff] %v1257_v24   ;;  %v728_v33 = vadd.f32 %v1315_v31, %v1574_v36  ;;  %v736_v34 = vadd.f32 %v1323_v32, %v1574_v36  ;;  %v808_v46 = vadd.f32 %v1212_v28, %v725_v27 }
 0x110   : > { %v677_v40 = vpop.f32.mrf.mxu0  ;;  %v709_v41 = vpop.f32.mrf.mxu1  ;;  %v816_v47 = vadd.f32 %v1228_v30, %v733_v29 }
 0x111   : > { %v811_v42 = vadd.f32 %v1217_v25, %v728_v33  ;;  %v819_v43 = vadd.f32 %v1233_v26, %v736_v34  ;;  %v726_v44 = vadd.f32 %v1574_v36, %v677_v40  ;;  %v734_v45 = vadd.f32 %v1574_v36, %v709_v41 }
 0x113   : > { %v1252_v48 = vpack.c.bf16 %v811_v42, %v810_v38  ;;  %v1272_v49 = vpack.c.bf16 %v819_v43, %v818_v39  ;;  %v809_v50 = vadd.f32 %v1213_v35, %v726_v44  ;;  %v817_v51 = vadd.f32 %v1229_v37, %v734_v45  ;;  %906 = sbr.rel (!%p1488_p6) target bundleno = 290 (0x122), region = 130 }
 0x114   : > { %v932_v55 = vld [vmem:[%s1598_s15 + $0x8] sm:$0xf] (%p1488_p6)  ;;  %v934_v56 = vld [vmem:[%s1598_s15 + $0xc] sm:$0xf] (%p1488_p6) }
 0x115   : > { %1283 = vst [vmem:[%s1598_s15 + $0x18] sm:$0xff] %v1252_v48   ;;  %1287 = vst [vmem:[%s1598_s15 + $0x38] sm:$0xff] %v1272_v49   ;;  %v1247_v52 = vpack.c.bf16 %v809_v50, %v808_v46  ;;  %v1267_v53 = vpack.c.bf16 %v817_v51, %v816_v47  ;;  %v948_v63 = vld [vmem:[%s1598_s15 + $0x28] sm:$0xf] (%p1488_p6)  ;;  %v950_v0 = vld [vmem:[%s1598_s15 + $0x2c] sm:$0xf] (%p1488_p6) }
 0x116   : > { %v928_v36 = vld [vmem:[%s1598_s15] sm:$0xf] (%p1488_p6)  ;;  %v930_v54 = vld [vmem:[%s1598_s15 + $0x4] sm:$0xf] (%p1488_p6)  ;;  %933 = vst [vmem:[%s911_s7 + $0x10] sm:$0xf] (%p1488_p6), %v932_v55 }
 0x117   : > { %1282 = vst [vmem:[%s1598_s15 + $0x10] sm:$0xff] %v1247_v52   ;;  %1286 = vst [vmem:[%s1598_s15 + $0x30] sm:$0xff] %v1267_v53   ;;  %v944_v61 = vld [vmem:[%s1598_s15 + $0x20] sm:$0xf] (%p1488_p6)  ;;  %v946_v62 = vld [vmem:[%s1598_s15 + $0x24] sm:$0xf] (%p1488_p6) }
 0x118   : > { %929 = vst [vmem:[%s911_s7] sm:$0xf] %v928_v36  ;;  %931 = vst [vmem:[%s911_s7 + $0x8] sm:$0xf] %v930_v54 }
 0x119   : > { %935 = vst [vmem:[%s911_s7 + $0x18] sm:$0xf] %v934_v56  ;;  %945 = vst [vmem:[%s911_s7 + $0x40] sm:$0xf] %v944_v61 }
 0x11a   : > { %947 = vst [vmem:[%s911_s7 + $0x48] sm:$0xf] %v946_v62  ;;  %949 = vst [vmem:[%s911_s7 + $0x50] sm:$0xf] %v948_v63 }
 0x11b   : > { %951 = vst [vmem:[%s911_s7 + $0x58] sm:$0xf] %v950_v0 }
 0x11c   : > { %v940_v59 = vld [vmem:[%s1598_s15 + $0x18] sm:$0xf]  ;;  %v942_v60 = vld [vmem:[%s1598_s15 + $0x1c] sm:$0xf] }
 0x11d   : > { %941 = vst [vmem:[%s911_s7 + $0x30] sm:$0xf] %v940_v59  ;;  %943 = vst [vmem:[%s911_s7 + $0x38] sm:$0xf] %v942_v60  ;;  %v956_v3 = vld [vmem:[%s1598_s15 + $0x38] sm:$0xf] }
 0x11e   : > { %v936_v57 = vld [vmem:[%s1598_s15 + $0x10] sm:$0xf]  ;;  %v938_v58 = vld [vmem:[%s1598_s15 + $0x14] sm:$0xf]  ;;  %v958_v4 = vld [vmem:[%s1598_s15 + $0x3c] sm:$0xf] }
 0x11f   : > { %937 = vst [vmem:[%s911_s7 + $0x20] sm:$0xf] %v936_v57  ;;  %939 = vst [vmem:[%s911_s7 + $0x28] sm:$0xf] %v938_v58  ;;  %v952_v1 = vld [vmem:[%s1598_s15 + $0x30] sm:$0xf] }
 0x120   : > { %v954_v2 = vld [vmem:[%s1598_s15 + $0x34] sm:$0xf]  ;;  %953 = vst [vmem:[%s911_s7 + $0x60] sm:$0xf] %v952_v1  ;;  %957 = vst [vmem:[%s911_s7 + $0x70] sm:$0xf] %v956_v3 }
 0x121   : > { %955 = vst [vmem:[%s911_s7 + $0x68] sm:$0xf] %v954_v2  ;;  %959 = vst [vmem:[%s911_s7 + $0x78] sm:$0xf] %v958_v4 }
 0x122 PF: > { %s14_s19 = sadd.s32 1, %s1422_s19   ;;  %s1658_s15 = smov %s1410_s16 }
 0x123   : > { %p11_p12 = scmp.ge.s32.totalorder %s14_s19, 4   ;;  %s1659_s16 = smov %s1493_s26 }
 0x124   : > { %s1660_s17 = smov %s1418_s18  ;;  %s1661_s18 = smov %s1663_s20 }
 0x125   :  { %13 = sbr.rel (!%p11_p12) target bundleno = 3 (0x3), region = 216 }

// kernel: vision_transformer_3d.14
= control target key start
LH: loop header
LB: loop body
LE: loop exit
PB: predicated region body
PF: predicated region fallthrough
CT: control target
= control target key end

     0   :  { %s1632_s0 = inlined_call_operand.vmem [shape: bf16[128,768], index: 0, kind: input, shape index: {}, may-alias: {0,1,2}]   ;;  %s1633_s1 = inlined_call_operand.vmem [shape: bf16[128,768], index: 1, kind: input, shape index: {}, may-alias: {0,1,2}]   ;;  %s1634_s2 = inlined_call_operand.vmem [shape: bf16[128,768], index: 2, kind: input, shape index: {}, may-alias: {0,1,2}]   ;;  %s1635_s3 = inlined_call_operand.vmem [shape: bf16[128,256], index: 3, kind: output, shape index: {}]  }
   0x1   :  { %1637 = sst [smem:[#allocation7_spill]] %s1635_s3 }
   0x2   :  { %s1418_s12 = smov 0   ;;  %s1420_s13 = smov 0  }
   0x3   :  { %s1422_s14 = smov 0   ;;  %s1424_s15 = smov 0  }
   0x4   :  { %s1426_s16 = smov 0   ;;  %s1428_s17 = smov 0  }
   0x5   :  { %s1430_s18 = smov 0   ;;  %s1432_s19 = smov 0  }
   0x6   :  { %s1434_s20 = smov 0   ;;  %s1436_s21 = smov 0  }
   0x7   :  { %s1438_s22 = smov 0  }
   0x8 LB: > { %s22_s24 = sadd.s32 1, %s1388_s20  ;;  %s25_s25 = sadd.s32 1, %s1392_s21  ;;  %s1396_s22 = sphi %s1438_s22, %s13_s22   ;;  %s1392_s21 = sphi %s1436_s21, %s1655_s21   ;;  %s1388_s20 = sphi %s1434_s20, %s1654_s20   ;;  %s1384_s19 = sphi %s1432_s19, %s1653_s19   ;;  %s1380_s18 = sphi %s1430_s18, %s1652_s18   ;;  %s1376_s17 = sphi %s1428_s17, %s1651_s17   ;;  %s1372_s16 = sphi %s1426_s16, %s1650_s16   ;;  %s1368_s15 = sphi %s1424_s15, %s1649_s15   ;;  %s1364_s14 = sphi %s1422_s14, %s1648_s14   ;;  %s1360_s13 = sphi %s1420_s13, %s1647_s13   ;;  %s1356_s12 = sphi %s1418_s12, %s1646_s12  }
   0x9   : > { %p23_p0 = scmp.ge.s32.totalorder %s22_s24, 2  ;;  %s34_s26 = sadd.s32 1, %s1376_s17 }
   0xa   : > { %p41_p1 = scmp.ne.s32.totalorder %s1376_s17, %s1372_s16  ;;  %p42_p2 = scmp.eq.s32.totalorder %s1396_s22, 0 }
   0xb   : > { %s1657_s24 = smov (%p23_p0, %s22_s24), 0  ;;  %s1659_s25 = smov (!%p23_p0, %s25_s25), %s1392_s21 }
   0xc   : > { %s30_s27 = ssub.s32 %s1388_s20, %s1657_s24  ;;  %p27_p3 = scmp.ge.s32.totalorder %s1659_s25, 2 }
   0xd   : > { %s57_s28 = sadd.s32 2, %s1388_s20  ;;  %p1491_p4 = por %p42_p2, %p41_p1 }
   0xe   : > { %s58_s30 = sadd.s32 2, %s1657_s24  ;;  %s1661_s25 = smov (%p27_p3, %s1659_s25), 0 }
   0xf   : > { %1639 = sst [smem:[#allocation6_spill]] %s1661_s25  ;;  %s60_s4 = ssub.s32 %s57_s28, %s58_s30 }
  0x10   : > { %s64_s5 = sadd.s32 1, %s1368_s15  ;;  %s29_s6 = ssub.s32 %s1392_s21, %s1661_s25 }
  0x11   : > { %p71_p5 = scmp.ne.s32.totalorder %s1368_s15, %s1364_s14  ;;  %s31_s7 = sor.u32 %s30_s27, %s29_s6 }
  0x12   : > { %s61_s8 = sor.u32 %s60_s4, %s29_s6  ;;  %p32_p6 = scmp.eq.s32.totalorder %s31_s7, 0 }
  0x13   : > { %p62_p7 = scmp.eq.s32.totalorder %s61_s8, 0  ;;  %p1505_p8 = por %p71_p5, %p42_p2 }
  0x14   : > { %s87_s10 = sadd.s32 4, %s1388_s20  ;;  %s88_s30 = sadd.s32 4, %s1657_s24 }
  0x15   : > { %s1511_s11 = scalar_select %p32_p6, %s1376_s17, %s34_s26  }
  0x16   : > { %s1514_s28 = scalar_select %p62_p7, %s1368_s15, %s64_s5  }
  0x17   : > { %s94_s23 = sadd.s32 1, %s1360_s13  ;;  %s90_s25 = ssub.s32 %s87_s10, %s88_s30 }
  0x18   : > { %p101_p9 = scmp.ne.s32.totalorder %s1360_s13, %s1356_s12  ;;  %s91_s27 = sor.u32 %s90_s25, %s29_s6 }
  0x19   : > { %s1641_s3 = sadd.s32 4294967295, %s1396_s22   ;;  %p92_p11 = scmp.eq.s32.totalorder %s91_s27, 0 }
  0x1a   : > { %p133_p10 = scmp.eq.s32.totalorder %s1641_s3, 3  ;;  %p1524_p12 = por %p101_p9, %p42_p2 }
  0x1b   : > { %s1536_s26 = scalar_select %p92_p11, %s1360_s13, %s94_s23  }
  0x1c   : > { %p1531_p13 = por %p133_p10, %p41_p1  ;;  %p1037_p0 = scmp.ge.s32.totalorder %s1396_s22, 4 }
  0x1e   : > { %155 = sbr.rel (%p1037_p0) target bundleno = 71 (0x47), region = 16 }
  0x23   : > { %158 = sbr.rel (!%p1491_p4) target bundleno = 47 (0x2f), region = 20  ;;  %s160_s3 = sand.u32 (%p1491_p4), 1, %s1376_s17  }
  0x24   : > { %s1177_s25 = smul.u32 (%p1491_p4), 48, %s1392_s21  ;;  %s1038_s5 = sshll.u32 (%p1491_p4), %s160_s3, 5 }
  0x25   : > { %s162_s23 = scalar_lea.vmem (%p1491_p4), [#allocation2], %s1038_s5 }
  0x26   : > { %s165_s6 = sadd.s32 (%p1491_p4), %s1388_s20, %s1177_s25 }
  0x27   : > { %s1041_s8 = sshll.u32 (%p1491_p4), %s165_s6, 2 }
  0x28   : > { %s167_s27 = scalar_lea.vmem %s1632_s0, %s1041_s8 }
  0x29   : > { %v184_v0 = vld [vmem:[%s167_s27] sm:$0xf]  ;;  %v186_v1 = vld [vmem:[%s167_s27 + $0x18] sm:$0xf]  ;;  %v188_v2 = vld [vmem:[%s167_s27 + $0x30] sm:$0xf] }
  0x2a   : > { %185 = vst [vmem:[%s162_s23] sm:$0xf] %v184_v0  ;;  %187 = vst [vmem:[%s162_s23 + $0x4] sm:$0xf] %v186_v1  ;;  %v190_v3 = vld [vmem:[%s167_s27 + $0x48] sm:$0xf] }
  0x2b   : > { %189 = vst [vmem:[%s162_s23 + $0x8] sm:$0xf] %v188_v2  ;;  %v192_v4 = vld [vmem:[%s167_s27 + $0x60] sm:$0xf]  ;;  %v194_v5 = vld [vmem:[%s167_s27 + $0x78] sm:$0xf] }
  0x2c   : > { %191 = vst [vmem:[%s162_s23 + $0xc] sm:$0xf] %v190_v3  ;;  %193 = vst [vmem:[%s162_s23 + $0x10] sm:$0xf] %v192_v4  ;;  %v196_v6 = vld [vmem:[%s167_s27 + $0x90] sm:$0xf] }
  0x2d   : > { %195 = vst [vmem:[%s162_s23 + $0x14] sm:$0xf] %v194_v5  ;;  %v198_v7 = vld [vmem:[%s167_s27 + $0xa8] sm:$0xf]  ;;  %197 = vst [vmem:[%s162_s23 + $0x18] sm:$0xf] %v196_v6 }
  0x2e   : > { %199 = vst [vmem:[%s162_s23 + $0x1c] sm:$0xf] %v198_v7 }
  0x2f PF: > { %239 = sbr.rel (!%p1505_p8) target bundleno = 59 (0x3b), region = 61  ;;  %s241_s29 = sand.u32 (%p1505_p8), 1, %s1368_s15  }
  0x30   : > { %s940_s3 = smul.u32 (%p1505_p8), 48, %s1392_s21  ;;  %s1042_s25 = sshll.u32 (%p1505_p8), %s241_s29, 5 }
  0x31   : > { %s243_s27 = scalar_lea.vmem (%p1505_p8), [#allocation3], %s1042_s25 }
  0x32   : > { %s941_s5 = sadd.s32 (%p1505_p8), %s1388_s20, %s940_s3 }
  0x33   : > { %s1043_s6 = sshll.u32 (%p1505_p8), %s941_s5, 2 }
  0x34   : > { %s943_s30 = scalar_lea.vmem %s1633_s1, %s1043_s6 }
  0x35   : > { %v1044_v8 = vld [vmem:[%s943_s30 + $0x8] sm:$0xf]  ;;  %v1045_v9 = vld [vmem:[%s943_s30 + $0x20] sm:$0xf]  ;;  %v1046_v10 = vld [vmem:[%s943_s30 + $0x38] sm:$0xf] }
  0x36   : > { %267 = vst [vmem:[%s243_s27] sm:$0xf] %v1044_v8  ;;  %269 = vst [vmem:[%s243_s27 + $0x4] sm:$0xf] %v1045_v9  ;;  %v1047_v11 = vld [vmem:[%s943_s30 + $0x50] sm:$0xf] }
  0x37   : > { %271 = vst [vmem:[%s243_s27 + $0x8] sm:$0xf] %v1046_v10  ;;  %v1048_v12 = vld [vmem:[%s943_s30 + $0x68] sm:$0xf]  ;;  %v1049_v13 = vld [vmem:[%s943_s30 + $0x80] sm:$0xf] }
  0x38   : > { %273 = vst [vmem:[%s243_s27 + $0xc] sm:$0xf] %v1047_v11  ;;  %275 = vst [vmem:[%s243_s27 + $0x10] sm:$0xf] %v1048_v12  ;;  %v1050_v14 = vld [vmem:[%s943_s30 + $0x98] sm:$0xf] }
  0x39   : > { %277 = vst [vmem:[%s243_s27 + $0x14] sm:$0xf] %v1049_v13  ;;  %v1051_v15 = vld [vmem:[%s943_s30 + $0xb0] sm:$0xf]  ;;  %279 = vst [vmem:[%s243_s27 + $0x18] sm:$0xf] %v1050_v14 }
  0x3a   : > { %281 = vst [vmem:[%s243_s27 + $0x1c] sm:$0xf] %v1051_v15 }
  0x3b PF: > { %321 = sbr.rel (!%p1524_p12) target bundleno = 71 (0x47), region = 102  ;;  %s323_s9 = sand.u32 (%p1524_p12), 1, %s1360_s13  }
  0x3c   : > { %s947_s23 = smul.u32 (%p1524_p12), 48, %s1392_s21  ;;  %s1052_s29 = sshll.u32 (%p1524_p12), %s323_s9, 5 }
  0x3d   : > { %s325_s10 = scalar_lea.vmem (%p1524_p12), [#allocation4], %s1052_s29 }
  0x3e   : > { %s948_s3 = sadd.s32 (%p1524_p12), %s1388_s20, %s947_s23 }
  0x3f   : > { %s1053_s25 = sshll.u32 (%p1524_p12), %s948_s3, 2 }
  0x40   : > { %s950_s8 = scalar_lea.vmem %s1634_s2, %s1053_s25 }
  0x41   : > { %v1054_v16 = vld [vmem:[%s950_s8 + $0x10] sm:$0xf]  ;;  %v1055_v17 = vld [vmem:[%s950_s8 + $0x28] sm:$0xf]  ;;  %v1056_v18 = vld [vmem:[%s950_s8 + $0x40] sm:$0xf] }
  0x42   : > { %349 = vst [vmem:[%s325_s10] sm:$0xf] %v1054_v16  ;;  %351 = vst [vmem:[%s325_s10 + $0x4] sm:$0xf] %v1055_v17  ;;  %v1057_v19 = vld [vmem:[%s950_s8 + $0x58] sm:$0xf] }
  0x43   : > { %353 = vst [vmem:[%s325_s10 + $0x8] sm:$0xf] %v1056_v18  ;;  %v1058_v20 = vld [vmem:[%s950_s8 + $0x70] sm:$0xf]  ;;  %v1059_v21 = vld [vmem:[%s950_s8 + $0x88] sm:$0xf] }
  0x44   : > { %355 = vst [vmem:[%s325_s10 + $0xc] sm:$0xf] %v1057_v19  ;;  %357 = vst [vmem:[%s325_s10 + $0x10] sm:$0xf] %v1058_v20  ;;  %v1060_v22 = vld [vmem:[%s950_s8 + $0xa0] sm:$0xf] }
  0x45   : > { %359 = vst [vmem:[%s325_s10 + $0x14] sm:$0xf] %v1059_v21  ;;  %v1061_v23 = vld [vmem:[%s950_s8 + $0xb8] sm:$0xf]  ;;  %361 = vst [vmem:[%s325_s10 + $0x18] sm:$0xf] %v1060_v22 }
  0x46   : > { %363 = vst [vmem:[%s325_s10 + $0x1c] sm:$0xf] %v1061_v23 }
  0x47 PF: > { %p1062_p1 = scmp.ge.s32.totalorder %s1396_s22, 1  ;;  %p402_p2 = scmp.lt.s32.totalorder %s1396_s22, 5 }
  0x49   : > { %p403_p3 = pnand %p1062_p1, %p402_p2 }
  0x4a   : > { %s416_s4 = sand.u32 (!%p403_p3), 1, %s1364_s14   ;;  %s409_s30 = sand.u32 (!%p403_p3), 1, %s1372_s16  }
  0x4b   : > { %406 = sbr.rel (%p403_p3) target bundleno = 851 (0x353), region = 143  ;;  %s1064_s27 = sshll.u32 (!%p403_p3), %s416_s4, 5 }
  0x4c   : > { %s1567_s9 = sshll.u32 (!%p403_p3), %s409_s30, 5  ;;  %s418_s23 = scalar_lea.vmem (!%p403_p3), [#allocation3], %s1064_s27 }
  0x4d   : > { %s411_s29 = scalar_lea.vmem (!%p403_p3), [#allocation2], %s1567_s9  ;;  %s423_s14 = sand.u32 (!%p403_p3), 1, %s1356_s12  }
  0x4e   : > { %s1065_s16 = sshll.u32 (!%p403_p3), %s423_s14, 5  ;;  %s452_s12 = scalar_lea.vmem (!%p403_p3), [#allocation5], %s1567_s9 }
  0x4f   : > { %s425_s3 = scalar_lea.vmem (!%p403_p3), [#allocation4], %s1065_s16 }
  0x50   : > { %v1266_v24 = vld [vmem:[%s418_s23 + $0x18] sm:$0xff]   ;;  %v1267_v25 = vld [vmem:[%s418_s23 + $0x10] sm:$0xff]   ;;  %v1270_v26 = vld [vmem:[%s411_s29] sm:$0xff]   ;;  %vm597_vm0 = vcmask 523264   ;;  %s1105_s25 = sshll.u32 (%p1531_p13), %s1384_s19, 4  ;;  %s1644_s4 = sld [smem:[#allocation7_spill]] (%p1531_p13) }
  0x51   : > { %1145 = vmatprep.subr.bf16.mxu0 %v1266_v24  ;;  %1153 = vmatprep.mubr.bf16.mxu0 %v1270_v26  ;;  %v1268_v27 = vld [vmem:[%s418_s23 + $0x8] sm:$0xff]   ;;  %v1269_v28 = vld [vmem:[%s418_s23] sm:$0xff]   ;;  %v1272_v30 = vld [vmem:[%s411_s29 + $0x10] sm:$0xff]   ;;  %s848_s5 = sadd.s32 (%p1531_p13), %s1380_s18, %s1105_s25 }
  0x52   : > { %1146 = vmatpush3.bf16.xpose.msra.mxu0 %v1266_v24  ;;  %v1271_v29 = vld [vmem:[%s411_s29 + $0x8] sm:$0xff]   ;;  %v1273_v31 = vld [vmem:[%s411_s29 + $0x18] sm:$0xff]   ;;  %s1094_s6 = sshll.u32 (%p1531_p13), %s848_s5, 2 }
  0x53   : > { %1147 = vmatprep.subr.bf16.mxu0 %v1267_v25 }
  0x56   : > { %s850_s30 = scalar_lea.vmem (%p1531_p13), %s1644_s4, %s1094_s6 }
  0x5a   : > { %1148 = vmatpush3.bf16.xpose.msra.mxu0 %v1267_v25 }
  0x5b   : > { %1149 = vmatprep.subr.bf16.mxu0 %v1268_v27 }
  0x62   : > { %1150 = vmatpush3.bf16.xpose.msra.mxu0 %v1268_v27 }
  0x63   : > { %1151 = vmatprep.subr.bf16.mxu0 %v1269_v28 }
  0x6a   : > { %1152 = vmatpush3.bf16.xpose.msra.mxu0 %v1269_v28 }
  0x71   : > { %1154 = vmatmul.mubr.bf16.vlgmr.msra.gmra.mxu0 %v1271_v29 }
  0x72   : > { %1157 = vmatprep.mubr.bf16.mxu0 %v1272_v30 }
  0x79   : > { %1158 = vmatmul.mubr.bf16.gmra.mxu0 %v1273_v31 }
 0x131   : > { %v1155_v32 = vpop.f32.mrf.mxu0 }
 0x132   : > { %v591_v33 = vmul.f32 0.088388346, %v1155_v32  ;;  %v1274_v32 = vld [vmem:[%s425_s3 + $0x18] sm:$0xff]  }
 0x133   : > { %v558_v34 = vpop.f32.mrf.mxu0  ;;  %1161 = vmatprep.subr.bf16.mxu1 %v1274_v32 }
 0x134   : > { %v589_v35 = vmul.f32 0.088388346, %v558_v34  ;;  %v604_v36 = vsel %vm597_vm0, %v591_v33, -inf  ;;  %1162 = vmatpush3.bf16.msra.mxu1 %v1274_v32  ;;  %v1276_v34 = vld [vmem:[%s425_s3 + $0x8] sm:$0xff]  }
 0x135   : > { %605 = vmax.xlane.f32.xlu1 %v604_v36  ;;  %v1156_v37 = vpop.f32.mrf.mxu0 }
 0x136   : > { %v592_v38 = vmul.f32 0.088388346, %v1156_v37  ;;  %v598_v39 = vsel %vm597_vm0, %v589_v35, -inf }
 0x137   : > { %599 = vmax.xlane.f32.xlu0 %v598_v39  ;;  %v561_v40 = vpop.f32.mrf.mxu0 }
 0x138   : > { %v590_v41 = vmul.f32 0.088388346, %v561_v40  ;;  %v607_v42 = vsel %vm597_vm0, %v592_v38, -inf }
 0x139   : > { %608 = vmax.xlane.f32.xlu1 %v607_v42  ;;  %v1159_v43 = vpop.f32.mrf.mxu0 }
 0x13a   : > { %v601_v44 = vsel %vm597_vm0, %v590_v41, -inf  ;;  %v595_v48 = vmul.f32 0.088388346, %v1159_v43 }
 0x13b   : > { %602 = vmax.xlane.f32.xlu0 %v601_v44  ;;  %v574_v45 = vpop.f32.mrf.mxu0 }
 0x13c   : > { %v593_v46 = vmul.f32 0.088388346, %v574_v45  ;;  %v616_v53 = vsel %vm597_vm0, %v595_v48, -inf }
 0x13d   : > { %v1160_v47 = vpop.f32.mrf.mxu0 }
 0x13e   : > { %v610_v49 = vsel %vm597_vm0, %v593_v46, -inf  ;;  %v596_v52 = vmul.f32 0.088388346, %v1160_v47 }
 0x13f   : > { %611 = vmax.xlane.f32.xlu0 %v610_v49  ;;  %v577_v50 = vpop.f32.mrf.mxu0 }
 0x140   : > { %v594_v51 = vmul.f32 0.088388346, %v577_v50  ;;  %v619_v55 = vsel %vm597_vm0, %v596_v52, -inf }
 0x142   : > { %v613_v54 = vsel %vm597_vm0, %v594_v51, -inf }
 0x143   : > { %617 = vmax.xlane.f32.xlu0 %v616_v53  ;;  %614 = vmax.xlane.f32.xlu1 %v613_v54 }
 0x147   : > { %620 = vmax.xlane.f32.xlu1 %v619_v55 }
 0x1be   : > { %v606_v56 = vpop.xlane.xlu1 %605 }
 0x1bf   : > { %v624_v57 = vsub.f32 %v591_v33, %v606_v56  ;;  %v1275_v33 = vld [vmem:[%s425_s3 + $0x10] sm:$0xff]  }
 0x1c0   : > { %v600_v58 = vpop.xlane.xlu0 %599  ;;  %1163 = vmatprep.subr.bf16.mxu1 %v1275_v33 }
 0x1c1   : > { %v622_v59 = vsub.f32 %v589_v35, %v600_v58  ;;  %v634_v61 = vmul.f32 1.442695, %v624_v57  ;;  %1164 = vmatpush3.bf16.msra.mxu1 %v1275_v33  ;;  %v1277_v35 = vld [vmem:[%s425_s3] sm:$0xff]  }
 0x1c2   : > { %v609_v60 = vpop.xlane.xlu1 %608  ;;  %1165 = vmatprep.subr.bf16.mxu1 %v1276_v34 }
 0x1c3   : > { %v630_v62 = vmul.f32 1.442695, %v622_v59  ;;  %v625_v63 = vsub.f32 %v592_v38, %v609_v60 }
 0x1c4   : > { %v603_v0 = vpop.xlane.xlu0 %602 }
 0x1c5   : > { %1278 = vpow2.f32 %v630_v62  ;;  %v623_v1 = vsub.f32 %v590_v41, %v603_v0  ;;  %v636_v2 = vmul.f32 1.442695, %v625_v63  ;;  %1166 = vmatpush3.bf16.msra.mxu1 %v1276_v34 }
 0x1c6   : > { %1280 = vpow2.f32 %v634_v61  ;;  %1167 = vmatprep.subr.bf16.mxu1 %v1277_v35 }
 0x1c7   : > { %v632_v3 = vmul.f32 1.442695, %v623_v1 }
 0x1c8   : > { %v612_v4 = vpop.xlane.xlu0 %611 }
 0x1c9   : > { %1282 = vpow2.f32 %v632_v3  ;;  %v626_v5 = vsub.f32 %v593_v46, %v612_v4  ;;  %1168 = vmatpush3.bf16.msra.mxu1 %v1277_v35 }
 0x1ca   : > { %1284 = vpow2.f32 %v636_v2 }
 0x1cb   : > { %v638_v6 = vmul.f32 1.442695, %v626_v5 }
 0x1cc   : > { %v618_v7 = vpop.xlane.xlu0 %617  ;;  %v615_v8 = vpop.xlane.xlu1 %614 }
 0x1cd   : > { %1286 = vpow2.f32 %v638_v6  ;;  %v628_v9 = vsub.f32 %v595_v48, %v618_v7  ;;  %v627_v10 = vsub.f32 %v594_v51, %v615_v8 }
 0x1cf   : > { %v642_v11 = vmul.f32 1.442695, %v628_v9  ;;  %v640_v12 = vmul.f32 1.442695, %v627_v10 }
 0x1d0   : > { %v621_v13 = vpop.xlane.xlu1 %620 }
 0x1d1   : > { %1288 = vpow2.f32 %v642_v11  ;;  %v629_v14 = vsub.f32 %v596_v52, %v621_v13 }
 0x1d2   : > { %v1279_v15 = vpop.eup %1278  ;;  %1290 = vpow2.f32 %v640_v12 }
 0x1d3   : > { %v644_v16 = vmul.f32 1.442695, %v629_v14  ;;  %v646_v17 = vsel %vm597_vm0, %v1279_v15, 0.0  ;;  %v1281_v18 = vpop.eup %1280 }
 0x1d4   : > { %647 = vadd.xlane.f32.xlu0 %v646_v17  ;;  %v652_v20 = vsel %vm597_vm0, %v1281_v18, 0.0 }
 0x1d5   : > { %1292 = vpow2.f32 %v644_v16 }
 0x1d6   : > { %v1283_v19 = vpop.eup %1282 }
 0x1d7   : > { %v649_v21 = vsel %vm597_vm0, %v1283_v19, 0.0  ;;  %v1285_v22 = vpop.eup %1284 }
 0x1d8   : > { %653 = vadd.xlane.f32.xlu0 %v652_v20  ;;  %650 = vadd.xlane.f32.xlu1 %v649_v21  ;;  %v655_v25 = vsel %vm597_vm0, %v1285_v22, 0.0 }
 0x1da   : > { %v1287_v23 = vpop.eup %1286 }
 0x1db   : > { %v658_v24 = vsel %vm597_vm0, %v1287_v23, 0.0 }
 0x1dc   : > { %659 = vadd.xlane.f32.xlu0 %v658_v24  ;;  %656 = vadd.xlane.f32.xlu1 %v655_v25 }
 0x1de   : > { %v1289_v26 = vpop.eup %1288 }
 0x1df   : > { %v1291_v27 = vpop.eup %1290  ;;  %v664_v28 = vsel %vm597_vm0, %v1289_v26, 0.0 }
 0x1e0   : > { %665 = vadd.xlane.f32.xlu0 %v664_v28  ;;  %v661_v29 = vsel %vm597_vm0, %v1291_v27, 0.0 }
 0x1e1   : > { %662 = vadd.xlane.f32.xlu1 %v661_v29 }
 0x1e2   : > { %v1293_v30 = vpop.eup %1292 }
 0x1e3   : > { %v667_v31 = vsel %vm597_vm0, %v1293_v30, 0.0 }
 0x1e5   : > { %668 = vadd.xlane.f32.xlu1 %v667_v31 }
 0x25d   : > { %v648_v36 = vpop.xlane.xlu0 %647 }
 0x25e   : > { %1294 = vrcp.f32 %v648_v36 }
 0x261   : > { %v654_v37 = vpop.xlane.xlu0 %653  ;;  %v651_v38 = vpop.xlane.xlu1 %650 }
 0x262   : > { %1296 = vrcp.f32 %v651_v38 }
 0x263   : > { %1298 = vrcp.f32 %v654_v37 }
 0x265   : > { %v660_v39 = vpop.xlane.xlu0 %659  ;;  %v657_v40 = vpop.xlane.xlu1 %656 }
 0x266   : > { %1300 = vrcp.f32 %v657_v40 }
 0x267   : > { %1302 = vrcp.f32 %v660_v39 }
 0x269   : > { %v666_v41 = vpop.xlane.xlu0 %665 }
 0x26a   : > { %v663_v42 = vpop.xlane.xlu1 %662 }
 0x26b   : > { %1304 = vrcp.f32 %v663_v42  ;;  %v1295_v43 = vpop.eup %1294 }
 0x26c   : > { %1306 = vrcp.f32 %v666_v41  ;;  %v678_v46 = vmul.f32 %v1295_v43, %v1279_v15 }
 0x26e   : > { %v669_v44 = vpop.xlane.xlu1 %668 }
 0x26f   : > { %1308 = vrcp.f32 %v669_v44  ;;  %v1297_v45 = vpop.eup %1296 }
 0x270   : > { %v679_v47 = vmul.f32 %v1297_v45, %v1283_v19  ;;  %v1299_v48 = vpop.eup %1298 }
 0x271   : > { %v680_v51 = vmul.f32 %v1299_v48, %v1281_v18 }
 0x272   : > { %v686_v49 = vpack.c.bf16 %v679_v47, %v678_v46 }
 0x273   : > { %v1301_v50 = vpop.eup %1300 }
 0x274   : > { %1169 = vmatprep.mubr.msk.bf16.mxu1 %vm597_vm0, %v686_v49  ;;  %v681_v52 = vmul.f32 %v1301_v50, %v1285_v22  ;;  %v1303_v53 = vpop.eup %1302 }
 0x275   : > { %v682_v56 = vmul.f32 %v1303_v53, %v1287_v23 }
 0x276   : > { %v687_v54 = vpack.c.bf16 %v681_v52, %v680_v51 }
 0x278   : > { %v1305_v55 = vpop.eup %1304  ;;  %1170 = vmatmul.mubr.msk.bf16.vlgmr.msra.gmra.mxu1 %vm597_vm0, %v687_v54 }
 0x279   : > { %v683_v57 = vmul.f32 %v1305_v55, %v1291_v27  ;;  %v1307_v58 = vpop.eup %1306 }
 0x27a   : > { %v684_v61 = vmul.f32 %v1307_v58, %v1289_v26 }
 0x27b   : > { %v688_v59 = vpack.c.bf16 %v683_v57, %v682_v56 }
 0x27c   : > { %v1309_v60 = vpop.eup %1308 }
 0x27d   : > { %1173 = vmatprep.mubr.msk.bf16.mxu1 %vm597_vm0, %v688_v59  ;;  %v685_v62 = vmul.f32 %v1309_v60, %v1293_v30 }
 0x27f   : > { %v689_v63 = vpack.c.bf16 %v685_v62, %v684_v61 }
 0x281   : > { %1174 = vmatmul.mubr.msk.bf16.gmra.mxu1 %vm597_vm0, %v689_v63 }
 0x338   : > { %v1171_v0 = vpop.f32.mrf.mxu1 }
 0x33a   : > { %v768_v1 = vpop.f32.mrf.mxu1 }
 0x33c   : > { %v1172_v2 = vpop.f32.mrf.mxu1 }
 0x33d   : > { %v1114_v3 = vpack.c.bf16 %v1172_v2, %v1171_v0 }
 0x33e   : > { %v771_v4 = vpop.f32.mrf.mxu1 }
 0x33f   : > { %1126 = vst [vmem:[%s452_s12 + $0x8] sm:$0xff] %v1114_v3   ;;  %v1109_v5 = vpack.c.bf16 %v771_v4, %v768_v1 }
 0x341   : > { %v1175_v6 = vpop.f32.mrf.mxu1  ;;  %1110 = vst [vmem:[%s452_s12] sm:$0xff] %v1109_v5  }
 0x343   : > { %v784_v7 = vpop.f32.mrf.mxu1 }
 0x345   : > { %v1176_v8 = vpop.f32.mrf.mxu1 }
 0x346   : > { %v1124_v9 = vpack.c.bf16 %v1176_v8, %v1175_v6  ;;  %845 = sbr.rel (!%p1531_p13) target bundleno = 851 (0x353), region = 159  ;;  %v871_v14 = vld [vmem:[%s452_s12 + $0x8] sm:$0xf] (%p1531_p13)  ;;  %v873_v15 = vld [vmem:[%s452_s12 + $0xc] sm:$0xf] (%p1531_p13) }
 0x347   : > { %v787_v10 = vpop.f32.mrf.mxu1  ;;  %872 = vst [vmem:[%s850_s30 + $0x10] sm:$0xf] (%p1531_p13), %v871_v14  ;;  %874 = vst [vmem:[%s850_s30 + $0x18] sm:$0xf] (%p1531_p13), %v873_v15 }
 0x348   : > { %1128 = vst [vmem:[%s452_s12 + $0x18] sm:$0xff] %v1124_v9   ;;  %v1119_v11 = vpack.c.bf16 %v787_v10, %v784_v7  ;;  %v867_v12 = vld [vmem:[%s452_s12] sm:$0xf] (%p1531_p13)  ;;  %v869_v13 = vld [vmem:[%s452_s12 + $0x4] sm:$0xf] (%p1531_p13) }
 0x349   : > { %868 = vst [vmem:[%s850_s30] sm:$0xf] (%p1531_p13), %v867_v12  ;;  %870 = vst [vmem:[%s850_s30 + $0x8] sm:$0xf] (%p1531_p13), %v869_v13 }
 0x34a   : > { %1127 = vst [vmem:[%s452_s12 + $0x10] sm:$0xff] %v1119_v11  }
 0x34f   : > { %v879_v18 = vld [vmem:[%s452_s12 + $0x18] sm:$0xf]  ;;  %v881_v19 = vld [vmem:[%s452_s12 + $0x1c] sm:$0xf] }
 0x350   : > { %880 = vst [vmem:[%s850_s30 + $0x30] sm:$0xf] %v879_v18  ;;  %882 = vst [vmem:[%s850_s30 + $0x38] sm:$0xf] %v881_v19 }
 0x351   : > { %v875_v16 = vld [vmem:[%s452_s12 + $0x10] sm:$0xf]  ;;  %v877_v17 = vld [vmem:[%s452_s12 + $0x14] sm:$0xf] }
 0x352   : > { %876 = vst [vmem:[%s850_s30 + $0x20] sm:$0xf] %v875_v16  ;;  %878 = vst [vmem:[%s850_s30 + $0x28] sm:$0xf] %v877_v17 }
 0x353 PF: > { %s13_s22 = sadd.s32 1, %s1396_s22   ;;  %s1645_s7 = sld [smem:[#allocation6_spill]] }
 0x354   : > { %p10_p4 = scmp.ge.s32.totalorder %s13_s22, 6   ;;  %s1646_s12 = smov %s1360_s13 }
 0x355   : > { %s1647_s13 = smov %s1536_s26  ;;  %s1648_s14 = smov %s1368_s15 }
 0x356   : > { %s1649_s15 = smov %s1514_s28  ;;  %s1650_s16 = smov %s1376_s17 }
 0x357   : > { %s1651_s17 = smov %s1511_s11  ;;  %s1652_s18 = smov %s1388_s20 }
 0x358   : > { %s1653_s19 = smov %s1392_s21  ;;  %s1654_s20 = smov %s1657_s24 }
 0x359   : > { %s1655_s21 = smov %s1645_s7  ;;  %12 = sbr.rel (!%p10_p4) target bundleno = 8 (0x8), region = 247 }

// kernel: vision_transformer_3d.13
= control target key start
LH: loop header
LB: loop body
LE: loop exit
PB: predicated region body
PF: predicated region fallthrough
CT: control target
= control target key end

     0   :  { %s1967_s18 = smov 0   ;;  %s1969_s19 = smov 0   ;;  %s2707_s0 = inlined_call_operand.vmem [shape: bf16[128,256], index: 0, kind: input, shape index: {}]   ;;  %s2708_s1 = inlined_call_operand.vmem [shape: bf16[256,768], index: 1, kind: input, shape index: {}]   ;;  %s2709_s2 = inlined_call_operand.vmem [shape: f32[1,768], index: 2, kind: input, shape index: {}]   ;;  %s2710_s3 = inlined_call_operand.vmem [shape: f32[1,256], index: 3, kind: input, shape index: {}]   ;;  %s2711_s4 = inlined_call_operand.vmem [shape: f32[1,256], index: 4, kind: input, shape index: {}]   ;;  %s2712_s5 = inlined_call_operand.vmem [shape: bf16[128,768], index: 5, kind: output, shape index: {}]  }
   0x1   :  { %s1971_s20 = smov 0   ;;  %s1973_s21 = smov 0  }
   0x2   :  { %s1975_s22 = smov 0  }
   0x3 LB: > { %s30_s23 = sadd.s32 1, %s1931_s21  ;;  %s1662_s24 = sadd.s32 4294967295, %s1935_s22   ;;  %s1935_s22 = sphi %s1975_s22, %s15_s22   ;;  %s1931_s21 = sphi %s1973_s21, %s2717_s21   ;;  %s1927_s20 = sphi %s1971_s20, %s2716_s20   ;;  %s1923_s19 = sphi %s1969_s19, %s2715_s19   ;;  %s1919_s18 = sphi %s1967_s18, %s2714_s18  }
   0x4   : > { %p32_p0 = scmp.ge.s32.totalorder %s30_s23, 3  ;;  %p76_p1 = scmp.ne.s32.totalorder %s1923_s19, %s1919_s18 }
   0x5   : > { %p77_p2 = scmp.eq.s32.totalorder %s1935_s22, 0  ;;  %p176_p4 = scmp.eq.s32.totalorder %s1662_s24, 2 }
   0x6   : > { %s2719_s23 = smov (%p32_p0, %s30_s23), 0  ;;  %s69_s26 = sadd.s32 1, %s1923_s19 }
   0x7   : > { %p78_p3 = por %p77_p2, %p76_p1  ;;  %s65_s25 = ssub.s32 %s1931_s21, %s2719_s23 }
   0x8   : > { %p67_p5 = scmp.eq.s32.totalorder %s65_s25, 0  ;;  %p2002_p6 = por %p176_p4, %p76_p1 }
   0x9   : > { %p1666_p7 = scmp.ge.s32.totalorder %s1935_s22, 3 }
   0xa   : > { %s2007_s28 = scalar_select %p67_p5, %s1923_s19, %s69_s26  }
   0xb   : > { %214 = sbr.rel (%p1666_p7) target bundleno = 36 (0x24), region = 28 }
  0x10   : > { %217 = sbr.rel (!%p78_p3) target bundleno = 36 (0x24), region = 32  ;;  %s219_s29 = sand.u32 (%p78_p3), 1, %s1923_s19  }
  0x11   : > { %s1727_s30 = sshll.u32 (%p78_p3), %s1931_s21, 3  ;;  %s1667_s6 = sshll.u32 (%p78_p3), %s219_s29, 8 }
  0x12   : > { %s2015_s9 = scalar_lea.vmem (%p78_p3), %s2708_s1, %s1727_s30  ;;  %s2020_s10 = scalar_lea.vmem (%p78_p3), [#allocation3], %s1667_s6 }
  0x13   : > { %v318_v0 = vld [vmem:[%s2015_s9] sm:$0xff] (%p78_p3)  ;;  %v320_v1 = vld [vmem:[%s2015_s9 + $0x18] sm:$0xff] (%p78_p3)  ;;  %v322_v2 = vld [vmem:[%s2015_s9 + $0x30] sm:$0xff] (%p78_p3) }
  0x14   : > { %319 = vst [vmem:[%s2020_s10] sm:$0xff] (%p78_p3), %v318_v0  ;;  %321 = vst [vmem:[%s2020_s10 + $0x8] sm:$0xff] (%p78_p3), %v320_v1  ;;  %v324_v3 = vld [vmem:[%s2015_s9 + $0x48] sm:$0xff] (%p78_p3)  ;;  %v326_v4 = vld [vmem:[%s2015_s9 + $0x60] sm:$0xff] (%p78_p3) }
  0x15   : > { %323 = vst [vmem:[%s2020_s10 + $0x10] sm:$0xff] %v322_v2  ;;  %v328_v5 = vld [vmem:[%s2015_s9 + $0x78] sm:$0xff]  ;;  %325 = vst [vmem:[%s2020_s10 + $0x18] sm:$0xff] %v324_v3  ;;  %v330_v6 = vld [vmem:[%s2015_s9 + $0x90] sm:$0xff] }
  0x16   : > { %327 = vst [vmem:[%s2020_s10 + $0x20] sm:$0xff] %v326_v4  ;;  %329 = vst [vmem:[%s2020_s10 + $0x28] sm:$0xff] %v328_v5  ;;  %v332_v7 = vld [vmem:[%s2015_s9 + $0xa8] sm:$0xff]  ;;  %v334_v8 = vld [vmem:[%s2015_s9 + $0xc0] sm:$0xff] }
  0x17   : > { %331 = vst [vmem:[%s2020_s10 + $0x30] sm:$0xff] %v330_v6  ;;  %333 = vst [vmem:[%s2020_s10 + $0x38] sm:$0xff] %v332_v7  ;;  %v336_v9 = vld [vmem:[%s2015_s9 + $0xd8] sm:$0xff]  ;;  %v338_v10 = vld [vmem:[%s2015_s9 + $0xf0] sm:$0xff] }
  0x18   : > { %335 = vst [vmem:[%s2020_s10 + $0x40] sm:$0xff] %v334_v8  ;;  %v340_v11 = vld [vmem:[%s2015_s9 + $0x108] sm:$0xff]  ;;  %337 = vst [vmem:[%s2020_s10 + $0x48] sm:$0xff] %v336_v9  ;;  %v342_v12 = vld [vmem:[%s2015_s9 + $0x120] sm:$0xff] }
  0x19   : > { %339 = vst [vmem:[%s2020_s10 + $0x50] sm:$0xff] %v338_v10  ;;  %341 = vst [vmem:[%s2020_s10 + $0x58] sm:$0xff] %v340_v11  ;;  %v344_v13 = vld [vmem:[%s2015_s9 + $0x138] sm:$0xff]  ;;  %v346_v14 = vld [vmem:[%s2015_s9 + $0x150] sm:$0xff] }
  0x1a   : > { %343 = vst [vmem:[%s2020_s10 + $0x60] sm:$0xff] %v342_v12  ;;  %345 = vst [vmem:[%s2020_s10 + $0x68] sm:$0xff] %v344_v13  ;;  %v348_v15 = vld [vmem:[%s2015_s9 + $0x168] sm:$0xff]  ;;  %v350_v16 = vld [vmem:[%s2015_s9 + $0x180] sm:$0xff] }
  0x1b   : > { %347 = vst [vmem:[%s2020_s10 + $0x70] sm:$0xff] %v346_v14  ;;  %v352_v17 = vld [vmem:[%s2015_s9 + $0x198] sm:$0xff]  ;;  %349 = vst [vmem:[%s2020_s10 + $0x78] sm:$0xff] %v348_v15  ;;  %v354_v18 = vld [vmem:[%s2015_s9 + $0x1b0] sm:$0xff] }
  0x1c   : > { %351 = vst [vmem:[%s2020_s10 + $0x80] sm:$0xff] %v350_v16  ;;  %353 = vst [vmem:[%s2020_s10 + $0x88] sm:$0xff] %v352_v17  ;;  %v356_v19 = vld [vmem:[%s2015_s9 + $0x1c8] sm:$0xff]  ;;  %v358_v20 = vld [vmem:[%s2015_s9 + $0x1e0] sm:$0xff] }
  0x1d   : > { %355 = vst [vmem:[%s2020_s10 + $0x90] sm:$0xff] %v354_v18  ;;  %357 = vst [vmem:[%s2020_s10 + $0x98] sm:$0xff] %v356_v19  ;;  %v360_v21 = vld [vmem:[%s2015_s9 + $0x1f8] sm:$0xff]  ;;  %v362_v22 = vld [vmem:[%s2015_s9 + $0x210] sm:$0xff] }
  0x1e   : > { %359 = vst [vmem:[%s2020_s10 + $0xa0] sm:$0xff] %v358_v20  ;;  %v364_v23 = vld [vmem:[%s2015_s9 + $0x228] sm:$0xff]  ;;  %361 = vst [vmem:[%s2020_s10 + $0xa8] sm:$0xff] %v360_v21  ;;  %v366_v24 = vld [vmem:[%s2015_s9 + $0x240] sm:$0xff] }
  0x1f   : > { %363 = vst [vmem:[%s2020_s10 + $0xb0] sm:$0xff] %v362_v22  ;;  %365 = vst [vmem:[%s2020_s10 + $0xb8] sm:$0xff] %v364_v23  ;;  %v368_v25 = vld [vmem:[%s2015_s9 + $0x258] sm:$0xff]  ;;  %v370_v26 = vld [vmem:[%s2015_s9 + $0x270] sm:$0xff] }
  0x20   : > { %367 = vst [vmem:[%s2020_s10 + $0xc0] sm:$0xff] %v366_v24  ;;  %369 = vst [vmem:[%s2020_s10 + $0xc8] sm:$0xff] %v368_v25  ;;  %v372_v27 = vld [vmem:[%s2015_s9 + $0x288] sm:$0xff]  ;;  %v374_v28 = vld [vmem:[%s2015_s9 + $0x2a0] sm:$0xff] }
  0x21   : > { %371 = vst [vmem:[%s2020_s10 + $0xd0] sm:$0xff] %v370_v26  ;;  %v376_v29 = vld [vmem:[%s2015_s9 + $0x2b8] sm:$0xff]  ;;  %373 = vst [vmem:[%s2020_s10 + $0xd8] sm:$0xff] %v372_v27  ;;  %v378_v30 = vld [vmem:[%s2015_s9 + $0x2d0] sm:$0xff] }
  0x22   : > { %375 = vst [vmem:[%s2020_s10 + $0xe0] sm:$0xff] %v374_v28  ;;  %377 = vst [vmem:[%s2020_s10 + $0xe8] sm:$0xff] %v376_v29  ;;  %v380_v31 = vld [vmem:[%s2015_s9 + $0x2e8] sm:$0xff] }
  0x23   : > { %379 = vst [vmem:[%s2020_s10 + $0xf0] sm:$0xff] %v378_v30  ;;  %381 = vst [vmem:[%s2020_s10 + $0xf8] sm:$0xff] %v380_v31 }
  0x24 PF: > { %p1670_p8 = scmp.ge.s32.totalorder %s1935_s22, 1  ;;  %p394_p9 = scmp.lt.s32.totalorder %s1935_s22, 4 }
  0x26   : > { %p395_p10 = pnand %p1670_p8, %p394_p9 }
  0x27   : > { %s401_s9 = sand.u32 (!%p395_p10), 1, %s1919_s18   ;;  %s1673_s16 = sshll.u32 (!%p395_p10), %s1927_s20, 1 }
  0x28   : > { %398 = sbr.rel (%p395_p10) target bundleno = 606 (0x25e), region = 74  ;;  %s1671_s10 = sshll.u32 (!%p395_p10), %s401_s9, 8 }
  0x29   : > { %s2264_s11 = scalar_lea.vmem (!%p395_p10), [#allocation3], %s1671_s10  ;;  %p447_p11 = scmp.lt.s32.totalorder (!%p395_p10), %s1673_s16, 5 }
  0x2a   : > { %s1672_s26 = sshll.u32 (!%p395_p10), %s401_s9, 7 }
  0x2b   : > { %s2622_s29 = scalar_lea.vmem (!%p395_p10), [#allocation4], %s1672_s26 }
  0x2d   : > { %v2088_v32 = vld [vmem:[%s2707_s0] sm:$0xff]  ;;  %v2098_v34 = vld [vmem:[%s2707_s0 + $0x8] sm:$0xff]  ;;  %v2112_v40 = vld [vmem:[%s2707_s0 + $0x10] sm:$0xff]  ;;  %s2721_s16 = smov (!%p447_p11, %s1673_s16), 5  ;;  %s1744_s18 = sshll.u32 (%p2002_p6), %s1927_s20, 3 }
  0x2e   : > { %v2093_v33 = vld [vmem:[%s2707_s0 + $0x40] sm:$0xff]  ;;  %v469_v35 = vunpack.c.l.bf16 %v2088_v32  ;;  %v470_v36 = vunpack.c.h.bf16 %v2088_v32  ;;  %v2107_v39 = vld [vmem:[%s2707_s0 + $0x48] sm:$0xff]  ;;  %v471_v41 = vunpack.c.l.bf16 %v2098_v34  ;;  %v472_v42 = vunpack.c.h.bf16 %v2098_v34  ;;  %v2121_v45 = vld [vmem:[%s2707_s0 + $0x18] sm:$0xff]  ;;  %s449_s25 = scalar_lea.vmem %s2709_s2, %s2721_s16  ;;  %s1470_s7 = scalar_lea.vmem (%p2002_p6), %s2712_s5, %s1744_s18 }
  0x2f   : > { %v485_v37 = vunpack.c.l.bf16 %v2093_v33  ;;  %v486_v38 = vunpack.c.h.bf16 %v2093_v33  ;;  %v487_v43 = vunpack.c.l.bf16 %v2107_v39  ;;  %v488_v44 = vunpack.c.h.bf16 %v2107_v39  ;;  %v2146_v54 = vld [vmem:[%s2707_s0 + $0x50] sm:$0xff]  ;;  %v2151_v55 = vld [vmem:[%s2707_s0 + $0x58] sm:$0xff]  ;;  %v2168_v62 = vld [vmem:[%s2707_s0 + $0x20] sm:$0xff] }
  0x30   : > { %v501_v46 = vadd.f32 %v470_v36, %v469_v35  ;;  %v473_v48 = vunpack.c.l.bf16 %v2112_v40  ;;  %v474_v49 = vunpack.c.h.bf16 %v2112_v40  ;;  %v504_v50 = vadd.f32 %v472_v42, %v471_v41  ;;  %v2173_v63 = vld [vmem:[%s2707_s0 + $0x28] sm:$0xff]  ;;  %v2190_v6 = vld [vmem:[%s2707_s0 + $0x60] sm:$0xff]  ;;  %v2212_v14 = vld [vmem:[%s2707_s0 + $0x30] sm:$0xff] }
  0x31   : > { %v525_v47 = vadd.f32 %v486_v38, %v485_v37  ;;  %v528_v51 = vadd.f32 %v488_v44, %v487_v43  ;;  %v475_v52 = vunpack.c.l.bf16 %v2121_v45  ;;  %v476_v53 = vunpack.c.h.bf16 %v2121_v45  ;;  %v2195_v7 = vld [vmem:[%s2707_s0 + $0x68] sm:$0xff]  ;;  %v2217_v15 = vld [vmem:[%s2707_s0 + $0x38] sm:$0xff]  ;;  %v2234_v22 = vld [vmem:[%s2707_s0 + $0x70] sm:$0xff] }
  0x32   : > { %502 = vadd.xlane.f32.xlu0 %v501_v46  ;;  %v507_v56 = vadd.f32 %v474_v49, %v473_v48  ;;  %v489_v57 = vunpack.c.l.bf16 %v2146_v54  ;;  %v490_v59 = vunpack.c.h.bf16 %v2146_v54  ;;  %v491_v60 = vunpack.c.l.bf16 %v2151_v55  ;;  %v2239_v23 = vld [vmem:[%s2707_s0 + $0x78] sm:$0xff] }
  0x33   : > { %526 = vadd.xlane.f32.xlu1 %v525_v47  ;;  %v510_v58 = vadd.f32 %v476_v53, %v475_v52  ;;  %v492_v61 = vunpack.c.h.bf16 %v2151_v55  ;;  %v477_v0 = vunpack.c.l.bf16 %v2168_v62  ;;  %v478_v1 = vunpack.c.h.bf16 %v2168_v62  ;;  %v1817_v46 = vld [vmem:[%s2264_s11 + $0x74] ss:$8 sps:$4 sm:$0xff]   ;;  %v1819_v47 = vld [vmem:[%s2264_s11 + $0x70] ss:$8 sps:$4 sm:$0xff]  }
  0x34   : > { %v531_v2 = vadd.f32 %v490_v59, %v489_v57  ;;  %v479_v4 = vunpack.c.l.bf16 %v2173_v63  ;;  %v480_v5 = vunpack.c.h.bf16 %v2173_v63  ;;  %v493_v9 = vunpack.c.l.bf16 %v2190_v6  ;;  %1134 = vmatprep.subr.bf16.mxu0 %v1817_v46  ;;  %1745 = vmatprep.subr.bf16.mxu1 %v1817_v46 }
  0x35   : > { %v534_v3 = vadd.f32 %v492_v61, %v491_v60  ;;  %v513_v8 = vadd.f32 %v478_v1, %v477_v0  ;;  %v494_v11 = vunpack.c.h.bf16 %v2190_v6  ;;  %v495_v12 = vunpack.c.l.bf16 %v2195_v7  ;;  %1135 = vmatpush1.bf16.msra.mxu0 %v1819_v47  ;;  %1761 = vmatpush1.bf16.msra.mxu1 %v1819_v47 }
  0x36   : > { %505 = vadd.xlane.f32.xlu0 %v504_v50  ;;  %v516_v10 = vadd.f32 %v480_v5, %v479_v4  ;;  %v496_v13 = vunpack.c.h.bf16 %v2195_v7  ;;  %v481_v16 = vunpack.c.l.bf16 %v2212_v14  ;;  %v482_v17 = vunpack.c.h.bf16 %v2212_v14  ;;  %v1820_v50 = vld [vmem:[%s2264_s11 + $0x64] ss:$8 sps:$4 sm:$0xff]  }
  0x37   : > { %529 = vadd.xlane.f32.xlu1 %v528_v51  ;;  %v537_v18 = vadd.f32 %v494_v11, %v493_v9  ;;  %v483_v20 = vunpack.c.l.bf16 %v2217_v15  ;;  %v484_v21 = vunpack.c.h.bf16 %v2217_v15  ;;  %v497_v25 = vunpack.c.l.bf16 %v2234_v22  ;;  %v1822_v51 = vld [vmem:[%s2264_s11 + $0x60] ss:$8 sps:$4 sm:$0xff]   ;;  %1136 = vmatprep.subr.bf16.mxu0 %v1820_v50 }
  0x38   : > { %v540_v19 = vadd.f32 %v496_v13, %v495_v12  ;;  %v519_v24 = vadd.f32 %v482_v17, %v481_v16  ;;  %v498_v27 = vunpack.c.h.bf16 %v2234_v22  ;;  %v499_v28 = vunpack.c.l.bf16 %v2239_v23  ;;  %1746 = vmatprep.subr.bf16.mxu1 %v1820_v50 }
  0x39   : > { %v522_v26 = vadd.f32 %v484_v21, %v483_v20  ;;  %v500_v29 = vunpack.c.h.bf16 %v2239_v23  ;;  %1137 = vmatpush1.bf16.msra.mxu0 %v1822_v51  ;;  %1762 = vmatpush1.bf16.msra.mxu1 %v1822_v51 }
  0x3a   : > { %508 = vadd.xlane.f32.xlu0 %v507_v56  ;;  %v543_v30 = vadd.f32 %v498_v27, %v497_v25  ;;  %v1823_v56 = vld [vmem:[%s2264_s11 + $0x54] ss:$8 sps:$4 sm:$0xff]  }
  0x3b   : > { %511 = vadd.xlane.f32.xlu1 %v510_v58  ;;  %v546_v31 = vadd.f32 %v500_v29, %v499_v28  ;;  %v1825_v58 = vld [vmem:[%s2264_s11 + $0x50] ss:$8 sps:$4 sm:$0xff]   ;;  %1138 = vmatprep.subr.bf16.mxu0 %v1823_v56 }
  0x3c   : > { %1747 = vmatprep.subr.bf16.mxu1 %v1823_v56 }
  0x3d   : > { %1139 = vmatpush1.bf16.msra.mxu0 %v1825_v58  ;;  %1763 = vmatpush1.bf16.msra.mxu1 %v1825_v58 }
  0x3e   : > { %532 = vadd.xlane.f32.xlu0 %v531_v2  ;;  %v1826_v2 = vld [vmem:[%s2264_s11 + $0x44] ss:$8 sps:$4 sm:$0xff]  }
  0x3f   : > { %535 = vadd.xlane.f32.xlu1 %v534_v3  ;;  %v1828_v3 = vld [vmem:[%s2264_s11 + $0x40] ss:$8 sps:$4 sm:$0xff]   ;;  %1140 = vmatprep.subr.bf16.mxu0 %v1826_v2 }
  0x40   : > { %1748 = vmatprep.subr.bf16.mxu1 %v1826_v2 }
  0x41   : > { %1141 = vmatpush1.bf16.msra.mxu0 %v1828_v3  ;;  %1764 = vmatpush1.bf16.msra.mxu1 %v1828_v3 }
  0x42   : > { %514 = vadd.xlane.f32.xlu0 %v513_v8  ;;  %v1829_v8 = vld [vmem:[%s2264_s11 + $0x34] ss:$8 sps:$4 sm:$0xff]  }
  0x43   : > { %517 = vadd.xlane.f32.xlu1 %v516_v10  ;;  %v1831_v10 = vld [vmem:[%s2264_s11 + $0x30] ss:$8 sps:$4 sm:$0xff]   ;;  %1142 = vmatprep.subr.bf16.mxu0 %v1829_v8 }
  0x44   : > { %1749 = vmatprep.subr.bf16.mxu1 %v1829_v8 }
  0x45   : > { %1143 = vmatpush1.bf16.msra.mxu0 %v1831_v10  ;;  %1765 = vmatpush1.bf16.msra.mxu1 %v1831_v10 }
  0x46   : > { %538 = vadd.xlane.f32.xlu0 %v537_v18  ;;  %v1832_v18 = vld [vmem:[%s2264_s11 + $0x24] ss:$8 sps:$4 sm:$0xff]  }
  0x47   : > { %541 = vadd.xlane.f32.xlu1 %v540_v19  ;;  %v1834_v19 = vld [vmem:[%s2264_s11 + $0x20] ss:$8 sps:$4 sm:$0xff]   ;;  %1144 = vmatprep.subr.bf16.mxu0 %v1832_v18 }
  0x48   : > { %1750 = vmatprep.subr.bf16.mxu1 %v1832_v18 }
  0x49   : > { %1145 = vmatpush1.bf16.msra.mxu0 %v1834_v19  ;;  %1766 = vmatpush1.bf16.msra.mxu1 %v1834_v19 }
  0x4a   : > { %520 = vadd.xlane.f32.xlu0 %v519_v24  ;;  %v1835_v24 = vld [vmem:[%s2264_s11 + $0x14] ss:$8 sps:$4 sm:$0xff]  }
  0x4b   : > { %523 = vadd.xlane.f32.xlu1 %v522_v26  ;;  %v1837_v26 = vld [vmem:[%s2264_s11 + $0x10] ss:$8 sps:$4 sm:$0xff]   ;;  %1146 = vmatprep.subr.bf16.mxu0 %v1835_v24 }
  0x4c   : > { %1751 = vmatprep.subr.bf16.mxu1 %v1835_v24 }
  0x4d   : > { %1147 = vmatpush1.bf16.msra.mxu0 %v1837_v26  ;;  %1767 = vmatpush1.bf16.msra.mxu1 %v1837_v26 }
  0x4e   : > { %544 = vadd.xlane.f32.xlu0 %v543_v30  ;;  %v1838_v30 = vld [vmem:[%s2264_s11 + $0x4] ss:$8 sps:$4 sm:$0xff]  }
  0x4f   : > { %547 = vadd.xlane.f32.xlu1 %v546_v31  ;;  %v1840_v31 = vld [vmem:[%s2264_s11] ss:$8 sps:$4 sm:$0xff]   ;;  %1148 = vmatprep.subr.bf16.mxu0 %v1838_v30 }
  0x50   : > { %1752 = vmatprep.subr.bf16.mxu1 %v1838_v30 }
  0x51   : > { %1149 = vmatpush1.bf16.msra.mxu0 %v1840_v31  ;;  %1768 = vmatpush1.bf16.msra.mxu1 %v1840_v31 }
  0xbb   : > { %v503_v46 = vpop.xlane.xlu0 %502 }
  0xbc   : > { %v527_v47 = vpop.xlane.xlu1 %526  ;;  %v550_v50 = vmul.f32 0.00390625, %v503_v46 }
  0xbd   : > { %v558_v51 = vmul.f32 0.00390625, %v527_v47 }
  0xbe   : > { %v2284_v56 = vsub.f32 %v469_v35, %v550_v50  ;;  %v2288_v58 = vsub.f32 %v470_v36, %v550_v50 }
  0xbf   : > { %v2292_v2 = vsub.f32 %v485_v37, %v558_v51  ;;  %v2296_v3 = vsub.f32 %v486_v38, %v558_v51  ;;  %v506_v8 = vpop.xlane.xlu0 %505 }
  0xc0   : > { %v530_v10 = vpop.xlane.xlu1 %529  ;;  %v551_v18 = vmul.f32 0.00390625, %v506_v8  ;;  %v598_v35 = vmul.f32 %v2284_v56, %v2284_v56  ;;  %v599_v32 = vmul.f32 %v2288_v58, %v2288_v58 }
  0xc1   : > { %v559_v19 = vmul.f32 0.00390625, %v530_v10  ;;  %v614_v36 = vmul.f32 %v2292_v2, %v2292_v2  ;;  %v615_v37 = vmul.f32 %v2296_v3, %v2296_v3 }
  0xc2   : > { %v2308_v33 = vsub.f32 %v471_v41, %v551_v18  ;;  %v2312_v38 = vsub.f32 %v472_v42, %v551_v18  ;;  %v630_v31 = vadd.f32 %v599_v32, %v598_v35 }
  0xc3   : > { %v2316_v24 = vsub.f32 %v487_v43, %v559_v19  ;;  %v2320_v26 = vsub.f32 %v488_v44, %v559_v19  ;;  %v509_v30 = vpop.xlane.xlu0 %508  ;;  %v654_v42 = vadd.f32 %v615_v37, %v614_v36 }
  0xc4   : > { %v512_v46 = vpop.xlane.xlu1 %511  ;;  %v552_v47 = vmul.f32 0.00390625, %v509_v30  ;;  %v600_v41 = vmul.f32 %v2308_v33, %v2308_v33  ;;  %v601_v34 = vmul.f32 %v2312_v38, %v2312_v38  ;;  %631 = vadd.xlane.f32.xlu0 %v630_v31 }
  0xc5   : > { %v553_v50 = vmul.f32 0.00390625, %v512_v46  ;;  %v616_v43 = vmul.f32 %v2316_v24, %v2316_v24  ;;  %v617_v39 = vmul.f32 %v2320_v26, %v2320_v26 }
  0xc6   : > { %v2332_v44 = vsub.f32 %v473_v48, %v552_v47  ;;  %v2336_v51 = vsub.f32 %v474_v49, %v552_v47  ;;  %v633_v19 = vadd.f32 %v601_v34, %v600_v41 }
  0xc7   : > { %v2340_v8 = vsub.f32 %v475_v52, %v553_v50  ;;  %v2344_v10 = vsub.f32 %v476_v53, %v553_v50  ;;  %v533_v18 = vpop.xlane.xlu0 %532  ;;  %v657_v49 = vadd.f32 %v617_v39, %v616_v43 }
  0xc8   : > { %v536_v35 = vpop.xlane.xlu1 %535  ;;  %v560_v32 = vmul.f32 0.00390625, %v533_v18  ;;  %v602_v48 = vmul.f32 %v2332_v44, %v2332_v44  ;;  %v603_v40 = vmul.f32 %v2336_v51, %v2336_v51  ;;  %655 = vadd.xlane.f32.xlu0 %v654_v42  ;;  %634 = vadd.xlane.f32.xlu1 %v633_v19  ;;  %v1843_v42 = vld [vmem:[%s2264_s11 + $0xf0] ss:$8 sps:$4 sm:$0xff]  }
  0xc9   : > { %v561_v36 = vmul.f32 0.00390625, %v536_v35  ;;  %v604_v45 = vmul.f32 %v2340_v8, %v2340_v8  ;;  %v605_v52 = vmul.f32 %v2344_v10, %v2344_v10 }
  0xca   : > { %v2356_v53 = vsub.f32 %v489_v57, %v560_v32  ;;  %v2360_v37 = vsub.f32 %v490_v59, %v560_v32  ;;  %v636_v47 = vadd.f32 %v603_v40, %v602_v48  ;;  %v1841_v59 = vld [vmem:[%s2264_s11 + $0xf4] ss:$8 sps:$4 sm:$0xff]   ;;  %v1844_v40 = vld [vmem:[%s2264_s11 + $0xe4] ss:$8 sps:$4 sm:$0xff]  }
  0xcb   : > { %v2364_v30 = vsub.f32 %v491_v60, %v561_v36  ;;  %v2368_v31 = vsub.f32 %v492_v61, %v561_v36  ;;  %v515_v46 = vpop.xlane.xlu0 %514  ;;  %v639_v60 = vadd.f32 %v605_v52, %v604_v45  ;;  %1150 = vmatprep.subr.bf16.mxu0 %v1841_v59  ;;  %1753 = vmatprep.subr.bf16.mxu1 %v1841_v59 }
  0xcc   : > { %v518_v50 = vpop.xlane.xlu1 %517  ;;  %v554_v41 = vmul.f32 0.00390625, %v515_v46  ;;  %v618_v57 = vmul.f32 %v2356_v53, %v2356_v53  ;;  %v619_v54 = vmul.f32 %v2360_v37, %v2360_v37  ;;  %658 = vadd.xlane.f32.xlu1 %v657_v49  ;;  %637 = vadd.xlane.f32.xlu0 %v636_v47  ;;  %v1846_v47 = vld [vmem:[%s2264_s11 + $0xe0] ss:$8 sps:$4 sm:$0xff]  }
  0xcd   : > { %v555_v34 = vmul.f32 0.00390625, %v518_v50  ;;  %v620_v55 = vmul.f32 %v2364_v30, %v2364_v30  ;;  %v621_v61 = vmul.f32 %v2368_v31, %v2368_v31  ;;  %1151 = vmatpush2.bf16.msra.mxu0 %v1843_v42  ;;  %1769 = vmatpush2.bf16.msra.mxu1 %v1843_v42  ;;  %v1849_v42 = vld [vmem:[%s2264_s11 + $0xd0] ss:$8 sps:$4 sm:$0xff]  }
  0xce   : > { %v2382_v43 = vsub.f32 %v477_v0, %v554_v41  ;;  %v2386_v39 = vsub.f32 %v478_v1, %v554_v41  ;;  %v660_v32 = vadd.f32 %v619_v54, %v618_v57  ;;  %1152 = vmatprep.subr.bf16.mxu0 %v1844_v40  ;;  %1754 = vmatprep.subr.bf16.mxu1 %v1844_v40  ;;  %v1847_v54 = vld [vmem:[%s2264_s11 + $0xd4] ss:$8 sps:$4 sm:$0xff]  }
  0xcf   : > { %v2390_v18 = vsub.f32 %v479_v4, %v555_v34  ;;  %v2394_v19 = vsub.f32 %v480_v5, %v555_v34  ;;  %v539_v35 = vpop.xlane.xlu0 %538  ;;  %v663_v63 = vadd.f32 %v621_v61, %v620_v55 }
  0xd0   : > { %v542_v36 = vpop.xlane.xlu1 %541  ;;  %v562_v0 = vmul.f32 0.00390625, %v539_v35  ;;  %v606_v1 = vmul.f32 %v2382_v43, %v2382_v43  ;;  %v607_v4 = vmul.f32 %v2386_v39, %v2386_v39  ;;  %640 = vadd.xlane.f32.xlu1 %v639_v60  ;;  %661 = vadd.xlane.f32.xlu0 %v660_v32 }
  0xd1   : > { %v563_v62 = vmul.f32 0.00390625, %v542_v36  ;;  %v608_v5 = vmul.f32 %v2390_v18, %v2390_v18  ;;  %v609_v48 = vmul.f32 %v2394_v19, %v2394_v19  ;;  %1153 = vmatpush2.bf16.msra.mxu0 %v1846_v47  ;;  %1770 = vmatpush2.bf16.msra.mxu1 %v1846_v47 }
  0xd2   : > { %v2407_v49 = vsub.f32 %v493_v9, %v562_v0  ;;  %v2411_v45 = vsub.f32 %v494_v11, %v562_v0  ;;  %v642_v41 = vadd.f32 %v607_v4, %v606_v1  ;;  %1154 = vmatprep.subr.bf16.mxu0 %v1847_v54  ;;  %1755 = vmatprep.subr.bf16.mxu1 %v1847_v54 }
  0xd3   : > { %v2415_v52 = vsub.f32 %v495_v12, %v563_v62  ;;  %v2419_v46 = vsub.f32 %v496_v13, %v563_v62  ;;  %v521_v50 = vpop.xlane.xlu0 %520  ;;  %v645_v7 = vadd.f32 %v609_v48, %v608_v5  ;;  %v1850_v62 = vld [vmem:[%s2264_s11 + $0xc4] ss:$8 sps:$4 sm:$0xff]   ;;  %v1852_v48 = vld [vmem:[%s2264_s11 + $0xc0] ss:$8 sps:$4 sm:$0xff]  }
  0xd4   : > { %v524_v34 = vpop.xlane.xlu1 %523  ;;  %v556_v9 = vmul.f32 0.00390625, %v521_v50  ;;  %v622_v11 = vmul.f32 %v2407_v49, %v2407_v49  ;;  %v623_v12 = vmul.f32 %v2411_v45, %v2411_v45  ;;  %664 = vadd.xlane.f32.xlu1 %v663_v63  ;;  %643 = vadd.xlane.f32.xlu0 %v642_v41  ;;  %v1855_v50 = vld [vmem:[%s2264_s11 + $0xb0] ss:$8 sps:$4 sm:$0xff]  }
  0xd5   : > { %v557_v6 = vmul.f32 0.00390625, %v524_v34  ;;  %v624_v13 = vmul.f32 %v2415_v52, %v2415_v52  ;;  %v625_v57 = vmul.f32 %v2419_v46, %v2419_v46  ;;  %1155 = vmatpush2.bf16.msra.mxu0 %v1849_v42  ;;  %1771 = vmatpush2.bf16.msra.mxu1 %v1849_v42  ;;  %v1856_v34 = vld [vmem:[%s2264_s11 + $0xa4] ss:$8 sps:$4 sm:$0xff]  }
  0xd6   : > { %v2433_v59 = vsub.f32 %v481_v16, %v556_v9  ;;  %v2437_v60 = vsub.f32 %v482_v17, %v556_v9  ;;  %v666_v32 = vadd.f32 %v623_v12, %v622_v11  ;;  %1156 = vmatprep.subr.bf16.mxu0 %v1850_v62  ;;  %1756 = vmatprep.subr.bf16.mxu1 %v1850_v62  ;;  %v1858_v9 = vld [vmem:[%s2264_s11 + $0xa0] ss:$8 sps:$4 sm:$0xff]   ;;  %v1861_v11 = vld [vmem:[%s2264_s11 + $0x90] ss:$8 sps:$4 sm:$0xff]   ;;  %v1862_v12 = vld [vmem:[%s2264_s11 + $0x84] ss:$8 sps:$4 sm:$0xff]  }
  0xd7   : > { %v2441_v55 = vsub.f32 %v483_v20, %v557_v6  ;;  %v2445_v61 = vsub.f32 %v484_v21, %v557_v6  ;;  %v545_v35 = vpop.xlane.xlu0 %544  ;;  %v669_v15 = vadd.f32 %v625_v57, %v624_v13  ;;  %v1859_v6 = vld [vmem:[%s2264_s11 + $0x94] ss:$8 sps:$4 sm:$0xff]  }
  0xd8   : > { %v548_v36 = vpop.xlane.xlu1 %547  ;;  %v564_v16 = vmul.f32 0.00390625, %v545_v35  ;;  %v610_v17 = vmul.f32 %v2433_v59, %v2433_v59  ;;  %v611_v20 = vmul.f32 %v2437_v60, %v2437_v60  ;;  %646 = vadd.xlane.f32.xlu1 %v645_v7  ;;  %667 = vadd.xlane.f32.xlu0 %v666_v32  ;;  %v1864_v7 = vld [vmem:[%s2264_s11 + $0x80] ss:$8 sps:$4 sm:$0xff]  }
  0xd9   : > { %v565_v14 = vmul.f32 0.00390625, %v548_v36  ;;  %v612_v21 = vmul.f32 %v2441_v55, %v2441_v55  ;;  %v613_v0 = vmul.f32 %v2445_v61, %v2445_v61  ;;  %1157 = vmatpush2.bf16.msra.mxu0 %v1852_v48  ;;  %1772 = vmatpush2.bf16.msra.mxu1 %v1852_v48 }
  0xda   : > { %v2459_v1 = vsub.f32 %v497_v25, %v564_v16  ;;  %v2463_v4 = vsub.f32 %v498_v27, %v564_v16  ;;  %v648_v40 = vadd.f32 %v611_v20, %v610_v17  ;;  %v760_v16 = vlaneseq }
  0xdb   : > { %v2467_v63 = vsub.f32 %v499_v28, %v565_v14  ;;  %v2471_v5 = vsub.f32 %v500_v29, %v565_v14  ;;  %v651_v27 = vadd.f32 %v613_v0, %v612_v21  ;;  %v1853_v29 = vld [vmem:[%s2264_s11 + $0xb4] ss:$8 sps:$4 sm:$0xff]  }
  0xdc   : > { %v626_v25 = vmul.f32 %v2459_v1, %v2459_v1  ;;  %v627_v22 = vmul.f32 %v2463_v4, %v2463_v4  ;;  %670 = vadd.xlane.f32.xlu1 %v669_v15  ;;  %649 = vadd.xlane.f32.xlu0 %v648_v40  ;;  %v761_v62 = vshrl.u32 %v760_v16, 7 }
  0xdd   : > { %v628_v23 = vmul.f32 %v2467_v63, %v2467_v63  ;;  %v629_v28 = vmul.f32 %v2471_v5, %v2471_v5  ;;  %1158 = vmatprep.subr.bf16.mxu0 %v1853_v29  ;;  %1757 = vmatprep.subr.bf16.mxu1 %v1853_v29  ;;  %v758_v29 = vld [vmem:[%s2710_s3] sm:$0x3] }
  0xde   : > { %v672_v47 = vadd.f32 %v627_v22, %v626_v25  ;;  %1159 = vmatpush2.bf16.msra.mxu0 %v1855_v50  ;;  %1773 = vmatpush2.bf16.msra.mxu1 %v1855_v50 }
  0xdf   : > { %v675_v41 = vadd.f32 %v629_v28, %v628_v23  ;;  %1160 = vmatprep.subr.bf16.mxu0 %v1856_v34  ;;  %1758 = vmatprep.subr.bf16.mxu1 %v1856_v34  ;;  %v2490_v28 = vsub.s32 1, %v761_v62 }
  0xe0   : > { %652 = vadd.xlane.f32.xlu1 %v651_v27  ;;  %673 = vadd.xlane.f32.xlu0 %v672_v47  ;;  %v2495_v47 = vsub.s32 0, %v761_v62 }
  0xe2   : > { %1161 = vmatpush2.bf16.msra.mxu0 %v1858_v9  ;;  %1774 = vmatpush2.bf16.msra.mxu1 %v1858_v9 }
  0xe3   : > { %1162 = vmatprep.subr.bf16.mxu0 %v1859_v6  ;;  %1759 = vmatprep.subr.bf16.mxu1 %v1859_v6 }
  0xe4   : > { %676 = vadd.xlane.f32.xlu1 %v675_v41  ;;  %v802_v41 = vld [vmem:[%s2711_s4] sm:$0x3] }
  0xe6   : > { %1163 = vmatpush2.bf16.msra.mxu0 %v1861_v11  ;;  %1775 = vmatpush2.bf16.msra.mxu1 %v1861_v11 }
  0xe7   : > { %1164 = vmatprep.subr.bf16.mxu0 %v1862_v12  ;;  %1760 = vmatprep.subr.bf16.mxu1 %v1862_v12 }
  0xea   : > { %1165 = vmatpush2.bf16.msra.mxu0 %v1864_v7  ;;  %1776 = vmatpush2.bf16.msra.mxu1 %v1864_v7  ;;  %v2501_v7 = vrot.slane %v758_v29, %v2490_v28 }
 0x14d   : > { %v632_v13 = vpop.xlane.xlu0 %631 }
 0x14e   : > { %v678_v57 = vmul.f32 0.00390625, %v632_v13 }
 0x150   : > { %v694_v54 = vadd.f32 1e-06, %v678_v57  ;;  %v2504_v57 = vrot.slane %v758_v29, %v2495_v47 }
 0x151   : > { %v635_v42 = vpop.xlane.xlu1 %634  ;;  %v656_v35 = vpop.xlane.xlu0 %655 }
 0x152   : > { %1865 = vrsqrt.f32 %v694_v54  ;;  %v679_v32 = vmul.f32 0.00390625, %v635_v42  ;;  %v686_v36 = vmul.f32 0.00390625, %v656_v35  ;;  %v2507_v54 = vrot.slane %v802_v41, %v2490_v28 }
 0x154   : > { %v695_v14 = vadd.f32 1e-06, %v679_v32  ;;  %v702_v17 = vadd.f32 1e-06, %v686_v36 }
 0x155   : > { %v659_v20 = vpop.xlane.xlu1 %658  ;;  %v638_v15 = vpop.xlane.xlu0 %637 }
 0x156   : > { %1867 = vrsqrt.f32 %v695_v14  ;;  %v687_v21 = vmul.f32 0.00390625, %v659_v20  ;;  %v680_v0 = vmul.f32 0.00390625, %v638_v15 }
 0x157   : > { %1869 = vrsqrt.f32 %v702_v17  ;;  %v2512_v17 = vrot.slane %v802_v41, %v2495_v47 }
 0x158   : > { %v703_v48 = vadd.f32 1e-06, %v687_v21  ;;  %v696_v40 = vadd.f32 1e-06, %v680_v0 }
 0x159   : > { %v641_v25 = vpop.xlane.xlu1 %640  ;;  %v662_v22 = vpop.xlane.xlu0 %661 }
 0x15a   : > { %1871 = vrsqrt.f32 %v703_v48  ;;  %v681_v27 = vmul.f32 0.00390625, %v641_v25  ;;  %v688_v23 = vmul.f32 0.00390625, %v662_v22 }
 0x15b   : > { %1873 = vrsqrt.f32 %v696_v40 }
 0x15c   : > { %v697_v50 = vadd.f32 1e-06, %v681_v27  ;;  %v704_v34 = vadd.f32 1e-06, %v688_v23 }
 0x15d   : > { %v665_v9 = vpop.xlane.xlu1 %664  ;;  %v644_v6 = vpop.xlane.xlu0 %643 }
 0x15e   : > { %1875 = vrsqrt.f32 %v697_v50  ;;  %v689_v11 = vmul.f32 0.00390625, %v665_v9  ;;  %v682_v12 = vmul.f32 0.00390625, %v644_v6 }
 0x15f   : > { %v1866_v13 = vpop.eup %1865  ;;  %1877 = vrsqrt.f32 %v704_v34 }
 0x160   : > { %v705_v42 = vadd.f32 1e-06, %v689_v11  ;;  %v698_v35 = vadd.f32 1e-06, %v682_v12  ;;  %v727_v32 = vmul.f32 %v1866_v13, %v2288_v58  ;;  %v726_v36 = vmul.f32 %v1866_v13, %v2284_v56 }
 0x161   : > { %v647_v16 = vpop.xlane.xlu1 %646  ;;  %v668_v14 = vpop.xlane.xlu0 %667 }
 0x162   : > { %1879 = vrsqrt.f32 %v705_v42  ;;  %v683_v20 = vmul.f32 0.00390625, %v647_v16  ;;  %v690_v15 = vmul.f32 0.00390625, %v668_v14  ;;  %v771_v21 = vmul.f32 %v2501_v7, %v727_v32 }
 0x163   : > { %v1868_v0 = vpop.eup %1867  ;;  %1881 = vrsqrt.f32 %v698_v35  ;;  %v770_v62 = vmul.f32 %v2504_v57, %v726_v36 }
 0x164   : > { %v1870_v48 = vpop.eup %1869  ;;  %v699_v40 = vadd.f32 1e-06, %v683_v20  ;;  %v706_v58 = vadd.f32 1e-06, %v690_v15  ;;  %v729_v56 = vmul.f32 %v1868_v0, %v2312_v38  ;;  %v815_v25 = vadd.f32 %v2507_v54, %v771_v21 }
 0x165   : > { %v671_v22 = vpop.xlane.xlu1 %670  ;;  %v650_v27 = vpop.xlane.xlu0 %649  ;;  %v728_v23 = vmul.f32 %v1868_v0, %v2308_v33  ;;  %v814_v29 = vadd.f32 %v2512_v17, %v770_v62  ;;  %v743_v50 = vmul.f32 %v1870_v48, %v2296_v3  ;;  %v742_v41 = vmul.f32 %v1870_v48, %v2292_v2 }
 0x166   : > { %1883 = vrsqrt.f32 %v699_v40  ;;  %v691_v34 = vmul.f32 0.00390625, %v671_v22  ;;  %v684_v9 = vmul.f32 0.00390625, %v650_v27  ;;  %v773_v6 = vmul.f32 %v2501_v7, %v729_v56 }
 0x167   : > { %v1872_v11 = vpop.eup %1871  ;;  %1885 = vrsqrt.f32 %v706_v58  ;;  %v772_v38 = vmul.f32 %v2504_v57, %v728_v23  ;;  %v787_v12 = vmul.f32 %v2501_v7, %v743_v50  ;;  %v786_v13 = vmul.f32 %v2504_v57, %v742_v41 }
 0x168   : > { %v707_v33 = vadd.f32 1e-06, %v691_v34  ;;  %v700_v42 = vadd.f32 1e-06, %v684_v9  ;;  %v817_v35 = vadd.f32 %v2507_v54, %v773_v6  ;;  %v745_v3 = vmul.f32 %v1872_v11, %v2320_v26  ;;  %v1874_v2 = vpop.eup %1873 }
 0x169   : > { %v653_v32 = vpop.xlane.xlu1 %652  ;;  %v674_v36 = vpop.xlane.xlu0 %673  ;;  %v816_v16 = vadd.f32 %v2512_v17, %v772_v38  ;;  %v831_v14 = vadd.f32 %v2507_v54, %v787_v12  ;;  %v744_v20 = vmul.f32 %v1872_v11, %v2316_v24  ;;  %v830_v15 = vadd.f32 %v2512_v17, %v786_v13 }
 0x16a   : > { %1887 = vrsqrt.f32 %v707_v33  ;;  %v685_v21 = vmul.f32 0.00390625, %v653_v32  ;;  %v692_v0 = vmul.f32 0.00390625, %v674_v36  ;;  %v847_v62 = vpack.c.bf16 %v817_v35, %v815_v25 }
 0x16b   : > { %v1876_v48 = vpop.eup %1875  ;;  %1889 = vrsqrt.f32 %v700_v42  ;;  %v846_v40 = vpack.c.bf16 %v816_v16, %v814_v29  ;;  %v789_v26 = vmul.f32 %v2501_v7, %v745_v3  ;;  %v788_v58 = vmul.f32 %v2504_v57, %v744_v20 }
 0x16c   : > { %v701_v56 = vadd.f32 1e-06, %v685_v21  ;;  %v708_v22 = vadd.f32 1e-06, %v692_v0  ;;  %1166 = vmatprep.mubr.bf16.mxu0 %v847_v62  ;;  %v731_v27 = vmul.f32 %v1874_v2, %v2336_v51  ;;  %v733_v24 = vmul.f32 %v1876_v48, %v2344_v10  ;;  %v1878_v34 = vpop.eup %1877 }
 0x16d   : > { %v677_v23 = vpop.xlane.xlu1 %676  ;;  %1167 = vmatmul.mubr.bf16.vlgmr.msra.gmra.mxu0 %v846_v40  ;;  %v833_v50 = vadd.f32 %v2507_v54, %v789_v26  ;;  %v832_v25 = vadd.f32 %v2512_v17, %v788_v58  ;;  %v730_v41 = vmul.f32 %v1874_v2, %v2332_v44  ;;  %v732_v29 = vmul.f32 %v1876_v48, %v2340_v8 }
 0x16e   : > { %1891 = vrsqrt.f32 %v701_v56  ;;  %v693_v9 = vmul.f32 0.00390625, %v677_v23  ;;  %v775_v6 = vmul.f32 %v2501_v7, %v731_v27  ;;  %v777_v11 = vmul.f32 %v2501_v7, %v733_v24 }
 0x16f   : > { %v1880_v51 = vpop.eup %1879  ;;  %1893 = vrsqrt.f32 %v708_v22  ;;  %v855_v10 = vpack.c.bf16 %v833_v50, %v831_v14  ;;  %v854_v38 = vpack.c.bf16 %v832_v25, %v830_v15  ;;  %v774_v12 = vmul.f32 %v2504_v57, %v730_v41 }
 0x170   : > { %v1882_v13 = vpop.eup %1881  ;;  %v709_v33 = vadd.f32 1e-06, %v693_v9  ;;  %v819_v42 = vadd.f32 %v2507_v54, %v775_v6  ;;  %v821_v44 = vadd.f32 %v2507_v54, %v777_v11  ;;  %v776_v8 = vmul.f32 %v2504_v57, %v732_v29 }
 0x171   : > { %1206 = vmatprep.mubr.bf16.mxu1 %v855_v10  ;;  %v818_v35 = vadd.f32 %v2512_v17, %v774_v12  ;;  %v747_v3 = vmul.f32 %v1878_v34, %v2360_v37  ;;  %v749_v2 = vmul.f32 %v1880_v51, %v2368_v31  ;;  %v746_v32 = vmul.f32 %v1878_v34, %v2356_v53 }
 0x172   : > { %1895 = vrsqrt.f32 %v709_v33  ;;  %1207 = vmatmul.mubr.bf16.vlgmr.msra.gmra.mxu1 %v854_v38  ;;  %v849_v36 = vpack.c.bf16 %v821_v44, %v819_v42  ;;  %v820_v16 = vadd.f32 %v2512_v17, %v776_v8  ;;  %v748_v14 = vmul.f32 %v1880_v51, %v2364_v30 }
 0x173   : > { %v1884_v20 = vpop.eup %1883  ;;  %v791_v15 = vmul.f32 %v2501_v7, %v747_v3  ;;  %v793_v21 = vmul.f32 %v2501_v7, %v749_v2  ;;  %v790_v0 = vmul.f32 %v2504_v57, %v746_v32  ;;  %v735_v37 = vmul.f32 %v1882_v13, %v2386_v39 }
 0x174   : > { %v1886_v62 = vpop.eup %1885  ;;  %1176 = vmatprep.mubr.bf16.mxu0 %v849_v36  ;;  %v848_v31 = vpack.c.bf16 %v820_v16, %v818_v35  ;;  %v792_v53 = vmul.f32 %v2504_v57, %v748_v14  ;;  %v737_v48 = vmul.f32 %v1884_v20, %v2394_v19  ;;  %v734_v40 = vmul.f32 %v1882_v13, %v2382_v43 }
 0x175   : > { %v835_v30 = vadd.f32 %v2507_v54, %v791_v15  ;;  %v837_v26 = vadd.f32 %v2507_v54, %v793_v21  ;;  %v834_v58 = vadd.f32 %v2512_v17, %v790_v0  ;;  %v779_v56 = vmul.f32 %v2501_v7, %v735_v37 }
 0x176   : > { %1177 = vmatmul.mubr.bf16.gmra.mxu0 %v848_v31  ;;  %v836_v39 = vadd.f32 %v2512_v17, %v792_v53  ;;  %v781_v22 = vmul.f32 %v2501_v7, %v737_v48  ;;  %v736_v27 = vmul.f32 %v1884_v20, %v2390_v18  ;;  %v778_v24 = vmul.f32 %v2504_v57, %v734_v40 }
 0x177   : > { %v1888_v19 = vpop.eup %1887  ;;  %v857_v23 = vpack.c.bf16 %v837_v26, %v835_v30  ;;  %v823_v43 = vadd.f32 %v2507_v54, %v779_v56  ;;  %v751_v50 = vmul.f32 %v1886_v62, %v2411_v45  ;;  %v750_v25 = vmul.f32 %v1886_v62, %v2407_v49 }
 0x178   : > { %v1890_v41 = vpop.eup %1889  ;;  %v856_v29 = vpack.c.bf16 %v836_v39, %v834_v58  ;;  %v825_v34 = vadd.f32 %v2507_v54, %v781_v22  ;;  %v780_v9 = vmul.f32 %v2504_v57, %v736_v27  ;;  %v822_v6 = vadd.f32 %v2512_v17, %v778_v24 }
 0x179   : > { %1216 = vmatprep.mubr.bf16.mxu1 %v857_v23  ;;  %v753_v18 = vmul.f32 %v1888_v19, %v2419_v46  ;;  %v795_v11 = vmul.f32 %v2501_v7, %v751_v50  ;;  %v752_v51 = vmul.f32 %v1888_v19, %v2415_v52  ;;  %v794_v10 = vmul.f32 %v2504_v57, %v750_v25 }
 0x17a   : > { %1217 = vmatmul.mubr.bf16.gmra.mxu1 %v856_v29  ;;  %v851_v45 = vpack.c.bf16 %v825_v34, %v823_v43  ;;  %v824_v49 = vadd.f32 %v2512_v17, %v780_v9  ;;  %v739_v38 = vmul.f32 %v1890_v41, %v2437_v60  ;;  %v738_v12 = vmul.f32 %v1890_v41, %v2433_v59 }
 0x17b   : > { %v1892_v13 = vpop.eup %1891  ;;  %v797_v33 = vmul.f32 %v2501_v7, %v753_v18  ;;  %v839_v42 = vadd.f32 %v2507_v54, %v795_v11  ;;  %v796_v46 = vmul.f32 %v2504_v57, %v752_v51  ;;  %v838_v44 = vadd.f32 %v2512_v17, %v794_v10 }
 0x17c   : > { %v1894_v52 = vpop.eup %1893  ;;  %1186 = vmatprep.mubr.bf16.mxu0 %v851_v45  ;;  %v850_v8 = vpack.c.bf16 %v824_v49, %v822_v6  ;;  %v741_v35 = vmul.f32 %v1892_v13, %v2445_v61  ;;  %v783_v3 = vmul.f32 %v2501_v7, %v739_v38  ;;  %v740_v60 = vmul.f32 %v1892_v13, %v2441_v55 }
 0x17d   : > { %v841_v59 = vadd.f32 %v2507_v54, %v797_v33  ;;  %v840_v2 = vadd.f32 %v2512_v17, %v796_v46  ;;  %v782_v32 = vmul.f32 %v2504_v57, %v738_v12  ;;  %v755_v36 = vmul.f32 %v1894_v52, %v2463_v4 }
 0x17e   : > { %1187 = vmatmul.mubr.bf16.gmra.mxu0 %v850_v8  ;;  %v785_v16 = vmul.f32 %v2501_v7, %v741_v35  ;;  %v827_v14 = vadd.f32 %v2507_v54, %v783_v3  ;;  %v784_v20 = vmul.f32 %v2504_v57, %v740_v60  ;;  %v754_v61 = vmul.f32 %v1894_v52, %v2459_v1 }
 0x17f   : > { %v1896_v15 = vpop.eup %1895  ;;  %v859_v21 = vpack.c.bf16 %v841_v59, %v839_v42  ;;  %v858_v55 = vpack.c.bf16 %v840_v2, %v838_v44  ;;  %v826_v0 = vadd.f32 %v2512_v17, %v782_v32  ;;  %v799_v37 = vmul.f32 %v2501_v7, %v755_v36 }
 0x180   : > { %v829_v62 = vadd.f32 %v2507_v54, %v785_v16  ;;  %v828_v4 = vadd.f32 %v2512_v17, %v784_v20  ;;  %v757_v31 = vmul.f32 %v1896_v15, %v2471_v5  ;;  %v756_v53 = vmul.f32 %v1896_v15, %v2467_v63 }
 0x181   : > { %1226 = vmatprep.mubr.bf16.mxu1 %v859_v21  ;;  %v798_v48 = vmul.f32 %v2504_v57, %v754_v61  ;;  %v843_v58 = vadd.f32 %v2507_v54, %v799_v37 }
 0x182   : > { %1227 = vmatmul.mubr.bf16.gmra.mxu1 %v858_v55  ;;  %v853_v1 = vpack.c.bf16 %v829_v62, %v827_v14  ;;  %v852_v40 = vpack.c.bf16 %v828_v4, %v826_v0  ;;  %v801_v30 = vmul.f32 %v2501_v7, %v757_v31  ;;  %v800_v26 = vmul.f32 %v2504_v57, %v756_v53  ;;  %v866_v7 = vld [vmem:[%s449_s25] sm:$0x3] }
 0x183   : > { %v842_v5 = vadd.f32 %v2512_v17, %v798_v48  ;;  %v2613_v57 = vrot.slane %v866_v7, %v2495_v47 }
 0x184   : > { %1196 = vmatprep.mubr.bf16.mxu0 %v853_v1  ;;  %v845_v56 = vadd.f32 %v2507_v54, %v801_v30  ;;  %v844_v63 = vadd.f32 %v2512_v17, %v800_v26  ;;  %v2616_v54 = vrot.slane %v866_v7, %v2490_v28 }
 0x186   : > { %1197 = vmatmul.mubr.bf16.gmra.mxu0 %v852_v40  ;;  %v861_v39 = vpack.c.bf16 %v845_v56, %v843_v58  ;;  %v860_v22 = vpack.c.bf16 %v844_v63, %v842_v5 }
 0x188   : > { %1236 = vmatprep.mubr.bf16.mxu1 %v861_v39 }
 0x18a   : > { %1237 = vmatmul.mubr.bf16.gmra.mxu1 %v860_v22 }
 0x22d   : > { %v1168_v17 = vpop.f32.mrf.mxu0 }
 0x22e   : > { %v1247_v24 = vadd.f32 %v1168_v17, %v2613_v57 }
 0x22f   : > { %v1170_v27 = vpop.f32.mrf.mxu0 }
 0x230   : > { %v1248_v19 = vadd.f32 %v1170_v27, %v2616_v54 }
 0x231   : > { %v1172_v23 = vpop.f32.mrf.mxu0 }
 0x232   : > { %v1728_v43 = vpack.c.bf16 %v1248_v19, %v1247_v24  ;;  %v1208_v50 = vpop.f32.mrf.mxu1  ;;  %v1249_v28 = vadd.f32 %v1172_v23, %v2613_v57 }
 0x233   : > { %v1174_v25 = vpop.f32.mrf.mxu0  ;;  %v1263_v29 = vadd.f32 %v1208_v50, %v2613_v57 }
 0x234   : > { %1442 = vst [vmem:[%s2622_s29] sm:$0xff] %v1728_v43  ;;  %v1250_v47 = vadd.f32 %v1174_v25, %v2616_v54  ;;  %v1210_v41 = vpop.f32.mrf.mxu1 }
 0x235   : > { %v1264_v34 = vadd.f32 %v1210_v41, %v2616_v54 }
 0x236   : > { %v1729_v9 = vpack.c.bf16 %v1250_v47, %v1249_v28  ;;  %v1178_v6 = vpop.f32.mrf.mxu0  ;;  %v1212_v18 = vpop.f32.mrf.mxu1 }
 0x237   : > { %v1736_v11 = vpack.c.bf16 %v1264_v34, %v1263_v29  ;;  %v1251_v45 = vadd.f32 %v1178_v6, %v2613_v57  ;;  %v1265_v49 = vadd.f32 %v1212_v18, %v2613_v57 }
 0x238   : > { %1443 = vst [vmem:[%s2622_s29 + $0x8] sm:$0xff] %v1729_v9  ;;  %v1180_v51 = vpop.f32.mrf.mxu0  ;;  %v1214_v10 = vpop.f32.mrf.mxu1 }
 0x239   : > { %1450 = vst [vmem:[%s2622_s29 + $0x40] sm:$0xff] %v1736_v11  ;;  %v1252_v38 = vadd.f32 %v1180_v51, %v2616_v54  ;;  %v1266_v12 = vadd.f32 %v1214_v10, %v2616_v54 }
 0x23a   : > { %v1182_v13 = vpop.f32.mrf.mxu0  ;;  %v1218_v33 = vpop.f32.mrf.mxu1 }
 0x23b   : > { %v1730_v42 = vpack.c.bf16 %v1252_v38, %v1251_v45  ;;  %v1737_v46 = vpack.c.bf16 %v1266_v12, %v1265_v49  ;;  %v1253_v8 = vadd.f32 %v1182_v13, %v2613_v57  ;;  %v1267_v35 = vadd.f32 %v1218_v33, %v2613_v57  ;;  %v1529_v10 = vld [vmem:[%s2622_s29] sm:$0xff] (%p2002_p6) }
 0x23c   : > { %v1184_v44 = vpop.f32.mrf.mxu0  ;;  %v1220_v52 = vpop.f32.mrf.mxu1  ;;  %1530 = vst [vmem:[%s1470_s7] sm:$0xff] (%p2002_p6), %v1529_v10 }
 0x23d   : > { %1444 = vst [vmem:[%s2622_s29 + $0x10] sm:$0xff] %v1730_v42  ;;  %1451 = vst [vmem:[%s2622_s29 + $0x48] sm:$0xff] %v1737_v46  ;;  %v1254_v3 = vadd.f32 %v1184_v44, %v2616_v54  ;;  %v1268_v60 = vadd.f32 %v1220_v52, %v2616_v54 }
 0x23e   : > { %v1188_v59 = vpop.f32.mrf.mxu0  ;;  %v1222_v2 = vpop.f32.mrf.mxu1 }
 0x23f   : > { %v1731_v32 = vpack.c.bf16 %v1254_v3, %v1253_v8  ;;  %v1738_v36 = vpack.c.bf16 %v1268_v60, %v1267_v35  ;;  %v1255_v20 = vadd.f32 %v1188_v59, %v2613_v57  ;;  %v1269_v61 = vadd.f32 %v1222_v2, %v2613_v57 }
 0x240   : > { %v1190_v16 = vpop.f32.mrf.mxu0  ;;  %v1224_v14 = vpop.f32.mrf.mxu1  ;;  %v1545_v33 = vld [vmem:[%s2622_s29 + $0x40] sm:$0xff] (%p2002_p6) }
 0x241   : > { %1445 = vst [vmem:[%s2622_s29 + $0x18] sm:$0xff] %v1731_v32  ;;  %1452 = vst [vmem:[%s2622_s29 + $0x50] sm:$0xff] %v1738_v36  ;;  %v1256_v15 = vadd.f32 %v1190_v16, %v2616_v54  ;;  %v1270_v21 = vadd.f32 %v1224_v14, %v2616_v54 }
 0x242   : > { %v1192_v55 = vpop.f32.mrf.mxu0  ;;  %v1228_v0 = vpop.f32.mrf.mxu1  ;;  %1546 = vst [vmem:[%s1470_s7 + $0xc0] sm:$0xff] (%p2002_p6), %v1545_v33 }
 0x243   : > { %v1732_v37 = vpack.c.bf16 %v1256_v15, %v1255_v20  ;;  %v1739_v62 = vpack.c.bf16 %v1270_v21, %v1269_v61  ;;  %v1257_v53 = vadd.f32 %v1192_v55, %v2613_v57  ;;  %v1271_v48 = vadd.f32 %v1228_v0, %v2613_v57 }
 0x244   : > { %v1194_v4 = vpop.f32.mrf.mxu0  ;;  %v1230_v31 = vpop.f32.mrf.mxu1  ;;  %v1533_v45 = vld [vmem:[%s2622_s29 + $0x10] sm:$0xff] (%p2002_p6)  ;;  %v1547_v42 = vld [vmem:[%s2622_s29 + $0x48] sm:$0xff] (%p2002_p6) }
 0x245   : > { %1446 = vst [vmem:[%s2622_s29 + $0x20] sm:$0xff] %v1732_v37  ;;  %1453 = vst [vmem:[%s2622_s29 + $0x58] sm:$0xff] %v1739_v62  ;;  %v1258_v1 = vadd.f32 %v1194_v4, %v2616_v54  ;;  %v1272_v40 = vadd.f32 %v1230_v31, %v2616_v54 }
 0x246   : > { %v1198_v30 = vpop.f32.mrf.mxu0  ;;  %v1232_v26 = vpop.f32.mrf.mxu1  ;;  %1534 = vst [vmem:[%s1470_s7 + $0x30] sm:$0xff] (%p2002_p6), %v1533_v45  ;;  %1548 = vst [vmem:[%s1470_s7 + $0xd8] sm:$0xff] (%p2002_p6), %v1547_v42 }
 0x247   : > { %v1733_v58 = vpack.c.bf16 %v1258_v1, %v1257_v53  ;;  %v1740_v56 = vpack.c.bf16 %v1272_v40, %v1271_v48  ;;  %v1259_v39 = vadd.f32 %v1198_v30, %v2613_v57  ;;  %v1273_v22 = vadd.f32 %v1232_v26, %v2613_v57 }
 0x248   : > { %v1200_v5 = vpop.f32.mrf.mxu0  ;;  %v1234_v63 = vpop.f32.mrf.mxu1  ;;  %v1549_v46 = vld [vmem:[%s2622_s29 + $0x50] sm:$0xff] (%p2002_p6) }
 0x249   : > { %1447 = vst [vmem:[%s2622_s29 + $0x28] sm:$0xff] %v1733_v58  ;;  %1454 = vst [vmem:[%s2622_s29 + $0x60] sm:$0xff] %v1740_v56  ;;  %v1260_v7 = vadd.f32 %v1200_v5, %v2616_v54  ;;  %v1274_v17 = vadd.f32 %v1234_v63, %v2616_v54 }
 0x24a   : > { %v1202_v27 = vpop.f32.mrf.mxu0  ;;  %v1238_v24 = vpop.f32.mrf.mxu1  ;;  %1550 = vst [vmem:[%s1470_s7 + $0xf0] sm:$0xff] (%p2002_p6), %v1549_v46 }
 0x24b   : > { %v1734_v19 = vpack.c.bf16 %v1260_v7, %v1259_v39  ;;  %v1741_v23 = vpack.c.bf16 %v1274_v17, %v1273_v22  ;;  %v1261_v25 = vadd.f32 %v1202_v27, %v2613_v57  ;;  %v1275_v28 = vadd.f32 %v1238_v24, %v2613_v57 }
 0x24c   : > { %v1204_v43 = vpop.f32.mrf.mxu0  ;;  %v1240_v50 = vpop.f32.mrf.mxu1  ;;  %v1537_v49 = vld [vmem:[%s2622_s29 + $0x20] sm:$0xff] (%p2002_p6)  ;;  %v1551_v44 = vld [vmem:[%s2622_s29 + $0x58] sm:$0xff] (%p2002_p6) }
 0x24d   : > { %1448 = vst [vmem:[%s2622_s29 + $0x30] sm:$0xff] %v1734_v19  ;;  %1455 = vst [vmem:[%s2622_s29 + $0x68] sm:$0xff] %v1741_v23  ;;  %v1262_v47 = vadd.f32 %v1204_v43, %v2616_v54  ;;  %v1276_v41 = vadd.f32 %v1240_v50, %v2616_v54 }
 0x24e   : > { %v1242_v29 = vpop.f32.mrf.mxu1  ;;  %1538 = vst [vmem:[%s1470_s7 + $0x60] sm:$0xff] (%p2002_p6), %v1537_v49  ;;  %1552 = vst [vmem:[%s1470_s7 + $0x108] sm:$0xff] (%p2002_p6), %v1551_v44 }
 0x24f   : > { %v1735_v34 = vpack.c.bf16 %v1262_v47, %v1261_v25  ;;  %v1742_v9 = vpack.c.bf16 %v1276_v41, %v1275_v28  ;;  %v1277_v18 = vadd.f32 %v1242_v29, %v2613_v57  ;;  %v1531_v57 = vld [vmem:[%s2622_s29 + $0x8] sm:$0xff] (%p2002_p6) }
 0x250   : > { %v1244_v6 = vpop.f32.mrf.mxu1  ;;  %v1539_v38 = vld [vmem:[%s2622_s29 + $0x28] sm:$0xff] (%p2002_p6)  ;;  %1532 = vst [vmem:[%s1470_s7 + $0x18] sm:$0xff] (%p2002_p6), %v1531_v57  ;;  %v1553_v52 = vld [vmem:[%s2622_s29 + $0x60] sm:$0xff] (%p2002_p6) }
 0x251   : > { %1449 = vst [vmem:[%s2622_s29 + $0x38] sm:$0xff] %v1735_v34  ;;  %1456 = vst [vmem:[%s2622_s29 + $0x70] sm:$0xff] %v1742_v9  ;;  %v1278_v11 = vadd.f32 %v1244_v6, %v2616_v54  ;;  %1464 = sbr.rel (!%p2002_p6) target bundleno = 606 (0x25e), region = 90  ;;  %v1535_v54 = vld [vmem:[%s2622_s29 + $0x18] sm:$0xff] (%p2002_p6) }
 0x252   : > { %1536 = vst [vmem:[%s1470_s7 + $0x48] sm:$0xff] (%p2002_p6), %v1535_v54  ;;  %1540 = vst [vmem:[%s1470_s7 + $0x78] sm:$0xff] (%p2002_p6), %v1539_v38 }
 0x253   : > { %v1743_v51 = vpack.c.bf16 %v1278_v11, %v1277_v18  ;;  %1554 = vst [vmem:[%s1470_s7 + $0x120] sm:$0xff] (%p2002_p6), %v1553_v52 }
 0x254   : > { %v1541_v12 = vld [vmem:[%s2622_s29 + $0x30] sm:$0xff] (%p2002_p6)  ;;  %v1555_v8 = vld [vmem:[%s2622_s29 + $0x68] sm:$0xff] (%p2002_p6) }
 0x255   : > { %1457 = vst [vmem:[%s2622_s29 + $0x78] sm:$0xff] %v1743_v51  ;;  %1542 = vst [vmem:[%s1470_s7 + $0x90] sm:$0xff] (%p2002_p6), %v1541_v12 }
 0x256   : > { %1556 = vst [vmem:[%s1470_s7 + $0x138] sm:$0xff] %v1555_v8 }
 0x258   : > { %v1543_v13 = vld [vmem:[%s2622_s29 + $0x38] sm:$0xff]  ;;  %v1557_v35 = vld [vmem:[%s2622_s29 + $0x70] sm:$0xff] }
 0x259   : > { %1544 = vst [vmem:[%s1470_s7 + $0xa8] sm:$0xff] %v1543_v13  ;;  %1558 = vst [vmem:[%s1470_s7 + $0x150] sm:$0xff] %v1557_v35 }
 0x25c   : > { %v1559_v3 = vld [vmem:[%s2622_s29 + $0x78] sm:$0xff] }
 0x25d   : > { %1560 = vst [vmem:[%s1470_s7 + $0x168] sm:$0xff] %v1559_v3 }
 0x25e PF: > { %s15_s22 = sadd.s32 1, %s1935_s22   ;;  %s2714_s18 = smov %s1923_s19 }
 0x25f   : > { %p12_p12 = scmp.ge.s32.totalorder %s15_s22, 5   ;;  %s2715_s19 = smov %s2007_s28 }
 0x260   : > { %s2716_s20 = smov %s1931_s21  ;;  %s2717_s21 = smov %s2719_s23 }
 0x261   :  { %14 = sbr.rel (!%p12_p12) target bundleno = 3 (0x3), region = 165 }

// kernel: vision_transformer_3d.15
= control target key start
LH: loop header
LB: loop body
LE: loop exit
PB: predicated region body
PF: predicated region fallthrough
CT: control target
= control target key end

     0   :  { %s1743_s15 = smov 0   ;;  %s1745_s16 = smov 0   ;;  %s2047_s0 = inlined_call_operand.vmem [shape: bf16[128,256], index: 0, kind: input, shape index: {}]   ;;  %s2048_s1 = inlined_call_operand.vmem [shape: bf16[256,256], index: 1, kind: input, shape index: {}]   ;;  %s2049_s2 = inlined_call_operand.vmem [shape: f32[1,256], index: 2, kind: input, shape index: {}]   ;;  %s2050_s3 = inlined_call_operand.vmem [shape: bf16[128,256], index: 3, kind: input, shape index: {}]   ;;  %s2051_s4 = inlined_call_operand.vmem [shape: bf16[128,256], index: 4, kind: output, shape index: {}]  }
   0x1   :  { %s1747_s17 = smov 0   ;;  %s1749_s18 = smov 0  }
   0x2   :  { %s1751_s19 = smov 0  }
   0x3 LB: > { %s29_s20 = sadd.s32 1, %s1712_s18  ;;  %s1350_s21 = sadd.s32 4294967295, %s1716_s19   ;;  %s1716_s19 = sphi %s1751_s19, %s14_s19   ;;  %s1712_s18 = sphi %s1749_s18, %s2057_s18   ;;  %s1708_s17 = sphi %s1747_s17, %s2056_s17   ;;  %s1704_s16 = sphi %s1745_s16, %s2055_s16   ;;  %s1700_s15 = sphi %s1743_s15, %s2054_s15  }
   0x4   : > { %p31_p0 = scmp.ge.s32.totalorder %s29_s20, 2  ;;  %p77_p1 = scmp.ne.s32.totalorder %s1704_s16, %s1700_s15 }
   0x5   : > { %p78_p2 = scmp.eq.s32.totalorder %s1716_s19, 0  ;;  %p163_p4 = scmp.eq.s32.totalorder %s1350_s21, 1 }
   0x6   : > { %s2059_s20 = smov (%p31_p0, %s29_s20), 0  ;;  %s70_s24 = sadd.s32 1, %s1704_s16 }
   0x7   : > { %p1775_p3 = por %p78_p2, %p77_p1  ;;  %s66_s23 = ssub.s32 %s1712_s18, %s2059_s20 }
   0x8   : > { %p68_p5 = scmp.eq.s32.totalorder %s66_s23, 0  ;;  %p1782_p6 = por %p163_p4, %p77_p1 }
   0x9   : > { %p1354_p7 = scmp.ge.s32.totalorder %s1716_s19, 2 }
   0xa   : > { %s1787_s26 = scalar_select %p68_p5, %s1704_s16, %s70_s24  }
   0xb   : > { %200 = sbr.rel (%p1354_p7) target bundleno = 55 (0x37), region = 20 }
  0x10   : > { %203 = sbr.rel (!%p1775_p3) target bundleno = 41 (0x29), region = 24  ;;  %s205_s27 = sand.u32 (%p1775_p3), 1, %s1704_s16  }
  0x11   : > { %s1356_s28 = sshll.u32 (%p1775_p3), %s1712_s18, 2  ;;  %s1355_s29 = sshll.u32 (%p1775_p3), %s205_s27, 7 }
  0x12   : > { %s1797_s6 = scalar_lea.vmem (%p1775_p3), %s2048_s1, %s1356_s28  ;;  %s1801_s7 = scalar_lea.vmem (%p1775_p3), [#allocation3], %s1355_s29 }
  0x13   : > { %v229_v0 = vld [vmem:[%s1797_s6] sm:$0xf] (%p1775_p3)  ;;  %v231_v1 = vld [vmem:[%s1797_s6 + $0x8] sm:$0xf] (%p1775_p3)  ;;  %v233_v2 = vld [vmem:[%s1797_s6 + $0x10] sm:$0xf] (%p1775_p3) }
  0x14   : > { %230 = vst [vmem:[%s1801_s7] sm:$0xf] (%p1775_p3), %v229_v0  ;;  %232 = vst [vmem:[%s1801_s7 + $0x4] sm:$0xf] (%p1775_p3), %v231_v1  ;;  %v235_v3 = vld [vmem:[%s1797_s6 + $0x18] sm:$0xf] (%p1775_p3) }
  0x15   : > { %v237_v4 = vld [vmem:[%s1797_s6 + $0x20] sm:$0xf]  ;;  %234 = vst [vmem:[%s1801_s7 + $0x8] sm:$0xf] %v233_v2  ;;  %236 = vst [vmem:[%s1801_s7 + $0xc] sm:$0xf] %v235_v3 }
  0x16   : > { %238 = vst [vmem:[%s1801_s7 + $0x10] sm:$0xf] %v237_v4  ;;  %v239_v5 = vld [vmem:[%s1797_s6 + $0x28] sm:$0xf]  ;;  %v241_v6 = vld [vmem:[%s1797_s6 + $0x30] sm:$0xf] }
  0x17   : > { %v243_v7 = vld [vmem:[%s1797_s6 + $0x38] sm:$0xf]  ;;  %240 = vst [vmem:[%s1801_s7 + $0x14] sm:$0xf] %v239_v5  ;;  %242 = vst [vmem:[%s1801_s7 + $0x18] sm:$0xf] %v241_v6 }
  0x18   : > { %244 = vst [vmem:[%s1801_s7 + $0x1c] sm:$0xf] %v243_v7  ;;  %v245_v8 = vld [vmem:[%s1797_s6 + $0x40] sm:$0xf]  ;;  %v247_v9 = vld [vmem:[%s1797_s6 + $0x48] sm:$0xf] }
  0x19   : > { %v249_v10 = vld [vmem:[%s1797_s6 + $0x50] sm:$0xf]  ;;  %246 = vst [vmem:[%s1801_s7 + $0x20] sm:$0xf] %v245_v8  ;;  %248 = vst [vmem:[%s1801_s7 + $0x24] sm:$0xf] %v247_v9 }
  0x1a   : > { %250 = vst [vmem:[%s1801_s7 + $0x28] sm:$0xf] %v249_v10  ;;  %v251_v11 = vld [vmem:[%s1797_s6 + $0x58] sm:$0xf]  ;;  %v253_v12 = vld [vmem:[%s1797_s6 + $0x60] sm:$0xf] }
  0x1b   : > { %v255_v13 = vld [vmem:[%s1797_s6 + $0x68] sm:$0xf]  ;;  %252 = vst [vmem:[%s1801_s7 + $0x2c] sm:$0xf] %v251_v11  ;;  %254 = vst [vmem:[%s1801_s7 + $0x30] sm:$0xf] %v253_v12 }
  0x1c   : > { %256 = vst [vmem:[%s1801_s7 + $0x34] sm:$0xf] %v255_v13  ;;  %v257_v14 = vld [vmem:[%s1797_s6 + $0x70] sm:$0xf]  ;;  %v259_v15 = vld [vmem:[%s1797_s6 + $0x78] sm:$0xf] }
  0x1d   : > { %v261_v16 = vld [vmem:[%s1797_s6 + $0x80] sm:$0xf]  ;;  %258 = vst [vmem:[%s1801_s7 + $0x38] sm:$0xf] %v257_v14  ;;  %260 = vst [vmem:[%s1801_s7 + $0x3c] sm:$0xf] %v259_v15 }
  0x1e   : > { %262 = vst [vmem:[%s1801_s7 + $0x40] sm:$0xf] %v261_v16  ;;  %v263_v17 = vld [vmem:[%s1797_s6 + $0x88] sm:$0xf]  ;;  %v265_v18 = vld [vmem:[%s1797_s6 + $0x90] sm:$0xf] }
  0x1f   : > { %v267_v19 = vld [vmem:[%s1797_s6 + $0x98] sm:$0xf]  ;;  %264 = vst [vmem:[%s1801_s7 + $0x44] sm:$0xf] %v263_v17  ;;  %266 = vst [vmem:[%s1801_s7 + $0x48] sm:$0xf] %v265_v18 }
  0x20   : > { %268 = vst [vmem:[%s1801_s7 + $0x4c] sm:$0xf] %v267_v19  ;;  %v269_v20 = vld [vmem:[%s1797_s6 + $0xa0] sm:$0xf]  ;;  %v271_v21 = vld [vmem:[%s1797_s6 + $0xa8] sm:$0xf] }
  0x21   : > { %v273_v22 = vld [vmem:[%s1797_s6 + $0xb0] sm:$0xf]  ;;  %270 = vst [vmem:[%s1801_s7 + $0x50] sm:$0xf] %v269_v20  ;;  %272 = vst [vmem:[%s1801_s7 + $0x54] sm:$0xf] %v271_v21 }
  0x22   : > { %274 = vst [vmem:[%s1801_s7 + $0x58] sm:$0xf] %v273_v22  ;;  %v275_v23 = vld [vmem:[%s1797_s6 + $0xb8] sm:$0xf]  ;;  %v277_v24 = vld [vmem:[%s1797_s6 + $0xc0] sm:$0xf] }
  0x23   : > { %v279_v25 = vld [vmem:[%s1797_s6 + $0xc8] sm:$0xf]  ;;  %276 = vst [vmem:[%s1801_s7 + $0x5c] sm:$0xf] %v275_v23  ;;  %278 = vst [vmem:[%s1801_s7 + $0x60] sm:$0xf] %v277_v24 }
  0x24   : > { %280 = vst [vmem:[%s1801_s7 + $0x64] sm:$0xf] %v279_v25  ;;  %v281_v26 = vld [vmem:[%s1797_s6 + $0xd0] sm:$0xf]  ;;  %v283_v27 = vld [vmem:[%s1797_s6 + $0xd8] sm:$0xf] }
  0x25   : > { %v285_v28 = vld [vmem:[%s1797_s6 + $0xe0] sm:$0xf]  ;;  %282 = vst [vmem:[%s1801_s7 + $0x68] sm:$0xf] %v281_v26  ;;  %284 = vst [vmem:[%s1801_s7 + $0x6c] sm:$0xf] %v283_v27 }
  0x26   : > { %286 = vst [vmem:[%s1801_s7 + $0x70] sm:$0xf] %v285_v28  ;;  %v287_v29 = vld [vmem:[%s1797_s6 + $0xe8] sm:$0xf]  ;;  %v289_v30 = vld [vmem:[%s1797_s6 + $0xf0] sm:$0xf] }
  0x27   : > { %v291_v31 = vld [vmem:[%s1797_s6 + $0xf8] sm:$0xf]  ;;  %288 = vst [vmem:[%s1801_s7 + $0x74] sm:$0xf] %v287_v29  ;;  %290 = vst [vmem:[%s1801_s7 + $0x78] sm:$0xf] %v289_v30 }
  0x28   : > { %292 = vst [vmem:[%s1801_s7 + $0x7c] sm:$0xf] %v291_v31 }
  0x29 PF: > { %386 = sbr.rel (!%p1775_p3) target bundleno = 55 (0x37), region = 69  ;;  %s388_s8 = sand.u32 (%p1775_p3), 1, %s1704_s16  }
  0x2a   : > { %s1358_s9 = sshll.u32 (%p1775_p3), %s1712_s18, 2  ;;  %s1357_s10 = sshll.u32 (%p1775_p3), %s388_s8, 6 }
  0x2b   : > { %s1872_s13 = scalar_lea.vmem (%p1775_p3), %s2050_s3, %s1358_s9  ;;  %s390_s14 = scalar_lea.vmem (%p1775_p3), [#allocation4], %s1357_s10 }
  0x2c   : > { %v412_v32 = vld [vmem:[%s1872_s13] sm:$0xf] (%p1775_p3)  ;;  %v414_v33 = vld [vmem:[%s1872_s13 + $0x8] sm:$0xf] (%p1775_p3)  ;;  %v416_v34 = vld [vmem:[%s1872_s13 + $0x10] sm:$0xf] (%p1775_p3) }
  0x2d   : > { %413 = vst [vmem:[%s390_s14] sm:$0xf] (%p1775_p3), %v412_v32  ;;  %415 = vst [vmem:[%s390_s14 + $0x4] sm:$0xf] (%p1775_p3), %v414_v33  ;;  %v418_v35 = vld [vmem:[%s1872_s13 + $0x18] sm:$0xf] (%p1775_p3) }
  0x2e   : > { %v420_v36 = vld [vmem:[%s1872_s13 + $0x20] sm:$0xf]  ;;  %417 = vst [vmem:[%s390_s14 + $0x8] sm:$0xf] %v416_v34  ;;  %419 = vst [vmem:[%s390_s14 + $0xc] sm:$0xf] %v418_v35 }
  0x2f   : > { %421 = vst [vmem:[%s390_s14 + $0x10] sm:$0xf] %v420_v36  ;;  %v422_v37 = vld [vmem:[%s1872_s13 + $0x28] sm:$0xf]  ;;  %v424_v38 = vld [vmem:[%s1872_s13 + $0x30] sm:$0xf] }
  0x30   : > { %v426_v39 = vld [vmem:[%s1872_s13 + $0x38] sm:$0xf]  ;;  %423 = vst [vmem:[%s390_s14 + $0x14] sm:$0xf] %v422_v37  ;;  %425 = vst [vmem:[%s390_s14 + $0x18] sm:$0xf] %v424_v38 }
  0x31   : > { %427 = vst [vmem:[%s390_s14 + $0x1c] sm:$0xf] %v426_v39  ;;  %v428_v40 = vld [vmem:[%s1872_s13 + $0x40] sm:$0xf]  ;;  %v430_v41 = vld [vmem:[%s1872_s13 + $0x48] sm:$0xf] }
  0x32   : > { %v432_v42 = vld [vmem:[%s1872_s13 + $0x50] sm:$0xf]  ;;  %429 = vst [vmem:[%s390_s14 + $0x20] sm:$0xf] %v428_v40  ;;  %431 = vst [vmem:[%s390_s14 + $0x24] sm:$0xf] %v430_v41 }
  0x33   : > { %433 = vst [vmem:[%s390_s14 + $0x28] sm:$0xf] %v432_v42  ;;  %v434_v43 = vld [vmem:[%s1872_s13 + $0x58] sm:$0xf]  ;;  %v436_v44 = vld [vmem:[%s1872_s13 + $0x60] sm:$0xf] }
  0x34   : > { %v438_v45 = vld [vmem:[%s1872_s13 + $0x68] sm:$0xf]  ;;  %435 = vst [vmem:[%s390_s14 + $0x2c] sm:$0xf] %v434_v43  ;;  %437 = vst [vmem:[%s390_s14 + $0x30] sm:$0xf] %v436_v44 }
  0x35   : > { %439 = vst [vmem:[%s390_s14 + $0x34] sm:$0xf] %v438_v45  ;;  %v440_v46 = vld [vmem:[%s1872_s13 + $0x70] sm:$0xf]  ;;  %v442_v47 = vld [vmem:[%s1872_s13 + $0x78] sm:$0xf] }
  0x36   : > { %441 = vst [vmem:[%s390_s14 + $0x38] sm:$0xf] %v440_v46  ;;  %443 = vst [vmem:[%s390_s14 + $0x3c] sm:$0xf] %v442_v47 }
  0x37 PF: > { %p1359_p8 = scmp.ge.s32.totalorder %s1716_s19, 1  ;;  %p498_p9 = scmp.lt.s32.totalorder %s1716_s19, 3 }
  0x39   : > { %p499_p10 = pnand %p1359_p8, %p498_p9 }
  0x3a   : > { %s505_s21 = sand.u32 (!%p499_p10), 1, %s1700_s15   ;;  %p566_p11 = scmp.lt.s32.totalorder (!%p499_p10), %s1708_s17, 1 }
  0x3b   : > { %502 = sbr.rel (%p499_p10) target bundleno = 340 (0x154), region = 110  ;;  %s1360_s22 = sshll.u32 (!%p499_p10), %s505_s21, 7 }
  0x3c   : > { %s1901_s29 = scalar_lea.vmem (!%p499_p10), [#allocation3], %s1360_s22  ;;  %s1965_s23 = sshll.u32 (!%p499_p10), %s505_s21, 6 }
  0x3d   : > { %s1986_s15 = scalar_lea.vmem (!%p499_p10), [#allocation5], %s1965_s23 }
  0x40   : > { %v1656_v48 = vld [vmem:[%s2047_s0 + $0x4] ss:$8 sps:$4 sm:$0xff]   ;;  %v1638_v50 = vld [vmem:[%s1901_s29 + $0x78] sm:$0xff]   ;;  %v1640_v52 = vld [vmem:[%s1901_s29 + $0x70] sm:$0xff]   ;;  %s567_s22 = scalar_select %p566_p11, %s1708_s17, 1 }
  0x41   : > { %v1659_v49 = vld [vmem:[%s2047_s0 + $0x44] ss:$8 sps:$4 sm:$0xff]   ;;  %871 = vmatprep.mubr.bf16.mxu0 %v1656_v48  ;;  %v1639_v51 = vld [vmem:[%s1901_s29 + $0x38] sm:$0xff]   ;;  %1518 = vmatprep.subr.bf16.mxu0 %v1638_v50  ;;  %v1641_v53 = vld [vmem:[%s1901_s29 + $0x30] sm:$0xff]   ;;  %s1413_s21 = sshll.u32 (%p1782_p6), %s1708_s17, 2 }
  0x42   : > { %903 = vmatprep.mubr.bf16.mxu1 %v1659_v49  ;;  %1582 = vmatprep.subr.bf16.mxu1 %v1638_v50  ;;  %v1642_v54 = vld [vmem:[%s1901_s29 + $0x68] sm:$0xff]   ;;  %v1644_v56 = vld [vmem:[%s1901_s29 + $0x60] sm:$0xff]   ;;  %v1646_v58 = vld [vmem:[%s1901_s29 + $0x58] sm:$0xff]   ;;  %s568_s28 = scalar_lea.vmem %s2049_s2, %s567_s22  ;;  %s1126_s6 = scalar_lea.vmem (%p1782_p6), %s2051_s4, %s1413_s21 }
  0x43   : > { %1519 = vmatpush3.bf16.msra.mxu0 %v1639_v51  ;;  %1590 = vmatpush3.bf16.msra.mxu1 %v1639_v51  ;;  %v1643_v55 = vld [vmem:[%s1901_s29 + $0x28] sm:$0xff]   ;;  %v1645_v57 = vld [vmem:[%s1901_s29 + $0x20] sm:$0xff]   ;;  %v1647_v59 = vld [vmem:[%s1901_s29 + $0x18] sm:$0xff]  }
  0x44   : > { %1520 = vmatprep.subr.bf16.mxu0 %v1640_v52  ;;  %1583 = vmatprep.subr.bf16.mxu1 %v1640_v52  ;;  %v1648_v60 = vld [vmem:[%s1901_s29 + $0x50] sm:$0xff]   ;;  %v1650_v62 = vld [vmem:[%s1901_s29 + $0x48] sm:$0xff]   ;;  %v1652_v0 = vld [vmem:[%s1901_s29 + $0x40] sm:$0xff]  }
  0x45   : > { %v1649_v61 = vld [vmem:[%s1901_s29 + $0x10] sm:$0xff]   ;;  %v1651_v63 = vld [vmem:[%s1901_s29 + $0x8] sm:$0xff]   ;;  %v1653_v1 = vld [vmem:[%s1901_s29] sm:$0xff]   ;;  %s1973_s29 = scalar_lea.vmem [#allocation4], %s1965_s23 }
  0x46   : > { %v1654_v2 = vld [vmem:[%s2047_s0] ss:$8 sps:$4 sm:$0xff]   ;;  %v1660_v4 = vld [vmem:[%s2047_s0 + $0x14] ss:$8 sps:$4 sm:$0xff]   ;;  %v1664_v6 = vld [vmem:[%s2047_s0 + $0x10] ss:$8 sps:$4 sm:$0xff]  }
  0x47   : > { %1521 = vmatpush3.bf16.msra.mxu0 %v1641_v53  ;;  %1591 = vmatpush3.bf16.msra.mxu1 %v1641_v53  ;;  %v1657_v3 = vld [vmem:[%s2047_s0 + $0x40] ss:$8 sps:$4 sm:$0xff]   ;;  %v1662_v5 = vld [vmem:[%s2047_s0 + $0x54] ss:$8 sps:$4 sm:$0xff]   ;;  %v1665_v7 = vld [vmem:[%s2047_s0 + $0x50] ss:$8 sps:$4 sm:$0xff]  }
  0x48   : > { %1522 = vmatprep.subr.bf16.mxu0 %v1642_v54  ;;  %1584 = vmatprep.subr.bf16.mxu1 %v1642_v54  ;;  %v1666_v8 = vld [vmem:[%s2047_s0 + $0x24] ss:$8 sps:$4 sm:$0xff]   ;;  %v1670_v10 = vld [vmem:[%s2047_s0 + $0x20] ss:$8 sps:$4 sm:$0xff]   ;;  %v1672_v12 = vld [vmem:[%s2047_s0 + $0x34] ss:$8 sps:$4 sm:$0xff]  }
  0x49   : > { %v1668_v9 = vld [vmem:[%s2047_s0 + $0x64] ss:$8 sps:$4 sm:$0xff]   ;;  %v1671_v11 = vld [vmem:[%s2047_s0 + $0x60] ss:$8 sps:$4 sm:$0xff]   ;;  %v1674_v13 = vld [vmem:[%s2047_s0 + $0x74] ss:$8 sps:$4 sm:$0xff]  }
  0x4a   : > { %v1676_v14 = vld [vmem:[%s2047_s0 + $0x30] ss:$8 sps:$4 sm:$0xff]   ;;  %v1970_v20 = vld [vmem:[%s568_s28] ss:$0 sm:$0xff]  ;;  %v1504_v48 = vld [vmem:[%s1973_s29 + $0x8] sm:$0xff]  }
  0x4b   : > { %1523 = vmatpush3.bf16.msra.mxu0 %v1643_v55  ;;  %1592 = vmatpush3.bf16.msra.mxu1 %v1643_v55  ;;  %v1677_v15 = vld [vmem:[%s2047_s0 + $0x70] ss:$8 sps:$4 sm:$0xff]   ;;  %v1433_v22 = vld [vmem:[%s1973_s29] sm:$0xff]   ;;  %v1508_v50 = vld [vmem:[%s1973_s29 + $0x28] sm:$0xff]  }
  0x4c   : > { %1524 = vmatprep.subr.bf16.mxu0 %v1644_v56  ;;  %1585 = vmatprep.subr.bf16.mxu1 %v1644_v56  ;;  %v1507_v24 = vld [vmem:[%s1973_s29 + $0x20] sm:$0xff]   ;;  %v1434_v28 = vunpack.c.l.bf16 %v1433_v22  ;;  %v1435_v34 = vunpack.c.h.bf16 %v1433_v22  ;;  %v1438_v56 = vunpack.c.l.bf16 %v1504_v48 }
  0x4d   : > { %v1450_v30 = vunpack.c.l.bf16 %v1507_v24  ;;  %v1451_v36 = vunpack.c.h.bf16 %v1507_v24 }
  0x4f   : > { %1525 = vmatpush3.bf16.msra.mxu0 %v1645_v57  ;;  %1593 = vmatpush3.bf16.msra.mxu1 %v1645_v57 }
  0x50   : > { %1526 = vmatprep.subr.bf16.mxu0 %v1646_v58  ;;  %1586 = vmatprep.subr.bf16.mxu1 %v1646_v58  ;;  %v1454_v58 = vunpack.c.l.bf16 %v1508_v50 }
  0x53   : > { %1527 = vmatpush3.bf16.msra.mxu0 %v1647_v59  ;;  %1594 = vmatpush3.bf16.msra.mxu1 %v1647_v59 }
  0x54   : > { %1528 = vmatprep.subr.bf16.mxu0 %v1648_v60  ;;  %1587 = vmatprep.subr.bf16.mxu1 %v1648_v60 }
  0x57   : > { %1529 = vmatpush3.bf16.msra.mxu0 %v1649_v61  ;;  %1595 = vmatpush3.bf16.msra.mxu1 %v1649_v61 }
  0x58   : > { %1530 = vmatprep.subr.bf16.mxu0 %v1650_v62  ;;  %1588 = vmatprep.subr.bf16.mxu1 %v1650_v62  ;;  %v1439_v62 = vunpack.c.h.bf16 %v1504_v48 }
  0x5b   : > { %1531 = vmatpush3.bf16.msra.mxu0 %v1651_v63  ;;  %1596 = vmatpush3.bf16.msra.mxu1 %v1651_v63 }
  0x5c   : > { %1532 = vmatprep.subr.bf16.mxu0 %v1652_v0  ;;  %1589 = vmatprep.subr.bf16.mxu1 %v1652_v0  ;;  %v1455_v0 = vunpack.c.h.bf16 %v1508_v50 }
  0x5f   : > { %1533 = vmatpush3.bf16.msra.mxu0 %v1653_v1  ;;  %1597 = vmatpush3.bf16.msra.mxu1 %v1653_v1 }
  0x62   : > { %872 = vmatmul.mubr.bf16.vlgmr.msra.gmra.mxu0 %v1654_v2  ;;  %904 = vmatmul.mubr.bf16.vlgmr.msra.gmra.mxu1 %v1657_v3 }
  0x63   : > { %879 = vmatprep.mubr.bf16.mxu0 %v1660_v4  ;;  %911 = vmatprep.mubr.bf16.mxu1 %v1662_v5 }
  0x6a   : > { %880 = vmatmul.mubr.bf16.gmra.mxu0 %v1664_v6  ;;  %912 = vmatmul.mubr.bf16.gmra.mxu1 %v1665_v7 }
  0x6b   : > { %887 = vmatprep.mubr.bf16.mxu0 %v1666_v8  ;;  %919 = vmatprep.mubr.bf16.mxu1 %v1668_v9 }
  0x72   : > { %888 = vmatmul.mubr.bf16.gmra.mxu0 %v1670_v10  ;;  %920 = vmatmul.mubr.bf16.gmra.mxu1 %v1671_v11 }
  0x73   : > { %895 = vmatprep.mubr.bf16.mxu0 %v1672_v12  ;;  %927 = vmatprep.mubr.bf16.mxu1 %v1674_v13  ;;  %v1505_v12 = vld [vmem:[%s1973_s29 + $0x10] sm:$0xff]  }
  0x7a   : > { %896 = vmatmul.mubr.bf16.gmra.mxu0 %v1676_v14  ;;  %928 = vmatmul.mubr.bf16.gmra.mxu1 %v1677_v15  ;;  %v1509_v14 = vld [vmem:[%s1973_s29 + $0x30] sm:$0xff]  }
 0x122   : > { %v1534_v16 = vpop.f32.mrf.mxu0  ;;  %v1558_v17 = vpop.f32.mrf.mxu1 }
 0x124   : > { %v1535_v18 = vpop.f32.mrf.mxu0  ;;  %v1559_v19 = vpop.f32.mrf.mxu1 }
 0x125   : > { %v1536_v21 = vadd.f32 %v1535_v18, %v1534_v16  ;;  %v1560_v23 = vadd.f32 %v1559_v19, %v1558_v17 }
 0x126   : > { %v1537_v25 = vpop.f32.mrf.mxu0  ;;  %v1561_v26 = vpop.f32.mrf.mxu1 }
 0x127   : > { %v936_v27 = vadd.f32 %v1536_v21, %v1970_v20  ;;  %v944_v29 = vadd.f32 %v1560_v23, %v1970_v20  ;;  %v1442_v21 = vunpack.c.l.bf16 %v1505_v12  ;;  %v1458_v23 = vunpack.c.l.bf16 %v1509_v14 }
 0x128   : > { %v1538_v31 = vpop.f32.mrf.mxu0  ;;  %v1562_v32 = vpop.f32.mrf.mxu1 }
 0x129   : > { %v1539_v33 = vadd.f32 %v1538_v31, %v1537_v25  ;;  %v1563_v35 = vadd.f32 %v1562_v32, %v1561_v26  ;;  %v1019_v41 = vadd.f32 %v1434_v28, %v936_v27  ;;  %v1027_v42 = vadd.f32 %v1450_v30, %v944_v29 }
 0x12a   : > { %v1540_v37 = vpop.f32.mrf.mxu0  ;;  %v1564_v38 = vpop.f32.mrf.mxu1  ;;  %v1443_v27 = vunpack.c.h.bf16 %v1505_v12  ;;  %v1459_v29 = vunpack.c.h.bf16 %v1509_v14 }
 0x12b   : > { %v937_v39 = vadd.f32 %v1539_v33, %v1970_v20  ;;  %v945_v40 = vadd.f32 %v1563_v35, %v1970_v20 }
 0x12c   : > { %v1541_v43 = vpop.f32.mrf.mxu0  ;;  %v1565_v44 = vpop.f32.mrf.mxu1 }
 0x12d   : > { %v1020_v45 = vadd.f32 %v1435_v34, %v937_v39  ;;  %v1028_v46 = vadd.f32 %v1451_v36, %v945_v40  ;;  %v1542_v47 = vadd.f32 %v1541_v43, %v1540_v37  ;;  %v1566_v49 = vadd.f32 %v1565_v44, %v1564_v38  ;;  %v1510_v43 = vld [vmem:[%s1973_s29 + $0x38] sm:$0xff]  }
 0x12e   : > { %v1543_v51 = vpop.f32.mrf.mxu0  ;;  %v1567_v52 = vpop.f32.mrf.mxu1 }
 0x12f   : > { %v1467_v53 = vpack.c.bf16 %v1020_v45, %v1019_v41  ;;  %v1487_v54 = vpack.c.bf16 %v1028_v46, %v1027_v42  ;;  %v938_v55 = vadd.f32 %v1542_v47, %v1970_v20  ;;  %v946_v57 = vadd.f32 %v1566_v49, %v1970_v20  ;;  %v1506_v41 = vld [vmem:[%s1973_s29 + $0x18] sm:$0xff]  }
 0x130   : > { %v1544_v59 = vpop.f32.mrf.mxu0  ;;  %v1568_v60 = vpop.f32.mrf.mxu1  ;;  %v1446_v48 = vunpack.c.l.bf16 %v1506_v41  ;;  %v1462_v49 = vunpack.c.l.bf16 %v1510_v43 }
 0x131   : > { %1468 = vst [vmem:[%s1986_s15] sm:$0xff] %v1467_v53   ;;  %1514 = vst [vmem:[%s1986_s15 + $0x20] sm:$0xff] %v1487_v54   ;;  %v1545_v61 = vadd.f32 %v1544_v59, %v1543_v51  ;;  %v1569_v63 = vadd.f32 %v1568_v60, %v1567_v52  ;;  %v1021_v5 = vadd.f32 %v1438_v56, %v938_v55  ;;  %v1447_v51 = vunpack.c.h.bf16 %v1506_v41 }
 0x132   : > { %v1546_v1 = vpop.f32.mrf.mxu0  ;;  %v1570_v2 = vpop.f32.mrf.mxu1  ;;  %v1029_v6 = vadd.f32 %v1454_v58, %v946_v57  ;;  %v1463_v53 = vunpack.c.h.bf16 %v1510_v43 }
 0x133   : > { %v939_v3 = vadd.f32 %v1545_v61, %v1970_v20  ;;  %v947_v4 = vadd.f32 %v1569_v63, %v1970_v20 }
 0x134   : > { %v1547_v7 = vpop.f32.mrf.mxu0  ;;  %v1571_v8 = vpop.f32.mrf.mxu1 }
 0x135   : > { %v1022_v9 = vadd.f32 %v1439_v62, %v939_v3  ;;  %v1030_v10 = vadd.f32 %v1455_v0, %v947_v4  ;;  %v1548_v11 = vadd.f32 %v1547_v7, %v1546_v1  ;;  %v1572_v13 = vadd.f32 %v1571_v8, %v1570_v2 }
 0x136   : > { %v1549_v15 = vpop.f32.mrf.mxu0  ;;  %v1573_v16 = vpop.f32.mrf.mxu1 }
 0x137   : > { %v1472_v17 = vpack.c.bf16 %v1022_v9, %v1021_v5  ;;  %v1492_v18 = vpack.c.bf16 %v1030_v10, %v1029_v6  ;;  %v940_v19 = vadd.f32 %v1548_v11, %v1970_v20  ;;  %v948_v22 = vadd.f32 %v1572_v13, %v1970_v20 }
 0x138   : > { %v1550_v24 = vpop.f32.mrf.mxu0  ;;  %v1574_v25 = vpop.f32.mrf.mxu1  ;;  %v1145_v2 = vld [vmem:[%s1986_s15 + $0x4] sm:$0xf] (%p1782_p6)  ;;  %v1159_v9 = vld [vmem:[%s1986_s15 + $0x20] sm:$0xf] (%p1782_p6) }
 0x139   : > { %1511 = vst [vmem:[%s1986_s15 + $0x8] sm:$0xff] %v1472_v17   ;;  %1515 = vst [vmem:[%s1986_s15 + $0x28] sm:$0xff] %v1492_v18   ;;  %v1551_v26 = vadd.f32 %v1550_v24, %v1549_v15  ;;  %v1575_v28 = vadd.f32 %v1574_v25, %v1573_v16  ;;  %v1023_v34 = vadd.f32 %v1442_v21, %v940_v19  ;;  %v1161_v10 = vld [vmem:[%s1986_s15 + $0x24] sm:$0xf] (%p1782_p6) }
 0x13a   : > { %v1552_v30 = vpop.f32.mrf.mxu0  ;;  %v1576_v31 = vpop.f32.mrf.mxu1  ;;  %v1031_v35 = vadd.f32 %v1458_v23, %v948_v22  ;;  %1146 = vst [vmem:[%s1126_s6 + $0x8] sm:$0xf] (%p1782_p6), %v1145_v2  ;;  %1160 = vst [vmem:[%s1126_s6 + $0x40] sm:$0xf] (%p1782_p6), %v1159_v9 }
 0x13b   : > { %v941_v32 = vadd.f32 %v1551_v26, %v1970_v20  ;;  %v949_v33 = vadd.f32 %v1575_v28, %v1970_v20  ;;  %1162 = vst [vmem:[%s1126_s6 + $0x48] sm:$0xf] (%p1782_p6), %v1161_v10 }
 0x13c   : > { %v1553_v36 = vpop.f32.mrf.mxu0  ;;  %v1577_v37 = vpop.f32.mrf.mxu1 }
 0x13d   : > { %v1024_v38 = vadd.f32 %v1443_v27, %v941_v32  ;;  %v1032_v39 = vadd.f32 %v1459_v29, %v949_v33  ;;  %v1554_v40 = vadd.f32 %v1553_v36, %v1552_v30  ;;  %v1578_v42 = vadd.f32 %v1577_v37, %v1576_v31 }
 0x13e   : > { %v1555_v44 = vpop.f32.mrf.mxu0  ;;  %v1579_v45 = vpop.f32.mrf.mxu1 }
 0x13f   : > { %v1477_v46 = vpack.c.bf16 %v1024_v38, %v1023_v34  ;;  %v1497_v47 = vpack.c.bf16 %v1032_v39, %v1031_v35  ;;  %v942_v54 = vadd.f32 %v1554_v40, %v1970_v20  ;;  %v950_v55 = vadd.f32 %v1578_v42, %v1970_v20 }
 0x140   : > { %v1556_v50 = vpop.f32.mrf.mxu0  ;;  %v1580_v52 = vpop.f32.mrf.mxu1  ;;  %v1147_v3 = vld [vmem:[%s1986_s15 + $0x8] sm:$0xf] (%p1782_p6)  ;;  %v1149_v4 = vld [vmem:[%s1986_s15 + $0xc] sm:$0xf] (%p1782_p6) }
 0x141   : > { %1512 = vst [vmem:[%s1986_s15 + $0x10] sm:$0xff] %v1477_v46   ;;  %1516 = vst [vmem:[%s1986_s15 + $0x30] sm:$0xff] %v1497_v47   ;;  %v1557_v56 = vadd.f32 %v1556_v50, %v1555_v44  ;;  %v1581_v57 = vadd.f32 %v1580_v52, %v1579_v45  ;;  %v1025_v60 = vadd.f32 %v1446_v48, %v942_v54  ;;  %v1163_v11 = vld [vmem:[%s1986_s15 + $0x28] sm:$0xf] (%p1782_p6)  ;;  %v1165_v12 = vld [vmem:[%s1986_s15 + $0x2c] sm:$0xf] (%p1782_p6) }
 0x142   : > { %v1033_v61 = vadd.f32 %v1462_v49, %v950_v55  ;;  %1148 = vst [vmem:[%s1126_s6 + $0x10] sm:$0xf] (%p1782_p6), %v1147_v3  ;;  %1150 = vst [vmem:[%s1126_s6 + $0x18] sm:$0xf] (%p1782_p6), %v1149_v4 }
 0x143   : > { %v943_v58 = vadd.f32 %v1557_v56, %v1970_v20  ;;  %v951_v59 = vadd.f32 %v1581_v57, %v1970_v20  ;;  %v1143_v20 = vld [vmem:[%s1986_s15] sm:$0xf] (%p1782_p6)  ;;  %1164 = vst [vmem:[%s1126_s6 + $0x50] sm:$0xf] (%p1782_p6), %v1163_v11  ;;  %1166 = vst [vmem:[%s1126_s6 + $0x58] sm:$0xf] (%p1782_p6), %v1165_v12 }
 0x144   : > { %1144 = vst [vmem:[%s1126_s6] sm:$0xf] (%p1782_p6), %v1143_v20 }
 0x145   : > { %v1026_v62 = vadd.f32 %v1447_v51, %v943_v58  ;;  %v1034_v63 = vadd.f32 %v1463_v53, %v951_v59  ;;  %1121 = sbr.rel (!%p1782_p6) target bundleno = 340 (0x154), region = 130 }
 0x147   : > { %v1482_v0 = vpack.c.bf16 %v1026_v62, %v1025_v60  ;;  %v1502_v1 = vpack.c.bf16 %v1034_v63, %v1033_v61 }
 0x148   : > { %v1151_v5 = vld [vmem:[%s1986_s15 + $0x10] sm:$0xf] (%p1782_p6)  ;;  %v1153_v6 = vld [vmem:[%s1986_s15 + $0x14] sm:$0xf] (%p1782_p6) }
 0x149   : > { %1513 = vst [vmem:[%s1986_s15 + $0x18] sm:$0xff] %v1482_v0   ;;  %1517 = vst [vmem:[%s1986_s15 + $0x38] sm:$0xff] %v1502_v1   ;;  %v1167_v13 = vld [vmem:[%s1986_s15 + $0x30] sm:$0xf] (%p1782_p6)  ;;  %v1169_v14 = vld [vmem:[%s1986_s15 + $0x34] sm:$0xf] (%p1782_p6) }
 0x14a   : > { %1152 = vst [vmem:[%s1126_s6 + $0x20] sm:$0xf] %v1151_v5  ;;  %1154 = vst [vmem:[%s1126_s6 + $0x28] sm:$0xf] %v1153_v6 }
 0x14b   : > { %1168 = vst [vmem:[%s1126_s6 + $0x60] sm:$0xf] %v1167_v13  ;;  %1170 = vst [vmem:[%s1126_s6 + $0x68] sm:$0xf] %v1169_v14 }
 0x150   : > { %v1155_v7 = vld [vmem:[%s1986_s15 + $0x18] sm:$0xf]  ;;  %v1157_v8 = vld [vmem:[%s1986_s15 + $0x1c] sm:$0xf] }
 0x151   : > { %1156 = vst [vmem:[%s1126_s6 + $0x30] sm:$0xf] %v1155_v7  ;;  %1158 = vst [vmem:[%s1126_s6 + $0x38] sm:$0xf] %v1157_v8  ;;  %v1171_v15 = vld [vmem:[%s1986_s15 + $0x38] sm:$0xf] }
 0x152   : > { %v1173_v16 = vld [vmem:[%s1986_s15 + $0x3c] sm:$0xf]  ;;  %1172 = vst [vmem:[%s1126_s6 + $0x70] sm:$0xf] %v1171_v15 }
 0x153   : > { %1174 = vst [vmem:[%s1126_s6 + $0x78] sm:$0xf] %v1173_v16 }
 0x154 PF: > { %s14_s19 = sadd.s32 1, %s1716_s19   ;;  %s2054_s15 = smov %s1704_s16 }
 0x155   : > { %p11_p12 = scmp.ge.s32.totalorder %s14_s19, 4   ;;  %s2055_s16 = smov %s1787_s26 }
 0x156   : > { %s2056_s17 = smov %s1712_s18  ;;  %s2057_s18 = smov %s2059_s20 }
 0x157   :  { %13 = sbr.rel (!%p11_p12) target bundleno = 3 (0x3), region = 216 }

// kernel: vision_transformer_3d.16
= control target key start
LH: loop header
LB: loop body
LE: loop exit
PB: predicated region body
PF: predicated region fallthrough
CT: control target
= control target key end

     0   :  { %s2319_s18 = smov 0   ;;  %s2321_s19 = smov 0   ;;  %s3286_s0 = inlined_call_operand.vmem [shape: bf16[128,256], index: 0, kind: input, shape index: {}]   ;;  %s3287_s1 = inlined_call_operand.vmem [shape: bf16[256,1024], index: 1, kind: input, shape index: {}]   ;;  %s3288_s2 = inlined_call_operand.vmem [shape: f32[1,1024], index: 2, kind: input, shape index: {}]   ;;  %s3289_s3 = inlined_call_operand.vmem [shape: f32[1,256], index: 3, kind: input, shape index: {}]   ;;  %s3290_s4 = inlined_call_operand.vmem [shape: f32[1,256], index: 4, kind: input, shape index: {}]   ;;  %s3291_s5 = inlined_call_operand.vmem [shape: bf16[128,1024], index: 5, kind: output, shape index: {}]  }
   0x1   :  { %s2323_s20 = smov 0   ;;  %s2325_s21 = smov 0  }
   0x2   :  { %s2327_s22 = smov 0  }
   0x3 LB: > { %s30_s23 = sadd.s32 1, %s2283_s21  ;;  %s1950_s24 = sadd.s32 4294967295, %s2287_s22   ;;  %s2287_s22 = sphi %s2327_s22, %s15_s22   ;;  %s2283_s21 = sphi %s2325_s21, %s3296_s21   ;;  %s2279_s20 = sphi %s2323_s20, %s3295_s20   ;;  %s2275_s19 = sphi %s2321_s19, %s3294_s19   ;;  %s2271_s18 = sphi %s2319_s18, %s3293_s18  }
   0x4   : > { %p32_p0 = scmp.ge.s32.totalorder %s30_s23, 4  ;;  %p76_p1 = scmp.ne.s32.totalorder %s2275_s19, %s2271_s18 }
   0x5   : > { %p77_p2 = scmp.eq.s32.totalorder %s2287_s22, 0  ;;  %p176_p4 = scmp.eq.s32.totalorder %s1950_s24, 3 }
   0x6   : > { %s3298_s23 = smov (%p32_p0, %s30_s23), 0  ;;  %s69_s26 = sadd.s32 1, %s2275_s19 }
   0x7   : > { %p78_p3 = por %p77_p2, %p76_p1  ;;  %s65_s25 = ssub.s32 %s2283_s21, %s3298_s23 }
   0x8   : > { %p67_p5 = scmp.eq.s32.totalorder %s65_s25, 0  ;;  %p2354_p6 = por %p176_p4, %p76_p1 }
   0x9   : > { %p1954_p7 = scmp.ge.s32.totalorder %s2287_s22, 4 }
   0xa   : > { %s2359_s28 = scalar_select %p67_p5, %s2275_s19, %s69_s26  }
   0xb   : > { %214 = sbr.rel (%p1954_p7) target bundleno = 52 (0x34), region = 28 }
  0x10   : > { %217 = sbr.rel (!%p78_p3) target bundleno = 52 (0x34), region = 32  ;;  %s219_s29 = sand.u32 (%p78_p3), 1, %s2275_s19  }
  0x11   : > { %s2015_s30 = sshll.u32 (%p78_p3), %s2283_s21, 3  ;;  %s1955_s6 = sshll.u32 (%p78_p3), %s219_s29, 8 }
  0x12   : > { %s2367_s9 = scalar_lea.vmem (%p78_p3), %s3287_s1, %s2015_s30  ;;  %s2372_s10 = scalar_lea.vmem (%p78_p3), [#allocation3], %s1955_s6 }
  0x13   : > { %v318_v0 = vld [vmem:[%s2367_s9] sm:$0xff] (%p78_p3) }
  0x14   : > { %v320_v1 = vld [vmem:[%s2367_s9 + $0x20] sm:$0xff] (%p78_p3)  ;;  %319 = vst [vmem:[%s2372_s10] sm:$0xff] (%p78_p3), %v318_v0 }
  0x15   : > { %v322_v2 = vld [vmem:[%s2367_s9 + $0x40] sm:$0xff]  ;;  %321 = vst [vmem:[%s2372_s10 + $0x8] sm:$0xff] %v320_v1 }
  0x16   : > { %323 = vst [vmem:[%s2372_s10 + $0x10] sm:$0xff] %v322_v2  ;;  %v324_v3 = vld [vmem:[%s2367_s9 + $0x60] sm:$0xff] }
  0x17   : > { %v326_v4 = vld [vmem:[%s2367_s9 + $0x80] sm:$0xff]  ;;  %325 = vst [vmem:[%s2372_s10 + $0x18] sm:$0xff] %v324_v3 }
  0x18   : > { %v328_v5 = vld [vmem:[%s2367_s9 + $0xa0] sm:$0xff]  ;;  %327 = vst [vmem:[%s2372_s10 + $0x20] sm:$0xff] %v326_v4 }
  0x19   : > { %329 = vst [vmem:[%s2372_s10 + $0x28] sm:$0xff] %v328_v5  ;;  %v330_v6 = vld [vmem:[%s2367_s9 + $0xc0] sm:$0xff] }
  0x1a   : > { %v332_v7 = vld [vmem:[%s2367_s9 + $0xe0] sm:$0xff]  ;;  %331 = vst [vmem:[%s2372_s10 + $0x30] sm:$0xff] %v330_v6 }
  0x1b   : > { %v334_v8 = vld [vmem:[%s2367_s9 + $0x100] sm:$0xff]  ;;  %333 = vst [vmem:[%s2372_s10 + $0x38] sm:$0xff] %v332_v7 }
  0x1c   : > { %335 = vst [vmem:[%s2372_s10 + $0x40] sm:$0xff] %v334_v8  ;;  %v336_v9 = vld [vmem:[%s2367_s9 + $0x120] sm:$0xff] }
  0x1d   : > { %v338_v10 = vld [vmem:[%s2367_s9 + $0x140] sm:$0xff]  ;;  %337 = vst [vmem:[%s2372_s10 + $0x48] sm:$0xff] %v336_v9 }
  0x1e   : > { %v340_v11 = vld [vmem:[%s2367_s9 + $0x160] sm:$0xff]  ;;  %339 = vst [vmem:[%s2372_s10 + $0x50] sm:$0xff] %v338_v10 }
  0x1f   : > { %341 = vst [vmem:[%s2372_s10 + $0x58] sm:$0xff] %v340_v11  ;;  %v342_v12 = vld [vmem:[%s2367_s9 + $0x180] sm:$0xff] }
  0x20   : > { %v344_v13 = vld [vmem:[%s2367_s9 + $0x1a0] sm:$0xff]  ;;  %343 = vst [vmem:[%s2372_s10 + $0x60] sm:$0xff] %v342_v12 }
  0x21   : > { %v346_v14 = vld [vmem:[%s2367_s9 + $0x1c0] sm:$0xff]  ;;  %345 = vst [vmem:[%s2372_s10 + $0x68] sm:$0xff] %v344_v13 }
  0x22   : > { %347 = vst [vmem:[%s2372_s10 + $0x70] sm:$0xff] %v346_v14  ;;  %v348_v15 = vld [vmem:[%s2367_s9 + $0x1e0] sm:$0xff] }
  0x23   : > { %v350_v16 = vld [vmem:[%s2367_s9 + $0x200] sm:$0xff]  ;;  %349 = vst [vmem:[%s2372_s10 + $0x78] sm:$0xff] %v348_v15 }
  0x24   : > { %v352_v17 = vld [vmem:[%s2367_s9 + $0x220] sm:$0xff]  ;;  %351 = vst [vmem:[%s2372_s10 + $0x80] sm:$0xff] %v350_v16 }
  0x25   : > { %353 = vst [vmem:[%s2372_s10 + $0x88] sm:$0xff] %v352_v17  ;;  %v354_v18 = vld [vmem:[%s2367_s9 + $0x240] sm:$0xff] }
  0x26   : > { %v356_v19 = vld [vmem:[%s2367_s9 + $0x260] sm:$0xff]  ;;  %355 = vst [vmem:[%s2372_s10 + $0x90] sm:$0xff] %v354_v18 }
  0x27   : > { %v358_v20 = vld [vmem:[%s2367_s9 + $0x280] sm:$0xff]  ;;  %357 = vst [vmem:[%s2372_s10 + $0x98] sm:$0xff] %v356_v19 }
  0x28   : > { %359 = vst [vmem:[%s2372_s10 + $0xa0] sm:$0xff] %v358_v20  ;;  %v360_v21 = vld [vmem:[%s2367_s9 + $0x2a0] sm:$0xff] }
  0x29   : > { %v362_v22 = vld [vmem:[%s2367_s9 + $0x2c0] sm:$0xff]  ;;  %361 = vst [vmem:[%s2372_s10 + $0xa8] sm:$0xff] %v360_v21 }
  0x2a   : > { %v364_v23 = vld [vmem:[%s2367_s9 + $0x2e0] sm:$0xff]  ;;  %363 = vst [vmem:[%s2372_s10 + $0xb0] sm:$0xff] %v362_v22 }
  0x2b   : > { %365 = vst [vmem:[%s2372_s10 + $0xb8] sm:$0xff] %v364_v23  ;;  %v366_v24 = vld [vmem:[%s2367_s9 + $0x300] sm:$0xff] }
  0x2c   : > { %v368_v25 = vld [vmem:[%s2367_s9 + $0x320] sm:$0xff]  ;;  %367 = vst [vmem:[%s2372_s10 + $0xc0] sm:$0xff] %v366_v24 }
  0x2d   : > { %v370_v26 = vld [vmem:[%s2367_s9 + $0x340] sm:$0xff]  ;;  %369 = vst [vmem:[%s2372_s10 + $0xc8] sm:$0xff] %v368_v25 }
  0x2e   : > { %371 = vst [vmem:[%s2372_s10 + $0xd0] sm:$0xff] %v370_v26  ;;  %v372_v27 = vld [vmem:[%s2367_s9 + $0x360] sm:$0xff] }
  0x2f   : > { %v374_v28 = vld [vmem:[%s2367_s9 + $0x380] sm:$0xff]  ;;  %373 = vst [vmem:[%s2372_s10 + $0xd8] sm:$0xff] %v372_v27 }
  0x30   : > { %v376_v29 = vld [vmem:[%s2367_s9 + $0x3a0] sm:$0xff]  ;;  %375 = vst [vmem:[%s2372_s10 + $0xe0] sm:$0xff] %v374_v28 }
  0x31   : > { %377 = vst [vmem:[%s2372_s10 + $0xe8] sm:$0xff] %v376_v29  ;;  %v378_v30 = vld [vmem:[%s2367_s9 + $0x3c0] sm:$0xff] }
  0x32   : > { %v380_v31 = vld [vmem:[%s2367_s9 + $0x3e0] sm:$0xff]  ;;  %379 = vst [vmem:[%s2372_s10 + $0xf0] sm:$0xff] %v378_v30 }
  0x33   : > { %381 = vst [vmem:[%s2372_s10 + $0xf8] sm:$0xff] %v380_v31 }
  0x34 PF: > { %p1958_p8 = scmp.ge.s32.totalorder %s2287_s22, 1  ;;  %p394_p9 = scmp.lt.s32.totalorder %s2287_s22, 5 }
  0x36   : > { %p395_p10 = pnand %p1958_p8, %p394_p9 }
  0x37   : > { %s401_s9 = sand.u32 (!%p395_p10), 1, %s2271_s18   ;;  %s1961_s16 = sshll.u32 (!%p395_p10), %s2279_s20, 1 }
  0x38   : > { %398 = sbr.rel (%p395_p10) target bundleno = 688 (0x2b0), region = 74  ;;  %s1959_s10 = sshll.u32 (!%p395_p10), %s401_s9, 8 }
  0x39   : > { %s2616_s11 = scalar_lea.vmem (!%p395_p10), [#allocation3], %s1959_s10  ;;  %p447_p11 = scmp.lt.s32.totalorder (!%p395_p10), %s1961_s16, 7 }
  0x3a   : > { %s3081_s26 = sshll.u32 (!%p395_p10), %s401_s9, 7 }
  0x3b   : > { %s3089_s18 = scalar_lea.vmem (!%p395_p10), [#allocation4], %s3081_s26 }
  0x3d   : > { %v2440_v32 = vld [vmem:[%s3286_s0] sm:$0xff]  ;;  %v2450_v34 = vld [vmem:[%s3286_s0 + $0x8] sm:$0xff]  ;;  %v2464_v40 = vld [vmem:[%s3286_s0 + $0x10] sm:$0xff]  ;;  %s3300_s16 = smov (!%p447_p11, %s1961_s16), 7  ;;  %s2032_s29 = sshll.u32 (%p2354_p6), %s2279_s20, 3 }
  0x3e   : > { %v2445_v33 = vld [vmem:[%s3286_s0 + $0x40] sm:$0xff]  ;;  %v469_v35 = vunpack.c.l.bf16 %v2440_v32  ;;  %v470_v36 = vunpack.c.h.bf16 %v2440_v32  ;;  %v2459_v39 = vld [vmem:[%s3286_s0 + $0x48] sm:$0xff]  ;;  %v471_v41 = vunpack.c.l.bf16 %v2450_v34  ;;  %v472_v42 = vunpack.c.h.bf16 %v2450_v34  ;;  %v2473_v45 = vld [vmem:[%s3286_s0 + $0x18] sm:$0xff]  ;;  %s449_s25 = scalar_lea.vmem %s3288_s2, %s3300_s16  ;;  %s1758_s7 = scalar_lea.vmem (%p2354_p6), %s3291_s5, %s2032_s29 }
  0x3f   : > { %v485_v37 = vunpack.c.l.bf16 %v2445_v33  ;;  %v486_v38 = vunpack.c.h.bf16 %v2445_v33  ;;  %v487_v43 = vunpack.c.l.bf16 %v2459_v39  ;;  %v488_v44 = vunpack.c.h.bf16 %v2459_v39  ;;  %v2498_v54 = vld [vmem:[%s3286_s0 + $0x50] sm:$0xff]  ;;  %v2503_v55 = vld [vmem:[%s3286_s0 + $0x58] sm:$0xff]  ;;  %v2520_v62 = vld [vmem:[%s3286_s0 + $0x20] sm:$0xff] }
  0x40   : > { %v501_v46 = vadd.f32 %v470_v36, %v469_v35  ;;  %v473_v48 = vunpack.c.l.bf16 %v2464_v40  ;;  %v474_v49 = vunpack.c.h.bf16 %v2464_v40  ;;  %v504_v50 = vadd.f32 %v472_v42, %v471_v41  ;;  %v2525_v63 = vld [vmem:[%s3286_s0 + $0x28] sm:$0xff]  ;;  %v2542_v6 = vld [vmem:[%s3286_s0 + $0x60] sm:$0xff]  ;;  %v2564_v14 = vld [vmem:[%s3286_s0 + $0x30] sm:$0xff] }
  0x41   : > { %v525_v47 = vadd.f32 %v486_v38, %v485_v37  ;;  %v528_v51 = vadd.f32 %v488_v44, %v487_v43  ;;  %v475_v52 = vunpack.c.l.bf16 %v2473_v45  ;;  %v476_v53 = vunpack.c.h.bf16 %v2473_v45  ;;  %v2547_v7 = vld [vmem:[%s3286_s0 + $0x68] sm:$0xff]  ;;  %v2569_v15 = vld [vmem:[%s3286_s0 + $0x38] sm:$0xff]  ;;  %v2586_v22 = vld [vmem:[%s3286_s0 + $0x70] sm:$0xff] }
  0x42   : > { %502 = vadd.xlane.f32.xlu0 %v501_v46  ;;  %v507_v56 = vadd.f32 %v474_v49, %v473_v48  ;;  %v489_v57 = vunpack.c.l.bf16 %v2498_v54  ;;  %v490_v59 = vunpack.c.h.bf16 %v2498_v54  ;;  %v491_v60 = vunpack.c.l.bf16 %v2503_v55  ;;  %v2591_v23 = vld [vmem:[%s3286_s0 + $0x78] sm:$0xff] }
  0x43   : > { %526 = vadd.xlane.f32.xlu1 %v525_v47  ;;  %v510_v58 = vadd.f32 %v476_v53, %v475_v52  ;;  %v492_v61 = vunpack.c.h.bf16 %v2503_v55  ;;  %v477_v0 = vunpack.c.l.bf16 %v2520_v62  ;;  %v478_v1 = vunpack.c.h.bf16 %v2520_v62  ;;  %v2105_v46 = vld [vmem:[%s2616_s11 + $0x74] ss:$8 sps:$4 sm:$0xff]   ;;  %v2107_v47 = vld [vmem:[%s2616_s11 + $0x70] ss:$8 sps:$4 sm:$0xff]  }
  0x44   : > { %v531_v2 = vadd.f32 %v490_v59, %v489_v57  ;;  %v479_v4 = vunpack.c.l.bf16 %v2525_v63  ;;  %v480_v5 = vunpack.c.h.bf16 %v2525_v63  ;;  %v493_v9 = vunpack.c.l.bf16 %v2542_v6  ;;  %1134 = vmatprep.subr.bf16.mxu0 %v2105_v46  ;;  %2033 = vmatprep.subr.bf16.mxu1 %v2105_v46 }
  0x45   : > { %v534_v3 = vadd.f32 %v492_v61, %v491_v60  ;;  %v513_v8 = vadd.f32 %v478_v1, %v477_v0  ;;  %v494_v11 = vunpack.c.h.bf16 %v2542_v6  ;;  %v495_v12 = vunpack.c.l.bf16 %v2547_v7  ;;  %1135 = vmatpush1.bf16.msra.mxu0 %v2107_v47  ;;  %2049 = vmatpush1.bf16.msra.mxu1 %v2107_v47 }
  0x46   : > { %505 = vadd.xlane.f32.xlu0 %v504_v50  ;;  %v516_v10 = vadd.f32 %v480_v5, %v479_v4  ;;  %v496_v13 = vunpack.c.h.bf16 %v2547_v7  ;;  %v481_v16 = vunpack.c.l.bf16 %v2564_v14  ;;  %v482_v17 = vunpack.c.h.bf16 %v2564_v14  ;;  %v2108_v50 = vld [vmem:[%s2616_s11 + $0x64] ss:$8 sps:$4 sm:$0xff]  }
  0x47   : > { %529 = vadd.xlane.f32.xlu1 %v528_v51  ;;  %v537_v18 = vadd.f32 %v494_v11, %v493_v9  ;;  %v483_v20 = vunpack.c.l.bf16 %v2569_v15  ;;  %v484_v21 = vunpack.c.h.bf16 %v2569_v15  ;;  %v497_v25 = vunpack.c.l.bf16 %v2586_v22  ;;  %v2110_v51 = vld [vmem:[%s2616_s11 + $0x60] ss:$8 sps:$4 sm:$0xff]   ;;  %1136 = vmatprep.subr.bf16.mxu0 %v2108_v50 }
  0x48   : > { %v540_v19 = vadd.f32 %v496_v13, %v495_v12  ;;  %v519_v24 = vadd.f32 %v482_v17, %v481_v16  ;;  %v498_v27 = vunpack.c.h.bf16 %v2586_v22  ;;  %v499_v28 = vunpack.c.l.bf16 %v2591_v23  ;;  %2034 = vmatprep.subr.bf16.mxu1 %v2108_v50 }
  0x49   : > { %v522_v26 = vadd.f32 %v484_v21, %v483_v20  ;;  %v500_v29 = vunpack.c.h.bf16 %v2591_v23  ;;  %1137 = vmatpush1.bf16.msra.mxu0 %v2110_v51  ;;  %2050 = vmatpush1.bf16.msra.mxu1 %v2110_v51 }
  0x4a   : > { %508 = vadd.xlane.f32.xlu0 %v507_v56  ;;  %v543_v30 = vadd.f32 %v498_v27, %v497_v25  ;;  %v2111_v56 = vld [vmem:[%s2616_s11 + $0x54] ss:$8 sps:$4 sm:$0xff]  }
  0x4b   : > { %511 = vadd.xlane.f32.xlu1 %v510_v58  ;;  %v546_v31 = vadd.f32 %v500_v29, %v499_v28  ;;  %v2113_v58 = vld [vmem:[%s2616_s11 + $0x50] ss:$8 sps:$4 sm:$0xff]   ;;  %1138 = vmatprep.subr.bf16.mxu0 %v2111_v56 }
  0x4c   : > { %2035 = vmatprep.subr.bf16.mxu1 %v2111_v56 }
  0x4d   : > { %1139 = vmatpush1.bf16.msra.mxu0 %v2113_v58  ;;  %2051 = vmatpush1.bf16.msra.mxu1 %v2113_v58 }
  0x4e   : > { %532 = vadd.xlane.f32.xlu0 %v531_v2  ;;  %v2114_v2 = vld [vmem:[%s2616_s11 + $0x44] ss:$8 sps:$4 sm:$0xff]  }
  0x4f   : > { %535 = vadd.xlane.f32.xlu1 %v534_v3  ;;  %v2116_v3 = vld [vmem:[%s2616_s11 + $0x40] ss:$8 sps:$4 sm:$0xff]   ;;  %1140 = vmatprep.subr.bf16.mxu0 %v2114_v2 }
  0x50   : > { %2036 = vmatprep.subr.bf16.mxu1 %v2114_v2 }
  0x51   : > { %1141 = vmatpush1.bf16.msra.mxu0 %v2116_v3  ;;  %2052 = vmatpush1.bf16.msra.mxu1 %v2116_v3 }
  0x52   : > { %514 = vadd.xlane.f32.xlu0 %v513_v8  ;;  %v2117_v8 = vld [vmem:[%s2616_s11 + $0x34] ss:$8 sps:$4 sm:$0xff]  }
  0x53   : > { %517 = vadd.xlane.f32.xlu1 %v516_v10  ;;  %v2119_v10 = vld [vmem:[%s2616_s11 + $0x30] ss:$8 sps:$4 sm:$0xff]   ;;  %1142 = vmatprep.subr.bf16.mxu0 %v2117_v8 }
  0x54   : > { %2037 = vmatprep.subr.bf16.mxu1 %v2117_v8 }
  0x55   : > { %1143 = vmatpush1.bf16.msra.mxu0 %v2119_v10  ;;  %2053 = vmatpush1.bf16.msra.mxu1 %v2119_v10 }
  0x56   : > { %538 = vadd.xlane.f32.xlu0 %v537_v18  ;;  %v2120_v18 = vld [vmem:[%s2616_s11 + $0x24] ss:$8 sps:$4 sm:$0xff]  }
  0x57   : > { %541 = vadd.xlane.f32.xlu1 %v540_v19  ;;  %v2122_v19 = vld [vmem:[%s2616_s11 + $0x20] ss:$8 sps:$4 sm:$0xff]   ;;  %1144 = vmatprep.subr.bf16.mxu0 %v2120_v18 }
  0x58   : > { %2038 = vmatprep.subr.bf16.mxu1 %v2120_v18 }
  0x59   : > { %1145 = vmatpush1.bf16.msra.mxu0 %v2122_v19  ;;  %2054 = vmatpush1.bf16.msra.mxu1 %v2122_v19 }
  0x5a   : > { %520 = vadd.xlane.f32.xlu0 %v519_v24  ;;  %v2123_v24 = vld [vmem:[%s2616_s11 + $0x14] ss:$8 sps:$4 sm:$0xff]  }
  0x5b   : > { %523 = vadd.xlane.f32.xlu1 %v522_v26  ;;  %v2125_v26 = vld [vmem:[%s2616_s11 + $0x10] ss:$8 sps:$4 sm:$0xff]   ;;  %1146 = vmatprep.subr.bf16.mxu0 %v2123_v24 }
  0x5c   : > { %2039 = vmatprep.subr.bf16.mxu1 %v2123_v24 }
  0x5d   : > { %1147 = vmatpush1.bf16.msra.mxu0 %v2125_v26  ;;  %2055 = vmatpush1.bf16.msra.mxu1 %v2125_v26 }
  0x5e   : > { %544 = vadd.xlane.f32.xlu0 %v543_v30  ;;  %v2126_v30 = vld [vmem:[%s2616_s11 + $0x4] ss:$8 sps:$4 sm:$0xff]  }
  0x5f   : > { %547 = vadd.xlane.f32.xlu1 %v546_v31  ;;  %v2128_v31 = vld [vmem:[%s2616_s11] ss:$8 sps:$4 sm:$0xff]   ;;  %1148 = vmatprep.subr.bf16.mxu0 %v2126_v30 }
  0x60   : > { %2040 = vmatprep.subr.bf16.mxu1 %v2126_v30 }
  0x61   : > { %1149 = vmatpush1.bf16.msra.mxu0 %v2128_v31  ;;  %2056 = vmatpush1.bf16.msra.mxu1 %v2128_v31 }
  0xcb   : > { %v503_v46 = vpop.xlane.xlu0 %502 }
  0xcc   : > { %v527_v47 = vpop.xlane.xlu1 %526  ;;  %v550_v50 = vmul.f32 0.00390625, %v503_v46 }
  0xcd   : > { %v558_v51 = vmul.f32 0.00390625, %v527_v47 }
  0xce   : > { %v2636_v56 = vsub.f32 %v469_v35, %v550_v50  ;;  %v2640_v58 = vsub.f32 %v470_v36, %v550_v50 }
  0xcf   : > { %v2644_v2 = vsub.f32 %v485_v37, %v558_v51  ;;  %v2648_v3 = vsub.f32 %v486_v38, %v558_v51  ;;  %v506_v8 = vpop.xlane.xlu0 %505 }
  0xd0   : > { %v530_v10 = vpop.xlane.xlu1 %529  ;;  %v551_v18 = vmul.f32 0.00390625, %v506_v8  ;;  %v598_v35 = vmul.f32 %v2636_v56, %v2636_v56  ;;  %v599_v32 = vmul.f32 %v2640_v58, %v2640_v58 }
  0xd1   : > { %v559_v19 = vmul.f32 0.00390625, %v530_v10  ;;  %v614_v36 = vmul.f32 %v2644_v2, %v2644_v2  ;;  %v615_v37 = vmul.f32 %v2648_v3, %v2648_v3 }
  0xd2   : > { %v2660_v33 = vsub.f32 %v471_v41, %v551_v18  ;;  %v2664_v38 = vsub.f32 %v472_v42, %v551_v18  ;;  %v630_v31 = vadd.f32 %v599_v32, %v598_v35 }
  0xd3   : > { %v2668_v24 = vsub.f32 %v487_v43, %v559_v19  ;;  %v2672_v26 = vsub.f32 %v488_v44, %v559_v19  ;;  %v509_v30 = vpop.xlane.xlu0 %508  ;;  %v654_v42 = vadd.f32 %v615_v37, %v614_v36 }
  0xd4   : > { %v512_v46 = vpop.xlane.xlu1 %511  ;;  %v552_v47 = vmul.f32 0.00390625, %v509_v30  ;;  %v600_v41 = vmul.f32 %v2660_v33, %v2660_v33  ;;  %v601_v34 = vmul.f32 %v2664_v38, %v2664_v38  ;;  %631 = vadd.xlane.f32.xlu0 %v630_v31 }
  0xd5   : > { %v553_v50 = vmul.f32 0.00390625, %v512_v46  ;;  %v616_v43 = vmul.f32 %v2668_v24, %v2668_v24  ;;  %v617_v39 = vmul.f32 %v2672_v26, %v2672_v26 }
  0xd6   : > { %v2684_v44 = vsub.f32 %v473_v48, %v552_v47  ;;  %v2688_v51 = vsub.f32 %v474_v49, %v552_v47  ;;  %v633_v19 = vadd.f32 %v601_v34, %v600_v41 }
  0xd7   : > { %v2692_v8 = vsub.f32 %v475_v52, %v553_v50  ;;  %v2696_v10 = vsub.f32 %v476_v53, %v553_v50  ;;  %v533_v18 = vpop.xlane.xlu0 %532  ;;  %v657_v49 = vadd.f32 %v617_v39, %v616_v43 }
  0xd8   : > { %v536_v35 = vpop.xlane.xlu1 %535  ;;  %v560_v32 = vmul.f32 0.00390625, %v533_v18  ;;  %v602_v48 = vmul.f32 %v2684_v44, %v2684_v44  ;;  %v603_v40 = vmul.f32 %v2688_v51, %v2688_v51  ;;  %655 = vadd.xlane.f32.xlu0 %v654_v42  ;;  %634 = vadd.xlane.f32.xlu1 %v633_v19  ;;  %v2131_v42 = vld [vmem:[%s2616_s11 + $0xf0] ss:$8 sps:$4 sm:$0xff]  }
  0xd9   : > { %v561_v36 = vmul.f32 0.00390625, %v536_v35  ;;  %v604_v45 = vmul.f32 %v2692_v8, %v2692_v8  ;;  %v605_v52 = vmul.f32 %v2696_v10, %v2696_v10 }
  0xda   : > { %v2708_v53 = vsub.f32 %v489_v57, %v560_v32  ;;  %v2712_v37 = vsub.f32 %v490_v59, %v560_v32  ;;  %v636_v47 = vadd.f32 %v603_v40, %v602_v48  ;;  %v2129_v59 = vld [vmem:[%s2616_s11 + $0xf4] ss:$8 sps:$4 sm:$0xff]   ;;  %v2132_v40 = vld [vmem:[%s2616_s11 + $0xe4] ss:$8 sps:$4 sm:$0xff]  }
  0xdb   : > { %v2716_v30 = vsub.f32 %v491_v60, %v561_v36  ;;  %v2720_v31 = vsub.f32 %v492_v61, %v561_v36  ;;  %v515_v46 = vpop.xlane.xlu0 %514  ;;  %v639_v60 = vadd.f32 %v605_v52, %v604_v45  ;;  %1150 = vmatprep.subr.bf16.mxu0 %v2129_v59  ;;  %2041 = vmatprep.subr.bf16.mxu1 %v2129_v59 }
  0xdc   : > { %v518_v50 = vpop.xlane.xlu1 %517  ;;  %v554_v41 = vmul.f32 0.00390625, %v515_v46  ;;  %v618_v57 = vmul.f32 %v2708_v53, %v2708_v53  ;;  %v619_v54 = vmul.f32 %v2712_v37, %v2712_v37  ;;  %658 = vadd.xlane.f32.xlu1 %v657_v49  ;;  %637 = vadd.xlane.f32.xlu0 %v636_v47  ;;  %v2134_v47 = vld [vmem:[%s2616_s11 + $0xe0] ss:$8 sps:$4 sm:$0xff]  }
  0xdd   : > { %v555_v34 = vmul.f32 0.00390625, %v518_v50  ;;  %v620_v55 = vmul.f32 %v2716_v30, %v2716_v30  ;;  %v621_v61 = vmul.f32 %v2720_v31, %v2720_v31  ;;  %1151 = vmatpush2.bf16.msra.mxu0 %v2131_v42  ;;  %2057 = vmatpush2.bf16.msra.mxu1 %v2131_v42  ;;  %v2137_v42 = vld [vmem:[%s2616_s11 + $0xd0] ss:$8 sps:$4 sm:$0xff]  }
  0xde   : > { %v2734_v43 = vsub.f32 %v477_v0, %v554_v41  ;;  %v2738_v39 = vsub.f32 %v478_v1, %v554_v41  ;;  %v660_v32 = vadd.f32 %v619_v54, %v618_v57  ;;  %1152 = vmatprep.subr.bf16.mxu0 %v2132_v40  ;;  %2042 = vmatprep.subr.bf16.mxu1 %v2132_v40  ;;  %v2135_v54 = vld [vmem:[%s2616_s11 + $0xd4] ss:$8 sps:$4 sm:$0xff]  }
  0xdf   : > { %v2742_v18 = vsub.f32 %v479_v4, %v555_v34  ;;  %v2746_v19 = vsub.f32 %v480_v5, %v555_v34  ;;  %v539_v35 = vpop.xlane.xlu0 %538  ;;  %v663_v63 = vadd.f32 %v621_v61, %v620_v55 }
  0xe0   : > { %v542_v36 = vpop.xlane.xlu1 %541  ;;  %v562_v0 = vmul.f32 0.00390625, %v539_v35  ;;  %v606_v1 = vmul.f32 %v2734_v43, %v2734_v43  ;;  %v607_v4 = vmul.f32 %v2738_v39, %v2738_v39  ;;  %640 = vadd.xlane.f32.xlu1 %v639_v60  ;;  %661 = vadd.xlane.f32.xlu0 %v660_v32 }
  0xe1   : > { %v563_v62 = vmul.f32 0.00390625, %v542_v36  ;;  %v608_v5 = vmul.f32 %v2742_v18, %v2742_v18  ;;  %v609_v48 = vmul.f32 %v2746_v19, %v2746_v19  ;;  %1153 = vmatpush2.bf16.msra.mxu0 %v2134_v47  ;;  %2058 = vmatpush2.bf16.msra.mxu1 %v2134_v47 }
  0xe2   : > { %v2759_v49 = vsub.f32 %v493_v9, %v562_v0  ;;  %v2763_v45 = vsub.f32 %v494_v11, %v562_v0  ;;  %v642_v41 = vadd.f32 %v607_v4, %v606_v1  ;;  %1154 = vmatprep.subr.bf16.mxu0 %v2135_v54  ;;  %2043 = vmatprep.subr.bf16.mxu1 %v2135_v54 }
  0xe3   : > { %v2767_v52 = vsub.f32 %v495_v12, %v563_v62  ;;  %v2771_v46 = vsub.f32 %v496_v13, %v563_v62  ;;  %v521_v50 = vpop.xlane.xlu0 %520  ;;  %v645_v7 = vadd.f32 %v609_v48, %v608_v5  ;;  %v2138_v62 = vld [vmem:[%s2616_s11 + $0xc4] ss:$8 sps:$4 sm:$0xff]   ;;  %v2140_v48 = vld [vmem:[%s2616_s11 + $0xc0] ss:$8 sps:$4 sm:$0xff]  }
  0xe4   : > { %v524_v34 = vpop.xlane.xlu1 %523  ;;  %v556_v9 = vmul.f32 0.00390625, %v521_v50  ;;  %v622_v11 = vmul.f32 %v2759_v49, %v2759_v49  ;;  %v623_v12 = vmul.f32 %v2763_v45, %v2763_v45  ;;  %664 = vadd.xlane.f32.xlu1 %v663_v63  ;;  %643 = vadd.xlane.f32.xlu0 %v642_v41  ;;  %v2143_v50 = vld [vmem:[%s2616_s11 + $0xb0] ss:$8 sps:$4 sm:$0xff]  }
  0xe5   : > { %v557_v6 = vmul.f32 0.00390625, %v524_v34  ;;  %v624_v13 = vmul.f32 %v2767_v52, %v2767_v52  ;;  %v625_v57 = vmul.f32 %v2771_v46, %v2771_v46  ;;  %1155 = vmatpush2.bf16.msra.mxu0 %v2137_v42  ;;  %2059 = vmatpush2.bf16.msra.mxu1 %v2137_v42  ;;  %v2144_v34 = vld [vmem:[%s2616_s11 + $0xa4] ss:$8 sps:$4 sm:$0xff]  }
  0xe6   : > { %v2785_v59 = vsub.f32 %v481_v16, %v556_v9  ;;  %v2789_v60 = vsub.f32 %v482_v17, %v556_v9  ;;  %v666_v32 = vadd.f32 %v623_v12, %v622_v11  ;;  %1156 = vmatprep.subr.bf16.mxu0 %v2138_v62  ;;  %2044 = vmatprep.subr.bf16.mxu1 %v2138_v62  ;;  %v2146_v9 = vld [vmem:[%s2616_s11 + $0xa0] ss:$8 sps:$4 sm:$0xff]   ;;  %v2149_v11 = vld [vmem:[%s2616_s11 + $0x90] ss:$8 sps:$4 sm:$0xff]   ;;  %v2150_v12 = vld [vmem:[%s2616_s11 + $0x84] ss:$8 sps:$4 sm:$0xff]  }
  0xe7   : > { %v2793_v55 = vsub.f32 %v483_v20, %v557_v6  ;;  %v2797_v61 = vsub.f32 %v484_v21, %v557_v6  ;;  %v545_v35 = vpop.xlane.xlu0 %544  ;;  %v669_v15 = vadd.f32 %v625_v57, %v624_v13  ;;  %v2147_v6 = vld [vmem:[%s2616_s11 + $0x94] ss:$8 sps:$4 sm:$0xff]  }
  0xe8   : > { %v548_v36 = vpop.xlane.xlu1 %547  ;;  %v564_v16 = vmul.f32 0.00390625, %v545_v35  ;;  %v610_v17 = vmul.f32 %v2785_v59, %v2785_v59  ;;  %v611_v20 = vmul.f32 %v2789_v60, %v2789_v60  ;;  %646 = vadd.xlane.f32.xlu1 %v645_v7  ;;  %667 = vadd.xlane.f32.xlu0 %v666_v32  ;;  %v2152_v7 = vld [vmem:[%s2616_s11 + $0x80] ss:$8 sps:$4 sm:$0xff]  }
  0xe9   : > { %v565_v14 = vmul.f32 0.00390625, %v548_v36  ;;  %v612_v21 = vmul.f32 %v2793_v55, %v2793_v55  ;;  %v613_v0 = vmul.f32 %v2797_v61, %v2797_v61  ;;  %1157 = vmatpush2.bf16.msra.mxu0 %v2140_v48  ;;  %2060 = vmatpush2.bf16.msra.mxu1 %v2140_v48 }
  0xea   : > { %v2811_v1 = vsub.f32 %v497_v25, %v564_v16  ;;  %v2815_v4 = vsub.f32 %v498_v27, %v564_v16  ;;  %v648_v40 = vadd.f32 %v611_v20, %v610_v17  ;;  %v760_v16 = vlaneseq }
  0xeb   : > { %v2819_v63 = vsub.f32 %v499_v28, %v565_v14  ;;  %v2823_v5 = vsub.f32 %v500_v29, %v565_v14  ;;  %v651_v27 = vadd.f32 %v613_v0, %v612_v21  ;;  %v2141_v29 = vld [vmem:[%s2616_s11 + $0xb4] ss:$8 sps:$4 sm:$0xff]  }
  0xec   : > { %v626_v25 = vmul.f32 %v2811_v1, %v2811_v1  ;;  %v627_v22 = vmul.f32 %v2815_v4, %v2815_v4  ;;  %670 = vadd.xlane.f32.xlu1 %v669_v15  ;;  %649 = vadd.xlane.f32.xlu0 %v648_v40  ;;  %v761_v62 = vshrl.u32 %v760_v16, 7 }
  0xed   : > { %v628_v23 = vmul.f32 %v2819_v63, %v2819_v63  ;;  %v629_v28 = vmul.f32 %v2823_v5, %v2823_v5  ;;  %1158 = vmatprep.subr.bf16.mxu0 %v2141_v29  ;;  %2045 = vmatprep.subr.bf16.mxu1 %v2141_v29  ;;  %v758_v29 = vld [vmem:[%s3289_s3] sm:$0x3] }
  0xee   : > { %v672_v47 = vadd.f32 %v627_v22, %v626_v25  ;;  %1159 = vmatpush2.bf16.msra.mxu0 %v2143_v50  ;;  %2061 = vmatpush2.bf16.msra.mxu1 %v2143_v50 }
  0xef   : > { %v675_v41 = vadd.f32 %v629_v28, %v628_v23  ;;  %1160 = vmatprep.subr.bf16.mxu0 %v2144_v34  ;;  %2046 = vmatprep.subr.bf16.mxu1 %v2144_v34  ;;  %v2842_v28 = vsub.s32 1, %v761_v62 }
  0xf0   : > { %652 = vadd.xlane.f32.xlu1 %v651_v27  ;;  %673 = vadd.xlane.f32.xlu0 %v672_v47  ;;  %v2847_v47 = vsub.s32 0, %v761_v62 }
  0xf2   : > { %1161 = vmatpush2.bf16.msra.mxu0 %v2146_v9  ;;  %2062 = vmatpush2.bf16.msra.mxu1 %v2146_v9 }
  0xf3   : > { %1162 = vmatprep.subr.bf16.mxu0 %v2147_v6  ;;  %2047 = vmatprep.subr.bf16.mxu1 %v2147_v6 }
  0xf4   : > { %676 = vadd.xlane.f32.xlu1 %v675_v41  ;;  %v802_v41 = vld [vmem:[%s3290_s4] sm:$0x3] }
  0xf6   : > { %1163 = vmatpush2.bf16.msra.mxu0 %v2149_v11  ;;  %2063 = vmatpush2.bf16.msra.mxu1 %v2149_v11 }
  0xf7   : > { %1164 = vmatprep.subr.bf16.mxu0 %v2150_v12  ;;  %2048 = vmatprep.subr.bf16.mxu1 %v2150_v12 }
  0xfa   : > { %1165 = vmatpush2.bf16.msra.mxu0 %v2152_v7  ;;  %2064 = vmatpush2.bf16.msra.mxu1 %v2152_v7  ;;  %v2853_v7 = vrot.slane %v758_v29, %v2842_v28 }
 0x15d   : > { %v632_v13 = vpop.xlane.xlu0 %631 }
 0x15e   : > { %v678_v57 = vmul.f32 0.00390625, %v632_v13 }
 0x160   : > { %v694_v54 = vadd.f32 1e-06, %v678_v57  ;;  %v2856_v57 = vrot.slane %v758_v29, %v2847_v47 }
 0x161   : > { %v635_v42 = vpop.xlane.xlu1 %634  ;;  %v656_v35 = vpop.xlane.xlu0 %655 }
 0x162   : > { %2153 = vrsqrt.f32 %v694_v54  ;;  %v679_v32 = vmul.f32 0.00390625, %v635_v42  ;;  %v686_v36 = vmul.f32 0.00390625, %v656_v35  ;;  %v2859_v54 = vrot.slane %v802_v41, %v2842_v28 }
 0x164   : > { %v695_v14 = vadd.f32 1e-06, %v679_v32  ;;  %v702_v17 = vadd.f32 1e-06, %v686_v36 }
 0x165   : > { %v659_v20 = vpop.xlane.xlu1 %658  ;;  %v638_v15 = vpop.xlane.xlu0 %637 }
 0x166   : > { %2155 = vrsqrt.f32 %v695_v14  ;;  %v687_v21 = vmul.f32 0.00390625, %v659_v20  ;;  %v680_v0 = vmul.f32 0.00390625, %v638_v15 }
 0x167   : > { %2157 = vrsqrt.f32 %v702_v17  ;;  %v2864_v17 = vrot.slane %v802_v41, %v2847_v47 }
 0x168   : > { %v703_v48 = vadd.f32 1e-06, %v687_v21  ;;  %v696_v40 = vadd.f32 1e-06, %v680_v0 }
 0x169   : > { %v641_v25 = vpop.xlane.xlu1 %640  ;;  %v662_v22 = vpop.xlane.xlu0 %661 }
 0x16a   : > { %2159 = vrsqrt.f32 %v703_v48  ;;  %v681_v27 = vmul.f32 0.00390625, %v641_v25  ;;  %v688_v23 = vmul.f32 0.00390625, %v662_v22 }
 0x16b   : > { %2161 = vrsqrt.f32 %v696_v40 }
 0x16c   : > { %v697_v50 = vadd.f32 1e-06, %v681_v27  ;;  %v704_v34 = vadd.f32 1e-06, %v688_v23 }
 0x16d   : > { %v665_v9 = vpop.xlane.xlu1 %664  ;;  %v644_v6 = vpop.xlane.xlu0 %643 }
 0x16e   : > { %2163 = vrsqrt.f32 %v697_v50  ;;  %v689_v11 = vmul.f32 0.00390625, %v665_v9  ;;  %v682_v12 = vmul.f32 0.00390625, %v644_v6 }
 0x16f   : > { %v2154_v13 = vpop.eup %2153  ;;  %2165 = vrsqrt.f32 %v704_v34 }
 0x170   : > { %v705_v42 = vadd.f32 1e-06, %v689_v11  ;;  %v698_v35 = vadd.f32 1e-06, %v682_v12  ;;  %v727_v32 = vmul.f32 %v2154_v13, %v2640_v58  ;;  %v726_v36 = vmul.f32 %v2154_v13, %v2636_v56 }
 0x171   : > { %v647_v16 = vpop.xlane.xlu1 %646  ;;  %v668_v14 = vpop.xlane.xlu0 %667 }
 0x172   : > { %2167 = vrsqrt.f32 %v705_v42  ;;  %v683_v20 = vmul.f32 0.00390625, %v647_v16  ;;  %v690_v15 = vmul.f32 0.00390625, %v668_v14  ;;  %v771_v21 = vmul.f32 %v2853_v7, %v727_v32 }
 0x173   : > { %v2156_v0 = vpop.eup %2155  ;;  %2169 = vrsqrt.f32 %v698_v35  ;;  %v770_v62 = vmul.f32 %v2856_v57, %v726_v36 }
 0x174   : > { %v2158_v48 = vpop.eup %2157  ;;  %v699_v40 = vadd.f32 1e-06, %v683_v20  ;;  %v706_v58 = vadd.f32 1e-06, %v690_v15  ;;  %v729_v56 = vmul.f32 %v2156_v0, %v2664_v38  ;;  %v815_v25 = vadd.f32 %v2859_v54, %v771_v21 }
 0x175   : > { %v671_v22 = vpop.xlane.xlu1 %670  ;;  %v650_v27 = vpop.xlane.xlu0 %649  ;;  %v728_v23 = vmul.f32 %v2156_v0, %v2660_v33  ;;  %v814_v29 = vadd.f32 %v2864_v17, %v770_v62  ;;  %v743_v50 = vmul.f32 %v2158_v48, %v2648_v3  ;;  %v742_v41 = vmul.f32 %v2158_v48, %v2644_v2 }
 0x176   : > { %2171 = vrsqrt.f32 %v699_v40  ;;  %v691_v34 = vmul.f32 0.00390625, %v671_v22  ;;  %v684_v9 = vmul.f32 0.00390625, %v650_v27  ;;  %v773_v6 = vmul.f32 %v2853_v7, %v729_v56 }
 0x177   : > { %v2160_v11 = vpop.eup %2159  ;;  %2173 = vrsqrt.f32 %v706_v58  ;;  %v772_v38 = vmul.f32 %v2856_v57, %v728_v23  ;;  %v787_v12 = vmul.f32 %v2853_v7, %v743_v50  ;;  %v786_v13 = vmul.f32 %v2856_v57, %v742_v41 }
 0x178   : > { %v707_v33 = vadd.f32 1e-06, %v691_v34  ;;  %v700_v42 = vadd.f32 1e-06, %v684_v9  ;;  %v817_v35 = vadd.f32 %v2859_v54, %v773_v6  ;;  %v745_v3 = vmul.f32 %v2160_v11, %v2672_v26  ;;  %v2162_v2 = vpop.eup %2161 }
 0x179   : > { %v653_v32 = vpop.xlane.xlu1 %652  ;;  %v674_v36 = vpop.xlane.xlu0 %673  ;;  %v816_v16 = vadd.f32 %v2864_v17, %v772_v38  ;;  %v831_v14 = vadd.f32 %v2859_v54, %v787_v12  ;;  %v744_v20 = vmul.f32 %v2160_v11, %v2668_v24  ;;  %v830_v15 = vadd.f32 %v2864_v17, %v786_v13 }
 0x17a   : > { %2175 = vrsqrt.f32 %v707_v33  ;;  %v685_v21 = vmul.f32 0.00390625, %v653_v32  ;;  %v692_v0 = vmul.f32 0.00390625, %v674_v36  ;;  %v847_v62 = vpack.c.bf16 %v817_v35, %v815_v25 }
 0x17b   : > { %v2164_v48 = vpop.eup %2163  ;;  %2177 = vrsqrt.f32 %v700_v42  ;;  %v846_v40 = vpack.c.bf16 %v816_v16, %v814_v29  ;;  %v789_v26 = vmul.f32 %v2853_v7, %v745_v3  ;;  %v788_v58 = vmul.f32 %v2856_v57, %v744_v20 }
 0x17c   : > { %v701_v56 = vadd.f32 1e-06, %v685_v21  ;;  %v708_v22 = vadd.f32 1e-06, %v692_v0  ;;  %1166 = vmatprep.mubr.bf16.mxu0 %v847_v62  ;;  %v731_v27 = vmul.f32 %v2162_v2, %v2688_v51  ;;  %v733_v24 = vmul.f32 %v2164_v48, %v2696_v10  ;;  %v2166_v34 = vpop.eup %2165 }
 0x17d   : > { %v677_v23 = vpop.xlane.xlu1 %676  ;;  %1167 = vmatmul.mubr.bf16.vlgmr.msra.gmra.mxu0 %v846_v40  ;;  %v833_v50 = vadd.f32 %v2859_v54, %v789_v26  ;;  %v832_v25 = vadd.f32 %v2864_v17, %v788_v58  ;;  %v730_v41 = vmul.f32 %v2162_v2, %v2684_v44  ;;  %v732_v29 = vmul.f32 %v2164_v48, %v2692_v8 }
 0x17e   : > { %2179 = vrsqrt.f32 %v701_v56  ;;  %v693_v9 = vmul.f32 0.00390625, %v677_v23  ;;  %v775_v6 = vmul.f32 %v2853_v7, %v731_v27  ;;  %v777_v11 = vmul.f32 %v2853_v7, %v733_v24 }
 0x17f   : > { %v2168_v51 = vpop.eup %2167  ;;  %2181 = vrsqrt.f32 %v708_v22  ;;  %v855_v10 = vpack.c.bf16 %v833_v50, %v831_v14  ;;  %v854_v38 = vpack.c.bf16 %v832_v25, %v830_v15  ;;  %v774_v12 = vmul.f32 %v2856_v57, %v730_v41 }
 0x180   : > { %v2170_v13 = vpop.eup %2169  ;;  %v709_v33 = vadd.f32 1e-06, %v693_v9  ;;  %v819_v42 = vadd.f32 %v2859_v54, %v775_v6  ;;  %v821_v44 = vadd.f32 %v2859_v54, %v777_v11  ;;  %v776_v8 = vmul.f32 %v2856_v57, %v732_v29 }
 0x181   : > { %1206 = vmatprep.mubr.bf16.mxu1 %v855_v10  ;;  %v818_v35 = vadd.f32 %v2864_v17, %v774_v12  ;;  %v747_v3 = vmul.f32 %v2166_v34, %v2712_v37  ;;  %v749_v2 = vmul.f32 %v2168_v51, %v2720_v31  ;;  %v746_v32 = vmul.f32 %v2166_v34, %v2708_v53 }
 0x182   : > { %2183 = vrsqrt.f32 %v709_v33  ;;  %1207 = vmatmul.mubr.bf16.vlgmr.msra.gmra.mxu1 %v854_v38  ;;  %v849_v36 = vpack.c.bf16 %v821_v44, %v819_v42  ;;  %v820_v16 = vadd.f32 %v2864_v17, %v776_v8  ;;  %v748_v14 = vmul.f32 %v2168_v51, %v2716_v30 }
 0x183   : > { %v2172_v20 = vpop.eup %2171  ;;  %v791_v15 = vmul.f32 %v2853_v7, %v747_v3  ;;  %v793_v21 = vmul.f32 %v2853_v7, %v749_v2  ;;  %v790_v0 = vmul.f32 %v2856_v57, %v746_v32  ;;  %v735_v37 = vmul.f32 %v2170_v13, %v2738_v39 }
 0x184   : > { %v2174_v62 = vpop.eup %2173  ;;  %1176 = vmatprep.mubr.bf16.mxu0 %v849_v36  ;;  %v848_v31 = vpack.c.bf16 %v820_v16, %v818_v35  ;;  %v792_v53 = vmul.f32 %v2856_v57, %v748_v14  ;;  %v737_v48 = vmul.f32 %v2172_v20, %v2746_v19  ;;  %v734_v40 = vmul.f32 %v2170_v13, %v2734_v43 }
 0x185   : > { %v835_v30 = vadd.f32 %v2859_v54, %v791_v15  ;;  %v837_v26 = vadd.f32 %v2859_v54, %v793_v21  ;;  %v834_v58 = vadd.f32 %v2864_v17, %v790_v0  ;;  %v779_v56 = vmul.f32 %v2853_v7, %v735_v37 }
 0x186   : > { %1177 = vmatmul.mubr.bf16.gmra.mxu0 %v848_v31  ;;  %v836_v39 = vadd.f32 %v2864_v17, %v792_v53  ;;  %v781_v22 = vmul.f32 %v2853_v7, %v737_v48  ;;  %v736_v27 = vmul.f32 %v2172_v20, %v2742_v18  ;;  %v778_v24 = vmul.f32 %v2856_v57, %v734_v40 }
 0x187   : > { %v2176_v19 = vpop.eup %2175  ;;  %v857_v23 = vpack.c.bf16 %v837_v26, %v835_v30  ;;  %v823_v43 = vadd.f32 %v2859_v54, %v779_v56  ;;  %v751_v50 = vmul.f32 %v2174_v62, %v2763_v45  ;;  %v750_v25 = vmul.f32 %v2174_v62, %v2759_v49 }
 0x188   : > { %v2178_v41 = vpop.eup %2177  ;;  %v856_v29 = vpack.c.bf16 %v836_v39, %v834_v58  ;;  %v825_v34 = vadd.f32 %v2859_v54, %v781_v22  ;;  %v780_v9 = vmul.f32 %v2856_v57, %v736_v27  ;;  %v822_v6 = vadd.f32 %v2864_v17, %v778_v24 }
 0x189   : > { %1216 = vmatprep.mubr.bf16.mxu1 %v857_v23  ;;  %v753_v18 = vmul.f32 %v2176_v19, %v2771_v46  ;;  %v795_v11 = vmul.f32 %v2853_v7, %v751_v50  ;;  %v752_v51 = vmul.f32 %v2176_v19, %v2767_v52  ;;  %v794_v10 = vmul.f32 %v2856_v57, %v750_v25 }
 0x18a   : > { %1217 = vmatmul.mubr.bf16.gmra.mxu1 %v856_v29  ;;  %v851_v45 = vpack.c.bf16 %v825_v34, %v823_v43  ;;  %v824_v49 = vadd.f32 %v2864_v17, %v780_v9  ;;  %v739_v38 = vmul.f32 %v2178_v41, %v2789_v60  ;;  %v738_v12 = vmul.f32 %v2178_v41, %v2785_v59 }
 0x18b   : > { %v2180_v13 = vpop.eup %2179  ;;  %v797_v33 = vmul.f32 %v2853_v7, %v753_v18  ;;  %v839_v42 = vadd.f32 %v2859_v54, %v795_v11  ;;  %v796_v46 = vmul.f32 %v2856_v57, %v752_v51  ;;  %v838_v44 = vadd.f32 %v2864_v17, %v794_v10 }
 0x18c   : > { %v2182_v52 = vpop.eup %2181  ;;  %1186 = vmatprep.mubr.bf16.mxu0 %v851_v45  ;;  %v850_v8 = vpack.c.bf16 %v824_v49, %v822_v6  ;;  %v741_v35 = vmul.f32 %v2180_v13, %v2797_v61  ;;  %v783_v3 = vmul.f32 %v2853_v7, %v739_v38  ;;  %v740_v60 = vmul.f32 %v2180_v13, %v2793_v55 }
 0x18d   : > { %v841_v59 = vadd.f32 %v2859_v54, %v797_v33  ;;  %v840_v2 = vadd.f32 %v2864_v17, %v796_v46  ;;  %v782_v32 = vmul.f32 %v2856_v57, %v738_v12  ;;  %v755_v36 = vmul.f32 %v2182_v52, %v2815_v4 }
 0x18e   : > { %1187 = vmatmul.mubr.bf16.gmra.mxu0 %v850_v8  ;;  %v785_v16 = vmul.f32 %v2853_v7, %v741_v35  ;;  %v827_v14 = vadd.f32 %v2859_v54, %v783_v3  ;;  %v784_v20 = vmul.f32 %v2856_v57, %v740_v60  ;;  %v754_v61 = vmul.f32 %v2182_v52, %v2811_v1 }
 0x18f   : > { %v2184_v15 = vpop.eup %2183  ;;  %v859_v21 = vpack.c.bf16 %v841_v59, %v839_v42  ;;  %v858_v55 = vpack.c.bf16 %v840_v2, %v838_v44  ;;  %v826_v0 = vadd.f32 %v2864_v17, %v782_v32  ;;  %v799_v37 = vmul.f32 %v2853_v7, %v755_v36 }
 0x190   : > { %v829_v62 = vadd.f32 %v2859_v54, %v785_v16  ;;  %v828_v4 = vadd.f32 %v2864_v17, %v784_v20  ;;  %v757_v31 = vmul.f32 %v2184_v15, %v2823_v5  ;;  %v756_v53 = vmul.f32 %v2184_v15, %v2819_v63 }
 0x191   : > { %1226 = vmatprep.mubr.bf16.mxu1 %v859_v21  ;;  %v798_v48 = vmul.f32 %v2856_v57, %v754_v61  ;;  %v843_v58 = vadd.f32 %v2859_v54, %v799_v37 }
 0x192   : > { %1227 = vmatmul.mubr.bf16.gmra.mxu1 %v858_v55  ;;  %v853_v1 = vpack.c.bf16 %v829_v62, %v827_v14  ;;  %v852_v40 = vpack.c.bf16 %v828_v4, %v826_v0  ;;  %v801_v30 = vmul.f32 %v2853_v7, %v757_v31  ;;  %v800_v26 = vmul.f32 %v2856_v57, %v756_v53  ;;  %v866_v7 = vld [vmem:[%s449_s25] sm:$0x3] }
 0x193   : > { %v842_v5 = vadd.f32 %v2864_v17, %v798_v48  ;;  %v2965_v57 = vrot.slane %v866_v7, %v2847_v47 }
 0x194   : > { %1196 = vmatprep.mubr.bf16.mxu0 %v853_v1  ;;  %v845_v56 = vadd.f32 %v2859_v54, %v801_v30  ;;  %v844_v63 = vadd.f32 %v2864_v17, %v800_v26  ;;  %v2968_v54 = vrot.slane %v866_v7, %v2842_v28 }
 0x196   : > { %1197 = vmatmul.mubr.bf16.gmra.mxu0 %v852_v40  ;;  %v861_v39 = vpack.c.bf16 %v845_v56, %v843_v58  ;;  %v860_v22 = vpack.c.bf16 %v844_v63, %v842_v5 }
 0x198   : > { %1236 = vmatprep.mubr.bf16.mxu1 %v861_v39 }
 0x19a   : > { %1237 = vmatmul.mubr.bf16.gmra.mxu1 %v860_v22 }
 0x23d   : > { %v1168_v17 = vpop.f32.mrf.mxu0 }
 0x23e   : > { %v2971_v27 = vadd.f32 %v1168_v17, %v2965_v57 }
 0x23f   : > { %v1170_v24 = vpop.f32.mrf.mxu0 }
 0x240   : > { %v1346_v19 = vmul.f32 %v2971_v27, %v2971_v27  ;;  %v2976_v23 = vadd.f32 %v1170_v24, %v2968_v54 }
 0x241   : > { %v1172_v43 = vpop.f32.mrf.mxu0 }
 0x242   : > { %v1378_v50 = vmul.f32 %v1346_v19, %v2971_v27  ;;  %v1347_v47 = vmul.f32 %v2976_v23, %v2976_v23  ;;  %v2982_v28 = vadd.f32 %v1172_v43, %v2965_v57  ;;  %v1208_v25 = vpop.f32.mrf.mxu1 }
 0x243   : > { %v2985_v41 = vadd.f32 %v1208_v25, %v2965_v57  ;;  %v1174_v29 = vpop.f32.mrf.mxu0 }
 0x244   : > { %v1410_v34 = vmul.f32 0.044715, %v1378_v50  ;;  %v1379_v9 = vmul.f32 %v1347_v47, %v2976_v23  ;;  %v1348_v6 = vmul.f32 %v2982_v28, %v2982_v28  ;;  %v2991_v18 = vadd.f32 %v1174_v29, %v2968_v54  ;;  %v1210_v11 = vpop.f32.mrf.mxu1 }
 0x245   : > { %v1362_v51 = vmul.f32 %v2985_v41, %v2985_v41  ;;  %v2996_v10 = vadd.f32 %v1210_v11, %v2968_v54 }
 0x246   : > { %v1442_v45 = vadd.f32 %v1410_v34, %v2971_v27  ;;  %v1411_v49 = vmul.f32 0.044715, %v1379_v9  ;;  %v1380_v38 = vmul.f32 %v1348_v6, %v2982_v28  ;;  %v1349_v12 = vmul.f32 %v2991_v18, %v2991_v18  ;;  %v1178_v13 = vpop.f32.mrf.mxu0  ;;  %v1212_v33 = vpop.f32.mrf.mxu1 }
 0x247   : > { %v1394_v42 = vmul.f32 %v1362_v51, %v2985_v41  ;;  %v1363_v46 = vmul.f32 %v2996_v10, %v2996_v10  ;;  %v3006_v44 = vadd.f32 %v1178_v13, %v2965_v57  ;;  %v3009_v52 = vadd.f32 %v1212_v33, %v2965_v57 }
 0x248   : > { %v1474_v8 = vmul.f32 0.7978846, %v1442_v45  ;;  %v1443_v35 = vadd.f32 %v1411_v49, %v2976_v23  ;;  %v1412_v3 = vmul.f32 0.044715, %v1380_v38  ;;  %v1381_v60 = vmul.f32 %v1349_v12, %v2991_v18  ;;  %v1180_v59 = vpop.f32.mrf.mxu0  ;;  %v1214_v2 = vpop.f32.mrf.mxu1 }
 0x249   : > { %v1426_v32 = vmul.f32 0.044715, %v1394_v42  ;;  %v1395_v36 = vmul.f32 %v1363_v46, %v2996_v10  ;;  %v1350_v16 = vmul.f32 %v3006_v44, %v3006_v44  ;;  %v1364_v14 = vmul.f32 %v3009_v52, %v3009_v52 }
 0x24a   : > { %2185 = vtanh.f32 %v1474_v8  ;;  %v1475_v20 = vmul.f32 0.7978846, %v1443_v35  ;;  %v1444_v61 = vadd.f32 %v1412_v3, %v2982_v28  ;;  %v1413_v15 = vmul.f32 0.044715, %v1381_v60  ;;  %v1182_v21 = vpop.f32.mrf.mxu0  ;;  %v1218_v4 = vpop.f32.mrf.mxu1 }
 0x24b   : > { %v1458_v55 = vadd.f32 %v1426_v32, %v2985_v41  ;;  %v1427_v0 = vmul.f32 0.044715, %v1395_v36  ;;  %v1382_v37 = vmul.f32 %v1350_v16, %v3006_v44  ;;  %v1396_v62 = vmul.f32 %v1364_v14, %v3009_v52 }
 0x24c   : > { %2187 = vtanh.f32 %v1475_v20  ;;  %v1476_v31 = vmul.f32 0.7978846, %v1444_v61  ;;  %v1445_v53 = vadd.f32 %v1413_v15, %v2991_v18  ;;  %v3024_v48 = vadd.f32 %v1180_v59, %v2968_v54  ;;  %v1184_v1 = vpop.f32.mrf.mxu0  ;;  %v1220_v17 = vpop.f32.mrf.mxu1 }
 0x24d   : > { %v1490_v40 = vmul.f32 0.7978846, %v1458_v55  ;;  %v1459_v30 = vadd.f32 %v1427_v0, %v2996_v10  ;;  %v1414_v26 = vmul.f32 0.044715, %v1382_v37  ;;  %v1428_v58 = vmul.f32 0.044715, %v1396_v62 }
 0x24e   : > { %2189 = vtanh.f32 %v1476_v31  ;;  %v1477_v56 = vmul.f32 0.7978846, %v1445_v53  ;;  %v1351_v5 = vmul.f32 %v3024_v48, %v3024_v48  ;;  %v3030_v63 = vadd.f32 %v1214_v2, %v2968_v54  ;;  %v1188_v50 = vpop.f32.mrf.mxu0  ;;  %v1222_v38 = vpop.f32.mrf.mxu1 }
 0x24f   : > { %2191 = vtanh.f32 %v1490_v40  ;;  %v1491_v39 = vmul.f32 0.7978846, %v1459_v30  ;;  %v1446_v22 = vadd.f32 %v1414_v26, %v3006_v44  ;;  %v1460_v7 = vadd.f32 %v1428_v58, %v3009_v52 }
 0x250   : > { %2193 = vtanh.f32 %v1477_v56  ;;  %v1383_v24 = vmul.f32 %v1351_v5, %v3024_v48  ;;  %v1365_v19 = vmul.f32 %v3030_v63, %v3030_v63  ;;  %v3038_v43 = vadd.f32 %v1182_v21, %v2965_v57 }
 0x251   : > { %2195 = vtanh.f32 %v1491_v39  ;;  %v1478_v47 = vmul.f32 0.7978846, %v1446_v22  ;;  %v1492_v25 = vmul.f32 0.7978846, %v1460_v7  ;;  %v3041_v29 = vadd.f32 %v1218_v4, %v2965_v57 }
 0x252   : > { %v1415_v34 = vmul.f32 0.044715, %v1383_v24  ;;  %v1397_v9 = vmul.f32 %v1365_v19, %v3030_v63  ;;  %v1352_v6 = vmul.f32 %v3038_v43, %v3038_v43  ;;  %v3047_v11 = vadd.f32 %v1184_v1, %v2968_v54 }
 0x253   : > { %2197 = vtanh.f32 %v1478_v47  ;;  %v1366_v51 = vmul.f32 %v3041_v29, %v3041_v29  ;;  %v3052_v45 = vadd.f32 %v1220_v17, %v2968_v54  ;;  %v3055_v49 = vadd.f32 %v1188_v50, %v2965_v57  ;;  %v1190_v17 = vpop.f32.mrf.mxu0 }
 0x254   : > { %2199 = vtanh.f32 %v1492_v25  ;;  %v1447_v12 = vadd.f32 %v1415_v34, %v3024_v48  ;;  %v1429_v13 = vmul.f32 0.044715, %v1397_v9  ;;  %v1384_v33 = vmul.f32 %v1352_v6, %v3038_v43 }
 0x255   : > { %v1398_v42 = vmul.f32 %v1366_v51, %v3041_v29  ;;  %v1353_v46 = vmul.f32 %v3047_v11, %v3047_v11  ;;  %v1367_v8 = vmul.f32 %v3052_v45, %v3052_v45  ;;  %v1354_v35 = vmul.f32 %v3055_v49, %v3055_v49 }
 0x256   : > { %v1479_v3 = vmul.f32 0.7978846, %v1447_v12  ;;  %v1461_v60 = vadd.f32 %v1429_v13, %v3030_v63  ;;  %v1416_v59 = vmul.f32 0.044715, %v1384_v33  ;;  %v3068_v2 = vadd.f32 %v1222_v38, %v2965_v57 }
 0x257   : > { %v2186_v32 = vpop.eup %2185  ;;  %v1430_v36 = vmul.f32 0.044715, %v1398_v42  ;;  %v1385_v16 = vmul.f32 %v1353_v46, %v3047_v11  ;;  %v1399_v14 = vmul.f32 %v1367_v8, %v3052_v45  ;;  %v1386_v20 = vmul.f32 %v1354_v35, %v3055_v49  ;;  %v1224_v8 = vpop.f32.mrf.mxu1 }
 0x258   : > { %v1538_v61 = vadd.f32 1.0, %v2186_v32  ;;  %2201 = vtanh.f32 %v1479_v3  ;;  %v1493_v15 = vmul.f32 0.7978846, %v1461_v60  ;;  %v1448_v21 = vadd.f32 %v1416_v59, %v3038_v43  ;;  %v1192_v35 = vpop.f32.mrf.mxu0 }
 0x259   : > { %v2188_v55 = vpop.eup %2187  ;;  %v1462_v0 = vadd.f32 %v1430_v36, %v3041_v29  ;;  %v1417_v37 = vmul.f32 0.044715, %v1385_v16  ;;  %v1431_v62 = vmul.f32 0.044715, %v1399_v14  ;;  %v1418_v4 = vmul.f32 0.044715, %v1386_v20 }
 0x25a   : > { %v1570_v31 = vmul.f32 0.5, %v1538_v61  ;;  %v1539_v53 = vadd.f32 1.0, %v2188_v55  ;;  %2203 = vtanh.f32 %v1493_v15  ;;  %v1480_v1 = vmul.f32 0.7978846, %v1448_v21 }
 0x25b   : > { %v2190_v40 = vpop.eup %2189  ;;  %v1494_v30 = vmul.f32 0.7978846, %v1462_v0  ;;  %v1449_v26 = vadd.f32 %v1417_v37, %v3047_v11  ;;  %v1463_v58 = vadd.f32 %v1431_v62, %v3052_v45  ;;  %v1450_v56 = vadd.f32 %v1418_v4, %v3055_v49  ;;  %v1228_v0 = vpop.f32.mrf.mxu1 }
 0x25c   : > { %v2192_v5 = vpop.eup %2191  ;;  %v1602_v39 = vmul.f32 %v1570_v31, %v2971_v27  ;;  %v1571_v22 = vmul.f32 0.5, %v1539_v53  ;;  %v1540_v7 = vadd.f32 1.0, %v2190_v40  ;;  %2205 = vtanh.f32 %v1480_v1  ;;  %v1194_v37 = vpop.f32.mrf.mxu0 }
 0x25d   : > { %v2194_v24 = vpop.eup %2193  ;;  %v1554_v19 = vadd.f32 1.0, %v2192_v5  ;;  %2207 = vtanh.f32 %v1494_v30  ;;  %v1481_v50 = vmul.f32 0.7978846, %v1449_v26  ;;  %v1495_v47 = vmul.f32 0.7978846, %v1463_v58 }
 0x25e   : > { %v2196_v25 = vpop.eup %2195  ;;  %v1603_v34 = vmul.f32 %v1571_v22, %v2976_v23  ;;  %v1572_v9 = vmul.f32 0.5, %v1540_v7  ;;  %v1541_v6 = vadd.f32 1.0, %v2194_v24  ;;  %v1482_v51 = vmul.f32 0.7978846, %v1450_v56 }
 0x25f   : > { %v1586_v38 = vmul.f32 0.5, %v1554_v19  ;;  %v1555_v27 = vadd.f32 1.0, %v2196_v25  ;;  %2209 = vtanh.f32 %v1481_v50  ;;  %v1368_v12 = vmul.f32 %v3068_v2, %v3068_v2 }
 0x260   : > { %v2198_v13 = vpop.eup %2197  ;;  %v2016_v33 = vpack.c.bf16 %v1603_v34, %v1602_v39  ;;  %v1604_v42 = vmul.f32 %v1572_v9, %v2982_v28  ;;  %v1573_v46 = vmul.f32 0.5, %v1541_v6  ;;  %2211 = vtanh.f32 %v1495_v47 }
 0x261   : > { %v2200_v3 = vpop.eup %2199  ;;  %v1618_v23 = vmul.f32 %v1586_v38, %v2985_v41  ;;  %v1587_v60 = vmul.f32 0.5, %v1555_v27  ;;  %v1542_v59 = vadd.f32 1.0, %v2198_v13  ;;  %2213 = vtanh.f32 %v1482_v51  ;;  %v1230_v38 = vpop.f32.mrf.mxu1 }
 0x262   : > { %1730 = vst [vmem:[%s3089_s18] sm:$0xff] %v2016_v33  ;;  %v1605_v32 = vmul.f32 %v1573_v46, %v2991_v18  ;;  %v1556_v36 = vadd.f32 1.0, %v2200_v3  ;;  %v1400_v16 = vmul.f32 %v1368_v12, %v3068_v2  ;;  %v3095_v28 = vadd.f32 %v1190_v17, %v2968_v54 }
 0x263   : > { %v1619_v14 = vmul.f32 %v1587_v60, %v2996_v10  ;;  %v1574_v20 = vmul.f32 0.5, %v1542_v59  ;;  %v3099_v41 = vadd.f32 %v1224_v8, %v2968_v54  ;;  %v3102_v61 = vadd.f32 %v1192_v35, %v2965_v57 }
 0x264   : > { %v2017_v15 = vpack.c.bf16 %v1605_v32, %v1604_v42  ;;  %v1588_v21 = vmul.f32 0.5, %v1556_v36  ;;  %v1432_v18 = vmul.f32 0.044715, %v1400_v16  ;;  %v1355_v55 = vmul.f32 %v3095_v28, %v3095_v28  ;;  %v1198_v42 = vpop.f32.mrf.mxu0 }
 0x265   : > { %v2202_v62 = vpop.eup %2201  ;;  %v2024_v4 = vpack.c.bf16 %v1619_v14, %v1618_v23  ;;  %v1606_v10 = vmul.f32 %v1574_v20, %v3006_v44  ;;  %v1369_v31 = vmul.f32 %v3099_v41, %v3099_v41  ;;  %v1356_v53 = vmul.f32 %v3102_v61, %v3102_v61 }
 0x266   : > { %1731 = vst [vmem:[%s3089_s18 + $0x8] sm:$0xff] %v2017_v15  ;;  %v1620_v1 = vmul.f32 %v1588_v21, %v3009_v52  ;;  %v1543_v40 = vadd.f32 1.0, %v2202_v62  ;;  %v1464_v30 = vadd.f32 %v1432_v18, %v3068_v2  ;;  %v1387_v26 = vmul.f32 %v1355_v55, %v3095_v28  ;;  %v1232_v21 = vpop.f32.mrf.mxu1 }
 0x267   : > { %v2204_v58 = vpop.eup %2203  ;;  %1738 = vst [vmem:[%s3089_s18 + $0x40] sm:$0xff] %v2024_v4  ;;  %v1401_v56 = vmul.f32 %v1369_v31, %v3099_v41  ;;  %v1388_v44 = vmul.f32 %v1356_v53, %v3102_v61  ;;  %v3119_v5 = vadd.f32 %v1228_v0, %v2965_v57  ;;  %v3122_v39 = vadd.f32 %v1194_v37, %v2968_v54 }
 0x268   : > { %v1575_v22 = vmul.f32 0.5, %v1543_v40  ;;  %v1557_v7 = vadd.f32 1.0, %v2204_v58  ;;  %v1496_v52 = vmul.f32 0.7978846, %v1464_v30  ;;  %v1419_v17 = vmul.f32 0.044715, %v1387_v26  ;;  %v1234_v30 = vpop.f32.mrf.mxu1 }
 0x269   : > { %v2206_v24 = vpop.eup %2205  ;;  %v1433_v19 = vmul.f32 0.044715, %v1401_v56  ;;  %v1420_v50 = vmul.f32 0.044715, %v1388_v44  ;;  %v1370_v47 = vmul.f32 %v3119_v5, %v3119_v5  ;;  %v1357_v25 = vmul.f32 %v3122_v39, %v3122_v39 }
 0x26a   : > { %v2208_v34 = vpop.eup %2207  ;;  %v1607_v9 = vmul.f32 %v1575_v22, %v3024_v48  ;;  %v1589_v6 = vmul.f32 0.5, %v1557_v7  ;;  %v1544_v51 = vadd.f32 1.0, %v2206_v24  ;;  %2215 = vtanh.f32 %v1496_v52 }
 0x26b   : > { %v1558_v27 = vadd.f32 1.0, %v2208_v34  ;;  %v1451_v12 = vadd.f32 %v1419_v17, %v3095_v28  ;;  %v1465_v13 = vadd.f32 %v1433_v19, %v3099_v41  ;;  %v1452_v33 = vadd.f32 %v1420_v50, %v3102_v61  ;;  %v1238_v34 = vpop.f32.mrf.mxu1 }
 0x26c   : > { %v2210_v46 = vpop.eup %2209  ;;  %v2018_v8 = vpack.c.bf16 %v1607_v9, %v1606_v10  ;;  %v1621_v35 = vmul.f32 %v1589_v6, %v3030_v63  ;;  %v1576_v3 = vmul.f32 0.5, %v1544_v51  ;;  %v1402_v48 = vmul.f32 %v1370_v47, %v3119_v5  ;;  %v1200_v63 = vpop.f32.mrf.mxu0 }
 0x26d   : > { %v2212_v23 = vpop.eup %2211  ;;  %v1590_v60 = vmul.f32 0.5, %v1558_v27  ;;  %v1545_v59 = vadd.f32 1.0, %v2210_v46  ;;  %v1483_v32 = vmul.f32 0.7978846, %v1451_v12  ;;  %v1497_v36 = vmul.f32 0.7978846, %v1465_v13 }
 0x26e   : > { %v2214_v16 = vpop.eup %2213  ;;  %1732 = vst [vmem:[%s3089_s18 + $0x10] sm:$0xff] %v2018_v8  ;;  %v2025_v14 = vpack.c.bf16 %v1621_v35, %v1620_v1  ;;  %v1559_v20 = vadd.f32 1.0, %v2212_v23  ;;  %v1484_v15 = vmul.f32 0.7978846, %v1452_v33  ;;  %v1608_v18 = vmul.f32 %v1576_v3, %v3038_v43  ;;  %v1202_v56 = vpop.f32.mrf.mxu0 }
 0x26f   : > { %v1577_v55 = vmul.f32 0.5, %v1545_v59  ;;  %2217 = vtanh.f32 %v1483_v32  ;;  %v1434_v37 = vmul.f32 0.044715, %v1402_v48  ;;  %v1389_v62 = vmul.f32 %v1357_v25, %v3122_v39  ;;  %v1240_v59 = vpop.f32.mrf.mxu1 }
 0x270   : > { %1739 = vst [vmem:[%s3089_s18 + $0x48] sm:$0xff] %v2025_v14  ;;  %v1591_v0 = vmul.f32 0.5, %v1559_v20  ;;  %2219 = vtanh.f32 %v1497_v36  ;;  %v1622_v4 = vmul.f32 %v1590_v60, %v3041_v29  ;;  %v3141_v31 = vadd.f32 %v1230_v38, %v2968_v54 }
 0x271   : > { %v1609_v10 = vmul.f32 %v1577_v55, %v3047_v11  ;;  %2221 = vtanh.f32 %v1484_v15  ;;  %v1466_v53 = vadd.f32 %v1434_v37, %v3119_v5  ;;  %v1421_v1 = vmul.f32 0.044715, %v1389_v62 }
 0x272   : > { %v1623_v43 = vmul.f32 %v1591_v0, %v3052_v45  ;;  %v3146_v40 = vadd.f32 %v1198_v42, %v2965_v57  ;;  %v1546_v58 = vadd.f32 1.0, %v2214_v16  ;;  %v1371_v29 = vmul.f32 %v3141_v31, %v3141_v31 }
 0x273   : > { %v2019_v26 = vpack.c.bf16 %v1609_v10, %v1608_v18  ;;  %v3151_v11 = vadd.f32 %v1232_v21, %v2965_v57  ;;  %v1498_v22 = vmul.f32 0.7978846, %v1466_v53  ;;  %v1453_v45 = vadd.f32 %v1421_v1, %v3122_v39  ;;  %v1204_v1 = vpop.f32.mrf.mxu0 }
 0x274   : > { %v2026_v44 = vpack.c.bf16 %v1623_v43, %v1622_v4  ;;  %v1358_v7 = vmul.f32 %v3146_v40, %v3146_v40  ;;  %v1403_v52 = vmul.f32 %v1371_v29, %v3141_v31  ;;  %v3161_v24 = vadd.f32 %v1200_v63, %v2968_v54 }
 0x275   : > { %1733 = vst [vmem:[%s3089_s18 + $0x18] sm:$0xff] %v2019_v26  ;;  %v1372_v17 = vmul.f32 %v3151_v11, %v3151_v11  ;;  %v3164_v19 = vadd.f32 %v1234_v30, %v2968_v54  ;;  %2223 = vtanh.f32 %v1498_v22  ;;  %v1485_v50 = vmul.f32 0.7978846, %v1453_v45  ;;  %v1242_v30 = vpop.f32.mrf.mxu1 }
 0x276   : > { %1740 = vst [vmem:[%s3089_s18 + $0x50] sm:$0xff] %v2026_v44  ;;  %v1390_v47 = vmul.f32 %v1358_v7, %v3146_v40  ;;  %v3169_v25 = vadd.f32 %v1202_v56, %v2965_v57  ;;  %v1435_v6 = vmul.f32 0.044715, %v1403_v52  ;;  %v1359_v38 = vmul.f32 %v3161_v24, %v3161_v24 }
 0x277   : > { %v2216_v9 = vpop.eup %2215  ;;  %v1404_v51 = vmul.f32 %v1372_v17, %v3151_v11  ;;  %v1373_v27 = vmul.f32 %v3164_v19, %v3164_v19  ;;  %2225 = vtanh.f32 %v1485_v50  ;;  %v1578_v3 = vmul.f32 0.5, %v1546_v58 }
 0x278   : > { %v1560_v12 = vadd.f32 1.0, %v2216_v9  ;;  %v1422_v13 = vmul.f32 0.044715, %v1390_v47  ;;  %v1360_v33 = vmul.f32 %v3169_v25, %v3169_v25  ;;  %v1467_v42 = vadd.f32 %v1435_v6, %v3141_v31 }
 0x279   : > { %v1436_v46 = vmul.f32 0.044715, %v1404_v51  ;;  %v1391_v8 = vmul.f32 %v1359_v38, %v3161_v24  ;;  %v1405_v35 = vmul.f32 %v1373_v27, %v3164_v19  ;;  %v3184_v60 = vadd.f32 %v1238_v34, %v2965_v57 }
 0x27a   : > { %v1454_v48 = vadd.f32 %v1422_v13, %v3146_v40  ;;  %v1392_v23 = vmul.f32 %v1360_v33, %v3169_v25  ;;  %v1499_v32 = vmul.f32 0.7978846, %v1467_v42  ;;  %v1592_v15 = vmul.f32 0.5, %v1560_v12 }
 0x27b   : > { %v1468_v36 = vadd.f32 %v1436_v46, %v3151_v11  ;;  %v1423_v16 = vmul.f32 0.044715, %v1391_v8  ;;  %v1437_v14 = vmul.f32 0.044715, %v1405_v35  ;;  %v1374_v55 = vmul.f32 %v3184_v60, %v3184_v60 }
 0x27c   : > { %v2218_v20 = vpop.eup %2217  ;;  %v1486_v21 = vmul.f32 0.7978846, %v1454_v48  ;;  %v1424_v18 = vmul.f32 0.044715, %v1392_v23  ;;  %2227 = vtanh.f32 %v1499_v32  ;;  %v1610_v10 = vmul.f32 %v1578_v3, %v3055_v49 }
 0x27d   : > { %v2220_v63 = vpop.eup %2219  ;;  %v1547_v0 = vadd.f32 1.0, %v2218_v20  ;;  %v1500_v37 = vmul.f32 0.7978846, %v1468_v36  ;;  %v1455_v62 = vadd.f32 %v1423_v16, %v3161_v24  ;;  %v1469_v53 = vadd.f32 %v1437_v14, %v3164_v19 }
 0x27e   : > { %v2222_v4 = vpop.eup %2221  ;;  %v1561_v43 = vadd.f32 1.0, %v2220_v63  ;;  %2229 = vtanh.f32 %v1486_v21  ;;  %v1456_v29 = vadd.f32 %v1424_v18, %v3169_v25  ;;  %v1624_v56 = vmul.f32 %v1592_v15, %v3068_v2  ;;  %v1244_v2 = vpop.f32.mrf.mxu1 }
 0x27f   : > { %v1579_v26 = vmul.f32 0.5, %v1547_v0  ;;  %2231 = vtanh.f32 %v1500_v37  ;;  %v1487_v58 = vmul.f32 0.7978846, %v1455_v62  ;;  %v1501_v22 = vmul.f32 0.7978846, %v1469_v53 }
 0x280   : > { %v1593_v44 = vmul.f32 0.5, %v1561_v43  ;;  %v1406_v45 = vmul.f32 %v1374_v55, %v3184_v60  ;;  %v1548_v49 = vadd.f32 1.0, %v2222_v4  ;;  %v3197_v52 = vadd.f32 %v1204_v1, %v2968_v54 }
 0x281   : > { %v1611_v7 = vmul.f32 %v1579_v26, %v3095_v28  ;;  %2233 = vtanh.f32 %v1487_v58  ;;  %v3201_v47 = vadd.f32 %v1240_v59, %v2968_v54  ;;  %v1488_v6 = vmul.f32 0.7978846, %v1456_v29 }
 0x282   : > { %v1625_v17 = vmul.f32 %v1593_v44, %v3099_v41  ;;  %2235 = vtanh.f32 %v1501_v22  ;;  %v1438_v50 = vmul.f32 0.044715, %v1406_v45  ;;  %v2224_v34 = vpop.eup %2223  ;;  %v1361_v28 = vmul.f32 %v3197_v52, %v3197_v52 }
 0x283   : > { %v2020_v9 = vpack.c.bf16 %v1611_v7, %v1610_v10  ;;  %v1375_v27 = vmul.f32 %v3201_v47, %v3201_v47  ;;  %v1580_v12 = vmul.f32 0.5, %v1548_v49  ;;  %v3211_v33 = vadd.f32 %v1242_v30, %v2965_v57 }
 0x284   : > { %v2027_v51 = vpack.c.bf16 %v1625_v17, %v1624_v56  ;;  %v1470_v38 = vadd.f32 %v1438_v50, %v3184_v60  ;;  %v2226_v41 = vpop.eup %2225  ;;  %v1393_v13 = vmul.f32 %v1361_v28, %v3197_v52  ;;  %v3214_v42 = vadd.f32 %v1244_v2, %v2968_v54 }
 0x285   : > { %1734 = vst [vmem:[%s3089_s18 + $0x20] sm:$0xff] %v2020_v9  ;;  %v1562_v46 = vadd.f32 1.0, %v2224_v34  ;;  %v1549_v8 = vadd.f32 1.0, %v2226_v41  ;;  %v1407_v3 = vmul.f32 %v1375_v27, %v3201_v47  ;;  %2237 = vtanh.f32 %v1488_v6 }
 0x286   : > { %1741 = vst [vmem:[%s3089_s18 + $0x58] sm:$0xff] %v2027_v51  ;;  %v1502_v35 = vmul.f32 0.7978846, %v1470_v38  ;;  %v1425_v48 = vmul.f32 0.044715, %v1393_v13  ;;  %v1376_v23 = vmul.f32 %v3211_v33, %v3211_v33  ;;  %v1377_v59 = vmul.f32 %v3214_v42, %v3214_v42 }
 0x287   : > { %v1581_v32 = vmul.f32 0.5, %v1549_v8  ;;  %v1439_v57 = vmul.f32 0.044715, %v1407_v3  ;;  %v1612_v20 = vmul.f32 %v1580_v12, %v3102_v61  ;;  %v1594_v15 = vmul.f32 0.5, %v1562_v46 }
 0x288   : > { %2239 = vtanh.f32 %v1502_v35  ;;  %v1457_v54 = vadd.f32 %v1425_v48, %v3197_v52  ;;  %v1408_v36 = vmul.f32 %v1376_v23, %v3211_v33  ;;  %v1409_v16 = vmul.f32 %v1377_v59, %v3214_v42 }
 0x289   : > { %v2228_v14 = vpop.eup %2227  ;;  %v1613_v21 = vmul.f32 %v1581_v32, %v3122_v39  ;;  %v1471_v18 = vadd.f32 %v1439_v57, %v3201_v47  ;;  %v1626_v39 = vmul.f32 %v1594_v15, %v3119_v5 }
 0x28a   : > { %v1563_v63 = vadd.f32 1.0, %v2228_v14  ;;  %v1489_v0 = vmul.f32 0.7978846, %v1457_v54  ;;  %v1440_v37 = vmul.f32 0.044715, %v1408_v36 }
 0x28b   : > { %v2230_v55 = vpop.eup %2229  ;;  %v2021_v4 = vpack.c.bf16 %v1613_v21, %v1612_v20  ;;  %v1503_v43 = vmul.f32 0.7978846, %v1471_v18  ;;  %v1441_v53 = vmul.f32 0.044715, %v1409_v16 }
 0x28c   : > { %v2232_v62 = vpop.eup %2231  ;;  %v1550_v10 = vadd.f32 1.0, %v2230_v55  ;;  %v1595_v1 = vmul.f32 0.5, %v1563_v63  ;;  %2241 = vtanh.f32 %v1489_v0  ;;  %v1472_v61 = vadd.f32 %v1440_v37, %v3211_v33  ;;  %v1833_v37 = vld [vmem:[%s3089_s18 + $0x40] sm:$0xff] (%p2354_p6) }
 0x28d   : > { %v1564_v30 = vadd.f32 1.0, %v2232_v62  ;;  %1735 = vst [vmem:[%s3089_s18 + $0x28] sm:$0xff] %v2021_v4  ;;  %2243 = vtanh.f32 %v1503_v43  ;;  %v1473_v58 = vadd.f32 %v1441_v53, %v3214_v42  ;;  %1834 = vst [vmem:[%s1758_s7 + $0x100] sm:$0xff] (%p2354_p6), %v1833_v37  ;;  %v1835_v62 = vld [vmem:[%s3089_s18 + $0x48] sm:$0xff] (%p2354_p6)  ;;  %v1837_v4 = vld [vmem:[%s3089_s18 + $0x50] sm:$0xff] (%p2354_p6) }
 0x28e   : > { %v2234_v26 = vpop.eup %2233  ;;  %v1627_v56 = vmul.f32 %v1595_v1, %v3141_v31  ;;  %v1582_v44 = vmul.f32 0.5, %v1550_v10  ;;  %v1504_v45 = vmul.f32 0.7978846, %v1472_v61  ;;  %v1839_v10 = vld [vmem:[%s3089_s18 + $0x58] sm:$0xff] (%p2354_p6)  ;;  %1836 = vst [vmem:[%s1758_s7 + $0x120] sm:$0xff] (%p2354_p6), %v1835_v62  ;;  %1838 = vst [vmem:[%s1758_s7 + $0x140] sm:$0xff] (%p2354_p6), %v1837_v4 }
 0x28f   : > { %v2236_v29 = vpop.eup %2235  ;;  %v1551_v22 = vadd.f32 1.0, %v2234_v26  ;;  %v1596_v7 = vmul.f32 0.5, %v1564_v30  ;;  %v1505_v17 = vmul.f32 0.7978846, %v1473_v58  ;;  %1840 = vst [vmem:[%s1758_s7 + $0x160] sm:$0xff] (%p2354_p6), %v1839_v10 }
 0x290   : > { %v1565_v49 = vadd.f32 1.0, %v2236_v29  ;;  %v2028_v50 = vpack.c.bf16 %v1627_v56, %v1626_v39  ;;  %2245 = vtanh.f32 %v1504_v45  ;;  %v1614_v5 = vmul.f32 %v1582_v44, %v3146_v40 }
 0x291   : > { %v1583_v2 = vmul.f32 0.5, %v1551_v22  ;;  %2247 = vtanh.f32 %v1505_v17  ;;  %v1628_v31 = vmul.f32 %v1596_v7, %v3151_v11 }
 0x292   : > { %v1597_v34 = vmul.f32 0.5, %v1565_v49  ;;  %1742 = vst [vmem:[%s3089_s18 + $0x60] sm:$0xff] %v2028_v50  ;;  %v2238_v6 = vpop.eup %2237 }
 0x293   : > { %v1615_v9 = vmul.f32 %v1583_v2, %v3161_v24  ;;  %v1552_v41 = vadd.f32 1.0, %v2238_v6 }
 0x294   : > { %v1629_v28 = vmul.f32 %v1597_v34, %v3164_v19  ;;  %v1827_v55 = vld [vmem:[%s3089_s18 + $0x28] sm:$0xff] (%p2354_p6) }
 0x295   : > { %v2240_v51 = vpop.eup %2239  ;;  %v2022_v38 = vpack.c.bf16 %v1615_v9, %v1614_v5  ;;  %v1584_v8 = vmul.f32 0.5, %v1552_v41  ;;  %1828 = vst [vmem:[%s1758_s7 + $0xa0] sm:$0xff] (%p2354_p6), %v1827_v55 }
 0x296   : > { %v2029_v27 = vpack.c.bf16 %v1629_v28, %v1628_v31  ;;  %v1566_v12 = vadd.f32 1.0, %v2240_v51 }
 0x297   : > { %1736 = vst [vmem:[%s3089_s18 + $0x30] sm:$0xff] %v2022_v38  ;;  %v1616_v19 = vmul.f32 %v1584_v8, %v3169_v25 }
 0x298   : > { %1743 = vst [vmem:[%s3089_s18 + $0x68] sm:$0xff] %v2029_v27  ;;  %v1598_v40 = vmul.f32 0.5, %v1566_v12 }
 0x299   : > { %v2242_v13 = vpop.eup %2241  ;;  %v1841_v43 = vld [vmem:[%s3089_s18 + $0x60] sm:$0xff] (%p2354_p6) }
 0x29a   : > { %v2244_v46 = vpop.eup %2243  ;;  %v1553_v35 = vadd.f32 1.0, %v2242_v13  ;;  %v1630_v32 = vmul.f32 %v1598_v40, %v3184_v60  ;;  %v1817_v60 = vld [vmem:[%s3089_s18] sm:$0xff] (%p2354_p6)  ;;  %1842 = vst [vmem:[%s1758_s7 + $0x180] sm:$0xff] (%p2354_p6), %v1841_v43 }
 0x29b   : > { %v1567_v24 = vadd.f32 1.0, %v2244_v46  ;;  %1818 = vst [vmem:[%s1758_s7] sm:$0xff] (%p2354_p6), %v1817_v60 }
 0x29c   : > { %v1585_v3 = vmul.f32 0.5, %v1553_v35 }
 0x29d   : > { %v1599_v48 = vmul.f32 0.5, %v1567_v24  ;;  %v2246_v11 = vpop.eup %2245 }
 0x29e   : > { %v1617_v23 = vmul.f32 %v1585_v3, %v3197_v52  ;;  %v2248_v59 = vpop.eup %2247  ;;  %v1568_v54 = vadd.f32 1.0, %v2246_v11  ;;  %v1819_v52 = vld [vmem:[%s3089_s18 + $0x8] sm:$0xff] (%p2354_p6)  ;;  %v1829_v63 = vld [vmem:[%s3089_s18 + $0x30] sm:$0xff] (%p2354_p6) }
 0x29f   : > { %v1631_v57 = vmul.f32 %v1599_v48, %v3201_v47  ;;  %v1569_v16 = vadd.f32 1.0, %v2248_v59  ;;  %v1821_v47 = vld [vmem:[%s3089_s18 + $0x10] sm:$0xff] (%p2354_p6)  ;;  %1820 = vst [vmem:[%s1758_s7 + $0x20] sm:$0xff] (%p2354_p6), %v1819_v52  ;;  %1830 = vst [vmem:[%s1758_s7 + $0xc0] sm:$0xff] (%p2354_p6), %v1829_v63  ;;  %v1843_v53 = vld [vmem:[%s3089_s18 + $0x68] sm:$0xff] (%p2354_p6) }
 0x2a0   : > { %v2023_v36 = vpack.c.bf16 %v1617_v23, %v1616_v19  ;;  %v1600_v20 = vmul.f32 0.5, %v1568_v54  ;;  %1822 = vst [vmem:[%s1758_s7 + $0x40] sm:$0xff] (%p2354_p6), %v1821_v47  ;;  %1844 = vst [vmem:[%s1758_s7 + $0x1a0] sm:$0xff] (%p2354_p6), %v1843_v53 }
 0x2a1   : > { %v2030_v14 = vpack.c.bf16 %v1631_v57, %v1630_v32  ;;  %v1601_v15 = vmul.f32 0.5, %v1569_v16 }
 0x2a2   : > { %1737 = vst [vmem:[%s3089_s18 + $0x38] sm:$0xff] %v2023_v36  ;;  %v1632_v21 = vmul.f32 %v1600_v20, %v3211_v33  ;;  %v1823_v33 = vld [vmem:[%s3089_s18 + $0x18] sm:$0xff] (%p2354_p6) }
 0x2a3   : > { %1744 = vst [vmem:[%s3089_s18 + $0x70] sm:$0xff] %v2030_v14  ;;  %v1633_v25 = vmul.f32 %v1601_v15, %v3214_v42  ;;  %1752 = sbr.rel (!%p2354_p6) target bundleno = 688 (0x2b0), region = 90  ;;  %v1825_v42 = vld [vmem:[%s3089_s18 + $0x20] sm:$0xff] (%p2354_p6)  ;;  %1824 = vst [vmem:[%s1758_s7 + $0x60] sm:$0xff] (%p2354_p6), %v1823_v33 }
 0x2a4   : > { %1826 = vst [vmem:[%s1758_s7 + $0x80] sm:$0xff] (%p2354_p6), %v1825_v42 }
 0x2a5   : > { %v2031_v18 = vpack.c.bf16 %v1633_v25, %v1632_v21 }
 0x2a7   : > { %1745 = vst [vmem:[%s3089_s18 + $0x78] sm:$0xff] %v2031_v18 }
 0x2a9   : > { %v1831_v0 = vld [vmem:[%s3089_s18 + $0x38] sm:$0xff] }
 0x2aa   : > { %1832 = vst [vmem:[%s1758_s7 + $0xe0] sm:$0xff] %v1831_v0  ;;  %v1845_v1 = vld [vmem:[%s3089_s18 + $0x70] sm:$0xff] }
 0x2ab   : > { %1846 = vst [vmem:[%s1758_s7 + $0x1c0] sm:$0xff] %v1845_v1 }
 0x2ae   : > { %v1847_v30 = vld [vmem:[%s3089_s18 + $0x78] sm:$0xff] }
 0x2af   : > { %1848 = vst [vmem:[%s1758_s7 + $0x1e0] sm:$0xff] %v1847_v30 }
 0x2b0 PF: > { %s15_s22 = sadd.s32 1, %s2287_s22   ;;  %s3293_s18 = smov %s2275_s19 }
 0x2b1   : > { %p12_p12 = scmp.ge.s32.totalorder %s15_s22, 6   ;;  %s3294_s19 = smov %s2359_s28 }
 0x2b2   : > { %s3295_s20 = smov %s2283_s21  ;;  %s3296_s21 = smov %s3298_s23 }
 0x2b3   :  { %14 = sbr.rel (!%p12_p12) target bundleno = 3 (0x3), region = 165 }

// kernel: vision_transformer_3d.23
= control target key start
LH: loop header
LB: loop body
LE: loop exit
PB: predicated region body
PF: predicated region fallthrough
CT: control target
= control target key end

     0   :  { %s1296_s30 = smov 0   ;;  %s1533_s0 = inlined_call_operand.vmem [shape: bf16[128,256], index: 0, kind: input, shape index: {}]   ;;  %s1534_s1 = inlined_call_operand.vmem [shape: f32[1,256], index: 1, kind: input, shape index: {}]   ;;  %s1535_s2 = inlined_call_operand.vmem [shape: f32[1,256], index: 2, kind: input, shape index: {}]   ;;  %s1536_s3 = inlined_call_operand.vmem [shape: bf16[256,64], index: 3, kind: input, shape index: {}]   ;;  %s1537_s4 = inlined_call_operand.vmem [shape: f32[1,64], index: 4, kind: input, shape index: {}]   ;;  %s1538_s5 = inlined_call_operand.vmem [shape: bf16[64,32], index: 5, kind: input, shape index: {}]   ;;  %s1539_s6 = inlined_call_operand.vmem [shape: f32[1,32], index: 6, kind: input, shape index: {}]   ;;  %s1540_s7 = inlined_call_operand.vmem [shape: bf16[32,4], index: 7, kind: input, shape index: {}]   ;;  %s1541_s8 = inlined_call_operand.vmem [shape: f32[1,4], index: 8, kind: input, shape index: {}]   ;;  %s1542_s9 = inlined_call_operand.vmem [shape: f32[128,4], index: 9, kind: output, shape index: {}]  }
   0x1 LB: > { %s1064_s10 = sadd.s32 4294967295, %s1244_s30   ;;  %p1068_p0 = scmp.ge.s32.totalorder %s1244_s30, 1  ;;  %s1244_s30 = sphi %s1296_s30, %s19_s30  }
   0x2   : > { %p289_p1 = scmp.lt.s32.totalorder %s1244_s30, 3 }
   0x4   : > { %p290_p2 = pnand %p1068_p0, %p289_p1 }
   0x5   : > { %s1069_s11 = sshll.u32 (!%p290_p2), %s1064_s10, 3 }
   0x6   : > { %293 = sbr.rel (%p290_p2) target bundleno = 974 (0x3ce), region = 56  ;;  %p327_p3 = scmp.lt.s32.totalorder (!%p290_p2), %s1069_s11, 15 }
   0xb   : > { %s1544_s11 = smov (!%p327_p3, %s1069_s11), 15  ;;  %v1200_v32 = vld [vmem:[%s1536_s3 + $0x78] sm:$0xff]   ;;  %vm808_vm0 = vcmask 523264   ;;  %vm921_vm1 = vcmask 261120   ;;  %vm999_vm2 = vcmask 31744  }
   0xc   : > { %s1109_s12 = sshll.u32 %s1544_s11, 3  ;;  %1110 = vmatprep.subr.bf16.mxu0 %v1200_v32  ;;  %v1208_v32 = vld [vmem:[%s1536_s3 + $0x58] sm:$0xff]  }
   0xd   : > { %s331_s15 = scalar_lea.vmem %s1533_s0, %s1109_s12  ;;  %s337_s18 = scalar_lea.vmem %s1542_s9, %s1109_s12 }
   0xe   : > { %v340_v0 = vld [vmem:[%s331_s15] sm:$0xff]  ;;  %v342_v1 = vld [vmem:[%s331_s15 + $0x10] sm:$0xff]  ;;  %v341_v2 = vld [vmem:[%s331_s15 + $0x8] sm:$0xff] }
   0xf   : > { %v348_v3 = vunpack.c.l.bf16 %v340_v0  ;;  %v349_v4 = vunpack.c.h.bf16 %v340_v0  ;;  %v352_v5 = vunpack.c.l.bf16 %v342_v1  ;;  %v353_v6 = vunpack.c.h.bf16 %v342_v1  ;;  %v343_v7 = vld [vmem:[%s331_s15 + $0x18] sm:$0xff]  ;;  %v1312_v8 = vld [vmem:[%s331_s15 + $0x20] sm:$0xff]  ;;  %v1314_v13 = vld [vmem:[%s331_s15 + $0x28] sm:$0xff] }
  0x10   : > { %v350_v9 = vunpack.c.l.bf16 %v341_v2  ;;  %v351_v10 = vunpack.c.h.bf16 %v341_v2  ;;  %v354_v11 = vunpack.c.l.bf16 %v343_v7  ;;  %v355_v12 = vunpack.c.h.bf16 %v343_v7  ;;  %v1316_v16 = vld [vmem:[%s331_s15 + $0x30] sm:$0xff]  ;;  %v1320_v19 = vld [vmem:[%s331_s15 + $0x38] sm:$0xff] }
  0x11   : > { %v364_v14 = vadd.f32 %v349_v4, %v348_v3  ;;  %v370_v15 = vadd.f32 %v353_v6, %v352_v5  ;;  %v356_v17 = vunpack.c.l.bf16 %v1312_v8  ;;  %v357_v18 = vunpack.c.h.bf16 %v1312_v8 }
  0x12   : > { %v367_v20 = vadd.f32 %v351_v10, %v350_v9  ;;  %v373_v21 = vadd.f32 %v355_v12, %v354_v11  ;;  %v358_v22 = vunpack.c.l.bf16 %v1314_v13  ;;  %v359_v23 = vunpack.c.h.bf16 %v1314_v13 }
  0x13   : > { %365 = vadd.xlane.f32.xlu0 %v364_v14  ;;  %371 = vadd.xlane.f32.xlu1 %v370_v15  ;;  %v376_v24 = vadd.f32 %v357_v18, %v356_v17  ;;  %v360_v25 = vunpack.c.l.bf16 %v1316_v16  ;;  %v361_v27 = vunpack.c.h.bf16 %v1316_v16  ;;  %v362_v28 = vunpack.c.l.bf16 %v1320_v19 }
  0x14   : > { %v379_v26 = vadd.f32 %v359_v23, %v358_v22  ;;  %v363_v29 = vunpack.c.h.bf16 %v1320_v19 }
  0x15   : > { %v382_v30 = vadd.f32 %v361_v27, %v360_v25 }
  0x16   : > { %v385_v31 = vadd.f32 %v363_v29, %v362_v28 }
  0x17   : > { %368 = vadd.xlane.f32.xlu0 %v367_v20  ;;  %374 = vadd.xlane.f32.xlu1 %v373_v21 }
  0x1b   : > { %377 = vadd.xlane.f32.xlu0 %v376_v24  ;;  %380 = vadd.xlane.f32.xlu1 %v379_v26 }
  0x1f   : > { %383 = vadd.xlane.f32.xlu0 %v382_v30  ;;  %386 = vadd.xlane.f32.xlu1 %v385_v31  ;;  %v1206_v30 = vld [vmem:[%s1536_s3 + $0x60] sm:$0xff]  }
  0x20   : > { %v1207_v31 = vld [vmem:[%s1536_s3 + $0x20] sm:$0xff]  }
  0x9c   : > { %v366_v33 = vpop.xlane.xlu0 %365  ;;  %v372_v34 = vpop.xlane.xlu1 %371 }
  0x9d   : > { %v389_v35 = vmul.f32 0.00390625, %v366_v33  ;;  %v391_v36 = vmul.f32 0.00390625, %v372_v34  ;;  %v1209_v33 = vld [vmem:[%s1536_s3 + $0x18] sm:$0xff]   ;;  %v1210_v34 = vld [vmem:[%s1536_s3 + $0x50] sm:$0xff]  }
  0x9f   : > { %v1331_v37 = vsub.f32 %v348_v3, %v389_v35  ;;  %v1333_v38 = vsub.f32 %v349_v4, %v389_v35  ;;  %v1335_v39 = vsub.f32 %v352_v5, %v391_v36  ;;  %v1337_v40 = vsub.f32 %v353_v6, %v391_v36  ;;  %v1211_v35 = vld [vmem:[%s1536_s3 + $0x10] sm:$0xff]   ;;  %v1212_v36 = vld [vmem:[%s1536_s3 + $0x48] sm:$0xff]  }
  0xa0   : > { %v369_v41 = vpop.xlane.xlu0 %368  ;;  %v375_v42 = vpop.xlane.xlu1 %374 }
  0xa1   : > { %v390_v43 = vmul.f32 0.00390625, %v369_v41  ;;  %v392_v44 = vmul.f32 0.00390625, %v375_v42  ;;  %v413_v45 = vmul.f32 %v1331_v37, %v1331_v37  ;;  %v414_v46 = vmul.f32 %v1333_v38, %v1333_v38  ;;  %v1213_v41 = vld [vmem:[%s1536_s3 + $0x8] sm:$0xff]   ;;  %v1214_v42 = vld [vmem:[%s1536_s3 + $0x40] sm:$0xff]  }
  0xa2   : > { %v417_v47 = vmul.f32 %v1335_v39, %v1335_v39  ;;  %v418_v48 = vmul.f32 %v1337_v40, %v1337_v40 }
  0xa3   : > { %v1347_v49 = vsub.f32 %v350_v9, %v390_v43  ;;  %v1349_v50 = vsub.f32 %v351_v10, %v390_v43  ;;  %v1351_v51 = vsub.f32 %v354_v11, %v392_v44  ;;  %v1353_v52 = vsub.f32 %v355_v12, %v392_v44  ;;  %v1215_v43 = vld [vmem:[%s1536_s3] sm:$0xff]  }
  0xa4   : > { %v378_v53 = vpop.xlane.xlu0 %377  ;;  %v429_v54 = vadd.f32 %v414_v46, %v413_v45  ;;  %v381_v55 = vpop.xlane.xlu1 %380  ;;  %v435_v60 = vadd.f32 %v418_v48, %v417_v47 }
  0xa5   : > { %v393_v56 = vmul.f32 0.00390625, %v378_v53  ;;  %v394_v57 = vmul.f32 0.00390625, %v381_v55  ;;  %v415_v58 = vmul.f32 %v1347_v49, %v1347_v49  ;;  %v416_v59 = vmul.f32 %v1349_v50, %v1349_v50 }
  0xa6   : > { %430 = vadd.xlane.f32.xlu0 %v429_v54  ;;  %v419_v61 = vmul.f32 %v1351_v51, %v1351_v51  ;;  %v420_v62 = vmul.f32 %v1353_v52, %v1353_v52  ;;  %v495_v55 = vlaneseq }
  0xa7   : > { %v1363_v63 = vsub.f32 %v356_v17, %v393_v56  ;;  %v1365_v0 = vsub.f32 %v357_v18, %v393_v56  ;;  %v1367_v1 = vsub.f32 %v358_v22, %v394_v57  ;;  %v1369_v2 = vsub.f32 %v359_v23, %v394_v57  ;;  %v1201_v23 = vld [vmem:[%s1536_s3 + $0x38] sm:$0xff]  }
  0xa8   : > { %v384_v3 = vpop.xlane.xlu0 %383  ;;  %v432_v4 = vadd.f32 %v416_v59, %v415_v58  ;;  %v387_v5 = vpop.xlane.xlu1 %386  ;;  %v438_v10 = vadd.f32 %v420_v62, %v419_v61  ;;  %1111 = vmatpush3.bf16.msra.mxu0 %v1201_v23  ;;  %v496_v62 = vshrl.u32 %v495_v55, 7 }
  0xa9   : > { %v395_v6 = vmul.f32 0.00390625, %v384_v3  ;;  %v396_v7 = vmul.f32 0.00390625, %v387_v5  ;;  %v421_v8 = vmul.f32 %v1363_v63, %v1363_v63  ;;  %v422_v9 = vmul.f32 %v1365_v0, %v1365_v0 }
  0xaa   : > { %436 = vadd.xlane.f32.xlu0 %v435_v60  ;;  %433 = vadd.xlane.f32.xlu1 %v432_v4  ;;  %v423_v11 = vmul.f32 %v1367_v1, %v1367_v1  ;;  %v424_v12 = vmul.f32 %v1369_v2, %v1369_v2 }
  0xab   : > { %v1379_v13 = vsub.f32 %v360_v25, %v395_v6  ;;  %v1381_v14 = vsub.f32 %v361_v27, %v395_v6  ;;  %v1383_v15 = vsub.f32 %v362_v28, %v396_v7  ;;  %v1385_v16 = vsub.f32 %v363_v29, %v396_v7  ;;  %v1202_v25 = vld [vmem:[%s1536_s3 + $0x70] sm:$0xff]   ;;  %v1204_v28 = vld [vmem:[%s1536_s3 + $0x68] sm:$0xff]  }
  0xac   : > { %v441_v17 = vadd.f32 %v422_v9, %v421_v8  ;;  %v444_v20 = vadd.f32 %v424_v12, %v423_v11  ;;  %1112 = vmatprep.subr.bf16.mxu0 %v1202_v25  ;;  %v1203_v27 = vld [vmem:[%s1536_s3 + $0x30] sm:$0xff]   ;;  %v1205_v29 = vld [vmem:[%s1536_s3 + $0x28] sm:$0xff]   ;;  %v497_v9 = vsub.s32 0, %v496_v62  ;;  %v493_v12 = vld [vmem:[%s1534_s1] sm:$0x3] }
  0xad   : > { %v425_v18 = vmul.f32 %v1379_v13, %v1379_v13  ;;  %v426_v19 = vmul.f32 %v1381_v14, %v1381_v14  ;;  %v427_v21 = vmul.f32 %v1383_v15, %v1383_v15  ;;  %v428_v22 = vmul.f32 %v1385_v16, %v1385_v16  ;;  %1113 = vmatpush3.bf16.msra.mxu0 %v1203_v27  ;;  %v521_v25 = vld [vmem:[%s1535_s2] sm:$0x3] }
  0xae   : > { %439 = vadd.xlane.f32.xlu1 %v438_v10  ;;  %442 = vadd.xlane.f32.xlu0 %v441_v17  ;;  %v501_v10 = vsub.s32 1, %v496_v62 }
  0xaf   : > { %v447_v24 = vadd.f32 %v426_v19, %v425_v18  ;;  %v450_v26 = vadd.f32 %v428_v22, %v427_v21  ;;  %1114 = vmatprep.subr.bf16.mxu0 %v1204_v28  ;;  %v1443_v21 = vrot.slane %v493_v12, %v497_v9 }
  0xb0   : > { %v502_v22 = vrot.slane %v493_v12, %v501_v10 }
  0xb1   : > { %1115 = vmatpush3.bf16.msra.mxu0 %v1205_v29  ;;  %v1450_v29 = vrot.slane %v521_v25, %v497_v9 }
  0xb2   : > { %445 = vadd.xlane.f32.xlu1 %v444_v20  ;;  %448 = vadd.xlane.f32.xlu0 %v447_v24 }
  0xb3   : > { %1116 = vmatprep.subr.bf16.mxu0 %v1206_v30  ;;  %v530_v30 = vrot.slane %v521_v25, %v501_v10 }
  0xb5   : > { %1117 = vmatpush3.bf16.msra.mxu0 %v1207_v31 }
  0xb6   : > { %451 = vadd.xlane.f32.xlu1 %v450_v26  ;;  %1118 = vmatprep.subr.bf16.mxu0 %v1208_v32 }
  0xb9   : > { %1119 = vmatpush3.bf16.msra.mxu0 %v1209_v33 }
  0xba   : > { %1120 = vmatprep.subr.bf16.mxu0 %v1210_v34 }
  0xbd   : > { %1121 = vmatpush3.bf16.msra.mxu0 %v1211_v35 }
  0xbe   : > { %1122 = vmatprep.subr.bf16.mxu0 %v1212_v36 }
  0xc1   : > { %1123 = vmatpush3.bf16.msra.mxu0 %v1213_v41 }
  0xc2   : > { %1124 = vmatprep.subr.bf16.mxu0 %v1214_v42 }
  0xc5   : > { %1125 = vmatpush3.bf16.msra.mxu0 %v1215_v43 }
 0x12f   : > { %v431_v44 = vpop.xlane.xlu0 %430 }
 0x130   : > { %v453_v45 = vmul.f32 0.00390625, %v431_v44 }
 0x132   : > { %v461_v46 = vadd.f32 1e-06, %v453_v45 }
 0x133   : > { %v434_v47 = vpop.xlane.xlu1 %433  ;;  %v437_v48 = vpop.xlane.xlu0 %436 }
 0x134   : > { %1222 = vrsqrt.f32 %v461_v46  ;;  %v454_v53 = vmul.f32 0.00390625, %v434_v47  ;;  %v455_v54 = vmul.f32 0.00390625, %v437_v48 }
 0x136   : > { %v462_v56 = vadd.f32 1e-06, %v454_v53  ;;  %v463_v57 = vadd.f32 1e-06, %v455_v54 }
 0x137   : > { %v440_v58 = vpop.xlane.xlu1 %439  ;;  %v443_v59 = vpop.xlane.xlu0 %442 }
 0x138   : > { %1224 = vrsqrt.f32 %v462_v56  ;;  %v456_v60 = vmul.f32 0.00390625, %v440_v58  ;;  %v457_v61 = vmul.f32 0.00390625, %v443_v59 }
 0x139   : > { %1226 = vrsqrt.f32 %v463_v57 }
 0x13a   : > { %v464_v3 = vadd.f32 1e-06, %v456_v60  ;;  %v465_v4 = vadd.f32 1e-06, %v457_v61 }
 0x13b   : > { %v446_v5 = vpop.xlane.xlu1 %445  ;;  %v449_v6 = vpop.xlane.xlu0 %448 }
 0x13c   : > { %1228 = vrsqrt.f32 %v464_v3  ;;  %v458_v7 = vmul.f32 0.00390625, %v446_v5  ;;  %v459_v8 = vmul.f32 0.00390625, %v449_v6 }
 0x13d   : > { %1230 = vrsqrt.f32 %v465_v4 }
 0x13e   : > { %v466_v11 = vadd.f32 1e-06, %v458_v7  ;;  %v467_v17 = vadd.f32 1e-06, %v459_v8 }
 0x13f   : > { %v452_v18 = vpop.xlane.xlu1 %451 }
 0x140   : > { %1232 = vrsqrt.f32 %v466_v11  ;;  %v460_v19 = vmul.f32 0.00390625, %v452_v18 }
 0x141   : > { %v1223_v20 = vpop.eup %1222  ;;  %1234 = vrsqrt.f32 %v467_v17 }
 0x142   : > { %v468_v23 = vadd.f32 1e-06, %v460_v19  ;;  %v478_v24 = vmul.f32 %v1223_v20, %v1333_v38  ;;  %v477_v26 = vmul.f32 %v1223_v20, %v1331_v37 }
 0x144   : > { %1236 = vrsqrt.f32 %v468_v23  ;;  %v506_v28 = vmul.f32 %v502_v22, %v478_v24  ;;  %v505_v31 = vmul.f32 %v1443_v21, %v477_v26 }
 0x145   : > { %v1225_v27 = vpop.eup %1224 }
 0x146   : > { %v1227_v32 = vpop.eup %1226  ;;  %v480_v33 = vmul.f32 %v1225_v27, %v1349_v50  ;;  %v479_v38 = vmul.f32 %v1225_v27, %v1347_v49  ;;  %v534_v41 = vadd.f32 %v530_v30, %v506_v28  ;;  %v533_v42 = vadd.f32 %v1450_v29, %v505_v31 }
 0x147   : > { %v482_v34 = vmul.f32 %v1227_v32, %v1337_v40  ;;  %v481_v49 = vmul.f32 %v1227_v32, %v1335_v39 }
 0x148   : > { %v508_v35 = vmul.f32 %v502_v22, %v480_v33  ;;  %v507_v36 = vmul.f32 %v1443_v21, %v479_v38  ;;  %v1074_v33 = vld [vmem:[%s1537_s4] ss:$0 sm:$0xff] }
 0x149   : > { %v1229_v37 = vpop.eup %1228  ;;  %v510_v43 = vmul.f32 %v502_v22, %v482_v34 }
 0x14a   : > { %v1231_v44 = vpop.eup %1230  ;;  %v536_v45 = vadd.f32 %v530_v30, %v508_v35  ;;  %v535_v46 = vadd.f32 %v1450_v29, %v507_v36  ;;  %v484_v47 = vmul.f32 %v1229_v37, %v1353_v52  ;;  %v483_v50 = vmul.f32 %v1229_v37, %v1351_v51 }
 0x14b   : > { %v486_v54 = vmul.f32 %v1231_v44, %v1365_v0  ;;  %v538_v57 = vadd.f32 %v530_v30, %v510_v43  ;;  %v509_v52 = vmul.f32 %v1443_v21, %v481_v49 }
 0x14c   : > { %v550_v48 = vpack.c.bf16 %v536_v45, %v534_v41  ;;  %v549_v40 = vpack.c.bf16 %v535_v46, %v533_v42  ;;  %v512_v53 = vmul.f32 %v502_v22, %v484_v47  ;;  %v511_v56 = vmul.f32 %v1443_v21, %v483_v50 }
 0x14d   : > { %v1233_v55 = vpop.eup %1232  ;;  %v514_v61 = vmul.f32 %v502_v22, %v486_v54  ;;  %v537_v6 = vadd.f32 %v1450_v29, %v509_v52 }
 0x14e   : > { %724 = vmatprep.mubr.bf16.mxu0 %v550_v48  ;;  %v540_v58 = vadd.f32 %v530_v30, %v512_v53  ;;  %v488_v59 = vmul.f32 %v1233_v55, %v1369_v2  ;;  %v1235_v60 = vpop.eup %1234  ;;  %v539_v3 = vadd.f32 %v1450_v29, %v511_v56  ;;  %v487_v0 = vmul.f32 %v1233_v55, %v1367_v1 }
 0x14f   : > { %725 = vmatmul.mubr.bf16.vlgmr.msra.gmra.mxu0 %v549_v40  ;;  %v485_v2 = vmul.f32 %v1231_v44, %v1363_v63  ;;  %v542_v7 = vadd.f32 %v530_v30, %v514_v61  ;;  %v490_v8 = vmul.f32 %v1235_v60, %v1381_v14  ;;  %v489_v20 = vmul.f32 %v1235_v60, %v1379_v13  ;;  %v1217_v13 = vld [vmem:[%s1538_s5 + $0x10] sm:$0xff]  }
 0x150   : > { %v552_v51 = vpack.c.bf16 %v540_v58, %v538_v57  ;;  %v516_v39 = vmul.f32 %v502_v22, %v488_v59  ;;  %v551_v9 = vpack.c.bf16 %v539_v3, %v537_v6  ;;  %v515_v10 = vmul.f32 %v1443_v21, %v487_v0 }
 0x151   : > { %v1237_v62 = vpop.eup %1236  ;;  %v513_v17 = vmul.f32 %v1443_v21, %v485_v2  ;;  %v518_v1 = vmul.f32 %v502_v22, %v490_v8  ;;  %v517_v26 = vmul.f32 %v1443_v21, %v489_v20 }
 0x152   : > { %732 = vmatprep.mubr.bf16.mxu0 %v552_v51  ;;  %v544_v4 = vadd.f32 %v530_v30, %v516_v39  ;;  %v492_v5 = vmul.f32 %v1237_v62, %v1385_v16  ;;  %v543_v18 = vadd.f32 %v1450_v29, %v515_v10  ;;  %v491_v16 = vmul.f32 %v1237_v62, %v1383_v15  ;;  %v1216_v15 = vld [vmem:[%s1538_s5 + $0x18] sm:$0xff]  }
 0x153   : > { %v541_v63 = vadd.f32 %v1450_v29, %v513_v17  ;;  %v546_v14 = vadd.f32 %v530_v30, %v518_v1  ;;  %v545_v27 = vadd.f32 %v1450_v29, %v517_v26  ;;  %1164 = vmatprep.subr.bf16.mxu1 %v1216_v15  ;;  %v1220_v17 = vld [vmem:[%s1540_s7 + $0x8] sm:$0xff]   ;;  %v1221_v1 = vld [vmem:[%s1540_s7] sm:$0xff]  }
 0x154   : > { %v554_v11 = vpack.c.bf16 %v544_v4, %v542_v7  ;;  %v520_v12 = vmul.f32 %v502_v22, %v492_v5  ;;  %v519_v24 = vmul.f32 %v1443_v21, %v491_v16  ;;  %1165 = vmatpush3.bf16.msra.mxu1 %v1216_v15  ;;  %v1218_v21 = vld [vmem:[%s1538_s5 + $0x8] sm:$0xff]  }
 0x155   : > { %v553_v23 = vpack.c.bf16 %v543_v18, %v541_v63  ;;  %1166 = vmatprep.subr.bf16.mxu1 %v1217_v13 }
 0x156   : > { %v548_v19 = vadd.f32 %v530_v30, %v520_v12  ;;  %v547_v22 = vadd.f32 %v1450_v29, %v519_v24  ;;  %v1219_v29 = vld [vmem:[%s1538_s5] sm:$0xff]  }
 0x157   : > { %733 = vmatmul.mubr.bf16.gmra.mxu0 %v551_v9 }
 0x158   : > { %740 = vmatprep.mubr.bf16.mxu0 %v554_v11  ;;  %v556_v25 = vpack.c.bf16 %v548_v19, %v546_v14  ;;  %v555_v28 = vpack.c.bf16 %v547_v22, %v545_v27  ;;  %1167 = vmatpush3.bf16.msra.mxu1 %v1217_v13  ;;  %v1091_v19 = vld [vmem:[%s1539_s6] ss:$0 sm:$0xff] }
 0x159   : > { %1168 = vmatprep.subr.bf16.mxu1 %v1218_v21 }
 0x15c   : > { %1169 = vmatpush3.bf16.msra.mxu1 %v1218_v21 }
 0x15d   : > { %1170 = vmatprep.subr.bf16.mxu1 %v1219_v29 }
 0x15f   : > { %741 = vmatmul.mubr.bf16.gmra.mxu0 %v553_v23 }
 0x160   : > { %748 = vmatprep.mubr.bf16.mxu0 %v556_v25  ;;  %1171 = vmatpush3.bf16.msra.mxu1 %v1219_v29 }
 0x161   : > { %1180 = vmatprep.subr.bf16.mxu1 %v1220_v17 }
 0x167   : > { %749 = vmatmul.mubr.bf16.gmra.mxu0 %v555_v28 }
 0x20f   : > { %v1126_v30 = vpop.f32.mrf.mxu0 }
 0x211   : > { %v1127_v31 = vpop.f32.mrf.mxu0 }
 0x212   : > { %v1128_v32 = vadd.f32 %v1127_v31, %v1126_v30 }
 0x213   : > { %v1129_v38 = vpop.f32.mrf.mxu0 }
 0x214   : > { %v727_v35 = vadd.f32 %v1128_v32, %v1074_v33 }
 0x215   : > { %v1130_v34 = vpop.f32.mrf.mxu0 }
 0x216   : > { %v1131_v36 = vadd.f32 %v1130_v34, %v1129_v38  ;;  %v757_v43 = vmax.f32 %v727_v35, 0.0 }
 0x217   : > { %v1132_v37 = vpop.f32.mrf.mxu0 }
 0x218   : > { %v730_v41 = vadd.f32 %v1131_v36, %v1074_v33 }
 0x219   : > { %v1133_v42 = vpop.f32.mrf.mxu0 }
 0x21a   : > { %v758_v44 = vmax.f32 %v730_v41, 0.0  ;;  %v1134_v45 = vadd.f32 %v1133_v42, %v1132_v37 }
 0x21b   : > { %v1135_v46 = vpop.f32.mrf.mxu0 }
 0x21c   : > { %v765_v47 = vpack.c.bf16 %v758_v44, %v757_v43  ;;  %v735_v49 = vadd.f32 %v1134_v45, %v1074_v33  ;;  %v1100_v44 = vld [vmem:[%s1541_s8] ss:$0 sm:$0xff] }
 0x21d   : > { %v1136_v50 = vpop.f32.mrf.mxu0 }
 0x21e   : > { %v1137_v48 = vadd.f32 %v1136_v50, %v1135_v46  ;;  %1172 = vmatprep.mubr.msk.bf16.mxu1 %vm808_vm0, %v765_v47  ;;  %v759_v55 = vmax.f32 %v735_v49, 0.0 }
 0x21f   : > { %v1138_v40 = vpop.f32.mrf.mxu0 }
 0x220   : > { %v738_v53 = vadd.f32 %v1137_v48, %v1074_v33 }
 0x221   : > { %v1139_v54 = vpop.f32.mrf.mxu0 }
 0x222   : > { %v760_v56 = vmax.f32 %v738_v53, 0.0  ;;  %v1140_v57 = vadd.f32 %v1139_v54, %v1138_v40 }
 0x223   : > { %v1141_v58 = vpop.f32.mrf.mxu0 }
 0x224   : > { %v766_v59 = vpack.c.bf16 %v760_v56, %v759_v55  ;;  %v743_v60 = vadd.f32 %v1140_v57, %v1074_v33 }
 0x225   : > { %v1142_v52 = vpop.f32.mrf.mxu0 }
 0x226   : > { %v1143_v51 = vadd.f32 %v1142_v52, %v1141_v58  ;;  %1173 = vmatmul.mubr.msk.bf16.vlgmr.msra.gmra.mxu1 %vm808_vm0, %v766_v59  ;;  %v761_v3 = vmax.f32 %v743_v60, 0.0 }
 0x227   : > { %v1144_v61 = vpop.f32.mrf.mxu0  ;;  %1181 = vmatpush3.bf16.msra.mxu1 %v1220_v17 }
 0x228   : > { %v746_v39 = vadd.f32 %v1143_v51, %v1074_v33  ;;  %1182 = vmatprep.subr.bf16.mxu1 %v1221_v1 }
 0x229   : > { %v1145_v62 = vpop.f32.mrf.mxu0 }
 0x22a   : > { %v762_v0 = vmax.f32 %v746_v39, 0.0  ;;  %v1146_v4 = vadd.f32 %v1145_v62, %v1144_v61 }
 0x22b   : > { %v1147_v5 = vpop.f32.mrf.mxu0  ;;  %1183 = vmatpush3.bf16.msra.mxu1 %v1221_v1 }
 0x22c   : > { %v767_v6 = vpack.c.bf16 %v762_v0, %v761_v3  ;;  %v751_v7 = vadd.f32 %v1146_v4, %v1074_v33 }
 0x22d   : > { %v1148_v2 = vpop.f32.mrf.mxu0 }
 0x22e   : > { %v1149_v8 = vadd.f32 %v1148_v2, %v1147_v5  ;;  %1176 = vmatprep.mubr.msk.bf16.mxu1 %vm808_vm0, %v767_v6  ;;  %v763_v10 = vmax.f32 %v751_v7, 0.0 }
 0x230   : > { %v754_v9 = vadd.f32 %v1149_v8, %v1074_v33 }
 0x232   : > { %v764_v11 = vmax.f32 %v754_v9, 0.0 }
 0x234   : > { %v768_v12 = vpack.c.bf16 %v764_v11, %v763_v10 }
 0x236   : > { %1177 = vmatmul.mubr.msk.bf16.gmra.mxu1 %vm808_vm0, %v768_v12 }
 0x2e6   : > { %v1174_v18 = vpop.f32.mrf.mxu1 }
 0x2e7   : > { %v864_v23 = vadd.f32 %v1174_v18, %v1091_v19 }
 0x2e8   : > { %v855_v16 = vpop.f32.mrf.mxu1 }
 0x2e9   : > { %v856_v20 = vadd.f32 %v1091_v19, %v855_v16  ;;  %v888_v28 = vmax.f32 %v864_v23, 0.0 }
 0x2ea   : > { %v1175_v63 = vpop.f32.mrf.mxu1 }
 0x2eb   : > { %v867_v14 = vadd.f32 %v1175_v63, %v1091_v19  ;;  %v886_v22 = vmax.f32 %v856_v20, 0.0 }
 0x2ec   : > { %v858_v24 = vpop.f32.mrf.mxu1 }
 0x2ed   : > { %v859_v25 = vadd.f32 %v1091_v19, %v858_v24  ;;  %v889_v26 = vmax.f32 %v867_v14, 0.0 }
 0x2ef   : > { %v887_v27 = vmax.f32 %v859_v25, 0.0  ;;  %v895_v13 = vpack.c.bf16 %v889_v26, %v888_v28 }
 0x2f1   : > { %v894_v15 = vpack.c.bf16 %v887_v27, %v886_v22 }
 0x2f3   : > { %1184 = vmatprep.mubr.msk.bf16.mxu1 %vm921_vm1, %v894_v15 }
 0x2f4   : > { %1185 = vmatmul.mubr.msk.bf16.vlgmr.msra.gmra.mxu1 %vm921_vm1, %v895_v13 }
 0x2f6   : > { %v1178_v21 = vpop.f32.mrf.mxu1 }
 0x2f7   : > { %v880_v33 = vadd.f32 %v1178_v21, %v1091_v19 }
 0x2f8   : > { %v871_v29 = vpop.f32.mrf.mxu1 }
 0x2f9   : > { %v872_v31 = vadd.f32 %v1091_v19, %v871_v29  ;;  %v892_v41 = vmax.f32 %v880_v33, 0.0 }
 0x2fa   : > { %v1179_v30 = vpop.f32.mrf.mxu1 }
 0x2fb   : > { %v883_v32 = vadd.f32 %v1179_v30, %v1091_v19  ;;  %v890_v36 = vmax.f32 %v872_v31, 0.0 }
 0x2fc   : > { %v874_v38 = vpop.f32.mrf.mxu1 }
 0x2fd   : > { %v875_v34 = vadd.f32 %v1091_v19, %v874_v38  ;;  %v893_v35 = vmax.f32 %v883_v32, 0.0 }
 0x2ff   : > { %v891_v37 = vmax.f32 %v875_v34, 0.0  ;;  %v897_v43 = vpack.c.bf16 %v893_v35, %v892_v41 }
 0x301   : > { %v896_v42 = vpack.c.bf16 %v891_v37, %v890_v36 }
 0x303   : > { %1188 = vmatprep.mubr.msk.bf16.mxu1 %vm921_vm1, %v896_v42 }
 0x304   : > { %1189 = vmatmul.mubr.msk.bf16.gmra.mxu1 %vm921_vm1, %v897_v43 }
 0x3b4   : > { %v1186_v45 = vpop.f32.mrf.mxu1 }
 0x3b5   : > { %v977_v46 = vadd.f32 %v1186_v45, %v1100_v44 }
 0x3b6   : > { %v968_v47 = vpop.f32.mrf.mxu1 }
 0x3b7   : > { %1002 = vst.msk [vmem:[%s337_s18 + $0x10] sm:$0xff] %vm999_vm2, %v977_v46  ;;  %v969_v50 = vadd.f32 %v1100_v44, %v968_v47 }
 0x3b8   : > { %v1187_v49 = vpop.f32.mrf.mxu1 }
 0x3b9   : > { %1000 = vst.msk [vmem:[%s337_s18] sm:$0xff] %vm999_vm2, %v969_v50  ;;  %v980_v48 = vadd.f32 %v1187_v49, %v1100_v44 }
 0x3ba   : > { %v971_v40 = vpop.f32.mrf.mxu1 }
 0x3bb   : > { %1003 = vst.msk [vmem:[%s337_s18 + $0x18] sm:$0xff] %vm999_vm2, %v980_v48  ;;  %v972_v53 = vadd.f32 %v1100_v44, %v971_v40 }
 0x3bd   : > { %1001 = vst.msk [vmem:[%s337_s18 + $0x8] sm:$0xff] %vm999_vm2, %v972_v53 }
 0x3c4   : > { %v1190_v54 = vpop.f32.mrf.mxu1 }
 0x3c5   : > { %v993_v55 = vadd.f32 %v1190_v54, %v1100_v44 }
 0x3c6   : > { %v984_v56 = vpop.f32.mrf.mxu1 }
 0x3c7   : > { %1006 = vst.msk [vmem:[%s337_s18 + $0x30] sm:$0xff] %vm999_vm2, %v993_v55  ;;  %v985_v57 = vadd.f32 %v1100_v44, %v984_v56 }
 0x3c8   : > { %v1191_v58 = vpop.f32.mrf.mxu1 }
 0x3c9   : > { %1004 = vst.msk [vmem:[%s337_s18 + $0x20] sm:$0xff] %vm999_vm2, %v985_v57  ;;  %v996_v59 = vadd.f32 %v1191_v58, %v1100_v44 }
 0x3ca   : > { %v987_v52 = vpop.f32.mrf.mxu1 }
 0x3cb   : > { %1007 = vst.msk [vmem:[%s337_s18 + $0x38] sm:$0xff] %vm999_vm2, %v996_v59  ;;  %v988_v60 = vadd.f32 %v1100_v44, %v987_v52 }
 0x3cd   : > { %1005 = vst.msk [vmem:[%s337_s18 + $0x28] sm:$0xff] %vm999_vm2, %v988_v60 }
 0x3ce PF: > { %s19_s30 = sadd.s32 1, %s1244_s30  }
 0x3cf   : > { %p16_p4 = scmp.ge.s32.totalorder %s19_s30, 4  }
 0x3d1   :  { %18 = sbr.rel (!%p16_p4) target bundleno = 1 (0x1), region = 86 }

// kernel: vision_transformer_3d.17
= control target key start
LH: loop header
LB: loop body
LE: loop exit
PB: predicated region body
PF: predicated region fallthrough
CT: control target
= control target key end

     0   :  { %s3386_s15 = smov 0   ;;  %s3388_s16 = smov 0   ;;  %s4210_s0 = inlined_call_operand.vmem [shape: bf16[128,1024], index: 0, kind: input, shape index: {}]   ;;  %s4211_s1 = inlined_call_operand.vmem [shape: bf16[1024,256], index: 1, kind: input, shape index: {}]   ;;  %s4212_s2 = inlined_call_operand.vmem [shape: f32[1,256], index: 2, kind: input, shape index: {}]   ;;  %s4213_s3 = inlined_call_operand.vmem [shape: bf16[128,256], index: 3, kind: input, shape index: {}]   ;;  %s4214_s4 = inlined_call_operand.vmem [shape: bf16[128,256], index: 4, kind: output, shape index: {}]  }
   0x1   :  { %s3390_s17 = smov 0   ;;  %s3392_s18 = smov 0  }
   0x2   :  { %s3394_s19 = smov 0  }
   0x3 LB: > { %s29_s20 = sadd.s32 1, %s3355_s18  ;;  %s2697_s21 = sadd.s32 4294967295, %s3359_s19   ;;  %s3359_s19 = sphi %s3394_s19, %s14_s19   ;;  %s3355_s18 = sphi %s3392_s18, %s4220_s18   ;;  %s3351_s17 = sphi %s3390_s17, %s4219_s17   ;;  %s3347_s16 = sphi %s3388_s16, %s4218_s16   ;;  %s3343_s15 = sphi %s3386_s15, %s4217_s15  }
   0x4   : > { %p31_p0 = scmp.ge.s32.totalorder %s29_s20, 2  ;;  %p77_p1 = scmp.ne.s32.totalorder %s3347_s16, %s3343_s15 }
   0x5   : > { %p78_p2 = scmp.eq.s32.totalorder %s3359_s19, 0  ;;  %p163_p4 = scmp.eq.s32.totalorder %s2697_s21, 1 }
   0x6   : > { %s4222_s20 = smov (%p31_p0, %s29_s20), 0  ;;  %s70_s24 = sadd.s32 1, %s3347_s16 }
   0x7   : > { %p3418_p3 = por %p78_p2, %p77_p1  ;;  %s66_s23 = ssub.s32 %s3355_s18, %s4222_s20 }
   0x8   : > { %p68_p5 = scmp.eq.s32.totalorder %s66_s23, 0  ;;  %p3425_p6 = por %p163_p4, %p77_p1 }
   0x9   : > { %p2701_p7 = scmp.ge.s32.totalorder %s3359_s19, 2 }
   0xa   : > { %s3430_s26 = scalar_select %p68_p5, %s3347_s16, %s70_s24  }
   0xb   : > { %200 = sbr.rel (%p2701_p7) target bundleno = 119 (0x77), region = 20 }
  0x10   : > { %203 = sbr.rel (!%p3418_p3) target bundleno = 105 (0x69), region = 24  ;;  %s205_s27 = sand.u32 (%p3418_p3), 1, %s3347_s16  }
  0x11   : > { %s2703_s28 = sshll.u32 (%p3418_p3), %s3355_s18, 2  ;;  %s2702_s29 = sshll.u32 (%p3418_p3), %s205_s27, 9 }
  0x12   : > { %s3440_s6 = scalar_lea.vmem (%p3418_p3), %s4211_s1, %s2703_s28  ;;  %s3444_s7 = scalar_lea.vmem (%p3418_p3), [#allocation3], %s2702_s29 }
  0x13   : > { %v229_v0 = vld [vmem:[%s3440_s6] sm:$0xf] (%p3418_p3)  ;;  %v231_v1 = vld [vmem:[%s3440_s6 + $0x8] sm:$0xf] (%p3418_p3)  ;;  %v233_v2 = vld [vmem:[%s3440_s6 + $0x10] sm:$0xf] (%p3418_p3) }
  0x14   : > { %230 = vst [vmem:[%s3444_s7] sm:$0xf] (%p3418_p3), %v229_v0  ;;  %232 = vst [vmem:[%s3444_s7 + $0x4] sm:$0xf] (%p3418_p3), %v231_v1  ;;  %v235_v3 = vld [vmem:[%s3440_s6 + $0x18] sm:$0xf] (%p3418_p3) }
  0x15   : > { %v237_v4 = vld [vmem:[%s3440_s6 + $0x20] sm:$0xf]  ;;  %234 = vst [vmem:[%s3444_s7 + $0x8] sm:$0xf] %v233_v2  ;;  %236 = vst [vmem:[%s3444_s7 + $0xc] sm:$0xf] %v235_v3 }
  0x16   : > { %238 = vst [vmem:[%s3444_s7 + $0x10] sm:$0xf] %v237_v4  ;;  %v239_v5 = vld [vmem:[%s3440_s6 + $0x28] sm:$0xf]  ;;  %v241_v6 = vld [vmem:[%s3440_s6 + $0x30] sm:$0xf] }
  0x17   : > { %v243_v7 = vld [vmem:[%s3440_s6 + $0x38] sm:$0xf]  ;;  %240 = vst [vmem:[%s3444_s7 + $0x14] sm:$0xf] %v239_v5  ;;  %242 = vst [vmem:[%s3444_s7 + $0x18] sm:$0xf] %v241_v6 }
  0x18   : > { %244 = vst [vmem:[%s3444_s7 + $0x1c] sm:$0xf] %v243_v7  ;;  %v245_v8 = vld [vmem:[%s3440_s6 + $0x40] sm:$0xf]  ;;  %v247_v9 = vld [vmem:[%s3440_s6 + $0x48] sm:$0xf] }
  0x19   : > { %v249_v10 = vld [vmem:[%s3440_s6 + $0x50] sm:$0xf]  ;;  %246 = vst [vmem:[%s3444_s7 + $0x20] sm:$0xf] %v245_v8  ;;  %248 = vst [vmem:[%s3444_s7 + $0x24] sm:$0xf] %v247_v9 }
  0x1a   : > { %250 = vst [vmem:[%s3444_s7 + $0x28] sm:$0xf] %v249_v10  ;;  %v251_v11 = vld [vmem:[%s3440_s6 + $0x58] sm:$0xf]  ;;  %v253_v12 = vld [vmem:[%s3440_s6 + $0x60] sm:$0xf] }
  0x1b   : > { %v255_v13 = vld [vmem:[%s3440_s6 + $0x68] sm:$0xf]  ;;  %252 = vst [vmem:[%s3444_s7 + $0x2c] sm:$0xf] %v251_v11  ;;  %254 = vst [vmem:[%s3444_s7 + $0x30] sm:$0xf] %v253_v12 }
  0x1c   : > { %256 = vst [vmem:[%s3444_s7 + $0x34] sm:$0xf] %v255_v13  ;;  %v257_v14 = vld [vmem:[%s3440_s6 + $0x70] sm:$0xf]  ;;  %v259_v15 = vld [vmem:[%s3440_s6 + $0x78] sm:$0xf] }
  0x1d   : > { %v261_v16 = vld [vmem:[%s3440_s6 + $0x80] sm:$0xf]  ;;  %258 = vst [vmem:[%s3444_s7 + $0x38] sm:$0xf] %v257_v14  ;;  %260 = vst [vmem:[%s3444_s7 + $0x3c] sm:$0xf] %v259_v15 }
  0x1e   : > { %262 = vst [vmem:[%s3444_s7 + $0x40] sm:$0xf] %v261_v16  ;;  %v263_v17 = vld [vmem:[%s3440_s6 + $0x88] sm:$0xf]  ;;  %v265_v18 = vld [vmem:[%s3440_s6 + $0x90] sm:$0xf] }
  0x1f   : > { %v267_v19 = vld [vmem:[%s3440_s6 + $0x98] sm:$0xf]  ;;  %264 = vst [vmem:[%s3444_s7 + $0x44] sm:$0xf] %v263_v17  ;;  %266 = vst [vmem:[%s3444_s7 + $0x48] sm:$0xf] %v265_v18 }
  0x20   : > { %268 = vst [vmem:[%s3444_s7 + $0x4c] sm:$0xf] %v267_v19  ;;  %v269_v20 = vld [vmem:[%s3440_s6 + $0xa0] sm:$0xf]  ;;  %v271_v21 = vld [vmem:[%s3440_s6 + $0xa8] sm:$0xf] }
  0x21   : > { %v273_v22 = vld [vmem:[%s3440_s6 + $0xb0] sm:$0xf]  ;;  %270 = vst [vmem:[%s3444_s7 + $0x50] sm:$0xf] %v269_v20  ;;  %272 = vst [vmem:[%s3444_s7 + $0x54] sm:$0xf] %v271_v21 }
  0x22   : > { %274 = vst [vmem:[%s3444_s7 + $0x58] sm:$0xf] %v273_v22  ;;  %v275_v23 = vld [vmem:[%s3440_s6 + $0xb8] sm:$0xf]  ;;  %v277_v24 = vld [vmem:[%s3440_s6 + $0xc0] sm:$0xf] }
  0x23   : > { %v279_v25 = vld [vmem:[%s3440_s6 + $0xc8] sm:$0xf]  ;;  %276 = vst [vmem:[%s3444_s7 + $0x5c] sm:$0xf] %v275_v23  ;;  %278 = vst [vmem:[%s3444_s7 + $0x60] sm:$0xf] %v277_v24 }
  0x24   : > { %280 = vst [vmem:[%s3444_s7 + $0x64] sm:$0xf] %v279_v25  ;;  %v281_v26 = vld [vmem:[%s3440_s6 + $0xd0] sm:$0xf]  ;;  %v283_v27 = vld [vmem:[%s3440_s6 + $0xd8] sm:$0xf] }
  0x25   : > { %v285_v28 = vld [vmem:[%s3440_s6 + $0xe0] sm:$0xf]  ;;  %282 = vst [vmem:[%s3444_s7 + $0x68] sm:$0xf] %v281_v26  ;;  %284 = vst [vmem:[%s3444_s7 + $0x6c] sm:$0xf] %v283_v27 }
  0x26   : > { %286 = vst [vmem:[%s3444_s7 + $0x70] sm:$0xf] %v285_v28  ;;  %v287_v29 = vld [vmem:[%s3440_s6 + $0xe8] sm:$0xf]  ;;  %v289_v30 = vld [vmem:[%s3440_s6 + $0xf0] sm:$0xf] }
  0x27   : > { %v291_v31 = vld [vmem:[%s3440_s6 + $0xf8] sm:$0xf]  ;;  %288 = vst [vmem:[%s3444_s7 + $0x74] sm:$0xf] %v287_v29  ;;  %290 = vst [vmem:[%s3444_s7 + $0x78] sm:$0xf] %v289_v30 }
  0x28   : > { %292 = vst [vmem:[%s3444_s7 + $0x7c] sm:$0xf] %v291_v31  ;;  %v293_v32 = vld [vmem:[%s3440_s6 + $0x100] sm:$0xf]  ;;  %v295_v33 = vld [vmem:[%s3440_s6 + $0x108] sm:$0xf] }
  0x29   : > { %v297_v34 = vld [vmem:[%s3440_s6 + $0x110] sm:$0xf]  ;;  %294 = vst [vmem:[%s3444_s7 + $0x80] sm:$0xf] %v293_v32  ;;  %296 = vst [vmem:[%s3444_s7 + $0x84] sm:$0xf] %v295_v33 }
  0x2a   : > { %298 = vst [vmem:[%s3444_s7 + $0x88] sm:$0xf] %v297_v34  ;;  %v299_v35 = vld [vmem:[%s3440_s6 + $0x118] sm:$0xf]  ;;  %v301_v36 = vld [vmem:[%s3440_s6 + $0x120] sm:$0xf] }
  0x2b   : > { %v303_v37 = vld [vmem:[%s3440_s6 + $0x128] sm:$0xf]  ;;  %300 = vst [vmem:[%s3444_s7 + $0x8c] sm:$0xf] %v299_v35  ;;  %302 = vst [vmem:[%s3444_s7 + $0x90] sm:$0xf] %v301_v36 }
  0x2c   : > { %304 = vst [vmem:[%s3444_s7 + $0x94] sm:$0xf] %v303_v37  ;;  %v305_v38 = vld [vmem:[%s3440_s6 + $0x130] sm:$0xf]  ;;  %v307_v39 = vld [vmem:[%s3440_s6 + $0x138] sm:$0xf] }
  0x2d   : > { %v309_v40 = vld [vmem:[%s3440_s6 + $0x140] sm:$0xf]  ;;  %306 = vst [vmem:[%s3444_s7 + $0x98] sm:$0xf] %v305_v38  ;;  %308 = vst [vmem:[%s3444_s7 + $0x9c] sm:$0xf] %v307_v39 }
  0x2e   : > { %310 = vst [vmem:[%s3444_s7 + $0xa0] sm:$0xf] %v309_v40  ;;  %v311_v41 = vld [vmem:[%s3440_s6 + $0x148] sm:$0xf]  ;;  %v313_v42 = vld [vmem:[%s3440_s6 + $0x150] sm:$0xf] }
  0x2f   : > { %v315_v43 = vld [vmem:[%s3440_s6 + $0x158] sm:$0xf]  ;;  %312 = vst [vmem:[%s3444_s7 + $0xa4] sm:$0xf] %v311_v41  ;;  %314 = vst [vmem:[%s3444_s7 + $0xa8] sm:$0xf] %v313_v42 }
  0x30   : > { %316 = vst [vmem:[%s3444_s7 + $0xac] sm:$0xf] %v315_v43  ;;  %v317_v44 = vld [vmem:[%s3440_s6 + $0x160] sm:$0xf]  ;;  %v319_v45 = vld [vmem:[%s3440_s6 + $0x168] sm:$0xf] }
  0x31   : > { %v321_v46 = vld [vmem:[%s3440_s6 + $0x170] sm:$0xf]  ;;  %318 = vst [vmem:[%s3444_s7 + $0xb0] sm:$0xf] %v317_v44  ;;  %320 = vst [vmem:[%s3444_s7 + $0xb4] sm:$0xf] %v319_v45 }
  0x32   : > { %322 = vst [vmem:[%s3444_s7 + $0xb8] sm:$0xf] %v321_v46  ;;  %v323_v47 = vld [vmem:[%s3440_s6 + $0x178] sm:$0xf]  ;;  %v325_v48 = vld [vmem:[%s3440_s6 + $0x180] sm:$0xf] }
  0x33   : > { %v327_v49 = vld [vmem:[%s3440_s6 + $0x188] sm:$0xf]  ;;  %324 = vst [vmem:[%s3444_s7 + $0xbc] sm:$0xf] %v323_v47  ;;  %326 = vst [vmem:[%s3444_s7 + $0xc0] sm:$0xf] %v325_v48 }
  0x34   : > { %328 = vst [vmem:[%s3444_s7 + $0xc4] sm:$0xf] %v327_v49  ;;  %v329_v50 = vld [vmem:[%s3440_s6 + $0x190] sm:$0xf]  ;;  %v331_v51 = vld [vmem:[%s3440_s6 + $0x198] sm:$0xf] }
  0x35   : > { %v333_v52 = vld [vmem:[%s3440_s6 + $0x1a0] sm:$0xf]  ;;  %330 = vst [vmem:[%s3444_s7 + $0xc8] sm:$0xf] %v329_v50  ;;  %332 = vst [vmem:[%s3444_s7 + $0xcc] sm:$0xf] %v331_v51 }
  0x36   : > { %334 = vst [vmem:[%s3444_s7 + $0xd0] sm:$0xf] %v333_v52  ;;  %v335_v53 = vld [vmem:[%s3440_s6 + $0x1a8] sm:$0xf]  ;;  %v337_v54 = vld [vmem:[%s3440_s6 + $0x1b0] sm:$0xf] }
  0x37   : > { %v339_v55 = vld [vmem:[%s3440_s6 + $0x1b8] sm:$0xf]  ;;  %336 = vst [vmem:[%s3444_s7 + $0xd4] sm:$0xf] %v335_v53  ;;  %338 = vst [vmem:[%s3444_s7 + $0xd8] sm:$0xf] %v337_v54 }
  0x38   : > { %340 = vst [vmem:[%s3444_s7 + $0xdc] sm:$0xf] %v339_v55  ;;  %v341_v56 = vld [vmem:[%s3440_s6 + $0x1c0] sm:$0xf]  ;;  %v343_v57 = vld [vmem:[%s3440_s6 + $0x1c8] sm:$0xf] }
  0x39   : > { %v345_v58 = vld [vmem:[%s3440_s6 + $0x1d0] sm:$0xf]  ;;  %342 = vst [vmem:[%s3444_s7 + $0xe0] sm:$0xf] %v341_v56  ;;  %344 = vst [vmem:[%s3444_s7 + $0xe4] sm:$0xf] %v343_v57 }
  0x3a   : > { %346 = vst [vmem:[%s3444_s7 + $0xe8] sm:$0xf] %v345_v58  ;;  %v347_v59 = vld [vmem:[%s3440_s6 + $0x1d8] sm:$0xf]  ;;  %v349_v60 = vld [vmem:[%s3440_s6 + $0x1e0] sm:$0xf] }
  0x3b   : > { %v351_v61 = vld [vmem:[%s3440_s6 + $0x1e8] sm:$0xf]  ;;  %348 = vst [vmem:[%s3444_s7 + $0xec] sm:$0xf] %v347_v59  ;;  %350 = vst [vmem:[%s3444_s7 + $0xf0] sm:$0xf] %v349_v60 }
  0x3c   : > { %352 = vst [vmem:[%s3444_s7 + $0xf4] sm:$0xf] %v351_v61  ;;  %v353_v62 = vld [vmem:[%s3440_s6 + $0x1f0] sm:$0xf]  ;;  %v355_v63 = vld [vmem:[%s3440_s6 + $0x1f8] sm:$0xf] }
  0x3d   : > { %v357_v0 = vld [vmem:[%s3440_s6 + $0x200] sm:$0xf]  ;;  %354 = vst [vmem:[%s3444_s7 + $0xf8] sm:$0xf] %v353_v62  ;;  %356 = vst [vmem:[%s3444_s7 + $0xfc] sm:$0xf] %v355_v63 }
  0x3e   : > { %358 = vst [vmem:[%s3444_s7 + $0x100] sm:$0xf] %v357_v0  ;;  %v359_v1 = vld [vmem:[%s3440_s6 + $0x208] sm:$0xf]  ;;  %v361_v2 = vld [vmem:[%s3440_s6 + $0x210] sm:$0xf] }
  0x3f   : > { %v363_v3 = vld [vmem:[%s3440_s6 + $0x218] sm:$0xf]  ;;  %360 = vst [vmem:[%s3444_s7 + $0x104] sm:$0xf] %v359_v1  ;;  %362 = vst [vmem:[%s3444_s7 + $0x108] sm:$0xf] %v361_v2 }
  0x40   : > { %364 = vst [vmem:[%s3444_s7 + $0x10c] sm:$0xf] %v363_v3  ;;  %v365_v4 = vld [vmem:[%s3440_s6 + $0x220] sm:$0xf]  ;;  %v367_v5 = vld [vmem:[%s3440_s6 + $0x228] sm:$0xf] }
  0x41   : > { %v369_v6 = vld [vmem:[%s3440_s6 + $0x230] sm:$0xf]  ;;  %366 = vst [vmem:[%s3444_s7 + $0x110] sm:$0xf] %v365_v4  ;;  %368 = vst [vmem:[%s3444_s7 + $0x114] sm:$0xf] %v367_v5 }
  0x42   : > { %370 = vst [vmem:[%s3444_s7 + $0x118] sm:$0xf] %v369_v6  ;;  %v371_v7 = vld [vmem:[%s3440_s6 + $0x238] sm:$0xf]  ;;  %v373_v8 = vld [vmem:[%s3440_s6 + $0x240] sm:$0xf] }
  0x43   : > { %v375_v9 = vld [vmem:[%s3440_s6 + $0x248] sm:$0xf]  ;;  %372 = vst [vmem:[%s3444_s7 + $0x11c] sm:$0xf] %v371_v7  ;;  %374 = vst [vmem:[%s3444_s7 + $0x120] sm:$0xf] %v373_v8 }
  0x44   : > { %376 = vst [vmem:[%s3444_s7 + $0x124] sm:$0xf] %v375_v9  ;;  %v377_v10 = vld [vmem:[%s3440_s6 + $0x250] sm:$0xf]  ;;  %v379_v11 = vld [vmem:[%s3440_s6 + $0x258] sm:$0xf] }
  0x45   : > { %v381_v12 = vld [vmem:[%s3440_s6 + $0x260] sm:$0xf]  ;;  %378 = vst [vmem:[%s3444_s7 + $0x128] sm:$0xf] %v377_v10  ;;  %380 = vst [vmem:[%s3444_s7 + $0x12c] sm:$0xf] %v379_v11 }
  0x46   : > { %382 = vst [vmem:[%s3444_s7 + $0x130] sm:$0xf] %v381_v12  ;;  %v383_v13 = vld [vmem:[%s3440_s6 + $0x268] sm:$0xf]  ;;  %v385_v14 = vld [vmem:[%s3440_s6 + $0x270] sm:$0xf] }
  0x47   : > { %v387_v15 = vld [vmem:[%s3440_s6 + $0x278] sm:$0xf]  ;;  %384 = vst [vmem:[%s3444_s7 + $0x134] sm:$0xf] %v383_v13  ;;  %386 = vst [vmem:[%s3444_s7 + $0x138] sm:$0xf] %v385_v14 }
  0x48   : > { %388 = vst [vmem:[%s3444_s7 + $0x13c] sm:$0xf] %v387_v15  ;;  %v389_v16 = vld [vmem:[%s3440_s6 + $0x280] sm:$0xf]  ;;  %v391_v17 = vld [vmem:[%s3440_s6 + $0x288] sm:$0xf] }
  0x49   : > { %v393_v18 = vld [vmem:[%s3440_s6 + $0x290] sm:$0xf]  ;;  %390 = vst [vmem:[%s3444_s7 + $0x140] sm:$0xf] %v389_v16  ;;  %392 = vst [vmem:[%s3444_s7 + $0x144] sm:$0xf] %v391_v17 }
  0x4a   : > { %394 = vst [vmem:[%s3444_s7 + $0x148] sm:$0xf] %v393_v18  ;;  %v395_v19 = vld [vmem:[%s3440_s6 + $0x298] sm:$0xf]  ;;  %v397_v20 = vld [vmem:[%s3440_s6 + $0x2a0] sm:$0xf] }
  0x4b   : > { %v399_v21 = vld [vmem:[%s3440_s6 + $0x2a8] sm:$0xf]  ;;  %396 = vst [vmem:[%s3444_s7 + $0x14c] sm:$0xf] %v395_v19  ;;  %398 = vst [vmem:[%s3444_s7 + $0x150] sm:$0xf] %v397_v20 }
  0x4c   : > { %400 = vst [vmem:[%s3444_s7 + $0x154] sm:$0xf] %v399_v21  ;;  %v401_v22 = vld [vmem:[%s3440_s6 + $0x2b0] sm:$0xf]  ;;  %v403_v23 = vld [vmem:[%s3440_s6 + $0x2b8] sm:$0xf] }
  0x4d   : > { %v405_v24 = vld [vmem:[%s3440_s6 + $0x2c0] sm:$0xf]  ;;  %402 = vst [vmem:[%s3444_s7 + $0x158] sm:$0xf] %v401_v22  ;;  %404 = vst [vmem:[%s3444_s7 + $0x15c] sm:$0xf] %v403_v23 }
  0x4e   : > { %406 = vst [vmem:[%s3444_s7 + $0x160] sm:$0xf] %v405_v24  ;;  %v407_v25 = vld [vmem:[%s3440_s6 + $0x2c8] sm:$0xf]  ;;  %v409_v26 = vld [vmem:[%s3440_s6 + $0x2d0] sm:$0xf] }
  0x4f   : > { %v411_v27 = vld [vmem:[%s3440_s6 + $0x2d8] sm:$0xf]  ;;  %408 = vst [vmem:[%s3444_s7 + $0x164] sm:$0xf] %v407_v25  ;;  %410 = vst [vmem:[%s3444_s7 + $0x168] sm:$0xf] %v409_v26 }
  0x50   : > { %412 = vst [vmem:[%s3444_s7 + $0x16c] sm:$0xf] %v411_v27  ;;  %v413_v28 = vld [vmem:[%s3440_s6 + $0x2e0] sm:$0xf]  ;;  %v415_v29 = vld [vmem:[%s3440_s6 + $0x2e8] sm:$0xf] }
  0x51   : > { %v417_v30 = vld [vmem:[%s3440_s6 + $0x2f0] sm:$0xf]  ;;  %414 = vst [vmem:[%s3444_s7 + $0x170] sm:$0xf] %v413_v28  ;;  %416 = vst [vmem:[%s3444_s7 + $0x174] sm:$0xf] %v415_v29 }
  0x52   : > { %418 = vst [vmem:[%s3444_s7 + $0x178] sm:$0xf] %v417_v30  ;;  %v419_v31 = vld [vmem:[%s3440_s6 + $0x2f8] sm:$0xf]  ;;  %v421_v32 = vld [vmem:[%s3440_s6 + $0x300] sm:$0xf] }
  0x53   : > { %v423_v33 = vld [vmem:[%s3440_s6 + $0x308] sm:$0xf]  ;;  %420 = vst [vmem:[%s3444_s7 + $0x17c] sm:$0xf] %v419_v31  ;;  %422 = vst [vmem:[%s3444_s7 + $0x180] sm:$0xf] %v421_v32 }
  0x54   : > { %424 = vst [vmem:[%s3444_s7 + $0x184] sm:$0xf] %v423_v33  ;;  %v425_v34 = vld [vmem:[%s3440_s6 + $0x310] sm:$0xf]  ;;  %v427_v35 = vld [vmem:[%s3440_s6 + $0x318] sm:$0xf] }
  0x55   : > { %v429_v36 = vld [vmem:[%s3440_s6 + $0x320] sm:$0xf]  ;;  %426 = vst [vmem:[%s3444_s7 + $0x188] sm:$0xf] %v425_v34  ;;  %428 = vst [vmem:[%s3444_s7 + $0x18c] sm:$0xf] %v427_v35 }
  0x56   : > { %430 = vst [vmem:[%s3444_s7 + $0x190] sm:$0xf] %v429_v36  ;;  %v431_v37 = vld [vmem:[%s3440_s6 + $0x328] sm:$0xf]  ;;  %v433_v38 = vld [vmem:[%s3440_s6 + $0x330] sm:$0xf] }
  0x57   : > { %v435_v39 = vld [vmem:[%s3440_s6 + $0x338] sm:$0xf]  ;;  %432 = vst [vmem:[%s3444_s7 + $0x194] sm:$0xf] %v431_v37  ;;  %434 = vst [vmem:[%s3444_s7 + $0x198] sm:$0xf] %v433_v38 }
  0x58   : > { %436 = vst [vmem:[%s3444_s7 + $0x19c] sm:$0xf] %v435_v39  ;;  %v437_v40 = vld [vmem:[%s3440_s6 + $0x340] sm:$0xf]  ;;  %v439_v41 = vld [vmem:[%s3440_s6 + $0x348] sm:$0xf] }
  0x59   : > { %v441_v42 = vld [vmem:[%s3440_s6 + $0x350] sm:$0xf]  ;;  %438 = vst [vmem:[%s3444_s7 + $0x1a0] sm:$0xf] %v437_v40  ;;  %440 = vst [vmem:[%s3444_s7 + $0x1a4] sm:$0xf] %v439_v41 }
  0x5a   : > { %442 = vst [vmem:[%s3444_s7 + $0x1a8] sm:$0xf] %v441_v42  ;;  %v443_v43 = vld [vmem:[%s3440_s6 + $0x358] sm:$0xf]  ;;  %v445_v44 = vld [vmem:[%s3440_s6 + $0x360] sm:$0xf] }
  0x5b   : > { %v447_v45 = vld [vmem:[%s3440_s6 + $0x368] sm:$0xf]  ;;  %444 = vst [vmem:[%s3444_s7 + $0x1ac] sm:$0xf] %v443_v43  ;;  %446 = vst [vmem:[%s3444_s7 + $0x1b0] sm:$0xf] %v445_v44 }
  0x5c   : > { %448 = vst [vmem:[%s3444_s7 + $0x1b4] sm:$0xf] %v447_v45  ;;  %v449_v46 = vld [vmem:[%s3440_s6 + $0x370] sm:$0xf]  ;;  %v451_v47 = vld [vmem:[%s3440_s6 + $0x378] sm:$0xf] }
  0x5d   : > { %v453_v48 = vld [vmem:[%s3440_s6 + $0x380] sm:$0xf]  ;;  %450 = vst [vmem:[%s3444_s7 + $0x1b8] sm:$0xf] %v449_v46  ;;  %452 = vst [vmem:[%s3444_s7 + $0x1bc] sm:$0xf] %v451_v47 }
  0x5e   : > { %454 = vst [vmem:[%s3444_s7 + $0x1c0] sm:$0xf] %v453_v48  ;;  %v455_v49 = vld [vmem:[%s3440_s6 + $0x388] sm:$0xf]  ;;  %v457_v50 = vld [vmem:[%s3440_s6 + $0x390] sm:$0xf] }
  0x5f   : > { %v459_v51 = vld [vmem:[%s3440_s6 + $0x398] sm:$0xf]  ;;  %456 = vst [vmem:[%s3444_s7 + $0x1c4] sm:$0xf] %v455_v49  ;;  %458 = vst [vmem:[%s3444_s7 + $0x1c8] sm:$0xf] %v457_v50 }
  0x60   : > { %460 = vst [vmem:[%s3444_s7 + $0x1cc] sm:$0xf] %v459_v51  ;;  %v461_v52 = vld [vmem:[%s3440_s6 + $0x3a0] sm:$0xf]  ;;  %v463_v53 = vld [vmem:[%s3440_s6 + $0x3a8] sm:$0xf] }
  0x61   : > { %v465_v54 = vld [vmem:[%s3440_s6 + $0x3b0] sm:$0xf]  ;;  %462 = vst [vmem:[%s3444_s7 + $0x1d0] sm:$0xf] %v461_v52  ;;  %464 = vst [vmem:[%s3444_s7 + $0x1d4] sm:$0xf] %v463_v53 }
  0x62   : > { %466 = vst [vmem:[%s3444_s7 + $0x1d8] sm:$0xf] %v465_v54  ;;  %v467_v55 = vld [vmem:[%s3440_s6 + $0x3b8] sm:$0xf]  ;;  %v469_v56 = vld [vmem:[%s3440_s6 + $0x3c0] sm:$0xf] }
  0x63   : > { %v471_v57 = vld [vmem:[%s3440_s6 + $0x3c8] sm:$0xf]  ;;  %468 = vst [vmem:[%s3444_s7 + $0x1dc] sm:$0xf] %v467_v55  ;;  %470 = vst [vmem:[%s3444_s7 + $0x1e0] sm:$0xf] %v469_v56 }
  0x64   : > { %472 = vst [vmem:[%s3444_s7 + $0x1e4] sm:$0xf] %v471_v57  ;;  %v473_v58 = vld [vmem:[%s3440_s6 + $0x3d0] sm:$0xf]  ;;  %v475_v59 = vld [vmem:[%s3440_s6 + $0x3d8] sm:$0xf] }
  0x65   : > { %v477_v60 = vld [vmem:[%s3440_s6 + $0x3e0] sm:$0xf]  ;;  %474 = vst [vmem:[%s3444_s7 + $0x1e8] sm:$0xf] %v473_v58  ;;  %476 = vst [vmem:[%s3444_s7 + $0x1ec] sm:$0xf] %v475_v59 }
  0x66   : > { %478 = vst [vmem:[%s3444_s7 + $0x1f0] sm:$0xf] %v477_v60  ;;  %v479_v61 = vld [vmem:[%s3440_s6 + $0x3e8] sm:$0xf]  ;;  %v481_v62 = vld [vmem:[%s3440_s6 + $0x3f0] sm:$0xf] }
  0x67   : > { %v483_v63 = vld [vmem:[%s3440_s6 + $0x3f8] sm:$0xf]  ;;  %480 = vst [vmem:[%s3444_s7 + $0x1f4] sm:$0xf] %v479_v61  ;;  %482 = vst [vmem:[%s3444_s7 + $0x1f8] sm:$0xf] %v481_v62 }
  0x68   : > { %484 = vst [vmem:[%s3444_s7 + $0x1fc] sm:$0xf] %v483_v63 }
  0x69 PF: > { %770 = sbr.rel (!%p3418_p3) target bundleno = 119 (0x77), region = 69  ;;  %s772_s8 = sand.u32 (%p3418_p3), 1, %s3347_s16  }
  0x6a   : > { %s2705_s9 = sshll.u32 (%p3418_p3), %s3355_s18, 2  ;;  %s2704_s10 = sshll.u32 (%p3418_p3), %s772_s8, 6 }
  0x6b   : > { %s3707_s13 = scalar_lea.vmem (%p3418_p3), %s4213_s3, %s2705_s9  ;;  %s774_s14 = scalar_lea.vmem (%p3418_p3), [#allocation4], %s2704_s10 }
  0x6c   : > { %v796_v0 = vld [vmem:[%s3707_s13] sm:$0xf] (%p3418_p3)  ;;  %v798_v1 = vld [vmem:[%s3707_s13 + $0x8] sm:$0xf] (%p3418_p3)  ;;  %v800_v2 = vld [vmem:[%s3707_s13 + $0x10] sm:$0xf] (%p3418_p3) }
  0x6d   : > { %797 = vst [vmem:[%s774_s14] sm:$0xf] (%p3418_p3), %v796_v0  ;;  %799 = vst [vmem:[%s774_s14 + $0x4] sm:$0xf] (%p3418_p3), %v798_v1  ;;  %v802_v3 = vld [vmem:[%s3707_s13 + $0x18] sm:$0xf] (%p3418_p3) }
  0x6e   : > { %v804_v4 = vld [vmem:[%s3707_s13 + $0x20] sm:$0xf]  ;;  %801 = vst [vmem:[%s774_s14 + $0x8] sm:$0xf] %v800_v2  ;;  %803 = vst [vmem:[%s774_s14 + $0xc] sm:$0xf] %v802_v3 }
  0x6f   : > { %805 = vst [vmem:[%s774_s14 + $0x10] sm:$0xf] %v804_v4  ;;  %v806_v5 = vld [vmem:[%s3707_s13 + $0x28] sm:$0xf]  ;;  %v808_v6 = vld [vmem:[%s3707_s13 + $0x30] sm:$0xf] }
  0x70   : > { %v810_v7 = vld [vmem:[%s3707_s13 + $0x38] sm:$0xf]  ;;  %807 = vst [vmem:[%s774_s14 + $0x14] sm:$0xf] %v806_v5  ;;  %809 = vst [vmem:[%s774_s14 + $0x18] sm:$0xf] %v808_v6 }
  0x71   : > { %811 = vst [vmem:[%s774_s14 + $0x1c] sm:$0xf] %v810_v7  ;;  %v812_v8 = vld [vmem:[%s3707_s13 + $0x40] sm:$0xf]  ;;  %v814_v9 = vld [vmem:[%s3707_s13 + $0x48] sm:$0xf] }
  0x72   : > { %v816_v10 = vld [vmem:[%s3707_s13 + $0x50] sm:$0xf]  ;;  %813 = vst [vmem:[%s774_s14 + $0x20] sm:$0xf] %v812_v8  ;;  %815 = vst [vmem:[%s774_s14 + $0x24] sm:$0xf] %v814_v9 }
  0x73   : > { %817 = vst [vmem:[%s774_s14 + $0x28] sm:$0xf] %v816_v10  ;;  %v818_v11 = vld [vmem:[%s3707_s13 + $0x58] sm:$0xf]  ;;  %v820_v12 = vld [vmem:[%s3707_s13 + $0x60] sm:$0xf] }
  0x74   : > { %v822_v13 = vld [vmem:[%s3707_s13 + $0x68] sm:$0xf]  ;;  %819 = vst [vmem:[%s774_s14 + $0x2c] sm:$0xf] %v818_v11  ;;  %821 = vst [vmem:[%s774_s14 + $0x30] sm:$0xf] %v820_v12 }
  0x75   : > { %823 = vst [vmem:[%s774_s14 + $0x34] sm:$0xf] %v822_v13  ;;  %v824_v14 = vld [vmem:[%s3707_s13 + $0x70] sm:$0xf]  ;;  %v826_v15 = vld [vmem:[%s3707_s13 + $0x78] sm:$0xf] }
  0x76   : > { %825 = vst [vmem:[%s774_s14 + $0x38] sm:$0xf] %v824_v14  ;;  %827 = vst [vmem:[%s774_s14 + $0x3c] sm:$0xf] %v826_v15 }
  0x77 PF: > { %p2706_p8 = scmp.ge.s32.totalorder %s3359_s19, 1  ;;  %p882_p9 = scmp.lt.s32.totalorder %s3359_s19, 3 }
  0x79   : > { %p883_p10 = pnand %p2706_p8, %p882_p9 }
  0x7a   : > { %s889_s21 = sand.u32 (!%p883_p10), 1, %s3343_s15   ;;  %p950_p11 = scmp.lt.s32.totalorder (!%p883_p10), %s3351_s17, 1 }
  0x7b   : > { %886 = sbr.rel (%p883_p10) target bundleno = 502 (0x1f6), region = 110  ;;  %s2707_s30 = sshll.u32 (!%p883_p10), %s889_s21, 9 }
  0x7c   : > { %s3754_s7 = scalar_lea.vmem (!%p883_p10), [#allocation3], %s2707_s30  ;;  %s4087_s12 = sshll.u32 (!%p883_p10), %s889_s21, 6 }
  0x7d   : > { %s4099_s21 = scalar_lea.vmem (!%p883_p10), [#allocation4], %s4087_s12  ;;  %s4117_s22 = scalar_lea.vmem (!%p883_p10), [#allocation5], %s4087_s12 }
  0x80   : > { %v3731_v16 = vld [vmem:[%s4210_s0] sm:$0xff]  ;;  %v3741_v18 = vld [vmem:[%s4210_s0 + $0x8] sm:$0xff]  ;;  %v3257_v22 = vld [vmem:[%s3754_s7 + $0x78] sm:$0xff]   ;;  %s951_s13 = scalar_select %p950_p11, %s3351_s17, 1 }
  0x81   : > { %v3736_v17 = vld [vmem:[%s4210_s0 + $0x20] sm:$0xff]  ;;  %v3750_v20 = vld [vmem:[%s4210_s0 + $0x28] sm:$0xff]  ;;  %v3258_v23 = vld [vmem:[%s3754_s7 + $0xf8] sm:$0xff]   ;;  %2961 = vmatprep.subr.bf16.mxu0 %v3257_v22  ;;  %s2856_s23 = sshll.u32 (%p3425_p6), %s3351_s17, 2 }
  0x82   : > { %v2712_v19 = vcombine.high %v3731_v16, %v3736_v17  ;;  %v2714_v21 = vcombine.high %v3741_v18, %v3750_v20  ;;  %v3259_v24 = vld [vmem:[%s3754_s7 + $0x38] sm:$0xff]   ;;  %3025 = vmatprep.subr.bf16.mxu1 %v3258_v23  ;;  %v3261_v26 = vld [vmem:[%s3754_s7 + $0x70] sm:$0xff]   ;;  %v3265_v30 = vld [vmem:[%s3754_s7 + $0x68] sm:$0xff]   ;;  %v2711_v58 = vcombine.low %v3731_v16, %v3736_v17  ;;  %v2713_v59 = vcombine.low %v3741_v18, %v3750_v20  ;;  %s952_s15 = scalar_lea.vmem %s4212_s2, %s951_s13  ;;  %s2473_s28 = scalar_lea.vmem (%p3425_p6), %s4214_s4, %s2856_s23 }
  0x83   : > { %v3260_v25 = vld [vmem:[%s3754_s7 + $0xb8] sm:$0xff]   ;;  %2962 = vmatpush3.bf16.msra.mxu0 %v3259_v24  ;;  %v3262_v27 = vld [vmem:[%s3754_s7 + $0xf0] sm:$0xff]   ;;  %v3266_v31 = vld [vmem:[%s3754_s7 + $0xe8] sm:$0xff]  }
  0x84   : > { %1927 = vmatprep.mubr.bf16.mxu0 %v2712_v19  ;;  %2024 = vmatprep.mubr.bf16.mxu1 %v2714_v21  ;;  %v3263_v28 = vld [vmem:[%s3754_s7 + $0x30] sm:$0xff]   ;;  %v3267_v32 = vld [vmem:[%s3754_s7 + $0x28] sm:$0xff]   ;;  %v3269_v34 = vld [vmem:[%s3754_s7 + $0x60] sm:$0xff]  }
  0x85   : > { %3026 = vmatpush3.bf16.msra.mxu1 %v3260_v25  ;;  %2963 = vmatprep.subr.bf16.mxu0 %v3261_v26  ;;  %v3264_v29 = vld [vmem:[%s3754_s7 + $0xb0] sm:$0xff]   ;;  %v3268_v33 = vld [vmem:[%s3754_s7 + $0xa8] sm:$0xff]   ;;  %v3270_v35 = vld [vmem:[%s3754_s7 + $0xe0] sm:$0xff]  }
  0x86   : > { %3027 = vmatprep.subr.bf16.mxu1 %v3262_v27  ;;  %v3271_v36 = vld [vmem:[%s3754_s7 + $0x20] sm:$0xff]   ;;  %v3273_v38 = vld [vmem:[%s3754_s7 + $0x58] sm:$0xff]   ;;  %v3277_v42 = vld [vmem:[%s3754_s7 + $0x50] sm:$0xff]  }
  0x87   : > { %2964 = vmatpush3.bf16.msra.mxu0 %v3263_v28  ;;  %v3272_v37 = vld [vmem:[%s3754_s7 + $0xa0] sm:$0xff]   ;;  %v3274_v39 = vld [vmem:[%s3754_s7 + $0xd8] sm:$0xff]   ;;  %v3278_v43 = vld [vmem:[%s3754_s7 + $0xd0] sm:$0xff]  }
  0x88   : > { %2965 = vmatprep.subr.bf16.mxu0 %v3265_v30  ;;  %v3275_v40 = vld [vmem:[%s3754_s7 + $0x18] sm:$0xff]   ;;  %v3279_v44 = vld [vmem:[%s3754_s7 + $0x10] sm:$0xff]   ;;  %v3281_v46 = vld [vmem:[%s3754_s7 + $0x48] sm:$0xff]  }
  0x89   : > { %3028 = vmatpush3.bf16.msra.mxu1 %v3264_v29  ;;  %v3276_v41 = vld [vmem:[%s3754_s7 + $0x98] sm:$0xff]   ;;  %v3280_v45 = vld [vmem:[%s3754_s7 + $0x90] sm:$0xff]   ;;  %v3282_v47 = vld [vmem:[%s3754_s7 + $0xc8] sm:$0xff]  }
  0x8a   : > { %3029 = vmatprep.subr.bf16.mxu1 %v3266_v31  ;;  %v3283_v48 = vld [vmem:[%s3754_s7 + $0x8] sm:$0xff]   ;;  %v3285_v50 = vld [vmem:[%s3754_s7 + $0x40] sm:$0xff]   ;;  %v3289_v60 = vld [vmem:[%s3754_s7 + $0x178] sm:$0xff]  }
  0x8b   : > { %2966 = vmatpush3.bf16.msra.mxu0 %v3267_v32  ;;  %v3284_v49 = vld [vmem:[%s3754_s7 + $0x88] sm:$0xff]   ;;  %v964_v51 = vld [vmem:[%s4210_s0 + $0x40] sm:$0xff]  ;;  %v3290_v61 = vld [vmem:[%s3754_s7 + $0x138] sm:$0xff]  }
  0x8c   : > { %2967 = vmatprep.subr.bf16.mxu0 %v3269_v34  ;;  %v968_v52 = vld [vmem:[%s4210_s0 + $0x60] sm:$0xff]  ;;  %v965_v54 = vld [vmem:[%s4210_s0 + $0x48] sm:$0xff]  ;;  %v3291_v63 = vld [vmem:[%s3754_s7 + $0x1f8] sm:$0xff]  }
  0x8d   : > { %3030 = vmatpush3.bf16.msra.mxu1 %v3268_v33  ;;  %v3286_v53 = vld [vmem:[%s3754_s7 + $0xc0] sm:$0xff]   ;;  %v969_v55 = vld [vmem:[%s4210_s0 + $0x68] sm:$0xff]  ;;  %v2720_v62 = vcombine.high %v964_v51, %v968_v52  ;;  %v3292_v1 = vld [vmem:[%s3754_s7 + $0x1b8] sm:$0xff]   ;;  %v2719_v6 = vcombine.low %v964_v51, %v968_v52 }
  0x8e   : > { %3031 = vmatprep.subr.bf16.mxu1 %v3270_v35  ;;  %v3287_v56 = vld [vmem:[%s3754_s7] sm:$0xff]   ;;  %v2722_v0 = vcombine.high %v965_v54, %v969_v55  ;;  %v3293_v2 = vld [vmem:[%s3754_s7 + $0x170] sm:$0xff]   ;;  %v2721_v8 = vcombine.low %v965_v54, %v969_v55  ;;  %v973_v10 = vld [vmem:[%s4210_s0 + $0x88] sm:$0xff] }
  0x8f   : > { %2968 = vmatpush3.bf16.msra.mxu0 %v3271_v36  ;;  %v3288_v57 = vld [vmem:[%s3754_s7 + $0x80] sm:$0xff]   ;;  %v3294_v4 = vld [vmem:[%s3754_s7 + $0x130] sm:$0xff]   ;;  %v977_v11 = vld [vmem:[%s4210_s0 + $0xa8] sm:$0xff] }
  0x90   : > { %2969 = vmatprep.subr.bf16.mxu0 %v3273_v38  ;;  %v972_v3 = vld [vmem:[%s4210_s0 + $0x80] sm:$0xff]  ;;  %v3295_v5 = vld [vmem:[%s3754_s7 + $0x1f0] sm:$0xff]   ;;  %v2730_v13 = vcombine.high %v973_v10, %v977_v11  ;;  %v3297_v14 = vld [vmem:[%s3754_s7 + $0x168] sm:$0xff]   ;;  %v2729_v24 = vcombine.low %v973_v10, %v977_v11 }
  0x91   : > { %3032 = vmatpush3.bf16.msra.mxu1 %v3272_v37  ;;  %v3296_v7 = vld [vmem:[%s3754_s7 + $0x1b0] sm:$0xff]   ;;  %v976_v9 = vld [vmem:[%s4210_s0 + $0xa0] sm:$0xff]  ;;  %v3298_v15 = vld [vmem:[%s3754_s7 + $0x128] sm:$0xff]  }
  0x92   : > { %3033 = vmatprep.subr.bf16.mxu1 %v3274_v39  ;;  %v2728_v12 = vcombine.high %v972_v3, %v976_v9  ;;  %v3299_v16 = vld [vmem:[%s3754_s7 + $0x1e8] sm:$0xff]   ;;  %v980_v18 = vld [vmem:[%s4210_s0 + $0xc0] sm:$0xff]  ;;  %v2727_v22 = vcombine.low %v972_v3, %v976_v9  ;;  %v3305_v34 = vld [vmem:[%s3754_s7 + $0x158] sm:$0xff]  }
  0x93   : > { %2970 = vmatpush3.bf16.msra.mxu0 %v3275_v40  ;;  %v3300_v17 = vld [vmem:[%s3754_s7 + $0x1a8] sm:$0xff]   ;;  %v984_v19 = vld [vmem:[%s4210_s0 + $0xe0] sm:$0xff]  ;;  %v3306_v35 = vld [vmem:[%s3754_s7 + $0x118] sm:$0xff]  }
  0x94   : > { %2971 = vmatprep.subr.bf16.mxu0 %v3277_v42  ;;  %v981_v20 = vld [vmem:[%s4210_s0 + $0xc8] sm:$0xff]  ;;  %v3301_v23 = vld [vmem:[%s3754_s7 + $0x160] sm:$0xff]   ;;  %v2736_v25 = vcombine.high %v980_v18, %v984_v19  ;;  %v3307_v36 = vld [vmem:[%s3754_s7 + $0x1d8] sm:$0xff]   ;;  %v2735_v37 = vcombine.low %v980_v18, %v984_v19 }
  0x95   : > { %3034 = vmatpush3.bf16.msra.mxu1 %v3276_v41  ;;  %v985_v21 = vld [vmem:[%s4210_s0 + $0xe8] sm:$0xff]  ;;  %v3302_v26 = vld [vmem:[%s3754_s7 + $0x120] sm:$0xff]   ;;  %v3308_v38 = vld [vmem:[%s3754_s7 + $0x198] sm:$0xff]  }
  0x96   : > { %3035 = vmatprep.subr.bf16.mxu1 %v3278_v43  ;;  %v2738_v27 = vcombine.high %v981_v20, %v985_v21  ;;  %v3303_v28 = vld [vmem:[%s3754_s7 + $0x1e0] sm:$0xff]   ;;  %v989_v32 = vld [vmem:[%s4210_s0 + $0x108] sm:$0xff]  ;;  %v2737_v39 = vcombine.low %v981_v20, %v985_v21  ;;  %v3309_v42 = vld [vmem:[%s3754_s7 + $0x150] sm:$0xff]  }
  0x97   : > { %2972 = vmatpush3.bf16.msra.mxu0 %v3279_v44  ;;  %v3304_v29 = vld [vmem:[%s3754_s7 + $0x1a0] sm:$0xff]   ;;  %v993_v33 = vld [vmem:[%s4210_s0 + $0x128] sm:$0xff]  ;;  %v3310_v43 = vld [vmem:[%s3754_s7 + $0x110] sm:$0xff]  }
  0x98   : > { %2973 = vmatprep.subr.bf16.mxu0 %v3281_v46  ;;  %v988_v30 = vld [vmem:[%s4210_s0 + $0x100] sm:$0xff]  ;;  %v2746_v41 = vcombine.high %v989_v32, %v993_v33  ;;  %v3311_v44 = vld [vmem:[%s3754_s7 + $0x1d0] sm:$0xff]   ;;  %v3313_v51 = vld [vmem:[%s3754_s7 + $0x148] sm:$0xff]   ;;  %v2745_v52 = vcombine.low %v989_v32, %v993_v33 }
  0x99   : > { %3036 = vmatpush3.bf16.msra.mxu1 %v3280_v45  ;;  %v992_v31 = vld [vmem:[%s4210_s0 + $0x120] sm:$0xff]  ;;  %v3312_v45 = vld [vmem:[%s3754_s7 + $0x190] sm:$0xff]   ;;  %v3314_v54 = vld [vmem:[%s3754_s7 + $0x108] sm:$0xff]  }
  0x9a   : > { %3037 = vmatprep.subr.bf16.mxu1 %v3282_v47  ;;  %v2744_v40 = vcombine.high %v988_v30, %v992_v31  ;;  %v996_v46 = vld [vmem:[%s4210_s0 + $0x140] sm:$0xff]  ;;  %v1017_v9 = vld [vmem:[%s4210_s0 + $0x1e8] sm:$0xff]  ;;  %v975_v32 = vld [vmem:[%s4210_s0 + $0x98] sm:$0xff] }
  0x9b   : > { %2974 = vmatpush3.bf16.msra.mxu0 %v3283_v48  ;;  %v1000_v47 = vld [vmem:[%s4210_s0 + $0x160] sm:$0xff]  ;;  %v997_v48 = vld [vmem:[%s4210_s0 + $0x148] sm:$0xff]  ;;  %v979_v33 = vld [vmem:[%s4210_s0 + $0xb8] sm:$0xff] }
  0x9c   : > { %2975 = vmatprep.subr.bf16.mxu0 %v3285_v50  ;;  %v2743_v50 = vcombine.low %v988_v30, %v992_v31  ;;  %v974_v30 = vld [vmem:[%s4210_s0 + $0x90] sm:$0xff] }
  0x9d   : > { %3038 = vmatpush3.bf16.msra.mxu1 %v3284_v49  ;;  %v1001_v49 = vld [vmem:[%s4210_s0 + $0x168] sm:$0xff]  ;;  %v978_v31 = vld [vmem:[%s4210_s0 + $0xb0] sm:$0xff] }
  0x9e   : > { %3039 = vmatprep.subr.bf16.mxu1 %v3286_v53  ;;  %v2752_v53 = vcombine.high %v996_v46, %v1000_v47  ;;  %v2754_v55 = vcombine.high %v997_v48, %v1001_v49  ;;  %v2753_v3 = vcombine.low %v997_v48, %v1001_v49  ;;  %v991_v48 = vld [vmem:[%s4210_s0 + $0x118] sm:$0xff] }
  0x9f   : > { %2976 = vmatpush3.bf16.msra.mxu0 %v3287_v56  ;;  %v3315_v56 = vld [vmem:[%s3754_s7 + $0x1c8] sm:$0xff]   ;;  %v995_v49 = vld [vmem:[%s4210_s0 + $0x138] sm:$0xff] }
  0xa0   : > { %3089 = vmatprep.subr.bf16.mxu0 %v3289_v60  ;;  %v1005_v60 = vld [vmem:[%s4210_s0 + $0x188] sm:$0xff] }
  0xa1   : > { %3040 = vmatpush3.bf16.msra.mxu1 %v3288_v57  ;;  %v3316_v57 = vld [vmem:[%s3754_s7 + $0x188] sm:$0xff]  }
  0xa2   : > { %1928 = vmatmul.mubr.bf16.vlgmr.msra.gmra.mxu0 %v2711_v58  ;;  %3153 = vmatprep.subr.bf16.mxu1 %v3291_v63  ;;  %v1004_v58 = vld [vmem:[%s4210_s0 + $0x180] sm:$0xff] }
  0xa3   : > { %3090 = vmatpush3.bf16.msra.mxu0 %v3290_v61  ;;  %1935 = vmatprep.mubr.bf16.mxu0 %v2720_v62  ;;  %v1009_v61 = vld [vmem:[%s4210_s0 + $0x1a8] sm:$0xff]  ;;  %v3317_v62 = vld [vmem:[%s3754_s7 + $0x140] sm:$0xff]  }
  0xa4   : > { %2025 = vmatmul.mubr.bf16.vlgmr.msra.gmra.mxu1 %v2713_v59  ;;  %3091 = vmatprep.subr.bf16.mxu0 %v3293_v2  ;;  %v1008_v59 = vld [vmem:[%s4210_s0 + $0x1a0] sm:$0xff]  ;;  %v2761_v11 = vcombine.low %v1005_v60, %v1009_v61 }
  0xa5   : > { %3154 = vmatpush3.bf16.msra.mxu1 %v3292_v1  ;;  %2032 = vmatprep.mubr.bf16.mxu1 %v2722_v0  ;;  %v3318_v63 = vld [vmem:[%s3754_s7 + $0x100] sm:$0xff]   ;;  %v2751_v1 = vcombine.low %v996_v46, %v1000_v47  ;;  %v2759_v10 = vcombine.low %v1004_v58, %v1008_v59  ;;  %v990_v46 = vld [vmem:[%s4210_s0 + $0x110] sm:$0xff] }
  0xa6   : > { %3155 = vmatprep.subr.bf16.mxu1 %v3295_v5  ;;  %v3319_v0 = vld [vmem:[%s3754_s7 + $0x1c0] sm:$0xff]   ;;  %v2762_v5 = vcombine.high %v1005_v60, %v1009_v61  ;;  %v994_v47 = vld [vmem:[%s4210_s0 + $0x130] sm:$0xff] }
  0xa7   : > { %3092 = vmatpush3.bf16.msra.mxu0 %v3294_v4  ;;  %v3320_v2 = vld [vmem:[%s3754_s7 + $0x180] sm:$0xff]   ;;  %v2760_v4 = vcombine.high %v1004_v58, %v1008_v59  ;;  %v2747_v58 = vcombine.low %v990_v46, %v994_v47  ;;  %v2749_v59 = vcombine.low %v991_v48, %v995_v49 }
  0xa8   : > { %3093 = vmatprep.subr.bf16.mxu0 %v3297_v14  ;;  %v958_v14 = vld [vmem:[%s4210_s0 + $0x10] sm:$0xff] }
  0xa9   : > { %3156 = vmatpush3.bf16.msra.mxu1 %v3296_v7  ;;  %v1016_v7 = vld [vmem:[%s4210_s0 + $0x1e0] sm:$0xff] }
  0xaa   : > { %1936 = vmatmul.mubr.bf16.gmra.mxu0 %v2719_v6  ;;  %3157 = vmatprep.subr.bf16.mxu1 %v3299_v16  ;;  %v1012_v6 = vld [vmem:[%s4210_s0 + $0x1c0] sm:$0xff]  ;;  %v959_v16 = vld [vmem:[%s4210_s0 + $0x18] sm:$0xff] }
  0xab   : > { %1943 = vmatprep.mubr.bf16.mxu0 %v2728_v12  ;;  %3094 = vmatpush3.bf16.msra.mxu0 %v3298_v15  ;;  %v2768_v12 = vcombine.high %v1012_v6, %v1016_v7  ;;  %v962_v15 = vld [vmem:[%s4210_s0 + $0x30] sm:$0xff]  ;;  %v2767_v18 = vcombine.low %v1012_v6, %v1016_v7 }
  0xac   : > { %2033 = vmatmul.mubr.bf16.gmra.mxu1 %v2721_v8  ;;  %3095 = vmatprep.subr.bf16.mxu0 %v3301_v23  ;;  %v1013_v8 = vld [vmem:[%s4210_s0 + $0x1c8] sm:$0xff]  ;;  %v2716_v20 = vcombine.high %v958_v14, %v962_v15  ;;  %v970_v23 = vld [vmem:[%s4210_s0 + $0x70] sm:$0xff] }
  0xad   : > { %2040 = vmatprep.mubr.bf16.mxu1 %v2730_v13  ;;  %3158 = vmatpush3.bf16.msra.mxu1 %v3300_v17  ;;  %v2770_v13 = vcombine.high %v1013_v8, %v1017_v9  ;;  %v963_v17 = vld [vmem:[%s4210_s0 + $0x38] sm:$0xff]  ;;  %v2769_v19 = vcombine.low %v1013_v8, %v1017_v9  ;;  %v1014_v6 = vld [vmem:[%s4210_s0 + $0x1d0] sm:$0xff] }
  0xae   : > { %3159 = vmatprep.subr.bf16.mxu1 %v3303_v28  ;;  %v2718_v21 = vcombine.high %v959_v16, %v963_v17  ;;  %v1018_v7 = vld [vmem:[%s4210_s0 + $0x1f0] sm:$0xff]  ;;  %v1015_v8 = vld [vmem:[%s4210_s0 + $0x1d8] sm:$0xff] }
  0xaf   : > { %3096 = vmatpush3.bf16.msra.mxu0 %v3302_v26  ;;  %v2715_v26 = vcombine.low %v958_v14, %v962_v15  ;;  %v1019_v9 = vld [vmem:[%s4210_s0 + $0x1f8] sm:$0xff]  ;;  %v2771_v14 = vcombine.low %v1014_v6, %v1018_v7 }
  0xb0   : > { %3097 = vmatprep.subr.bf16.mxu0 %v3305_v34  ;;  %v2773_v15 = vcombine.low %v1015_v8, %v1019_v9 }
  0xb1   : > { %3160 = vmatpush3.bf16.msra.mxu1 %v3304_v29 }
  0xb2   : > { %1944 = vmatmul.mubr.bf16.gmra.mxu0 %v2727_v22  ;;  %3161 = vmatprep.subr.bf16.mxu1 %v3307_v36  ;;  %v966_v22 = vld [vmem:[%s4210_s0 + $0x50] sm:$0xff]  ;;  %v2732_v36 = vcombine.high %v974_v30, %v978_v31 }
  0xb3   : > { %1951 = vmatprep.mubr.bf16.mxu0 %v2736_v25  ;;  %3098 = vmatpush3.bf16.msra.mxu0 %v3306_v35  ;;  %v971_v25 = vld [vmem:[%s4210_s0 + $0x78] sm:$0xff]  ;;  %v2724_v28 = vcombine.high %v966_v22, %v970_v23  ;;  %v2723_v34 = vcombine.low %v966_v22, %v970_v23 }
  0xb4   : > { %2041 = vmatmul.mubr.bf16.gmra.mxu1 %v2729_v24  ;;  %3099 = vmatprep.subr.bf16.mxu0 %v3309_v42  ;;  %v967_v24 = vld [vmem:[%s4210_s0 + $0x58] sm:$0xff]  ;;  %v2731_v42 = vcombine.low %v974_v30, %v978_v31 }
  0xb5   : > { %2048 = vmatprep.mubr.bf16.mxu1 %v2738_v27  ;;  %3162 = vmatpush3.bf16.msra.mxu1 %v3308_v38  ;;  %v2717_v27 = vcombine.low %v959_v16, %v963_v17  ;;  %v2726_v29 = vcombine.high %v967_v24, %v971_v25  ;;  %v2725_v35 = vcombine.low %v967_v24, %v971_v25  ;;  %v982_v38 = vld [vmem:[%s4210_s0 + $0xd0] sm:$0xff] }
  0xb6   : > { %3163 = vmatprep.subr.bf16.mxu1 %v3311_v44 }
  0xb7   : > { %3100 = vmatpush3.bf16.msra.mxu0 %v3310_v43  ;;  %v2733_v43 = vcombine.low %v975_v32, %v979_v33 }
  0xb8   : > { %3101 = vmatprep.subr.bf16.mxu0 %v3313_v51 }
  0xb9   : > { %3164 = vmatpush3.bf16.msra.mxu1 %v3312_v45 }
  0xba   : > { %1952 = vmatmul.mubr.bf16.gmra.mxu0 %v2735_v37  ;;  %3165 = vmatprep.subr.bf16.mxu1 %v3315_v56  ;;  %v2734_v37 = vcombine.high %v975_v32, %v979_v33  ;;  %v999_v56 = vld [vmem:[%s4210_s0 + $0x158] sm:$0xff] }
  0xbb   : > { %1959 = vmatprep.mubr.bf16.mxu0 %v2744_v40  ;;  %3102 = vmatpush3.bf16.msra.mxu0 %v3314_v54  ;;  %v983_v40 = vld [vmem:[%s4210_s0 + $0xd8] sm:$0xff]  ;;  %v998_v54 = vld [vmem:[%s4210_s0 + $0x150] sm:$0xff] }
  0xbc   : > { %2049 = vmatmul.mubr.bf16.gmra.mxu1 %v2737_v39  ;;  %3103 = vmatprep.subr.bf16.mxu0 %v3317_v62  ;;  %v986_v39 = vld [vmem:[%s4210_s0 + $0xf0] sm:$0xff] }
  0xbd   : > { %2056 = vmatprep.mubr.bf16.mxu1 %v2746_v41  ;;  %3166 = vmatpush3.bf16.msra.mxu1 %v3316_v57  ;;  %v987_v41 = vld [vmem:[%s4210_s0 + $0xf8] sm:$0xff]  ;;  %v2740_v44 = vcombine.high %v982_v38, %v986_v39  ;;  %v1006_v62 = vld [vmem:[%s4210_s0 + $0x190] sm:$0xff] }
  0xbe   : > { %3167 = vmatprep.subr.bf16.mxu1 %v3319_v0  ;;  %v2742_v45 = vcombine.high %v983_v40, %v987_v41  ;;  %v2741_v51 = vcombine.low %v983_v40, %v987_v41  ;;  %v1003_v57 = vld [vmem:[%s4210_s0 + $0x178] sm:$0xff] }
  0xbf   : > { %3104 = vmatpush3.bf16.msra.mxu0 %v3318_v63  ;;  %v2758_v61 = vcombine.high %v999_v56, %v1003_v57  ;;  %v1010_v63 = vld [vmem:[%s4210_s0 + $0x1b0] sm:$0xff]  ;;  %v1007_v0 = vld [vmem:[%s4210_s0 + $0x198] sm:$0xff] }
  0xc1   : > { %3168 = vmatpush3.bf16.msra.mxu1 %v3320_v2 }
  0xc2   : > { %1960 = vmatmul.mubr.bf16.gmra.mxu0 %v2743_v50  ;;  %v2739_v50 = vcombine.low %v982_v38, %v986_v39 }
  0xc3   : > { %1967 = vmatprep.mubr.bf16.mxu0 %v2752_v53  ;;  %v2750_v53 = vcombine.high %v991_v48, %v995_v49 }
  0xc4   : > { %2057 = vmatmul.mubr.bf16.gmra.mxu1 %v2745_v52  ;;  %v2748_v52 = vcombine.high %v990_v46, %v994_v47 }
  0xc5   : > { %2064 = vmatprep.mubr.bf16.mxu1 %v2754_v55  ;;  %v1002_v55 = vld [vmem:[%s4210_s0 + $0x170] sm:$0xff] }
  0xc6   : > { %v2756_v60 = vcombine.high %v998_v54, %v1002_v55  ;;  %v2755_v2 = vcombine.low %v998_v54, %v1002_v55 }
  0xca   : > { %1968 = vmatmul.mubr.bf16.gmra.mxu0 %v2751_v1  ;;  %v1011_v1 = vld [vmem:[%s4210_s0 + $0x1b8] sm:$0xff] }
  0xcb   : > { %1975 = vmatprep.mubr.bf16.mxu0 %v2760_v4  ;;  %v2764_v4 = vcombine.high %v1006_v62, %v1010_v63 }
  0xcc   : > { %2065 = vmatmul.mubr.bf16.gmra.mxu1 %v2753_v3  ;;  %v2757_v3 = vcombine.low %v999_v56, %v1003_v57 }
  0xcd   : > { %2072 = vmatprep.mubr.bf16.mxu1 %v2762_v5  ;;  %v2766_v5 = vcombine.high %v1007_v0, %v1011_v1 }
  0xd2   : > { %1976 = vmatmul.mubr.bf16.gmra.mxu0 %v2759_v10  ;;  %v2763_v10 = vcombine.low %v1006_v62, %v1010_v63 }
  0xd3   : > { %1983 = vmatprep.mubr.bf16.mxu0 %v2768_v12  ;;  %v2772_v12 = vcombine.high %v1014_v6, %v1018_v7 }
  0xd4   : > { %2073 = vmatmul.mubr.bf16.gmra.mxu1 %v2761_v11  ;;  %v2765_v11 = vcombine.low %v1007_v0, %v1011_v1 }
  0xd5   : > { %2080 = vmatprep.mubr.bf16.mxu1 %v2770_v13  ;;  %v2774_v13 = vcombine.high %v1015_v8, %v1019_v9 }
  0xda   : > { %1984 = vmatmul.mubr.bf16.gmra.mxu0 %v2767_v18 }
  0xdb   : > { %2121 = vmatprep.mubr.bf16.mxu0 %v2716_v20 }
  0xdc   : > { %2081 = vmatmul.mubr.bf16.gmra.mxu1 %v2769_v19 }
  0xdd   : > { %2218 = vmatprep.mubr.bf16.mxu1 %v2718_v21 }
  0xe2   : > { %2122 = vmatmul.mubr.bf16.vlgmr.msra.gmra.mxu0 %v2715_v26 }
  0xe3   : > { %2129 = vmatprep.mubr.bf16.mxu0 %v2724_v28 }
  0xe4   : > { %2219 = vmatmul.mubr.bf16.vlgmr.msra.gmra.mxu1 %v2717_v27 }
  0xe5   : > { %2226 = vmatprep.mubr.bf16.mxu1 %v2726_v29 }
  0xea   : > { %2130 = vmatmul.mubr.bf16.gmra.mxu0 %v2723_v34 }
  0xeb   : > { %2137 = vmatprep.mubr.bf16.mxu0 %v2732_v36 }
  0xec   : > { %2227 = vmatmul.mubr.bf16.gmra.mxu1 %v2725_v35 }
  0xed   : > { %2234 = vmatprep.mubr.bf16.mxu1 %v2734_v37 }
  0xf2   : > { %2138 = vmatmul.mubr.bf16.gmra.mxu0 %v2731_v42 }
  0xf3   : > { %2145 = vmatprep.mubr.bf16.mxu0 %v2740_v44 }
  0xf4   : > { %2235 = vmatmul.mubr.bf16.gmra.mxu1 %v2733_v43 }
  0xf5   : > { %2242 = vmatprep.mubr.bf16.mxu1 %v2742_v45 }
  0xfa   : > { %2146 = vmatmul.mubr.bf16.gmra.mxu0 %v2739_v50 }
  0xfb   : > { %2153 = vmatprep.mubr.bf16.mxu0 %v2748_v52 }
  0xfc   : > { %2243 = vmatmul.mubr.bf16.gmra.mxu1 %v2741_v51 }
  0xfd   : > { %2250 = vmatprep.mubr.bf16.mxu1 %v2750_v53 }
 0x102   : > { %2154 = vmatmul.mubr.bf16.gmra.mxu0 %v2747_v58 }
 0x103   : > { %2161 = vmatprep.mubr.bf16.mxu0 %v2756_v60 }
 0x104   : > { %2251 = vmatmul.mubr.bf16.gmra.mxu1 %v2749_v59 }
 0x105   : > { %2258 = vmatprep.mubr.bf16.mxu1 %v2758_v61 }
 0x10a   : > { %2162 = vmatmul.mubr.bf16.gmra.mxu0 %v2755_v2 }
 0x10b   : > { %2169 = vmatprep.mubr.bf16.mxu0 %v2764_v4 }
 0x10c   : > { %2259 = vmatmul.mubr.bf16.gmra.mxu1 %v2757_v3 }
 0x10d   : > { %2266 = vmatprep.mubr.bf16.mxu1 %v2766_v5 }
 0x112   : > { %2170 = vmatmul.mubr.bf16.gmra.mxu0 %v2763_v10 }
 0x113   : > { %2177 = vmatprep.mubr.bf16.mxu0 %v2772_v12 }
 0x114   : > { %2267 = vmatmul.mubr.bf16.gmra.mxu1 %v2765_v11 }
 0x115   : > { %2274 = vmatprep.mubr.bf16.mxu1 %v2774_v13 }
 0x11a   : > { %2178 = vmatmul.mubr.bf16.gmra.mxu0 %v2771_v14 }
 0x11c   : > { %2275 = vmatmul.mubr.bf16.gmra.mxu1 %v2773_v15 }
 0x162   : > { %v2977_v16 = vpop.f32.mrf.mxu0 }
 0x164   : > { %v3041_v17 = vpop.f32.mrf.mxu1  ;;  %v2978_v18 = vpop.f32.mrf.mxu0 }
 0x165   : > { %v2979_v19 = vadd.f32 %v2978_v18, %v2977_v16 }
 0x166   : > { %v3042_v20 = vpop.f32.mrf.mxu1  ;;  %v4004_v22 = vpop.f32.mrf.mxu0 }
 0x167   : > { %v3043_v21 = vadd.f32 %v3042_v20, %v3041_v17 }
 0x168   : > { %v4006_v23 = vpop.f32.mrf.mxu1  ;;  %v4010_v25 = vpop.f32.mrf.mxu0 }
 0x169   : > { %v4008_v24 = vadd.f32 %v3043_v21, %v2979_v19 }
 0x16a   : > { %v4012_v26 = vpop.f32.mrf.mxu1  ;;  %v2983_v27 = vpop.f32.mrf.mxu0 }
 0x16c   : > { %v3047_v28 = vpop.f32.mrf.mxu1  ;;  %v2984_v29 = vpop.f32.mrf.mxu0 }
 0x16d   : > { %v2985_v30 = vadd.f32 %v2984_v29, %v2983_v27 }
 0x16e   : > { %v3048_v31 = vpop.f32.mrf.mxu1  ;;  %v4014_v33 = vpop.f32.mrf.mxu0 }
 0x16f   : > { %v3049_v32 = vadd.f32 %v3048_v31, %v3047_v28 }
 0x170   : > { %v4016_v34 = vpop.f32.mrf.mxu1  ;;  %v4020_v36 = vpop.f32.mrf.mxu0 }
 0x171   : > { %v4018_v35 = vadd.f32 %v3049_v32, %v2985_v30 }
 0x172   : > { %v4022_v37 = vpop.f32.mrf.mxu1  ;;  %v2989_v38 = vpop.f32.mrf.mxu0 }
 0x174   : > { %v3053_v39 = vpop.f32.mrf.mxu1  ;;  %v2990_v40 = vpop.f32.mrf.mxu0 }
 0x175   : > { %v2991_v41 = vadd.f32 %v2990_v40, %v2989_v38 }
 0x176   : > { %v3054_v42 = vpop.f32.mrf.mxu1  ;;  %v4024_v44 = vpop.f32.mrf.mxu0 }
 0x177   : > { %v3055_v43 = vadd.f32 %v3054_v42, %v3053_v39 }
 0x178   : > { %v4026_v45 = vpop.f32.mrf.mxu1  ;;  %v4030_v47 = vpop.f32.mrf.mxu0 }
 0x179   : > { %v4028_v46 = vadd.f32 %v3055_v43, %v2991_v41 }
 0x17a   : > { %v4032_v48 = vpop.f32.mrf.mxu1  ;;  %v2995_v49 = vpop.f32.mrf.mxu0 }
 0x17c   : > { %v3059_v50 = vpop.f32.mrf.mxu1  ;;  %v2996_v51 = vpop.f32.mrf.mxu0 }
 0x17d   : > { %v2997_v52 = vadd.f32 %v2996_v51, %v2995_v49 }
 0x17e   : > { %v3060_v53 = vpop.f32.mrf.mxu1  ;;  %v4034_v55 = vpop.f32.mrf.mxu0 }
 0x17f   : > { %v3061_v54 = vadd.f32 %v3060_v53, %v3059_v50 }
 0x180   : > { %v4036_v56 = vpop.f32.mrf.mxu1  ;;  %v4040_v58 = vpop.f32.mrf.mxu0 }
 0x181   : > { %v4038_v57 = vadd.f32 %v3061_v54, %v2997_v52 }
 0x182   : > { %v4042_v59 = vpop.f32.mrf.mxu1  ;;  %v3001_v60 = vpop.f32.mrf.mxu0 }
 0x184   : > { %v3065_v61 = vpop.f32.mrf.mxu1  ;;  %v3002_v62 = vpop.f32.mrf.mxu0 }
 0x185   : > { %v3003_v63 = vadd.f32 %v3002_v62, %v3001_v60 }
 0x186   : > { %v3066_v0 = vpop.f32.mrf.mxu1  ;;  %v4044_v2 = vpop.f32.mrf.mxu0 }
 0x187   : > { %v3067_v1 = vadd.f32 %v3066_v0, %v3065_v61  ;;  %v3046_v0 = vadd.f32 %v4012_v26, %v4006_v23  ;;  %v4102_v26 = vld [vmem:[%s952_s15] ss:$0 sm:$0xff] }
 0x188   : > { %v4046_v3 = vpop.f32.mrf.mxu1  ;;  %v4050_v5 = vpop.f32.mrf.mxu0 }
 0x189   : > { %v4048_v4 = vadd.f32 %v3067_v1, %v3003_v63  ;;  %v2982_v63 = vadd.f32 %v4010_v25, %v4004_v22  ;;  %v2876_v22 = vld [vmem:[%s4099_s21] sm:$0xff]  }
 0x18a   : > { %v4052_v6 = vpop.f32.mrf.mxu1  ;;  %v3007_v7 = vpop.f32.mrf.mxu0 }
 0x18c   : > { %v3071_v8 = vpop.f32.mrf.mxu1  ;;  %v3008_v9 = vpop.f32.mrf.mxu0 }
 0x18d   : > { %v3009_v10 = vadd.f32 %v3008_v9, %v3007_v7 }
 0x18e   : > { %v3072_v11 = vpop.f32.mrf.mxu1  ;;  %v4054_v13 = vpop.f32.mrf.mxu0 }
 0x18f   : > { %v3073_v12 = vadd.f32 %v3072_v11, %v3071_v8 }
 0x190   : > { %v4056_v14 = vpop.f32.mrf.mxu1  ;;  %v4060_v16 = vpop.f32.mrf.mxu0 }
 0x191   : > { %v4058_v15 = vadd.f32 %v3073_v12, %v3009_v10 }
 0x192   : > { %v4062_v17 = vpop.f32.mrf.mxu1  ;;  %v3013_v18 = vpop.f32.mrf.mxu0 }
 0x194   : > { %v3077_v19 = vpop.f32.mrf.mxu1  ;;  %v3014_v20 = vpop.f32.mrf.mxu0 }
 0x195   : > { %v3015_v21 = vadd.f32 %v3014_v20, %v3013_v18  ;;  %v2030_v18 = vadd.f32 %v3046_v0, %v2982_v63 }
 0x196   : > { %v3078_v27 = vpop.f32.mrf.mxu1  ;;  %v4064_v29 = vpop.f32.mrf.mxu0 }
 0x197   : > { %v3079_v28 = vadd.f32 %v3078_v27, %v3077_v19 }
 0x198   : > { %v4066_v30 = vpop.f32.mrf.mxu1  ;;  %v4070_v32 = vpop.f32.mrf.mxu0 }
 0x199   : > { %v4068_v31 = vadd.f32 %v3079_v28, %v3015_v21  ;;  %v2988_v28 = vadd.f32 %v4020_v36, %v4014_v33 }
 0x19a   : > { %v4072_v38 = vpop.f32.mrf.mxu1  ;;  %v3019_v39 = vpop.f32.mrf.mxu0 }
 0x19c   : > { %v3083_v40 = vpop.f32.mrf.mxu1  ;;  %v3020_v41 = vpop.f32.mrf.mxu0 }
 0x19d   : > { %v3021_v42 = vadd.f32 %v3020_v41, %v3019_v39  ;;  %v3052_v39 = vadd.f32 %v4022_v37, %v4016_v34 }
 0x19e   : > { %v3084_v43 = vpop.f32.mrf.mxu1  ;;  %v4074_v50 = vpop.f32.mrf.mxu0 }
 0x19f   : > { %v3085_v49 = vadd.f32 %v3084_v43, %v3083_v40  ;;  %v2877_v40 = vunpack.c.l.bf16 %v2876_v22  ;;  %v2038_v33 = vadd.f32 %v3052_v39, %v2988_v28 }
 0x1a0   : > { %v4076_v51 = vpop.f32.mrf.mxu1  ;;  %v4081_v53 = vpop.f32.mrf.mxu0 }
 0x1a1   : > { %v4079_v52 = vadd.f32 %v3085_v49, %v3021_v42  ;;  %v2878_v49 = vunpack.c.h.bf16 %v2876_v22 }
 0x1a2   : > { %v4083_v54 = vpop.f32.mrf.mxu1  ;;  %v3105_v60 = vpop.f32.mrf.mxu0 }
 0x1a4   : > { %v3169_v61 = vpop.f32.mrf.mxu1  ;;  %v3106_v62 = vpop.f32.mrf.mxu0 }
 0x1a5   : > { %v3107_v1 = vadd.f32 %v3106_v62, %v3105_v60 }
 0x1a6   : > { %v3170_v7 = vpop.f32.mrf.mxu1  ;;  %v3108_v8 = vpop.f32.mrf.mxu0 }
 0x1a7   : > { %v2124_v9 = vadd.f32 %v3107_v1, %v4008_v24  ;;  %v3171_v10 = vadd.f32 %v3170_v7, %v3169_v61 }
 0x1a8   : > { %v3172_v11 = vpop.f32.mrf.mxu1  ;;  %v3109_v12 = vpop.f32.mrf.mxu0 }
 0x1a9   : > { %v2221_v19 = vadd.f32 %v3171_v10, %v2124_v9  ;;  %v3110_v25 = vadd.f32 %v3109_v12, %v3108_v8  ;;  %v2947_v9 = vld [vmem:[%s4099_s21 + $0x8] sm:$0xff]  }
 0x1aa   : > { %v3173_v23 = vpop.f32.mrf.mxu1  ;;  %v3111_v20 = vpop.f32.mrf.mxu0  ;;  %v2882_v28 = vunpack.c.h.bf16 %v2947_v9 }
 0x1ab   : > { %v2127_v21 = vadd.f32 %v3110_v25, %v2030_v18  ;;  %v3174_v24 = vadd.f32 %v3173_v23, %v3172_v11  ;;  %v2283_v42 = vadd.f32 %v4102_v26, %v2221_v19  ;;  %v2994_v23 = vadd.f32 %v4030_v47, %v4024_v44 }
 0x1ac   : > { %v3175_v27 = vpop.f32.mrf.mxu1  ;;  %v3112_v41 = vpop.f32.mrf.mxu0 }
 0x1ad   : > { %v2224_v43 = vadd.f32 %v3174_v24, %v2127_v21  ;;  %v3113_v60 = vadd.f32 %v3112_v41, %v3111_v20  ;;  %v2366_v34 = vadd.f32 %v2877_v40, %v2283_v42  ;;  %v2881_v20 = vunpack.c.l.bf16 %v2947_v9 }
 0x1ae   : > { %v3176_v61 = vpop.f32.mrf.mxu1  ;;  %v3114_v62 = vpop.f32.mrf.mxu0 }
 0x1af   : > { %v2284_v63 = vadd.f32 %v4102_v26, %v2224_v43  ;;  %v2132_v0 = vadd.f32 %v3113_v60, %v4018_v35  ;;  %v3177_v1 = vadd.f32 %v3176_v61, %v3175_v27  ;;  %v3058_v35 = vadd.f32 %v4032_v48, %v4026_v45 }
 0x1b0   : > { %v3178_v7 = vpop.f32.mrf.mxu1  ;;  %v3115_v36 = vpop.f32.mrf.mxu0 }
 0x1b1   : > { %v2367_v37 = vadd.f32 %v2878_v49, %v2284_v63  ;;  %v2229_v8 = vadd.f32 %v3177_v1, %v2132_v0  ;;  %v3116_v10 = vadd.f32 %v3115_v36, %v3114_v62  ;;  %v2046_v48 = vadd.f32 %v3058_v35, %v2994_v23  ;;  %v2948_v62 = vld [vmem:[%s4099_s21 + $0x10] sm:$0xff]  }
 0x1b2   : > { %v3179_v11 = vpop.f32.mrf.mxu1  ;;  %v3117_v12 = vpop.f32.mrf.mxu0 }
 0x1b3   : > { %v2910_v18 = vpack.c.bf16 %v2367_v37, %v2366_v34  ;;  %v2135_v19 = vadd.f32 %v3116_v10, %v2038_v33  ;;  %v3180_v22 = vadd.f32 %v3179_v11, %v3178_v7  ;;  %v2285_v24 = vadd.f32 %v4102_v26, %v2229_v8 }
 0x1b4   : > { %v3181_v25 = vpop.f32.mrf.mxu1  ;;  %v3118_v21 = vpop.f32.mrf.mxu0  ;;  %v3000_v37 = vadd.f32 %v4040_v58, %v4034_v55  ;;  %v2885_v8 = vunpack.c.l.bf16 %v2948_v62 }
 0x1b5   : > { %2911 = vst [vmem:[%s4117_s22] sm:$0xff] %v2910_v18   ;;  %v2232_v27 = vadd.f32 %v3180_v22, %v2135_v19  ;;  %v3119_v39 = vadd.f32 %v3118_v21, %v3117_v12  ;;  %v2368_v49 = vadd.f32 %v2881_v20, %v2285_v24  ;;  %v2886_v12 = vunpack.c.h.bf16 %v2948_v62  ;;  %v2949_v24 = vld [vmem:[%s4099_s21 + $0x18] sm:$0xff]  }
 0x1b6   : > { %v3182_v40 = vpop.f32.mrf.mxu1  ;;  %v3120_v41 = vpop.f32.mrf.mxu0 }
 0x1b7   : > { %v2286_v42 = vadd.f32 %v4102_v26, %v2232_v27  ;;  %v2140_v44 = vadd.f32 %v3119_v39, %v4028_v46  ;;  %v3183_v47 = vadd.f32 %v3182_v40, %v3181_v25  ;;  %v3064_v46 = vadd.f32 %v4042_v59, %v4036_v56 }
 0x1b8   : > { %v3184_v45 = vpop.f32.mrf.mxu1  ;;  %v3121_v43 = vpop.f32.mrf.mxu0 }
 0x1b9   : > { %v2369_v60 = vadd.f32 %v2882_v28, %v2286_v42  ;;  %v2237_v61 = vadd.f32 %v3183_v47, %v2140_v44  ;;  %v3122_v63 = vadd.f32 %v3121_v43, %v3120_v41  ;;  %v2054_v58 = vadd.f32 %v3064_v46, %v3000_v37 }
 0x1ba   : > { %v3185_v0 = vpop.f32.mrf.mxu1  ;;  %v3123_v1 = vpop.f32.mrf.mxu0  ;;  %v3006_v47 = vadd.f32 %v4050_v5, %v4044_v2 }
 0x1bb   : > { %v2915_v7 = vpack.c.bf16 %v2369_v60, %v2368_v49  ;;  %v2143_v33 = vadd.f32 %v3122_v63, %v2046_v48  ;;  %v3186_v36 = vadd.f32 %v3185_v0, %v3184_v45  ;;  %v2287_v10 = vadd.f32 %v4102_v26, %v2237_v61 }
 0x1bc   : > { %v3187_v34 = vpop.f32.mrf.mxu1  ;;  %v3124_v9 = vpop.f32.mrf.mxu0  ;;  %v2889_v45 = vunpack.c.l.bf16 %v2949_v24  ;;  %v2890_v60 = vunpack.c.h.bf16 %v2949_v24 }
 0x1bd   : > { %2954 = vst [vmem:[%s4117_s22 + $0x8] sm:$0xff] %v2915_v7   ;;  %v2240_v11 = vadd.f32 %v3186_v36, %v2143_v33  ;;  %v3125_v18 = vadd.f32 %v3124_v9, %v3123_v1  ;;  %v2370_v56 = vadd.f32 %v2885_v8, %v2287_v10 }
 0x1be   : > { %v3188_v19 = vpop.f32.mrf.mxu1  ;;  %v3126_v22 = vpop.f32.mrf.mxu0 }
 0x1bf   : > { %v2288_v25 = vadd.f32 %v4102_v26, %v2240_v11  ;;  %v2148_v23 = vadd.f32 %v3125_v18, %v4038_v57  ;;  %v3189_v35 = vadd.f32 %v3188_v19, %v3187_v34  ;;  %v3070_v57 = vadd.f32 %v4052_v6, %v4046_v3  ;;  %v2950_v34 = vld [vmem:[%s4099_s21 + $0x20] sm:$0xff]  }
 0x1c0   : > { %v3190_v55 = vpop.f32.mrf.mxu1  ;;  %v3127_v20 = vpop.f32.mrf.mxu0  ;;  %v3012_v18 = vadd.f32 %v4060_v16, %v4054_v13  ;;  %v2893_v19 = vunpack.c.l.bf16 %v2950_v34 }
 0x1c1   : > { %v2371_v59 = vadd.f32 %v2886_v12, %v2288_v25  ;;  %v2245_v21 = vadd.f32 %v3189_v35, %v2148_v23  ;;  %v3128_v27 = vadd.f32 %v3127_v20, %v3126_v22  ;;  %v2062_v5 = vadd.f32 %v3070_v57, %v3006_v47 }
 0x1c2   : > { %v3191_v28 = vpop.f32.mrf.mxu1  ;;  %v3129_v39 = vpop.f32.mrf.mxu0  ;;  %v2894_v35 = vunpack.c.h.bf16 %v2950_v34 }
 0x1c3   : > { %v2920_v40 = vpack.c.bf16 %v2371_v59, %v2370_v56  ;;  %v2151_v41 = vadd.f32 %v3128_v27, %v2054_v58  ;;  %v3192_v42 = vadd.f32 %v3191_v28, %v3190_v55  ;;  %v2289_v43 = vadd.f32 %v4102_v26, %v2245_v21  ;;  %v2951_v28 = vld [vmem:[%s4099_s21 + $0x28] sm:$0xff]  }
 0x1c4   : > { %v3193_v44 = vpop.f32.mrf.mxu1  ;;  %v3130_v48 = vpop.f32.mrf.mxu0 }
 0x1c5   : > { %2955 = vst [vmem:[%s4117_s22 + $0x10] sm:$0xff] %v2920_v40   ;;  %v2248_v49 = vadd.f32 %v3192_v42, %v2151_v41  ;;  %v3131_v61 = vadd.f32 %v3130_v48, %v3129_v39  ;;  %v2372_v3 = vadd.f32 %v2889_v45, %v2289_v43  ;;  %v3018_v45 = vadd.f32 %v4070_v32, %v4064_v29 }
 0x1c6   : > { %v3194_v62 = vpop.f32.mrf.mxu1  ;;  %v3132_v63 = vpop.f32.mrf.mxu0  ;;  %v2897_v48 = vunpack.c.l.bf16 %v2951_v28 }
 0x1c7   : > { %v2290_v0 = vadd.f32 %v4102_v26, %v2248_v49  ;;  %v2156_v1 = vadd.f32 %v3131_v61, %v4048_v4  ;;  %v3195_v7 = vadd.f32 %v3194_v62, %v3193_v44  ;;  %v3076_v4 = vadd.f32 %v4062_v17, %v4056_v14 }
 0x1c8   : > { %v3196_v2 = vpop.f32.mrf.mxu1  ;;  %v3133_v33 = vpop.f32.mrf.mxu0  ;;  %v2898_v61 = vunpack.c.h.bf16 %v2951_v28 }
 0x1c9   : > { %v2373_v6 = vadd.f32 %v2890_v60, %v2290_v0  ;;  %v2253_v36 = vadd.f32 %v3195_v7, %v2156_v1  ;;  %v3134_v37 = vadd.f32 %v3133_v33, %v3132_v63  ;;  %v2070_v16 = vadd.f32 %v3076_v4, %v3012_v18 }
 0x1ca   : > { %v3197_v46 = vpop.f32.mrf.mxu1  ;;  %v3135_v8 = vpop.f32.mrf.mxu0 }
 0x1cb   : > { %v2925_v9 = vpack.c.bf16 %v2373_v6, %v2372_v3  ;;  %v2159_v10 = vadd.f32 %v3134_v37, %v2062_v5  ;;  %v3198_v11 = vadd.f32 %v3197_v46, %v3196_v2  ;;  %v2291_v25 = vadd.f32 %v4102_v26, %v2253_v36  ;;  %v2952_v3 = vld [vmem:[%s4099_s21 + $0x30] sm:$0xff]  }
 0x1cc   : > { %v3199_v12 = vpop.f32.mrf.mxu1  ;;  %v3136_v22 = vpop.f32.mrf.mxu0 }
 0x1cd   : > { %2956 = vst [vmem:[%s4117_s22 + $0x18] sm:$0xff] %v2925_v9   ;;  %v2256_v23 = vadd.f32 %v3198_v11, %v2159_v10  ;;  %v3137_v55 = vadd.f32 %v3136_v22, %v3135_v8  ;;  %v2374_v14 = vadd.f32 %v2893_v19, %v2291_v25  ;;  %v3024_v10 = vadd.f32 %v4081_v53, %v4074_v50 }
 0x1ce   : > { %v3200_v58 = vpop.f32.mrf.mxu1  ;;  %v3138_v20 = vpop.f32.mrf.mxu0  ;;  %v2901_v11 = vunpack.c.l.bf16 %v2952_v3  ;;  %v2902_v19 = vunpack.c.h.bf16 %v2952_v3 }
 0x1cf   : > { %v2292_v56 = vadd.f32 %v4102_v26, %v2256_v23  ;;  %v2164_v59 = vadd.f32 %v3137_v55, %v4058_v15  ;;  %v3201_v21 = vadd.f32 %v3200_v58, %v3199_v12  ;;  %v3082_v15 = vadd.f32 %v4072_v38, %v4066_v30 }
 0x1d0   : > { %v3202_v13 = vpop.f32.mrf.mxu1  ;;  %v3139_v24 = vpop.f32.mrf.mxu0 }
 0x1d1   : > { %v2375_v17 = vadd.f32 %v2894_v35, %v2292_v56  ;;  %v2261_v27 = vadd.f32 %v3201_v21, %v2164_v59  ;;  %v3140_v39 = vadd.f32 %v3139_v24, %v3138_v20  ;;  %v2078_v32 = vadd.f32 %v3082_v15, %v3018_v45  ;;  %v2498_v45 = vld [vmem:[%s4117_s22 + $0x10] sm:$0xf] (%p3425_p6)  ;;  %v2500_v15 = vld [vmem:[%s4117_s22 + $0x14] sm:$0xf] (%p3425_p6) }
 0x1d2   : > { %v3203_v40 = vpop.f32.mrf.mxu1  ;;  %v3141_v41 = vpop.f32.mrf.mxu0  ;;  %2499 = vst [vmem:[%s2473_s28 + $0x20] sm:$0xf] (%p3425_p6), %v2498_v45  ;;  %2501 = vst [vmem:[%s2473_s28 + $0x28] sm:$0xf] (%p3425_p6), %v2500_v15 }
 0x1d3   : > { %v2930_v42 = vpack.c.bf16 %v2375_v17, %v2374_v14  ;;  %v2167_v44 = vadd.f32 %v3140_v39, %v2070_v16  ;;  %v3204_v47 = vadd.f32 %v3203_v40, %v3202_v13  ;;  %v2293_v49 = vadd.f32 %v4102_v26, %v2261_v27  ;;  %v2953_v13 = vld [vmem:[%s4099_s21 + $0x38] sm:$0xff]  }
 0x1d4   : > { %v3205_v57 = vpop.f32.mrf.mxu1  ;;  %v3142_v43 = vpop.f32.mrf.mxu0  ;;  %v2905_v27 = vunpack.c.l.bf16 %v2953_v13 }
 0x1d5   : > { %2957 = vst [vmem:[%s4117_s22 + $0x20] sm:$0xff] %v2930_v42   ;;  %v2264_v60 = vadd.f32 %v3204_v47, %v2167_v44  ;;  %v3143_v62 = vadd.f32 %v3142_v43, %v3141_v41  ;;  %v2376_v30 = vadd.f32 %v2897_v48, %v2293_v49  ;;  %v2490_v44 = vld [vmem:[%s4117_s22] sm:$0xf] (%p3425_p6)  ;;  %v2492_v47 = vld [vmem:[%s4117_s22 + $0x4] sm:$0xf] (%p3425_p6) }
 0x1d6   : > { %v3206_v63 = vpop.f32.mrf.mxu1  ;;  %v3144_v0 = vpop.f32.mrf.mxu0  ;;  %2491 = vst [vmem:[%s2473_s28] sm:$0xf] (%p3425_p6), %v2490_v44  ;;  %2493 = vst [vmem:[%s2473_s28 + $0x8] sm:$0xf] (%p3425_p6), %v2492_v47  ;;  %v2502_v48 = vld [vmem:[%s4117_s22 + $0x18] sm:$0xf] (%p3425_p6) }
 0x1d7   : > { %v2294_v1 = vadd.f32 %v4102_v26, %v2264_v60  ;;  %v2172_v7 = vadd.f32 %v3143_v62, %v4068_v31  ;;  %v3207_v2 = vadd.f32 %v3206_v63, %v3205_v57  ;;  %v3088_v31 = vadd.f32 %v4083_v54, %v4076_v51  ;;  %v2496_v57 = vld [vmem:[%s4117_s22 + $0xc] sm:$0xf] (%p3425_p6)  ;;  %v2504_v43 = vld [vmem:[%s4117_s22 + $0x1c] sm:$0xf] (%p3425_p6)  ;;  %2503 = vst [vmem:[%s2473_s28 + $0x30] sm:$0xf] (%p3425_p6), %v2502_v48 }
 0x1d8   : > { %v3208_v29 = vpop.f32.mrf.mxu1  ;;  %v3145_v5 = vpop.f32.mrf.mxu0  ;;  %2497 = vst [vmem:[%s2473_s28 + $0x18] sm:$0xf] (%p3425_p6), %v2496_v57  ;;  %2505 = vst [vmem:[%s2473_s28 + $0x38] sm:$0xf] (%p3425_p6), %v2504_v43 }
 0x1d9   : > { %v2377_v38 = vadd.f32 %v2898_v61, %v2294_v1  ;;  %v2269_v33 = vadd.f32 %v3207_v2, %v2172_v7  ;;  %v3146_v6 = vadd.f32 %v3145_v5, %v3144_v0  ;;  %v2086_v58 = vadd.f32 %v3088_v31, %v3024_v10 }
 0x1da   : > { %v3209_v36 = vpop.f32.mrf.mxu1  ;;  %v3147_v34 = vpop.f32.mrf.mxu0 }
 0x1db   : > { %v2935_v37 = vpack.c.bf16 %v2377_v38, %v2376_v30  ;;  %v2175_v46 = vadd.f32 %v3146_v6, %v2078_v32  ;;  %v3210_v8 = vadd.f32 %v3209_v36, %v3208_v29  ;;  %v2295_v18 = vadd.f32 %v4102_v26, %v2269_v33 }
 0x1dc   : > { %v3211_v9 = vpop.f32.mrf.mxu1  ;;  %v3148_v12 = vpop.f32.mrf.mxu0  ;;  %v2506_v49 = vld [vmem:[%s4117_s22 + $0x20] sm:$0xf] (%p3425_p6)  ;;  %v2508_v60 = vld [vmem:[%s4117_s22 + $0x24] sm:$0xf] (%p3425_p6) }
 0x1dd   : > { %2958 = vst [vmem:[%s4117_s22 + $0x28] sm:$0xff] %v2935_v37   ;;  %v2272_v4 = vadd.f32 %v3210_v8, %v2175_v46  ;;  %v3149_v22 = vadd.f32 %v3148_v12, %v3147_v34  ;;  %v2378_v54 = vadd.f32 %v2901_v11, %v2295_v18  ;;  %2507 = vst [vmem:[%s2473_s28 + $0x40] sm:$0xf] (%p3425_p6), %v2506_v49 }
 0x1de   : > { %v3212_v25 = vpop.f32.mrf.mxu1  ;;  %v3150_v23 = vpop.f32.mrf.mxu0  ;;  %2509 = vst [vmem:[%s2473_s28 + $0x48] sm:$0xf] (%p3425_p6), %v2508_v60 }
 0x1df   : > { %v2296_v35 = vadd.f32 %v4102_v26, %v2272_v4  ;;  %v2180_v55 = vadd.f32 %v3149_v22, %v4079_v52  ;;  %v3213_v50 = vadd.f32 %v3212_v25, %v3211_v9  ;;  %v2906_v52 = vunpack.c.h.bf16 %v2953_v13 }
 0x1e0   : > { %v3214_v53 = vpop.f32.mrf.mxu1  ;;  %v3151_v51 = vpop.f32.mrf.mxu0 }
 0x1e1   : > { %v2379_v20 = vadd.f32 %v2902_v19, %v2296_v35  ;;  %v2277_v56 = vadd.f32 %v3213_v50, %v2180_v55  ;;  %v3152_v59 = vadd.f32 %v3151_v51, %v3150_v23 }
 0x1e2   : > { %v3215_v21 = vpop.f32.mrf.mxu1 }
 0x1e3   : > { %v2940_v16 = vpack.c.bf16 %v2379_v20, %v2378_v54  ;;  %v2183_v24 = vadd.f32 %v3152_v59, %v2086_v58  ;;  %v3216_v14 = vadd.f32 %v3215_v21, %v3214_v53  ;;  %v2297_v17 = vadd.f32 %v4102_v26, %v2277_v56 }
 0x1e4   : > { %v2510_v61 = vld [vmem:[%s4117_s22 + $0x28] sm:$0xf] (%p3425_p6)  ;;  %v2512_v62 = vld [vmem:[%s4117_s22 + $0x2c] sm:$0xf] (%p3425_p6) }
 0x1e5   : > { %2959 = vst [vmem:[%s4117_s22 + $0x30] sm:$0xff] %v2940_v16   ;;  %v2280_v28 = vadd.f32 %v3216_v14, %v2183_v24  ;;  %v2380_v40 = vadd.f32 %v2905_v27, %v2297_v17  ;;  %2511 = vst [vmem:[%s2473_s28 + $0x50] sm:$0xf] (%p3425_p6), %v2510_v61 }
 0x1e6   : > { %2513 = vst [vmem:[%s2473_s28 + $0x58] sm:$0xf] (%p3425_p6), %v2512_v62 }
 0x1e7   : > { %v2298_v39 = vadd.f32 %v4102_v26, %v2280_v28  ;;  %v2494_v26 = vld [vmem:[%s4117_s22 + $0x8] sm:$0xf] (%p3425_p6) }
 0x1e8   : > { %2495 = vst [vmem:[%s2473_s28 + $0x10] sm:$0xf] (%p3425_p6), %v2494_v26 }
 0x1e9   : > { %v2381_v41 = vadd.f32 %v2906_v52, %v2298_v39  ;;  %2468 = sbr.rel (!%p3425_p6) target bundleno = 502 (0x1f6), region = 130 }
 0x1eb   : > { %v2945_v42 = vpack.c.bf16 %v2381_v41, %v2380_v40 }
 0x1ec   : > { %v2514_v63 = vld [vmem:[%s4117_s22 + $0x30] sm:$0xf] (%p3425_p6)  ;;  %v2516_v0 = vld [vmem:[%s4117_s22 + $0x34] sm:$0xf] (%p3425_p6) }
 0x1ed   : > { %2960 = vst [vmem:[%s4117_s22 + $0x38] sm:$0xff] %v2945_v42   ;;  %2515 = vst [vmem:[%s2473_s28 + $0x60] sm:$0xf] (%p3425_p6), %v2514_v63 }
 0x1ee   : > { %2517 = vst [vmem:[%s2473_s28 + $0x68] sm:$0xf] %v2516_v0 }
 0x1f4   : > { %v2518_v1 = vld [vmem:[%s4117_s22 + $0x38] sm:$0xf]  ;;  %v2520_v7 = vld [vmem:[%s4117_s22 + $0x3c] sm:$0xf] }
 0x1f5   : > { %2519 = vst [vmem:[%s2473_s28 + $0x70] sm:$0xf] %v2518_v1  ;;  %2521 = vst [vmem:[%s2473_s28 + $0x78] sm:$0xf] %v2520_v7 }
 0x1f6 PF: > { %s14_s19 = sadd.s32 1, %s3359_s19   ;;  %s4217_s15 = smov %s3347_s16 }
 0x1f7   : > { %p11_p12 = scmp.ge.s32.totalorder %s14_s19, 4   ;;  %s4218_s16 = smov %s3430_s26 }
 0x1f8   : > { %s4219_s17 = smov %s3355_s18  ;;  %s4220_s18 = smov %s4222_s20 }
 0x1f9   :  { %13 = sbr.rel (!%p11_p12) target bundleno = 3 (0x3), region = 216 }

</bundles_post_ra>
